<compile_context>
chip_gen: v6e
topology: v6e:2x2x1
jax: 0.10.0
libtpu: 0.0.40
codegen_flags: <defaults>
</compile_context>

<pallas_src>
import functools

import jax
import jax.numpy as jnp
from jax.experimental import pallas as pl
from jax.experimental.pallas import tpu as pltpu


# ---------------------------------------------------------------------------
# small helpers
# ---------------------------------------------------------------------------
def _apply_act(x, act):
    if act == "relu":
        return jnp.maximum(x, 0.0)
    if act == "leaky":
        return jnp.where(x >= 0.0, x, 0.2 * x)
    if act == "tanh":
        return jnp.tanh(x)
    return x


def _make_taps(k, stride):
    """Static (phase, row_off, col_off) per kernel tap."""
    taps = []
    for dy in range(k):
        for dx in range(k):
            if stride == 1:
                taps.append((0, dy, dx))
            else:  # stride == 2: phase plane holds x[2r+a, 2c+b]
                taps.append(((dy % 2) * 2 + (dx % 2), dy // 2, dx // 2))
    return tuple(taps)


def _make_phases(xp, stride):
    """(N,Hp,Wp,C) padded input -> (N,P,Hs,Ws,C) phase planes (P=1 for s=1, 4 for s=2)."""
    if stride == 1:
        return xp[:, None]
    N, Hp, Wp, C = xp.shape
    ph = xp.reshape(N, Hp // 2, 2, Wp // 2, 2, C)
    ph = jnp.transpose(ph, (0, 2, 4, 1, 3, 5))
    return ph.reshape(N, 4, Hp // 2, Wp // 2, C)


# ---------------------------------------------------------------------------
# Pallas kernels
# ---------------------------------------------------------------------------
def _pconv_kernel(x_ref, wc_ref, wm_ref, scale_ref, shift_ref, y_ref, mout_ref,
                  *, taps, act, winsize):
    """Partial conv (im2col, one MXU dot) + affine norm + activation, one batch element.

    x_ref : (P, Hs, Ws, Cin+1)  phase planes of zero-padded [x*mask | mask]
    wc_ref: (k*k*(Cin+1), Cout) conv weights (zero rows at mask channels)
    wm_ref: (k*k*(Cin+1), 1)    mask window-sum weights (1 at mask channels)
    """
    Ho, Wo, Cout = y_ref.shape
    Cp = x_ref.shape[-1]
    cols = [x_ref[ph, ro:ro + Ho, co:co + Wo, :].reshape(Ho * Wo, Cp)
            for ph, ro, co in taps]
    patches = jnp.concatenate(cols, axis=-1).astype(jnp.bfloat16)     # (HW, T*Cp)
    conv = jnp.dot(patches, wc_ref[...].astype(jnp.bfloat16),
                   preferred_element_type=jnp.float32)                # (HW, Cout)
    msum = jnp.dot(patches, wm_ref[...].astype(jnp.bfloat16),
                   preferred_element_type=jnp.float32)                # (HW, 1)
    update = (msum > 0.0).astype(jnp.float32)
    ratio = winsize * pl.reciprocal(msum + 1e-8, approx=True) * update
    out = conv * ratio * scale_ref[...] + shift_ref[...]              # RN_B substitute
    out = _apply_act(out, act)
    y_ref[...] = out.reshape(Ho, Wo, Cout).astype(y_ref.dtype)
    mout_ref[...] = update.reshape(Ho, Wo, 1).astype(mout_ref.dtype)


def _conv_bn_kernel(x_ref, w_ref, scale_ref, shift_ref, y_ref, *, k, pre_relu, act):
    """(optional ReLU) -> kxk conv (stride 1, im2col one dot) -> affine, one batch."""
    H, W, Cout = y_ref.shape
    Cin = x_ref.shape[-1]
    cols = [x_ref[dy:dy + H, dx:dx + W, :].reshape(H * W, Cin)
            for dy in range(k) for dx in range(k)]
    patches = jnp.concatenate(cols, axis=-1)
    if pre_relu:
        patches = jnp.maximum(patches, 0.0)
    out = jnp.dot(patches.astype(jnp.bfloat16), w_ref[...].astype(jnp.bfloat16),
                  preferred_element_type=jnp.float32)
    out = out * scale_ref[...] + shift_ref[...]
    out = _apply_act(out, act)
    y_ref[...] = out.reshape(H, W, Cout).astype(y_ref.dtype)


def _se_combine_kernel(x_ref, w1_ref, b1_ref, w2_ref, b2_ref, wc_ref,
                       scale_ref, shift_ref, y_ref):
    """SEModule (pool -> FC -> ReLU -> FC -> sigmoid -> scale) fused with 1x1 combiner."""
    H, W, C = x_ref.shape
    Cout = y_ref.shape[-1]
    flat = x_ref[...].astype(jnp.float32).reshape(H * W, C)
    pooled = jnp.mean(flat, axis=0, keepdims=True)                    # (1, C)
    h = jnp.maximum(jnp.dot(pooled, w1_ref[...],
                            preferred_element_type=jnp.float32) + b1_ref[...], 0.0)
    gate = jax.nn.sigmoid(jnp.dot(h, w2_ref[...],
                                  preferred_element_type=jnp.float32) + b2_ref[...])
    scaled = flat * gate                                              # channel scale
    out = jnp.dot(scaled.astype(jnp.bfloat16), wc_ref[...].astype(jnp.bfloat16),
                  preferred_element_type=jnp.float32)                 # 1x1 combiner
    out = out * scale_ref[...] + shift_ref[...]
    y_ref[...] = out.reshape(H, W, Cout).astype(y_ref.dtype)


_PARAMS_1D = pltpu.CompilerParams(dimension_semantics=("parallel",))


# ---------------------------------------------------------------------------
# Wrappers
# ---------------------------------------------------------------------------
def pconv2d(x, mask, p, *, stride, act):
    """Partial conv layer.  x: (N,H,W,Cin), mask: (N,H,W,1) -> (y, mask_update)."""
    N, H, W, Cin = x.shape
    k = p["w"].shape[0]
    Cout = p["w"].shape[-1]
    pad = k // 2
    assert H % stride == 0 and W % stride == 0
    Ho, Wo = H // stride, W // stride

    # pack [x*mask | mask] so the mask window-sum falls out of the same patch matrix
    xm = jnp.concatenate([x * mask, mask], axis=-1)
    xp = jnp.pad(xm, ((0, 0), (pad, pad), (pad, pad), (0, 0)))
    phases = _make_phases(xp, stride)                 # (N, P, Hs, Ws, Cin+1)
    taps = _make_taps(k, stride)
    P, Hs, Ws, Cp = phases.shape[1:]

    # augmented weights: conv weights get a zero row per mask channel; mask weights = 1
    wk = jnp.pad(p["w"].reshape(k * k, Cin, Cout), ((0, 0), (0, 1), (0, 0)))
    w_conv = wk.reshape(k * k * (Cin + 1), Cout)
    w_mask = jnp.tile(jnp.zeros((Cin + 1, 1), jnp.float32).at[Cin, 0].set(1.0), (k * k, 1))

    kernel = functools.partial(_pconv_kernel, taps=taps, act=act, winsize=float(k * k))
    y, mout = pl.pallas_call(
        kernel,
        out_shape=(jax.ShapeDtypeStruct((N, Ho, Wo, Cout), x.dtype),
                   jax.ShapeDtypeStruct((N, Ho, Wo, 1), x.dtype)),
        grid=(N,),
        in_specs=[
            pl.BlockSpec((None, P, Hs, Ws, Cp), lambda n: (n, 0, 0, 0, 0)),
            pl.BlockSpec((k * k * (Cin + 1), Cout), lambda n: (0, 0)),
            pl.BlockSpec((k * k * (Cin + 1), 1), lambda n: (0, 0)),
            pl.BlockSpec((1, Cout), lambda n: (0, 0)),
            pl.BlockSpec((1, Cout), lambda n: (0, 0)),
        ],
        out_specs=(
            pl.BlockSpec((None, Ho, Wo, Cout), lambda n: (n, 0, 0, 0)),
            pl.BlockSpec((None, Ho, Wo, 1), lambda n: (n, 0, 0, 0)),
        ),
        compiler_params=_PARAMS_1D,
    )(phases, w_conv, w_mask, p["scale"], p["shift"])
    return y, mout


def conv2d_bn(x, p, *, pre_relu, act="none"):
    """Plain stride-1 conv with optional preceding ReLU + affine (conv_up substitute)."""
    N, H, W, Cin = x.shape
    k = p["w"].shape[0]
    Cout = p["w"].shape[-1]
    pad = k // 2
    Hp, Wp = H + 2 * pad, W + 2 * pad
    xp = jnp.pad(x, ((0, 0), (pad, pad), (pad, pad), (0, 0)))
    wmat = p["w"].reshape(k * k * Cin, Cout)
    kernel = functools.partial(_conv_bn_kernel, k=k, pre_relu=pre_relu, act=act)
    return pl.pallas_call(
        kernel,
        out_shape=jax.ShapeDtypeStruct((N, H, W, Cout), x.dtype),
        grid=(N,),
        in_specs=[
            pl.BlockSpec((None, Hp, Wp, Cin), lambda n: (n, 0, 0, 0)),
            pl.BlockSpec((k * k * Cin, Cout), lambda n: (0, 0)),
            pl.BlockSpec((1, Cout), lambda n: (0, 0)),
            pl.BlockSpec((1, Cout), lambda n: (0, 0)),
        ],
        out_specs=pl.BlockSpec((None, H, W, Cout), lambda n: (n, 0, 0, 0)),
        compiler_params=_PARAMS_1D,
    )(xp, wmat, p["scale"], p["shift"])


def se_combine(x, p_se, p_comb):
    """Fused SEModule + 1x1 combiner conv + affine."""
    N, H, W, C = x.shape
    Cout = p_comb["w"].shape[-1]
    wc = p_comb["w"].reshape(C, Cout)
    return pl.pallas_call(
        _se_combine_kernel,
        out_shape=jax.ShapeDtypeStruct((N, H, W, Cout), x.dtype),
        grid=(N,),
        in_specs=[
            pl.BlockSpec((None, H, W, C), lambda n: (n, 0, 0, 0)),
            pl.BlockSpec((C, C), lambda n: (0, 0)),
            pl.BlockSpec((1, C), lambda n: (0, 0)),
            pl.BlockSpec((C, C), lambda n: (0, 0)),
            pl.BlockSpec((1, C), lambda n: (0, 0)),
            pl.BlockSpec((C, Cout), lambda n: (0, 0)),
            pl.BlockSpec((1, Cout), lambda n: (0, 0)),
            pl.BlockSpec((1, Cout), lambda n: (0, 0)),
        ],
        out_specs=pl.BlockSpec((None, H, W, Cout), lambda n: (n, 0, 0, 0)),
        compiler_params=_PARAMS_1D,
    )(x, p_se["w1"], p_se["b1"], p_se["w2"], p_se["b2"], wc,
      p_comb["scale"], p_comb["shift"])


def upsample2(x, factor=2):
    return jnp.repeat(jnp.repeat(x, factor, axis=1), factor, axis=2)


# ---------------------------------------------------------------------------
# Parameter init (deterministic, synthetic)
# ---------------------------------------------------------------------------
def _init_conv(key, cin, cout, k=3):
    # NOTE: conv_up's ConvTranspose2d(k=3,s=1,p=1) is algebraically a flipped-kernel conv;
    # with synthetic weights we generate the conv-equivalent kernel directly.
    return {
        "w": jax.random.normal(key, (k, k, cin, cout), jnp.float32) * 0.05,
        "scale": jnp.ones((1, cout), jnp.float32),   # BN / RN_B affine (identity init)
        "shift": jnp.zeros((1, cout), jnp.float32),
    }


def init_coarse(key, in_ch, ngf):
    ks = jax.random.split(key, 16)
    se_c = 4 * ngf  # corresponds to the hard-coded 128*2 when ngf == 64
    return {
        "conv1": _init_conv(ks[0], in_ch, ngf),
        "conv2": _init_conv(ks[1], ngf, 2 * ngf),
        "conv4": _init_conv(ks[2], 2 * ngf, 4 * ngf),
        "conv5": _init_conv(ks[3], 4 * ngf, 4 * ngf),
        "conv6": _init_conv(ks[4], 4 * ngf, 4 * ngf),
        "conv7": _init_conv(ks[5], 4 * ngf, 4 * ngf),
        "up8": _init_conv(ks[6], 8 * ngf, 4 * ngf),
        "bot8": _init_conv(ks[7], 8 * ngf, 4 * ngf),
        "up12": _init_conv(ks[8], 8 * ngf, 2 * ngf),
        "bot12": _init_conv(ks[9], 8 * ngf, 2 * ngf),
        "se": {
            "w1": jax.random.normal(ks[10], (se_c, se_c), jnp.float32) * 0.05,
            "b1": jnp.zeros((1, se_c), jnp.float32),
            "w2": jax.random.normal(ks[11], (se_c, se_c), jnp.float32) * 0.05,
            "b2": jnp.zeros((1, se_c), jnp.float32),
        },
        "combiner": _init_conv(ks[12], 4 * ngf, 2 * ngf, k=1),
        "up14": _init_conv(ks[13], 4 * ngf, ngf),
        "up15": _init_conv(ks[14], 2 * ngf, 3),
    }


# ---------------------------------------------------------------------------
# CoarseGenerator / Generator forward (NHWC internally)
# ---------------------------------------------------------------------------
def coarse_forward(p, x_in, mask, x_orig):
    # encoder
    x1, m1 = pconv2d(x_in, mask, p["conv1"], stride=2, act="leaky")     # H/2, ngf
    x2, m2 = pconv2d(x1, m1, p["conv2"], stride=2, act="leaky")         # H/4, 2ngf
    x4, m4 = pconv2d(x2, m2, p["conv4"], stride=2, act="relu")          # H/8, 4ngf
    x5, m5 = pconv2d(x4, m4, p["conv5"], stride=1, act="relu")
    x6, m6 = pconv2d(x5, m5, p["conv6"], stride=1, act="relu")
    x7, m7 = pconv2d(x6, m6, p["conv7"], stride=1, act="relu")
    # decoder (dual up / bottom paths)
    skip_a = jnp.concatenate([x7, x6], axis=-1)                          # 8ngf
    u8 = conv2d_bn(skip_a, p["up8"], pre_relu=True)                      # conv_up
    b8, mb8 = pconv2d(skip_a, m7, p["bot8"], stride=1, act="relu")
    skip_b = jnp.concatenate([u8, b8], axis=-1)                          # 8ngf
    u12 = conv2d_bn(skip_b, p["up12"], pre_relu=True)                    # 2ngf
    b12, mb12 = pconv2d(skip_b, mb8, p["bot12"], stride=1, act="relu")   # 2ngf
    feat = jnp.concatenate([u12, b12], axis=-1)                          # 4ngf
    feat = se_combine(feat, p["se"], p["combiner"])                      # SE + 1x1 -> 2ngf
    feat = upsample2(feat)                                               # H/4
    u14 = conv2d_bn(jnp.concatenate([feat, x2], axis=-1), p["up14"], pre_relu=True)
    u14 = upsample2(u14)                                                 # H/2
    u15 = conv2d_bn(jnp.concatenate([u14, x1], axis=-1), p["up15"], pre_relu=True)
    out = upsample2(u15)                                                 # H, 3 channels
    m_out = upsample2(mb12, factor=8)                                    # full res, (N,H,W,1)
    return out, m_out


def generator_forward(params, x, mask):
    # x: (N, 3, H, W) NCHW, mask: (N, 1, H, W)  (PyTorch convention)
    xh = jnp.transpose(x, (0, 2, 3, 1))
    mh = jnp.transpose(mask.astype(x.dtype), (0, 2, 3, 1))               # (N, H, W, 1)
    inp1 = jnp.concatenate([xh, 1.0 - mh], axis=-1)                      # cat(x, (1-mask))
    out1, m1 = coarse_forward(params["cg1"], inp1, mh, xh)
    out2, m2 = coarse_forward(params["cg2"], jnp.concatenate([xh, out1], -1), m1, out1)
    out3, m3 = coarse_forward(params["cg3"], jnp.concatenate([xh, out2], -1), m2, out2)
    out4, m4 = coarse_forward(params["cg4"], jnp.concatenate([xh, out3], -1), m3, out3)
    to_nchw = lambda t: jnp.transpose(t, (0, 3, 1, 2))
    return tuple(map(to_nchw, (out1, out2, out3, out4, m1, m2, m3)))


# ---------------------------------------------------------------------------
if __name__ == "__main__":
    key = jax.random.PRNGKey(0)
    kx, km, kp = jax.random.split(key, 3)
    N, H, W, ngf = 2, 16, 16, 8

    x = jax.random.normal(kx, (N, 3, H, W), jnp.float32)
    mask = (jax.random.uniform(km, (N, 1, H, W)) > 0.5).astype(jnp.float32)

    params = {
        "cg1": init_coarse(jax.random.fold_in(kp, 1), 4, ngf),  # cat(x, 1-mask) -> 4 ch
        "cg2": init_coarse(jax.random.fold_in(kp, 2), 6, ngf),  # cat(x, out)    -> 6 ch
        "cg3": init_coarse(jax.random.fold_in(kp, 3), 6, ngf),
        "cg4": init_coarse(jax.random.fold_in(kp, 4), 6, ngf),
    }

    outs = jax.jit(generator_forward)(params, x, mask)
    outs = jax.block_until_ready(outs)

    assert outs[0].shape == (N, 3, H, W)
    assert outs[3].shape == (N, 3, H, W)
    assert outs[4].shape == (N, 1, H, W)
    assert all(bool(jnp.isfinite(o).all()) for o in outs)
    print("KERNEL_OK")
</pallas_src>

<mosaic_0001>
module attributes {stable_mosaic.version = 11 : i64} {
  func.func @_pconv_kernel(%arg0: i32, %arg1: memref<1x4x9x9x5xf32, #tpu.memory_space<vmem>>, %arg2: memref<45x8xf32, #tpu.memory_space<vmem>>, %arg3: memref<45x1xf32, #tpu.memory_space<vmem>>, %arg4: memref<1x8xf32, #tpu.memory_space<vmem>>, %arg5: memref<1x8xf32, #tpu.memory_space<vmem>>, %arg6: memref<1x8x8x8xf32, #tpu.memory_space<vmem>>, %arg7: memref<1x8x8x1xf32, #tpu.memory_space<vmem>>) attributes {dimension_semantics = [#tpu.dimension_semantics<parallel>], iteration_bounds = array<i64: 2>, scalar_prefetch = 0 : i64, scratch_operands = 0 : i64, tpu.core_type = #tpu.core_type<tc>, window_params = [{transform_indices = @transform_0, window_bounds = array<i64: 1, 4, 9, 9, 5>}, {pipeline_mode = #tpu.pipeline_mode<synchronous>, transform_indices = @transform_1, window_bounds = array<i64: 45, 8>}, {pipeline_mode = #tpu.pipeline_mode<synchronous>, transform_indices = @transform_2, window_bounds = array<i64: 45, 1>}, {pipeline_mode = #tpu.pipeline_mode<synchronous>, transform_indices = @transform_3, window_bounds = array<i64: 1, 8>}, {pipeline_mode = #tpu.pipeline_mode<synchronous>, transform_indices = @transform_4, window_bounds = array<i64: 1, 8>}, {transform_indices = @transform_5, window_bounds = array<i64: 1, 8, 8, 8>}, {transform_indices = @transform_6, window_bounds = array<i64: 1, 8, 8, 1>}]} {
    %c0 = arith.constant 0 : index
    %c0_0 = arith.constant 0 : index
    %c0_1 = arith.constant 0 : index
    %c0_2 = arith.constant 0 : index
    %c0_3 = arith.constant 0 : index
    %0 = vector.load %arg1[%c0, %c0_0, %c0_1, %c0_2, %c0_3] : memref<1x4x9x9x5xf32, #tpu.memory_space<vmem>>, vector<1x1x8x8x5xf32>
    %1 = vector.shape_cast %0 : vector<1x1x8x8x5xf32> to vector<8x8x5xf32>
    %2 = vector.shape_cast %1 : vector<8x8x5xf32> to vector<64x5xf32>
    %c0_4 = arith.constant 0 : index
    %c1 = arith.constant 1 : index
    %c0_5 = arith.constant 0 : index
    %c0_6 = arith.constant 0 : index
    %c0_7 = arith.constant 0 : index
    %3 = vector.load %arg1[%c0_4, %c1, %c0_5, %c0_6, %c0_7] : memref<1x4x9x9x5xf32, #tpu.memory_space<vmem>>, vector<1x1x8x8x5xf32>
    %4 = vector.shape_cast %3 : vector<1x1x8x8x5xf32> to vector<8x8x5xf32>
    %5 = vector.shape_cast %4 : vector<8x8x5xf32> to vector<64x5xf32>
    %c0_8 = arith.constant 0 : index
    %c0_9 = arith.constant 0 : index
    %c0_10 = arith.constant 0 : index
    %c1_11 = arith.constant 1 : index
    %c0_12 = arith.constant 0 : index
    %6 = vector.load %arg1[%c0_8, %c0_9, %c0_10, %c1_11, %c0_12] : memref<1x4x9x9x5xf32, #tpu.memory_space<vmem>>, vector<1x1x8x8x5xf32>
    %7 = vector.shape_cast %6 : vector<1x1x8x8x5xf32> to vector<8x8x5xf32>
    %8 = vector.shape_cast %7 : vector<8x8x5xf32> to vector<64x5xf32>
    %c0_13 = arith.constant 0 : index
    %c2 = arith.constant 2 : index
    %c0_14 = arith.constant 0 : index
    %c0_15 = arith.constant 0 : index
    %c0_16 = arith.constant 0 : index
    %9 = vector.load %arg1[%c0_13, %c2, %c0_14, %c0_15, %c0_16] : memref<1x4x9x9x5xf32, #tpu.memory_space<vmem>>, vector<1x1x8x8x5xf32>
    %10 = vector.shape_cast %9 : vector<1x1x8x8x5xf32> to vector<8x8x5xf32>
    %11 = vector.shape_cast %10 : vector<8x8x5xf32> to vector<64x5xf32>
    %c0_17 = arith.constant 0 : index
    %c3 = arith.constant 3 : index
    %c0_18 = arith.constant 0 : index
    %c0_19 = arith.constant 0 : index
    %c0_20 = arith.constant 0 : index
    %12 = vector.load %arg1[%c0_17, %c3, %c0_18, %c0_19, %c0_20] : memref<1x4x9x9x5xf32, #tpu.memory_space<vmem>>, vector<1x1x8x8x5xf32>
    %13 = vector.shape_cast %12 : vector<1x1x8x8x5xf32> to vector<8x8x5xf32>
    %14 = vector.shape_cast %13 : vector<8x8x5xf32> to vector<64x5xf32>
    %c0_21 = arith.constant 0 : index
    %c2_22 = arith.constant 2 : index
    %c0_23 = arith.constant 0 : index
    %c1_24 = arith.constant 1 : index
    %c0_25 = arith.constant 0 : index
    %15 = vector.load %arg1[%c0_21, %c2_22, %c0_23, %c1_24, %c0_25] : memref<1x4x9x9x5xf32, #tpu.memory_space<vmem>>, vector<1x1x8x8x5xf32>
    %16 = vector.shape_cast %15 : vector<1x1x8x8x5xf32> to vector<8x8x5xf32>
    %17 = vector.shape_cast %16 : vector<8x8x5xf32> to vector<64x5xf32>
    %c0_26 = arith.constant 0 : index
    %c0_27 = arith.constant 0 : index
    %c1_28 = arith.constant 1 : index
    %c0_29 = arith.constant 0 : index
    %c0_30 = arith.constant 0 : index
    %18 = vector.load %arg1[%c0_26, %c0_27, %c1_28, %c0_29, %c0_30] : memref<1x4x9x9x5xf32, #tpu.memory_space<vmem>>, vector<1x1x8x8x5xf32>
    %19 = vector.shape_cast %18 : vector<1x1x8x8x5xf32> to vector<8x8x5xf32>
    %20 = vector.shape_cast %19 : vector<8x8x5xf32> to vector<64x5xf32>
    %c0_31 = arith.constant 0 : index
    %c1_32 = arith.constant 1 : index
    %c1_33 = arith.constant 1 : index
    %c0_34 = arith.constant 0 : index
    %c0_35 = arith.constant 0 : index
    %21 = vector.load %arg1[%c0_31, %c1_32, %c1_33, %c0_34, %c0_35] : memref<1x4x9x9x5xf32, #tpu.memory_space<vmem>>, vector<1x1x8x8x5xf32>
    %22 = vector.shape_cast %21 : vector<1x1x8x8x5xf32> to vector<8x8x5xf32>
    %23 = vector.shape_cast %22 : vector<8x8x5xf32> to vector<64x5xf32>
    %c0_36 = arith.constant 0 : index
    %c0_37 = arith.constant 0 : index
    %c1_38 = arith.constant 1 : index
    %c1_39 = arith.constant 1 : index
    %c0_40 = arith.constant 0 : index
    %24 = vector.load %arg1[%c0_36, %c0_37, %c1_38, %c1_39, %c0_40] : memref<1x4x9x9x5xf32, #tpu.memory_space<vmem>>, vector<1x1x8x8x5xf32>
    %25 = vector.shape_cast %24 : vector<1x1x8x8x5xf32> to vector<8x8x5xf32>
    %26 = vector.shape_cast %25 : vector<8x8x5xf32> to vector<64x5xf32>
    %27 = tpu.concatenate %2, %5, %8, %11, %14, %17, %20, %23, %26 in 1 : vector<64x5xf32>, vector<64x5xf32>, vector<64x5xf32>, vector<64x5xf32>, vector<64x5xf32>, vector<64x5xf32>, vector<64x5xf32>, vector<64x5xf32>, vector<64x5xf32> -> vector<64x45xf32>
    %28 = arith.truncf %27 : vector<64x45xf32> to vector<64x45xbf16>
    %c0_41 = arith.constant 0 : index
    %c0_42 = arith.constant 0 : index
    %29 = vector.load %arg2[%c0_41, %c0_42] : memref<45x8xf32, #tpu.memory_space<vmem>>, vector<45x8xf32>
    %30 = arith.truncf %29 : vector<45x8xf32> to vector<45x8xbf16>
    %cst = arith.constant dense<0.000000e+00> : vector<64x8xf32>
    %31 = tpu.matmul %28, %30, %cst {dimension_numbers = #tpu.dot_dimension_numbers<[1], [0], [0], [1], [0, 0, 1, 1], [], []>} : vector<64x45xbf16>, vector<45x8xbf16>, vector<64x8xf32> -> vector<64x8xf32>
    %c0_43 = arith.constant 0 : index
    %c0_44 = arith.constant 0 : index
    %32 = vector.load %arg3[%c0_43, %c0_44] : memref<45x1xf32, #tpu.memory_space<vmem>>, vector<45x1xf32>
    %33 = arith.truncf %32 : vector<45x1xf32> to vector<45x1xbf16>
    %cst_45 = arith.constant dense<0.000000e+00> : vector<64x1xf32>
    %34 = tpu.matmul %28, %33, %cst_45 {dimension_numbers = #tpu.dot_dimension_numbers<[1], [0], [0], [1], [0, 0, 1, 1], [], []>} : vector<64x45xbf16>, vector<45x1xbf16>, vector<64x1xf32> -> vector<64x1xf32>
    %cst_46 = arith.constant 0.000000e+00 : f32
    %35 = vector.broadcast %cst_46 : f32 to vector<64x1xf32>
    %36 = arith.cmpf ogt, %34, %35 : vector<64x1xf32>
    %37 = arith.extui %36 : vector<64x1xi1> to vector<64x1xi32>
    %38 = arith.sitofp %37 : vector<64x1xi32> to vector<64x1xf32>
    %cst_47 = arith.constant 9.99999993E-9 : f32
    %39 = vector.broadcast %cst_47 : f32 to vector<64x1xf32>
    %40 = arith.addf %34, %39 : vector<64x1xf32>
    %41 = tpu.reciprocal %40 {approx = true} : vector<64x1xf32> -> vector<64x1xf32>
    %cst_48 = arith.constant 9.000000e+00 : f32
    %42 = vector.broadcast %cst_48 : f32 to vector<64x1xf32>
    %43 = arith.mulf %42, %41 : vector<64x1xf32>
    %44 = arith.mulf %43, %38 : vector<64x1xf32>
    %45 = vector.broadcast %44 : vector<64x1xf32> to vector<64x8xf32>
    %46 = arith.mulf %31, %45 : vector<64x8xf32>
    %c0_49 = arith.constant 0 : index
    %c0_50 = arith.constant 0 : index
    %47 = vector.load %arg4[%c0_49, %c0_50] : memref<1x8xf32, #tpu.memory_space<vmem>>, vector<1x8xf32>
    %48 = vector.broadcast %47 : vector<1x8xf32> to vector<64x8xf32>
    %49 = arith.mulf %46, %48 : vector<64x8xf32>
    %c0_51 = arith.constant 0 : index
    %c0_52 = arith.constant 0 : index
    %50 = vector.load %arg5[%c0_51, %c0_52] : memref<1x8xf32, #tpu.memory_space<vmem>>, vector<1x8xf32>
    %51 = vector.broadcast %50 : vector<1x8xf32> to vector<64x8xf32>
    %52 = arith.addf %49, %51 : vector<64x8xf32>
    %cst_53 = arith.constant 0.000000e+00 : f32
    %53 = vector.broadcast %cst_53 : f32 to vector<64x8xf32>
    %54 = arith.cmpf oge, %52, %53 : vector<64x8xf32>
    %cst_54 = arith.constant 2.000000e-01 : f32
    %55 = vector.broadcast %cst_54 : f32 to vector<64x8xf32>
    %56 = arith.mulf %55, %52 : vector<64x8xf32>
    %57 = arith.select %54, %52, %56 : vector<64x8xi1>, vector<64x8xf32>
    %58 = vector.shape_cast %57 : vector<64x8xf32> to vector<8x8x8xf32>
    %c0_55 = arith.constant 0 : index
    %c0_56 = arith.constant 0 : index
    %c0_57 = arith.constant 0 : index
    %c0_58 = arith.constant 0 : index
    %59 = vector.load %arg6[%c0_55, %c0_56, %c0_57, %c0_58] : memref<1x8x8x8xf32, #tpu.memory_space<vmem>>, vector<1x8x8x8xf32>
    %60 = vector.shape_cast %59 : vector<1x8x8x8xf32> to vector<8x8x8xf32>
    %61 = vector.shape_cast %58 : vector<8x8x8xf32> to vector<1x8x8x8xf32>
    tpu.vector_store %arg6[%c0_55, %c0_56, %c0_57, %c0_58], %61 {strides = array<i32>} : memref<1x8x8x8xf32, #tpu.memory_space<vmem>>, vector<1x8x8x8xf32>,
    %62 = vector.shape_cast %38 : vector<64x1xf32> to vector<8x8x1xf32>
    %c0_59 = arith.constant 0 : index
    %c0_60 = arith.constant 0 : index
    %c0_61 = arith.constant 0 : index
    %c0_62 = arith.constant 0 : index
    %63 = vector.load %arg7[%c0_59, %c0_60, %c0_61, %c0_62] : memref<1x8x8x1xf32, #tpu.memory_space<vmem>>, vector<1x8x8x1xf32>
    %64 = vector.shape_cast %63 : vector<1x8x8x1xf32> to vector<8x8x1xf32>
    %65 = vector.shape_cast %62 : vector<8x8x1xf32> to vector<1x8x8x1xf32>
    tpu.vector_store %arg7[%c0_59, %c0_60, %c0_61, %c0_62], %65 {strides = array<i32>} : memref<1x8x8x1xf32, #tpu.memory_space<vmem>>, vector<1x8x8x1xf32>,
    return
  }
  func.func @transform_0(%arg0: i32) -> (i32, i32, i32, i32, i32) {
    %c0_i32 = arith.constant 0 : i32
    %c0_i32_0 = arith.constant 0 : i32
    %c0_i32_1 = arith.constant 0 : i32
    %c0_i32_2 = arith.constant 0 : i32
    %c0_i32_3 = arith.constant 0 : i32
    return %arg0, %c0_i32, %c0_i32_0, %c0_i32_1, %c0_i32_2 : i32, i32, i32, i32, i32
  }
  func.func @transform_1(%arg0: i32) -> (i32, i32) {
    %c0_i32 = arith.constant 0 : i32
    %c0_i32_0 = arith.constant 0 : i32
    %c0_i32_1 = arith.constant 0 : i32
    return %c0_i32, %c0_i32_0 : i32, i32
  }
  func.func @transform_2(%arg0: i32) -> (i32, i32) {
    %c0_i32 = arith.constant 0 : i32
    %c0_i32_0 = arith.constant 0 : i32
    %c0_i32_1 = arith.constant 0 : i32
    return %c0_i32, %c0_i32_0 : i32, i32
  }
  func.func @transform_3(%arg0: i32) -> (i32, i32) {
    %c0_i32 = arith.constant 0 : i32
    %c0_i32_0 = arith.constant 0 : i32
    %c0_i32_1 = arith.constant 0 : i32
    return %c0_i32, %c0_i32_0 : i32, i32
  }
  func.func @transform_4(%arg0: i32) -> (i32, i32) {
    %c0_i32 = arith.constant 0 : i32
    %c0_i32_0 = arith.constant 0 : i32
    %c0_i32_1 = arith.constant 0 : i32
    return %c0_i32, %c0_i32_0 : i32, i32
  }
  func.func @transform_5(%arg0: i32) -> (i32, i32, i32, i32) {
    %c0_i32 = arith.constant 0 : i32
    %c0_i32_0 = arith.constant 0 : i32
    %c0_i32_1 = arith.constant 0 : i32
    %c0_i32_2 = arith.constant 0 : i32
    return %arg0, %c0_i32, %c0_i32_0, %c0_i32_1 : i32, i32, i32, i32
  }
  func.func @transform_6(%arg0: i32) -> (i32, i32, i32, i32) {
    %c0_i32 = arith.constant 0 : i32
    %c0_i32_0 = arith.constant 0 : i32
    %c0_i32_1 = arith.constant 0 : i32
    %c0_i32_2 = arith.constant 0 : i32
    return %arg0, %c0_i32, %c0_i32_0, %c0_i32_1 : i32, i32, i32, i32
  }
}

module attributes {stable_mosaic.version = 11 : i64} {
  func.func @_pconv_kernel(%arg0: i32, %arg1: memref<1x4x5x5x9xf32, #tpu.memory_space<vmem>>, %arg2: memref<81x16xf32, #tpu.memory_space<vmem>>, %arg3: memref<81x1xf32, #tpu.memory_space<vmem>>, %arg4: memref<1x16xf32, #tpu.memory_space<vmem>>, %arg5: memref<1x16xf32, #tpu.memory_space<vmem>>, %arg6: memref<1x4x4x16xf32, #tpu.memory_space<vmem>>, %arg7: memref<1x4x4x1xf32, #tpu.memory_space<vmem>>) attributes {dimension_semantics = [#tpu.dimension_semantics<parallel>], iteration_bounds = array<i64: 2>, scalar_prefetch = 0 : i64, scratch_operands = 0 : i64, tpu.core_type = #tpu.core_type<tc>, window_params = [{transform_indices = @transform_0, window_bounds = array<i64: 1, 4, 5, 5, 9>}, {pipeline_mode = #tpu.pipeline_mode<synchronous>, transform_indices = @transform_1, window_bounds = array<i64: 81, 16>}, {pipeline_mode = #tpu.pipeline_mode<synchronous>, transform_indices = @transform_2, window_bounds = array<i64: 81, 1>}, {pipeline_mode = #tpu.pipeline_mode<synchronous>, transform_indices = @transform_3, window_bounds = array<i64: 1, 16>}, {pipeline_mode = #tpu.pipeline_mode<synchronous>, transform_indices = @transform_4, window_bounds = array<i64: 1, 16>}, {transform_indices = @transform_5, window_bounds = array<i64: 1, 4, 4, 16>}, {transform_indices = @transform_6, window_bounds = array<i64: 1, 4, 4, 1>}]} {
    %c0 = arith.constant 0 : index
    %c0_0 = arith.constant 0 : index
    %c0_1 = arith.constant 0 : index
    %c0_2 = arith.constant 0 : index
    %c0_3 = arith.constant 0 : index
    %0 = vector.load %arg1[%c0, %c0_0, %c0_1, %c0_2, %c0_3] : memref<1x4x5x5x9xf32, #tpu.memory_space<vmem>>, vector<1x1x4x4x9xf32>
    %1 = vector.shape_cast %0 : vector<1x1x4x4x9xf32> to vector<4x4x9xf32>
    %2 = vector.shape_cast %1 : vector<4x4x9xf32> to vector<16x9xf32>
    %c0_4 = arith.constant 0 : index
    %c1 = arith.constant 1 : index
    %c0_5 = arith.constant 0 : index
    %c0_6 = arith.constant 0 : index
    %c0_7 = arith.constant 0 : index
    %3 = vector.load %arg1[%c0_4, %c1, %c0_5, %c0_6, %c0_7] : memref<1x4x5x5x9xf32, #tpu.memory_space<vmem>>, vector<1x1x4x4x9xf32>
    %4 = vector.shape_cast %3 : vector<1x1x4x4x9xf32> to vector<4x4x9xf32>
    %5 = vector.shape_cast %4 : vector<4x4x9xf32> to vector<16x9xf32>
    %c0_8 = arith.constant 0 : index
    %c0_9 = arith.constant 0 : index
    %c0_10 = arith.constant 0 : index
    %c1_11 = arith.constant 1 : index
    %c0_12 = arith.constant 0 : index
    %6 = vector.load %arg1[%c0_8, %c0_9, %c0_10, %c1_11, %c0_12] : memref<1x4x5x5x9xf32, #tpu.memory_space<vmem>>, vector<1x1x4x4x9xf32>
    %7 = vector.shape_cast %6 : vector<1x1x4x4x9xf32> to vector<4x4x9xf32>
    %8 = vector.shape_cast %7 : vector<4x4x9xf32> to vector<16x9xf32>
    %c0_13 = arith.constant 0 : index
    %c2 = arith.constant 2 : index
    %c0_14 = arith.constant 0 : index
    %c0_15 = arith.constant 0 : index
    %c0_16 = arith.constant 0 : index
    %9 = vector.load %arg1[%c0_13, %c2, %c0_14, %c0_15, %c0_16] : memref<1x4x5x5x9xf32, #tpu.memory_space<vmem>>, vector<1x1x4x4x9xf32>
    %10 = vector.shape_cast %9 : vector<1x1x4x4x9xf32> to vector<4x4x9xf32>
    %11 = vector.shape_cast %10 : vector<4x4x9xf32> to vector<16x9xf32>
    %c0_17 = arith.constant 0 : index
    %c3 = arith.constant 3 : index
    %c0_18 = arith.constant 0 : index
    %c0_19 = arith.constant 0 : index
    %c0_20 = arith.constant 0 : index
    %12 = vector.load %arg1[%c0_17, %c3, %c0_18, %c0_19, %c0_20] : memref<1x4x5x5x9xf32, #tpu.memory_space<vmem>>, vector<1x1x4x4x9xf32>
    %13 = vector.shape_cast %12 : vector<1x1x4x4x9xf32> to vector<4x4x9xf32>
    %14 = vector.shape_cast %13 : vector<4x4x9xf32> to vector<16x9xf32>
    %c0_21 = arith.constant 0 : index
    %c2_22 = arith.constant 2 : index
    %c0_23 = arith.constant 0 : index
    %c1_24 = arith.constant 1 : index
    %c0_25 = arith.constant 0 : index
    %15 = vector.load %arg1[%c0_21, %c2_22, %c0_23, %c1_24, %c0_25] : memref<1x4x5x5x9xf32, #tpu.memory_space<vmem>>, vector<1x1x4x4x9xf32>
    %16 = vector.shape_cast %15 : vector<1x1x4x4x9xf32> to vector<4x4x9xf32>
    %17 = vector.shape_cast %16 : vector<4x4x9xf32> to vector<16x9xf32>
    %c0_26 = arith.constant 0 : index
    %c0_27 = arith.constant 0 : index
    %c1_28 = arith.constant 1 : index
    %c0_29 = arith.constant 0 : index
    %c0_30 = arith.constant 0 : index
    %18 = vector.load %arg1[%c0_26, %c0_27, %c1_28, %c0_29, %c0_30] : memref<1x4x5x5x9xf32, #tpu.memory_space<vmem>>, vector<1x1x4x4x9xf32>
    %19 = vector.shape_cast %18 : vector<1x1x4x4x9xf32> to vector<4x4x9xf32>
    %20 = vector.shape_cast %19 : vector<4x4x9xf32> to vector<16x9xf32>
    %c0_31 = arith.constant 0 : index
    %c1_32 = arith.constant 1 : index
    %c1_33 = arith.constant 1 : index
    %c0_34 = arith.constant 0 : index
    %c0_35 = arith.constant 0 : index
    %21 = vector.load %arg1[%c0_31, %c1_32, %c1_33, %c0_34, %c0_35] : memref<1x4x5x5x9xf32, #tpu.memory_space<vmem>>, vector<1x1x4x4x9xf32>
    %22 = vector.shape_cast %21 : vector<1x1x4x4x9xf32> to vector<4x4x9xf32>
    %23 = vector.shape_cast %22 : vector<4x4x9xf32> to vector<16x9xf32>
    %c0_36 = arith.constant 0 : index
    %c0_37 = arith.constant 0 : index
    %c1_38 = arith.constant 1 : index
    %c1_39 = arith.constant 1 : index
    %c0_40 = arith.constant 0 : index
    %24 = vector.load %arg1[%c0_36, %c0_37, %c1_38, %c1_39, %c0_40] : memref<1x4x5x5x9xf32, #tpu.memory_space<vmem>>, vector<1x1x4x4x9xf32>
    %25 = vector.shape_cast %24 : vector<1x1x4x4x9xf32> to vector<4x4x9xf32>
    %26 = vector.shape_cast %25 : vector<4x4x9xf32> to vector<16x9xf32>
    %27 = tpu.concatenate %2, %5, %8, %11, %14, %17, %20, %23, %26 in 1 : vector<16x9xf32>, vector<16x9xf32>, vector<16x9xf32>, vector<16x9xf32>, vector<16x9xf32>, vector<16x9xf32>, vector<16x9xf32>, vector<16x9xf32>, vector<16x9xf32> -> vector<16x81xf32>
    %28 = arith.truncf %27 : vector<16x81xf32> to vector<16x81xbf16>
    %c0_41 = arith.constant 0 : index
    %c0_42 = arith.constant 0 : index
    %29 = vector.load %arg2[%c0_41, %c0_42] : memref<81x16xf32, #tpu.memory_space<vmem>>, vector<81x16xf32>
    %30 = arith.truncf %29 : vector<81x16xf32> to vector<81x16xbf16>
    %cst = arith.constant dense<0.000000e+00> : vector<16x16xf32>
    %31 = tpu.matmul %28, %30, %cst {dimension_numbers = #tpu.dot_dimension_numbers<[1], [0], [0], [1], [0, 0, 1, 1], [], []>} : vector<16x81xbf16>, vector<81x16xbf16>, vector<16x16xf32> -> vector<16x16xf32>
    %c0_43 = arith.constant 0 : index
    %c0_44 = arith.constant 0 : index
    %32 = vector.load %arg3[%c0_43, %c0_44] : memref<81x1xf32, #tpu.memory_space<vmem>>, vector<81x1xf32>
    %33 = arith.truncf %32 : vector<81x1xf32> to vector<81x1xbf16>
    %cst_45 = arith.constant dense<0.000000e+00> : vector<16x1xf32>
    %34 = tpu.matmul %28, %33, %cst_45 {dimension_numbers = #tpu.dot_dimension_numbers<[1], [0], [0], [1], [0, 0, 1, 1], [], []>} : vector<16x81xbf16>, vector<81x1xbf16>, vector<16x1xf32> -> vector<16x1xf32>
    %cst_46 = arith.constant 0.000000e+00 : f32
    %35 = vector.broadcast %cst_46 : f32 to vector<16x1xf32>
    %36 = arith.cmpf ogt, %34, %35 : vector<16x1xf32>
    %37 = arith.extui %36 : vector<16x1xi1> to vector<16x1xi32>
    %38 = arith.sitofp %37 : vector<16x1xi32> to vector<16x1xf32>
    %cst_47 = arith.constant 9.99999993E-9 : f32
    %39 = vector.broadcast %cst_47 : f32 to vector<16x1xf32>
    %40 = arith.addf %34, %39 : vector<16x1xf32>
    %41 = tpu.reciprocal %40 {approx = true} : vector<16x1xf32> -> vector<16x1xf32>
    %cst_48 = arith.constant 9.000000e+00 : f32
    %42 = vector.broadcast %cst_48 : f32 to vector<16x1xf32>
    %43 = arith.mulf %42, %41 : vector<16x1xf32>
    %44 = arith.mulf %43, %38 : vector<16x1xf32>
    %45 = vector.broadcast %44 : vector<16x1xf32> to vector<16x16xf32>
    %46 = arith.mulf %31, %45 : vector<16x16xf32>
    %c0_49 = arith.constant 0 : index
    %c0_50 = arith.constant 0 : index
    %47 = vector.load %arg4[%c0_49, %c0_50] : memref<1x16xf32, #tpu.memory_space<vmem>>, vector<1x16xf32>
    %48 = vector.broadcast %47 : vector<1x16xf32> to vector<16x16xf32>
    %49 = arith.mulf %46, %48 : vector<16x16xf32>
    %c0_51 = arith.constant 0 : index
    %c0_52 = arith.constant 0 : index
    %50 = vector.load %arg5[%c0_51, %c0_52] : memref<1x16xf32, #tpu.memory_space<vmem>>, vector<1x16xf32>
    %51 = vector.broadcast %50 : vector<1x16xf32> to vector<16x16xf32>
    %52 = arith.addf %49, %51 : vector<16x16xf32>
    %cst_53 = arith.constant 0.000000e+00 : f32
    %53 = vector.broadcast %cst_53 : f32 to vector<16x16xf32>
    %54 = arith.cmpf oge, %52, %53 : vector<16x16xf32>
    %cst_54 = arith.constant 2.000000e-01 : f32
    %55 = vector.broadcast %cst_54 : f32 to vector<16x16xf32>
    %56 = arith.mulf %55, %52 : vector<16x16xf32>
    %57 = arith.select %54, %52, %56 : vector<16x16xi1>, vector<16x16xf32>
    %58 = vector.shape_cast %57 : vector<16x16xf32> to vector<4x4x16xf32>
    %c0_55 = arith.constant 0 : index
    %c0_56 = arith.constant 0 : index
    %c0_57 = arith.constant 0 : index
    %c0_58 = arith.constant 0 : index
    %59 = vector.load %arg6[%c0_55, %c0_56, %c0_57, %c0_58] : memref<1x4x4x16xf32, #tpu.memory_space<vmem>>, vector<1x4x4x16xf32>
    %60 = vector.shape_cast %59 : vector<1x4x4x16xf32> to vector<4x4x16xf32>
    %61 = vector.shape_cast %58 : vector<4x4x16xf32> to vector<1x4x4x16xf32>
    tpu.vector_store %arg6[%c0_55, %c0_56, %c0_57, %c0_58], %61 {strides = array<i32>} : memref<1x4x4x16xf32, #tpu.memory_space<vmem>>, vector<1x4x4x16xf32>,
    %62 = vector.shape_cast %38 : vector<16x1xf32> to vector<4x4x1xf32>
    %c0_59 = arith.constant 0 : index
    %c0_60 = arith.constant 0 : index
    %c0_61 = arith.constant 0 : index
    %c0_62 = arith.constant 0 : index
    %63 = vector.load %arg7[%c0_59, %c0_60, %c0_61, %c0_62] : memref<1x4x4x1xf32, #tpu.memory_space<vmem>>, vector<1x4x4x1xf32>
    %64 = vector.shape_cast %63 : vector<1x4x4x1xf32> to vector<4x4x1xf32>
    %65 = vector.shape_cast %62 : vector<4x4x1xf32> to vector<1x4x4x1xf32>
    tpu.vector_store %arg7[%c0_59, %c0_60, %c0_61, %c0_62], %65 {strides = array<i32>} : memref<1x4x4x1xf32, #tpu.memory_space<vmem>>, vector<1x4x4x1xf32>,
    return
  }
  func.func @transform_0(%arg0: i32) -> (i32, i32, i32, i32, i32) {
    %c0_i32 = arith.constant 0 : i32
    %c0_i32_0 = arith.constant 0 : i32
    %c0_i32_1 = arith.constant 0 : i32
    %c0_i32_2 = arith.constant 0 : i32
    %c0_i32_3 = arith.constant 0 : i32
    return %arg0, %c0_i32, %c0_i32_0, %c0_i32_1, %c0_i32_2 : i32, i32, i32, i32, i32
  }
  func.func @transform_1(%arg0: i32) -> (i32, i32) {
    %c0_i32 = arith.constant 0 : i32
    %c0_i32_0 = arith.constant 0 : i32
    %c0_i32_1 = arith.constant 0 : i32
    return %c0_i32, %c0_i32_0 : i32, i32
  }
  func.func @transform_2(%arg0: i32) -> (i32, i32) {
    %c0_i32 = arith.constant 0 : i32
    %c0_i32_0 = arith.constant 0 : i32
    %c0_i32_1 = arith.constant 0 : i32
    return %c0_i32, %c0_i32_0 : i32, i32
  }
  func.func @transform_3(%arg0: i32) -> (i32, i32) {
    %c0_i32 = arith.constant 0 : i32
    %c0_i32_0 = arith.constant 0 : i32
    %c0_i32_1 = arith.constant 0 : i32
    return %c0_i32, %c0_i32_0 : i32, i32
  }
  func.func @transform_4(%arg0: i32) -> (i32, i32) {
    %c0_i32 = arith.constant 0 : i32
    %c0_i32_0 = arith.constant 0 : i32
    %c0_i32_1 = arith.constant 0 : i32
    return %c0_i32, %c0_i32_0 : i32, i32
  }
  func.func @transform_5(%arg0: i32) -> (i32, i32, i32, i32) {
    %c0_i32 = arith.constant 0 : i32
    %c0_i32_0 = arith.constant 0 : i32
    %c0_i32_1 = arith.constant 0 : i32
    %c0_i32_2 = arith.constant 0 : i32
    return %arg0, %c0_i32, %c0_i32_0, %c0_i32_1 : i32, i32, i32, i32
  }
  func.func @transform_6(%arg0: i32) -> (i32, i32, i32, i32) {
    %c0_i32 = arith.constant 0 : i32
    %c0_i32_0 = arith.constant 0 : i32
    %c0_i32_1 = arith.constant 0 : i32
    %c0_i32_2 = arith.constant 0 : i32
    return %arg0, %c0_i32, %c0_i32_0, %c0_i32_1 : i32, i32, i32, i32
  }
}

module attributes {stable_mosaic.version = 11 : i64} {
  func.func @_pconv_kernel(%arg0: i32, %arg1: memref<1x4x3x3x17xf32, #tpu.memory_space<vmem>>, %arg2: memref<153x32xf32, #tpu.memory_space<vmem>>, %arg3: memref<153x1xf32, #tpu.memory_space<vmem>>, %arg4: memref<1x32xf32, #tpu.memory_space<vmem>>, %arg5: memref<1x32xf32, #tpu.memory_space<vmem>>, %arg6: memref<1x2x2x32xf32, #tpu.memory_space<vmem>>, %arg7: memref<1x2x2x1xf32, #tpu.memory_space<vmem>>) attributes {dimension_semantics = [#tpu.dimension_semantics<parallel>], iteration_bounds = array<i64: 2>, scalar_prefetch = 0 : i64, scratch_operands = 0 : i64, tpu.core_type = #tpu.core_type<tc>, window_params = [{transform_indices = @transform_0, window_bounds = array<i64: 1, 4, 3, 3, 17>}, {pipeline_mode = #tpu.pipeline_mode<synchronous>, transform_indices = @transform_1, window_bounds = array<i64: 153, 32>}, {pipeline_mode = #tpu.pipeline_mode<synchronous>, transform_indices = @transform_2, window_bounds = array<i64: 153, 1>}, {pipeline_mode = #tpu.pipeline_mode<synchronous>, transform_indices = @transform_3, window_bounds = array<i64: 1, 32>}, {pipeline_mode = #tpu.pipeline_mode<synchronous>, transform_indices = @transform_4, window_bounds = array<i64: 1, 32>}, {transform_indices = @transform_5, window_bounds = array<i64: 1, 2, 2, 32>}, {transform_indices = @transform_6, window_bounds = array<i64: 1, 2, 2, 1>}]} {
    %c0 = arith.constant 0 : index
    %c0_0 = arith.constant 0 : index
    %c0_1 = arith.constant 0 : index
    %c0_2 = arith.constant 0 : index
    %c0_3 = arith.constant 0 : index
    %0 = vector.load %arg1[%c0, %c0_0, %c0_1, %c0_2, %c0_3] : memref<1x4x3x3x17xf32, #tpu.memory_space<vmem>>, vector<1x1x2x2x17xf32>
    %1 = vector.shape_cast %0 : vector<1x1x2x2x17xf32> to vector<2x2x17xf32>
    %2 = vector.shape_cast %1 : vector<2x2x17xf32> to vector<4x17xf32>
    %c0_4 = arith.constant 0 : index
    %c1 = arith.constant 1 : index
    %c0_5 = arith.constant 0 : index
    %c0_6 = arith.constant 0 : index
    %c0_7 = arith.constant 0 : index
    %3 = vector.load %arg1[%c0_4, %c1, %c0_5, %c0_6, %c0_7] : memref<1x4x3x3x17xf32, #tpu.memory_space<vmem>>, vector<1x1x2x2x17xf32>
    %4 = vector.shape_cast %3 : vector<1x1x2x2x17xf32> to vector<2x2x17xf32>
    %5 = vector.shape_cast %4 : vector<2x2x17xf32> to vector<4x17xf32>
    %c0_8 = arith.constant 0 : index
    %c0_9 = arith.constant 0 : index
    %c0_10 = arith.constant 0 : index
    %c1_11 = arith.constant 1 : index
    %c0_12 = arith.constant 0 : index
    %6 = vector.load %arg1[%c0_8, %c0_9, %c0_10, %c1_11, %c0_12] : memref<1x4x3x3x17xf32, #tpu.memory_space<vmem>>, vector<1x1x2x2x17xf32>
    %7 = vector.shape_cast %6 : vector<1x1x2x2x17xf32> to vector<2x2x17xf32>
    %8 = vector.shape_cast %7 : vector<2x2x17xf32> to vector<4x17xf32>
    %c0_13 = arith.constant 0 : index
    %c2 = arith.constant 2 : index
    %c0_14 = arith.constant 0 : index
    %c0_15 = arith.constant 0 : index
    %c0_16 = arith.constant 0 : index
    %9 = vector.load %arg1[%c0_13, %c2, %c0_14, %c0_15, %c0_16] : memref<1x4x3x3x17xf32, #tpu.memory_space<vmem>>, vector<1x1x2x2x17xf32>
    %10 = vector.shape_cast %9 : vector<1x1x2x2x17xf32> to vector<2x2x17xf32>
    %11 = vector.shape_cast %10 : vector<2x2x17xf32> to vector<4x17xf32>
    %c0_17 = arith.constant 0 : index
    %c3 = arith.constant 3 : index
    %c0_18 = arith.constant 0 : index
    %c0_19 = arith.constant 0 : index
    %c0_20 = arith.constant 0 : index
    %12 = vector.load %arg1[%c0_17, %c3, %c0_18, %c0_19, %c0_20] : memref<1x4x3x3x17xf32, #tpu.memory_space<vmem>>, vector<1x1x2x2x17xf32>
    %13 = vector.shape_cast %12 : vector<1x1x2x2x17xf32> to vector<2x2x17xf32>
    %14 = vector.shape_cast %13 : vector<2x2x17xf32> to vector<4x17xf32>
    %c0_21 = arith.constant 0 : index
    %c2_22 = arith.constant 2 : index
    %c0_23 = arith.constant 0 : index
    %c1_24 = arith.constant 1 : index
    %c0_25 = arith.constant 0 : index
    %15 = vector.load %arg1[%c0_21, %c2_22, %c0_23, %c1_24, %c0_25] : memref<1x4x3x3x17xf32, #tpu.memory_space<vmem>>, vector<1x1x2x2x17xf32>
    %16 = vector.shape_cast %15 : vector<1x1x2x2x17xf32> to vector<2x2x17xf32>
    %17 = vector.shape_cast %16 : vector<2x2x17xf32> to vector<4x17xf32>
    %c0_26 = arith.constant 0 : index
    %c0_27 = arith.constant 0 : index
    %c1_28 = arith.constant 1 : index
    %c0_29 = arith.constant 0 : index
    %c0_30 = arith.constant 0 : index
    %18 = vector.load %arg1[%c0_26, %c0_27, %c1_28, %c0_29, %c0_30] : memref<1x4x3x3x17xf32, #tpu.memory_space<vmem>>, vector<1x1x2x2x17xf32>
    %19 = vector.shape_cast %18 : vector<1x1x2x2x17xf32> to vector<2x2x17xf32>
    %20 = vector.shape_cast %19 : vector<2x2x17xf32> to vector<4x17xf32>
    %c0_31 = arith.constant 0 : index
    %c1_32 = arith.constant 1 : index
    %c1_33 = arith.constant 1 : index
    %c0_34 = arith.constant 0 : index
    %c0_35 = arith.constant 0 : index
    %21 = vector.load %arg1[%c0_31, %c1_32, %c1_33, %c0_34, %c0_35] : memref<1x4x3x3x17xf32, #tpu.memory_space<vmem>>, vector<1x1x2x2x17xf32>
    %22 = vector.shape_cast %21 : vector<1x1x2x2x17xf32> to vector<2x2x17xf32>
    %23 = vector.shape_cast %22 : vector<2x2x17xf32> to vector<4x17xf32>
    %c0_36 = arith.constant 0 : index
    %c0_37 = arith.constant 0 : index
    %c1_38 = arith.constant 1 : index
    %c1_39 = arith.constant 1 : index
    %c0_40 = arith.constant 0 : index
    %24 = vector.load %arg1[%c0_36, %c0_37, %c1_38, %c1_39, %c0_40] : memref<1x4x3x3x17xf32, #tpu.memory_space<vmem>>, vector<1x1x2x2x17xf32>
    %25 = vector.shape_cast %24 : vector<1x1x2x2x17xf32> to vector<2x2x17xf32>
    %26 = vector.shape_cast %25 : vector<2x2x17xf32> to vector<4x17xf32>
    %27 = tpu.concatenate %2, %5, %8, %11, %14, %17, %20, %23, %26 in 1 : vector<4x17xf32>, vector<4x17xf32>, vector<4x17xf32>, vector<4x17xf32>, vector<4x17xf32>, vector<4x17xf32>, vector<4x17xf32>, vector<4x17xf32>, vector<4x17xf32> -> vector<4x153xf32>
    %28 = arith.truncf %27 : vector<4x153xf32> to vector<4x153xbf16>
    %c0_41 = arith.constant 0 : index
    %c0_42 = arith.constant 0 : index
    %29 = vector.load %arg2[%c0_41, %c0_42] : memref<153x32xf32, #tpu.memory_space<vmem>>, vector<153x32xf32>
    %30 = arith.truncf %29 : vector<153x32xf32> to vector<153x32xbf16>
    %cst = arith.constant dense<0.000000e+00> : vector<4x32xf32>
    %31 = tpu.matmul %28, %30, %cst {dimension_numbers = #tpu.dot_dimension_numbers<[1], [0], [0], [1], [0, 0, 1, 1], [], []>} : vector<4x153xbf16>, vector<153x32xbf16>, vector<4x32xf32> -> vector<4x32xf32>
    %c0_43 = arith.constant 0 : index
    %c0_44 = arith.constant 0 : index
    %32 = vector.load %arg3[%c0_43, %c0_44] : memref<153x1xf32, #tpu.memory_space<vmem>>, vector<153x1xf32>
    %33 = arith.truncf %32 : vector<153x1xf32> to vector<153x1xbf16>
    %cst_45 = arith.constant dense<0.000000e+00> : vector<4x1xf32>
    %34 = tpu.matmul %28, %33, %cst_45 {dimension_numbers = #tpu.dot_dimension_numbers<[1], [0], [0], [1], [0, 0, 1, 1], [], []>} : vector<4x153xbf16>, vector<153x1xbf16>, vector<4x1xf32> -> vector<4x1xf32>
    %cst_46 = arith.constant 0.000000e+00 : f32
    %35 = vector.broadcast %cst_46 : f32 to vector<4x1xf32>
    %36 = arith.cmpf ogt, %34, %35 : vector<4x1xf32>
    %37 = arith.extui %36 : vector<4x1xi1> to vector<4x1xi32>
    %38 = arith.sitofp %37 : vector<4x1xi32> to vector<4x1xf32>
    %cst_47 = arith.constant 9.99999993E-9 : f32
    %39 = vector.broadcast %cst_47 : f32 to vector<4x1xf32>
    %40 = arith.addf %34, %39 : vector<4x1xf32>
    %41 = tpu.reciprocal %40 {approx = true} : vector<4x1xf32> -> vector<4x1xf32>
    %cst_48 = arith.constant 9.000000e+00 : f32
    %42 = vector.broadcast %cst_48 : f32 to vector<4x1xf32>
    %43 = arith.mulf %42, %41 : vector<4x1xf32>
    %44 = arith.mulf %43, %38 : vector<4x1xf32>
    %45 = vector.broadcast %44 : vector<4x1xf32> to vector<4x32xf32>
    %46 = arith.mulf %31, %45 : vector<4x32xf32>
    %c0_49 = arith.constant 0 : index
    %c0_50 = arith.constant 0 : index
    %47 = vector.load %arg4[%c0_49, %c0_50] : memref<1x32xf32, #tpu.memory_space<vmem>>, vector<1x32xf32>
    %48 = vector.broadcast %47 : vector<1x32xf32> to vector<4x32xf32>
    %49 = arith.mulf %46, %48 : vector<4x32xf32>
    %c0_51 = arith.constant 0 : index
    %c0_52 = arith.constant 0 : index
    %50 = vector.load %arg5[%c0_51, %c0_52] : memref<1x32xf32, #tpu.memory_space<vmem>>, vector<1x32xf32>
    %51 = vector.broadcast %50 : vector<1x32xf32> to vector<4x32xf32>
    %52 = arith.addf %49, %51 : vector<4x32xf32>
    %cst_53 = arith.constant 0.000000e+00 : f32
    %53 = vector.broadcast %cst_53 : f32 to vector<4x32xf32>
    %54 = arith.maximumf %52, %53 : vector<4x32xf32>
    %55 = vector.shape_cast %54 : vector<4x32xf32> to vector<2x2x32xf32>
    %c0_54 = arith.constant 0 : index
    %c0_55 = arith.constant 0 : index
    %c0_56 = arith.constant 0 : index
    %c0_57 = arith.constant 0 : index
    %56 = vector.load %arg6[%c0_54, %c0_55, %c0_56, %c0_57] : memref<1x2x2x32xf32, #tpu.memory_space<vmem>>, vector<1x2x2x32xf32>
    %57 = vector.shape_cast %56 : vector<1x2x2x32xf32> to vector<2x2x32xf32>
    %58 = vector.shape_cast %55 : vector<2x2x32xf32> to vector<1x2x2x32xf32>
    tpu.vector_store %arg6[%c0_54, %c0_55, %c0_56, %c0_57], %58 {strides = array<i32>} : memref<1x2x2x32xf32, #tpu.memory_space<vmem>>, vector<1x2x2x32xf32>,
    %59 = vector.shape_cast %38 : vector<4x1xf32> to vector<2x2x1xf32>
    %c0_58 = arith.constant 0 : index
    %c0_59 = arith.constant 0 : index
    %c0_60 = arith.constant 0 : index
    %c0_61 = arith.constant 0 : index
    %60 = vector.load %arg7[%c0_58, %c0_59, %c0_60, %c0_61] : memref<1x2x2x1xf32, #tpu.memory_space<vmem>>, vector<1x2x2x1xf32>
    %61 = vector.shape_cast %60 : vector<1x2x2x1xf32> to vector<2x2x1xf32>
    %62 = vector.shape_cast %59 : vector<2x2x1xf32> to vector<1x2x2x1xf32>
    tpu.vector_store %arg7[%c0_58, %c0_59, %c0_60, %c0_61], %62 {strides = array<i32>} : memref<1x2x2x1xf32, #tpu.memory_space<vmem>>, vector<1x2x2x1xf32>,
    return
  }
  func.func @transform_0(%arg0: i32) -> (i32, i32, i32, i32, i32) {
    %c0_i32 = arith.constant 0 : i32
    %c0_i32_0 = arith.constant 0 : i32
    %c0_i32_1 = arith.constant 0 : i32
    %c0_i32_2 = arith.constant 0 : i32
    %c0_i32_3 = arith.constant 0 : i32
    return %arg0, %c0_i32, %c0_i32_0, %c0_i32_1, %c0_i32_2 : i32, i32, i32, i32, i32
  }
  func.func @transform_1(%arg0: i32) -> (i32, i32) {
    %c0_i32 = arith.constant 0 : i32
    %c0_i32_0 = arith.constant 0 : i32
    %c0_i32_1 = arith.constant 0 : i32
    return %c0_i32, %c0_i32_0 : i32, i32
  }
  func.func @transform_2(%arg0: i32) -> (i32, i32) {
    %c0_i32 = arith.constant 0 : i32
    %c0_i32_0 = arith.constant 0 : i32
    %c0_i32_1 = arith.constant 0 : i32
    return %c0_i32, %c0_i32_0 : i32, i32
  }
  func.func @transform_3(%arg0: i32) -> (i32, i32) {
    %c0_i32 = arith.constant 0 : i32
    %c0_i32_0 = arith.constant 0 : i32
    %c0_i32_1 = arith.constant 0 : i32
    return %c0_i32, %c0_i32_0 : i32, i32
  }
  func.func @transform_4(%arg0: i32) -> (i32, i32) {
    %c0_i32 = arith.constant 0 : i32
    %c0_i32_0 = arith.constant 0 : i32
    %c0_i32_1 = arith.constant 0 : i32
    return %c0_i32, %c0_i32_0 : i32, i32
  }
  func.func @transform_5(%arg0: i32) -> (i32, i32, i32, i32) {
    %c0_i32 = arith.constant 0 : i32
    %c0_i32_0 = arith.constant 0 : i32
    %c0_i32_1 = arith.constant 0 : i32
    %c0_i32_2 = arith.constant 0 : i32
    return %arg0, %c0_i32, %c0_i32_0, %c0_i32_1 : i32, i32, i32, i32
  }
  func.func @transform_6(%arg0: i32) -> (i32, i32, i32, i32) {
    %c0_i32 = arith.constant 0 : i32
    %c0_i32_0 = arith.constant 0 : i32
    %c0_i32_1 = arith.constant 0 : i32
    %c0_i32_2 = arith.constant 0 : i32
    return %arg0, %c0_i32, %c0_i32_0, %c0_i32_1 : i32, i32, i32, i32
  }
}

module attributes {stable_mosaic.version = 11 : i64} {
  func.func @_pconv_kernel(%arg0: i32, %arg1: memref<1x1x4x4x33xf32, #tpu.memory_space<vmem>>, %arg2: memref<297x32xf32, #tpu.memory_space<vmem>>, %arg3: memref<297x1xf32, #tpu.memory_space<vmem>>, %arg4: memref<1x32xf32, #tpu.memory_space<vmem>>, %arg5: memref<1x32xf32, #tpu.memory_space<vmem>>, %arg6: memref<1x2x2x32xf32, #tpu.memory_space<vmem>>, %arg7: memref<1x2x2x1xf32, #tpu.memory_space<vmem>>) attributes {dimension_semantics = [#tpu.dimension_semantics<parallel>], iteration_bounds = array<i64: 2>, scalar_prefetch = 0 : i64, scratch_operands = 0 : i64, tpu.core_type = #tpu.core_type<tc>, window_params = [{transform_indices = @transform_0, window_bounds = array<i64: 1, 1, 4, 4, 33>}, {pipeline_mode = #tpu.pipeline_mode<synchronous>, transform_indices = @transform_1, window_bounds = array<i64: 297, 32>}, {pipeline_mode = #tpu.pipeline_mode<synchronous>, transform_indices = @transform_2, window_bounds = array<i64: 297, 1>}, {pipeline_mode = #tpu.pipeline_mode<synchronous>, transform_indices = @transform_3, window_bounds = array<i64: 1, 32>}, {pipeline_mode = #tpu.pipeline_mode<synchronous>, transform_indices = @transform_4, window_bounds = array<i64: 1, 32>}, {transform_indices = @transform_5, window_bounds = array<i64: 1, 2, 2, 32>}, {transform_indices = @transform_6, window_bounds = array<i64: 1, 2, 2, 1>}]} {
    %c0 = arith.constant 0 : index
    %c0_0 = arith.constant 0 : index
    %c0_1 = arith.constant 0 : index
    %c0_2 = arith.constant 0 : index
    %c0_3 = arith.constant 0 : index
    %0 = vector.load %arg1[%c0, %c0_0, %c0_1, %c0_2, %c0_3] : memref<1x1x4x4x33xf32, #tpu.memory_space<vmem>>, vector<1x1x2x2x33xf32>
    %1 = vector.shape_cast %0 : vector<1x1x2x2x33xf32> to vector<2x2x33xf32>
    %2 = vector.shape_cast %1 : vector<2x2x33xf32> to vector<4x33xf32>
    %c0_4 = arith.constant 0 : index
    %c0_5 = arith.constant 0 : index
    %c0_6 = arith.constant 0 : index
    %c1 = arith.constant 1 : index
    %c0_7 = arith.constant 0 : index
    %3 = vector.load %arg1[%c0_4, %c0_5, %c0_6, %c1, %c0_7] : memref<1x1x4x4x33xf32, #tpu.memory_space<vmem>>, vector<1x1x2x2x33xf32>
    %4 = vector.shape_cast %3 : vector<1x1x2x2x33xf32> to vector<2x2x33xf32>
    %5 = vector.shape_cast %4 : vector<2x2x33xf32> to vector<4x33xf32>
    %c0_8 = arith.constant 0 : index
    %c0_9 = arith.constant 0 : index
    %c0_10 = arith.constant 0 : index
    %c2 = arith.constant 2 : index
    %c0_11 = arith.constant 0 : index
    %6 = vector.load %arg1[%c0_8, %c0_9, %c0_10, %c2, %c0_11] : memref<1x1x4x4x33xf32, #tpu.memory_space<vmem>>, vector<1x1x2x2x33xf32>
    %7 = vector.shape_cast %6 : vector<1x1x2x2x33xf32> to vector<2x2x33xf32>
    %8 = vector.shape_cast %7 : vector<2x2x33xf32> to vector<4x33xf32>
    %c0_12 = arith.constant 0 : index
    %c0_13 = arith.constant 0 : index
    %c1_14 = arith.constant 1 : index
    %c0_15 = arith.constant 0 : index
    %c0_16 = arith.constant 0 : index
    %9 = vector.load %arg1[%c0_12, %c0_13, %c1_14, %c0_15, %c0_16] : memref<1x1x4x4x33xf32, #tpu.memory_space<vmem>>, vector<1x1x2x2x33xf32>
    %10 = vector.shape_cast %9 : vector<1x1x2x2x33xf32> to vector<2x2x33xf32>
    %11 = vector.shape_cast %10 : vector<2x2x33xf32> to vector<4x33xf32>
    %c0_17 = arith.constant 0 : index
    %c0_18 = arith.constant 0 : index
    %c1_19 = arith.constant 1 : index
    %c1_20 = arith.constant 1 : index
    %c0_21 = arith.constant 0 : index
    %12 = vector.load %arg1[%c0_17, %c0_18, %c1_19, %c1_20, %c0_21] : memref<1x1x4x4x33xf32, #tpu.memory_space<vmem>>, vector<1x1x2x2x33xf32>
    %13 = vector.shape_cast %12 : vector<1x1x2x2x33xf32> to vector<2x2x33xf32>
    %14 = vector.shape_cast %13 : vector<2x2x33xf32> to vector<4x33xf32>
    %c0_22 = arith.constant 0 : index
    %c0_23 = arith.constant 0 : index
    %c1_24 = arith.constant 1 : index
    %c2_25 = arith.constant 2 : index
    %c0_26 = arith.constant 0 : index
    %15 = vector.load %arg1[%c0_22, %c0_23, %c1_24, %c2_25, %c0_26] : memref<1x1x4x4x33xf32, #tpu.memory_space<vmem>>, vector<1x1x2x2x33xf32>
    %16 = vector.shape_cast %15 : vector<1x1x2x2x33xf32> to vector<2x2x33xf32>
    %17 = vector.shape_cast %16 : vector<2x2x33xf32> to vector<4x33xf32>
    %c0_27 = arith.constant 0 : index
    %c0_28 = arith.constant 0 : index
    %c2_29 = arith.constant 2 : index
    %c0_30 = arith.constant 0 : index
    %c0_31 = arith.constant 0 : index
    %18 = vector.load %arg1[%c0_27, %c0_28, %c2_29, %c0_30, %c0_31] : memref<1x1x4x4x33xf32, #tpu.memory_space<vmem>>, vector<1x1x2x2x33xf32>
    %19 = vector.shape_cast %18 : vector<1x1x2x2x33xf32> to vector<2x2x33xf32>
    %20 = vector.shape_cast %19 : vector<2x2x33xf32> to vector<4x33xf32>
    %c0_32 = arith.constant 0 : index
    %c0_33 = arith.constant 0 : index
    %c2_34 = arith.constant 2 : index
    %c1_35 = arith.constant 1 : index
    %c0_36 = arith.constant 0 : index
    %21 = vector.load %arg1[%c0_32, %c0_33, %c2_34, %c1_35, %c0_36] : memref<1x1x4x4x33xf32, #tpu.memory_space<vmem>>, vector<1x1x2x2x33xf32>
    %22 = vector.shape_cast %21 : vector<1x1x2x2x33xf32> to vector<2x2x33xf32>
    %23 = vector.shape_cast %22 : vector<2x2x33xf32> to vector<4x33xf32>
    %c0_37 = arith.constant 0 : index
    %c0_38 = arith.constant 0 : index
    %c2_39 = arith.constant 2 : index
    %c2_40 = arith.constant 2 : index
    %c0_41 = arith.constant 0 : index
    %24 = vector.load %arg1[%c0_37, %c0_38, %c2_39, %c2_40, %c0_41] : memref<1x1x4x4x33xf32, #tpu.memory_space<vmem>>, vector<1x1x2x2x33xf32>
    %25 = vector.shape_cast %24 : vector<1x1x2x2x33xf32> to vector<2x2x33xf32>
    %26 = vector.shape_cast %25 : vector<2x2x33xf32> to vector<4x33xf32>
    %27 = tpu.concatenate %2, %5, %8, %11, %14, %17, %20, %23, %26 in 1 : vector<4x33xf32>, vector<4x33xf32>, vector<4x33xf32>, vector<4x33xf32>, vector<4x33xf32>, vector<4x33xf32>, vector<4x33xf32>, vector<4x33xf32>, vector<4x33xf32> -> vector<4x297xf32>
    %28 = arith.truncf %27 : vector<4x297xf32> to vector<4x297xbf16>
    %c0_42 = arith.constant 0 : index
    %c0_43 = arith.constant 0 : index
    %29 = vector.load %arg2[%c0_42, %c0_43] : memref<297x32xf32, #tpu.memory_space<vmem>>, vector<297x32xf32>
    %30 = arith.truncf %29 : vector<297x32xf32> to vector<297x32xbf16>
    %cst = arith.constant dense<0.000000e+00> : vector<4x32xf32>
    %31 = tpu.matmul %28, %30, %cst {dimension_numbers = #tpu.dot_dimension_numbers<[1], [0], [0], [1], [0, 0, 1, 1], [], []>} : vector<4x297xbf16>, vector<297x32xbf16>, vector<4x32xf32> -> vector<4x32xf32>
    %c0_44 = arith.constant 0 : index
    %c0_45 = arith.constant 0 : index
    %32 = vector.load %arg3[%c0_44, %c0_45] : memref<297x1xf32, #tpu.memory_space<vmem>>, vector<297x1xf32>
    %33 = arith.truncf %32 : vector<297x1xf32> to vector<297x1xbf16>
    %cst_46 = arith.constant dense<0.000000e+00> : vector<4x1xf32>
    %34 = tpu.matmul %28, %33, %cst_46 {dimension_numbers = #tpu.dot_dimension_numbers<[1], [0], [0], [1], [0, 0, 1, 1], [], []>} : vector<4x297xbf16>, vector<297x1xbf16>, vector<4x1xf32> -> vector<4x1xf32>
    %cst_47 = arith.constant 0.000000e+00 : f32
    %35 = vector.broadcast %cst_47 : f32 to vector<4x1xf32>
    %36 = arith.cmpf ogt, %34, %35 : vector<4x1xf32>
    %37 = arith.extui %36 : vector<4x1xi1> to vector<4x1xi32>
    %38 = arith.sitofp %37 : vector<4x1xi32> to vector<4x1xf32>
    %cst_48 = arith.constant 9.99999993E-9 : f32
    %39 = vector.broadcast %cst_48 : f32 to vector<4x1xf32>
    %40 = arith.addf %34, %39 : vector<4x1xf32>
    %41 = tpu.reciprocal %40 {approx = true} : vector<4x1xf32> -> vector<4x1xf32>
    %cst_49 = arith.constant 9.000000e+00 : f32
    %42 = vector.broadcast %cst_49 : f32 to vector<4x1xf32>
    %43 = arith.mulf %42, %41 : vector<4x1xf32>
    %44 = arith.mulf %43, %38 : vector<4x1xf32>
    %45 = vector.broadcast %44 : vector<4x1xf32> to vector<4x32xf32>
    %46 = arith.mulf %31, %45 : vector<4x32xf32>
    %c0_50 = arith.constant 0 : index
    %c0_51 = arith.constant 0 : index
    %47 = vector.load %arg4[%c0_50, %c0_51] : memref<1x32xf32, #tpu.memory_space<vmem>>, vector<1x32xf32>
    %48 = vector.broadcast %47 : vector<1x32xf32> to vector<4x32xf32>
    %49 = arith.mulf %46, %48 : vector<4x32xf32>
    %c0_52 = arith.constant 0 : index
    %c0_53 = arith.constant 0 : index
    %50 = vector.load %arg5[%c0_52, %c0_53] : memref<1x32xf32, #tpu.memory_space<vmem>>, vector<1x32xf32>
    %51 = vector.broadcast %50 : vector<1x32xf32> to vector<4x32xf32>
    %52 = arith.addf %49, %51 : vector<4x32xf32>
    %cst_54 = arith.constant 0.000000e+00 : f32
    %53 = vector.broadcast %cst_54 : f32 to vector<4x32xf32>
    %54 = arith.maximumf %52, %53 : vector<4x32xf32>
    %55 = vector.shape_cast %54 : vector<4x32xf32> to vector<2x2x32xf32>
    %c0_55 = arith.constant 0 : index
    %c0_56 = arith.constant 0 : index
    %c0_57 = arith.constant 0 : index
    %c0_58 = arith.constant 0 : index
    %56 = vector.load %arg6[%c0_55, %c0_56, %c0_57, %c0_58] : memref<1x2x2x32xf32, #tpu.memory_space<vmem>>, vector<1x2x2x32xf32>
    %57 = vector.shape_cast %56 : vector<1x2x2x32xf32> to vector<2x2x32xf32>
    %58 = vector.shape_cast %55 : vector<2x2x32xf32> to vector<1x2x2x32xf32>
    tpu.vector_store %arg6[%c0_55, %c0_56, %c0_57, %c0_58], %58 {strides = array<i32>} : memref<1x2x2x32xf32, #tpu.memory_space<vmem>>, vector<1x2x2x32xf32>,
    %59 = vector.shape_cast %38 : vector<4x1xf32> to vector<2x2x1xf32>
    %c0_59 = arith.constant 0 : index
    %c0_60 = arith.constant 0 : index
    %c0_61 = arith.constant 0 : index
    %c0_62 = arith.constant 0 : index
    %60 = vector.load %arg7[%c0_59, %c0_60, %c0_61, %c0_62] : memref<1x2x2x1xf32, #tpu.memory_space<vmem>>, vector<1x2x2x1xf32>
    %61 = vector.shape_cast %60 : vector<1x2x2x1xf32> to vector<2x2x1xf32>
    %62 = vector.shape_cast %59 : vector<2x2x1xf32> to vector<1x2x2x1xf32>
    tpu.vector_store %arg7[%c0_59, %c0_60, %c0_61, %c0_62], %62 {strides = array<i32>} : memref<1x2x2x1xf32, #tpu.memory_space<vmem>>, vector<1x2x2x1xf32>,
    return
  }
  func.func @transform_0(%arg0: i32) -> (i32, i32, i32, i32, i32) {
    %c0_i32 = arith.constant 0 : i32
    %c0_i32_0 = arith.constant 0 : i32
    %c0_i32_1 = arith.constant 0 : i32
    %c0_i32_2 = arith.constant 0 : i32
    %c0_i32_3 = arith.constant 0 : i32
    return %arg0, %c0_i32, %c0_i32_0, %c0_i32_1, %c0_i32_2 : i32, i32, i32, i32, i32
  }
  func.func @transform_1(%arg0: i32) -> (i32, i32) {
    %c0_i32 = arith.constant 0 : i32
    %c0_i32_0 = arith.constant 0 : i32
    %c0_i32_1 = arith.constant 0 : i32
    return %c0_i32, %c0_i32_0 : i32, i32
  }
  func.func @transform_2(%arg0: i32) -> (i32, i32) {
    %c0_i32 = arith.constant 0 : i32
    %c0_i32_0 = arith.constant 0 : i32
    %c0_i32_1 = arith.constant 0 : i32
    return %c0_i32, %c0_i32_0 : i32, i32
  }
  func.func @transform_3(%arg0: i32) -> (i32, i32) {
    %c0_i32 = arith.constant 0 : i32
    %c0_i32_0 = arith.constant 0 : i32
    %c0_i32_1 = arith.constant 0 : i32
    return %c0_i32, %c0_i32_0 : i32, i32
  }
  func.func @transform_4(%arg0: i32) -> (i32, i32) {
    %c0_i32 = arith.constant 0 : i32
    %c0_i32_0 = arith.constant 0 : i32
    %c0_i32_1 = arith.constant 0 : i32
    return %c0_i32, %c0_i32_0 : i32, i32
  }
  func.func @transform_5(%arg0: i32) -> (i32, i32, i32, i32) {
    %c0_i32 = arith.constant 0 : i32
    %c0_i32_0 = arith.constant 0 : i32
    %c0_i32_1 = arith.constant 0 : i32
    %c0_i32_2 = arith.constant 0 : i32
    return %arg0, %c0_i32, %c0_i32_0, %c0_i32_1 : i32, i32, i32, i32
  }
  func.func @transform_6(%arg0: i32) -> (i32, i32, i32, i32) {
    %c0_i32 = arith.constant 0 : i32
    %c0_i32_0 = arith.constant 0 : i32
    %c0_i32_1 = arith.constant 0 : i32
    %c0_i32_2 = arith.constant 0 : i32
    return %arg0, %c0_i32, %c0_i32_0, %c0_i32_1 : i32, i32, i32, i32
  }
}

module attributes {stable_mosaic.version = 11 : i64} {
  func.func @_pconv_kernel(%arg0: i32, %arg1: memref<1x1x4x4x65xf32, #tpu.memory_space<vmem>>, %arg2: memref<585x32xf32, #tpu.memory_space<vmem>>, %arg3: memref<585x1xf32, #tpu.memory_space<vmem>>, %arg4: memref<1x32xf32, #tpu.memory_space<vmem>>, %arg5: memref<1x32xf32, #tpu.memory_space<vmem>>, %arg6: memref<1x2x2x32xf32, #tpu.memory_space<vmem>>, %arg7: memref<1x2x2x1xf32, #tpu.memory_space<vmem>>) attributes {dimension_semantics = [#tpu.dimension_semantics<parallel>], iteration_bounds = array<i64: 2>, scalar_prefetch = 0 : i64, scratch_operands = 0 : i64, tpu.core_type = #tpu.core_type<tc>, window_params = [{transform_indices = @transform_0, window_bounds = array<i64: 1, 1, 4, 4, 65>}, {pipeline_mode = #tpu.pipeline_mode<synchronous>, transform_indices = @transform_1, window_bounds = array<i64: 585, 32>}, {pipeline_mode = #tpu.pipeline_mode<synchronous>, transform_indices = @transform_2, window_bounds = array<i64: 585, 1>}, {pipeline_mode = #tpu.pipeline_mode<synchronous>, transform_indices = @transform_3, window_bounds = array<i64: 1, 32>}, {pipeline_mode = #tpu.pipeline_mode<synchronous>, transform_indices = @transform_4, window_bounds = array<i64: 1, 32>}, {transform_indices = @transform_5, window_bounds = array<i64: 1, 2, 2, 32>}, {transform_indices = @transform_6, window_bounds = array<i64: 1, 2, 2, 1>}]} {
    %c0 = arith.constant 0 : index
    %c0_0 = arith.constant 0 : index
    %c0_1 = arith.constant 0 : index
    %c0_2 = arith.constant 0 : index
    %c0_3 = arith.constant 0 : index
    %0 = vector.load %arg1[%c0, %c0_0, %c0_1, %c0_2, %c0_3] : memref<1x1x4x4x65xf32, #tpu.memory_space<vmem>>, vector<1x1x2x2x65xf32>
    %1 = vector.shape_cast %0 : vector<1x1x2x2x65xf32> to vector<2x2x65xf32>
    %2 = vector.shape_cast %1 : vector<2x2x65xf32> to vector<4x65xf32>
    %c0_4 = arith.constant 0 : index
    %c0_5 = arith.constant 0 : index
    %c0_6 = arith.constant 0 : index
    %c1 = arith.constant 1 : index
    %c0_7 = arith.constant 0 : index
    %3 = vector.load %arg1[%c0_4, %c0_5, %c0_6, %c1, %c0_7] : memref<1x1x4x4x65xf32, #tpu.memory_space<vmem>>, vector<1x1x2x2x65xf32>
    %4 = vector.shape_cast %3 : vector<1x1x2x2x65xf32> to vector<2x2x65xf32>
    %5 = vector.shape_cast %4 : vector<2x2x65xf32> to vector<4x65xf32>
    %c0_8 = arith.constant 0 : index
    %c0_9 = arith.constant 0 : index
    %c0_10 = arith.constant 0 : index
    %c2 = arith.constant 2 : index
    %c0_11 = arith.constant 0 : index
    %6 = vector.load %arg1[%c0_8, %c0_9, %c0_10, %c2, %c0_11] : memref<1x1x4x4x65xf32, #tpu.memory_space<vmem>>, vector<1x1x2x2x65xf32>
    %7 = vector.shape_cast %6 : vector<1x1x2x2x65xf32> to vector<2x2x65xf32>
    %8 = vector.shape_cast %7 : vector<2x2x65xf32> to vector<4x65xf32>
    %c0_12 = arith.constant 0 : index
    %c0_13 = arith.constant 0 : index
    %c1_14 = arith.constant 1 : index
    %c0_15 = arith.constant 0 : index
    %c0_16 = arith.constant 0 : index
    %9 = vector.load %arg1[%c0_12, %c0_13, %c1_14, %c0_15, %c0_16] : memref<1x1x4x4x65xf32, #tpu.memory_space<vmem>>, vector<1x1x2x2x65xf32>
    %10 = vector.shape_cast %9 : vector<1x1x2x2x65xf32> to vector<2x2x65xf32>
    %11 = vector.shape_cast %10 : vector<2x2x65xf32> to vector<4x65xf32>
    %c0_17 = arith.constant 0 : index
    %c0_18 = arith.constant 0 : index
    %c1_19 = arith.constant 1 : index
    %c1_20 = arith.constant 1 : index
    %c0_21 = arith.constant 0 : index
    %12 = vector.load %arg1[%c0_17, %c0_18, %c1_19, %c1_20, %c0_21] : memref<1x1x4x4x65xf32, #tpu.memory_space<vmem>>, vector<1x1x2x2x65xf32>
    %13 = vector.shape_cast %12 : vector<1x1x2x2x65xf32> to vector<2x2x65xf32>
    %14 = vector.shape_cast %13 : vector<2x2x65xf32> to vector<4x65xf32>
    %c0_22 = arith.constant 0 : index
    %c0_23 = arith.constant 0 : index
    %c1_24 = arith.constant 1 : index
    %c2_25 = arith.constant 2 : index
    %c0_26 = arith.constant 0 : index
    %15 = vector.load %arg1[%c0_22, %c0_23, %c1_24, %c2_25, %c0_26] : memref<1x1x4x4x65xf32, #tpu.memory_space<vmem>>, vector<1x1x2x2x65xf32>
    %16 = vector.shape_cast %15 : vector<1x1x2x2x65xf32> to vector<2x2x65xf32>
    %17 = vector.shape_cast %16 : vector<2x2x65xf32> to vector<4x65xf32>
    %c0_27 = arith.constant 0 : index
    %c0_28 = arith.constant 0 : index
    %c2_29 = arith.constant 2 : index
    %c0_30 = arith.constant 0 : index
    %c0_31 = arith.constant 0 : index
    %18 = vector.load %arg1[%c0_27, %c0_28, %c2_29, %c0_30, %c0_31] : memref<1x1x4x4x65xf32, #tpu.memory_space<vmem>>, vector<1x1x2x2x65xf32>
    %19 = vector.shape_cast %18 : vector<1x1x2x2x65xf32> to vector<2x2x65xf32>
    %20 = vector.shape_cast %19 : vector<2x2x65xf32> to vector<4x65xf32>
    %c0_32 = arith.constant 0 : index
    %c0_33 = arith.constant 0 : index
    %c2_34 = arith.constant 2 : index
    %c1_35 = arith.constant 1 : index
    %c0_36 = arith.constant 0 : index
    %21 = vector.load %arg1[%c0_32, %c0_33, %c2_34, %c1_35, %c0_36] : memref<1x1x4x4x65xf32, #tpu.memory_space<vmem>>, vector<1x1x2x2x65xf32>
    %22 = vector.shape_cast %21 : vector<1x1x2x2x65xf32> to vector<2x2x65xf32>
    %23 = vector.shape_cast %22 : vector<2x2x65xf32> to vector<4x65xf32>
    %c0_37 = arith.constant 0 : index
    %c0_38 = arith.constant 0 : index
    %c2_39 = arith.constant 2 : index
    %c2_40 = arith.constant 2 : index
    %c0_41 = arith.constant 0 : index
    %24 = vector.load %arg1[%c0_37, %c0_38, %c2_39, %c2_40, %c0_41] : memref<1x1x4x4x65xf32, #tpu.memory_space<vmem>>, vector<1x1x2x2x65xf32>
    %25 = vector.shape_cast %24 : vector<1x1x2x2x65xf32> to vector<2x2x65xf32>
    %26 = vector.shape_cast %25 : vector<2x2x65xf32> to vector<4x65xf32>
    %27 = tpu.concatenate %2, %5, %8, %11, %14, %17, %20, %23, %26 in 1 : vector<4x65xf32>, vector<4x65xf32>, vector<4x65xf32>, vector<4x65xf32>, vector<4x65xf32>, vector<4x65xf32>, vector<4x65xf32>, vector<4x65xf32>, vector<4x65xf32> -> vector<4x585xf32>
    %28 = arith.truncf %27 : vector<4x585xf32> to vector<4x585xbf16>
    %c0_42 = arith.constant 0 : index
    %c0_43 = arith.constant 0 : index
    %29 = vector.load %arg2[%c0_42, %c0_43] : memref<585x32xf32, #tpu.memory_space<vmem>>, vector<585x32xf32>
    %30 = arith.truncf %29 : vector<585x32xf32> to vector<585x32xbf16>
    %cst = arith.constant dense<0.000000e+00> : vector<4x32xf32>
    %31 = tpu.matmul %28, %30, %cst {dimension_numbers = #tpu.dot_dimension_numbers<[1], [0], [0], [1], [0, 0, 1, 1], [], []>} : vector<4x585xbf16>, vector<585x32xbf16>, vector<4x32xf32> -> vector<4x32xf32>
    %c0_44 = arith.constant 0 : index
    %c0_45 = arith.constant 0 : index
    %32 = vector.load %arg3[%c0_44, %c0_45] : memref<585x1xf32, #tpu.memory_space<vmem>>, vector<585x1xf32>
    %33 = arith.truncf %32 : vector<585x1xf32> to vector<585x1xbf16>
    %cst_46 = arith.constant dense<0.000000e+00> : vector<4x1xf32>
    %34 = tpu.matmul %28, %33, %cst_46 {dimension_numbers = #tpu.dot_dimension_numbers<[1], [0], [0], [1], [0, 0, 1, 1], [], []>} : vector<4x585xbf16>, vector<585x1xbf16>, vector<4x1xf32> -> vector<4x1xf32>
    %cst_47 = arith.constant 0.000000e+00 : f32
    %35 = vector.broadcast %cst_47 : f32 to vector<4x1xf32>
    %36 = arith.cmpf ogt, %34, %35 : vector<4x1xf32>
    %37 = arith.extui %36 : vector<4x1xi1> to vector<4x1xi32>
    %38 = arith.sitofp %37 : vector<4x1xi32> to vector<4x1xf32>
    %cst_48 = arith.constant 9.99999993E-9 : f32
    %39 = vector.broadcast %cst_48 : f32 to vector<4x1xf32>
    %40 = arith.addf %34, %39 : vector<4x1xf32>
    %41 = tpu.reciprocal %40 {approx = true} : vector<4x1xf32> -> vector<4x1xf32>
    %cst_49 = arith.constant 9.000000e+00 : f32
    %42 = vector.broadcast %cst_49 : f32 to vector<4x1xf32>
    %43 = arith.mulf %42, %41 : vector<4x1xf32>
    %44 = arith.mulf %43, %38 : vector<4x1xf32>
    %45 = vector.broadcast %44 : vector<4x1xf32> to vector<4x32xf32>
    %46 = arith.mulf %31, %45 : vector<4x32xf32>
    %c0_50 = arith.constant 0 : index
    %c0_51 = arith.constant 0 : index
    %47 = vector.load %arg4[%c0_50, %c0_51] : memref<1x32xf32, #tpu.memory_space<vmem>>, vector<1x32xf32>
    %48 = vector.broadcast %47 : vector<1x32xf32> to vector<4x32xf32>
    %49 = arith.mulf %46, %48 : vector<4x32xf32>
    %c0_52 = arith.constant 0 : index
    %c0_53 = arith.constant 0 : index
    %50 = vector.load %arg5[%c0_52, %c0_53] : memref<1x32xf32, #tpu.memory_space<vmem>>, vector<1x32xf32>
    %51 = vector.broadcast %50 : vector<1x32xf32> to vector<4x32xf32>
    %52 = arith.addf %49, %51 : vector<4x32xf32>
    %cst_54 = arith.constant 0.000000e+00 : f32
    %53 = vector.broadcast %cst_54 : f32 to vector<4x32xf32>
    %54 = arith.maximumf %52, %53 : vector<4x32xf32>
    %55 = vector.shape_cast %54 : vector<4x32xf32> to vector<2x2x32xf32>
    %c0_55 = arith.constant 0 : index
    %c0_56 = arith.constant 0 : index
    %c0_57 = arith.constant 0 : index
    %c0_58 = arith.constant 0 : index
    %56 = vector.load %arg6[%c0_55, %c0_56, %c0_57, %c0_58] : memref<1x2x2x32xf32, #tpu.memory_space<vmem>>, vector<1x2x2x32xf32>
    %57 = vector.shape_cast %56 : vector<1x2x2x32xf32> to vector<2x2x32xf32>
    %58 = vector.shape_cast %55 : vector<2x2x32xf32> to vector<1x2x2x32xf32>
    tpu.vector_store %arg6[%c0_55, %c0_56, %c0_57, %c0_58], %58 {strides = array<i32>} : memref<1x2x2x32xf32, #tpu.memory_space<vmem>>, vector<1x2x2x32xf32>,
    %59 = vector.shape_cast %38 : vector<4x1xf32> to vector<2x2x1xf32>
    %c0_59 = arith.constant 0 : index
    %c0_60 = arith.constant 0 : index
    %c0_61 = arith.constant 0 : index
    %c0_62 = arith.constant 0 : index
    %60 = vector.load %arg7[%c0_59, %c0_60, %c0_61, %c0_62] : memref<1x2x2x1xf32, #tpu.memory_space<vmem>>, vector<1x2x2x1xf32>
    %61 = vector.shape_cast %60 : vector<1x2x2x1xf32> to vector<2x2x1xf32>
    %62 = vector.shape_cast %59 : vector<2x2x1xf32> to vector<1x2x2x1xf32>
    tpu.vector_store %arg7[%c0_59, %c0_60, %c0_61, %c0_62], %62 {strides = array<i32>} : memref<1x2x2x1xf32, #tpu.memory_space<vmem>>, vector<1x2x2x1xf32>,
    return
  }
  func.func @transform_0(%arg0: i32) -> (i32, i32, i32, i32, i32) {
    %c0_i32 = arith.constant 0 : i32
    %c0_i32_0 = arith.constant 0 : i32
    %c0_i32_1 = arith.constant 0 : i32
    %c0_i32_2 = arith.constant 0 : i32
    %c0_i32_3 = arith.constant 0 : i32
    return %arg0, %c0_i32, %c0_i32_0, %c0_i32_1, %c0_i32_2 : i32, i32, i32, i32, i32
  }
  func.func @transform_1(%arg0: i32) -> (i32, i32) {
    %c0_i32 = arith.constant 0 : i32
    %c0_i32_0 = arith.constant 0 : i32
    %c0_i32_1 = arith.constant 0 : i32
    return %c0_i32, %c0_i32_0 : i32, i32
  }
  func.func @transform_2(%arg0: i32) -> (i32, i32) {
    %c0_i32 = arith.constant 0 : i32
    %c0_i32_0 = arith.constant 0 : i32
    %c0_i32_1 = arith.constant 0 : i32
    return %c0_i32, %c0_i32_0 : i32, i32
  }
  func.func @transform_3(%arg0: i32) -> (i32, i32) {
    %c0_i32 = arith.constant 0 : i32
    %c0_i32_0 = arith.constant 0 : i32
    %c0_i32_1 = arith.constant 0 : i32
    return %c0_i32, %c0_i32_0 : i32, i32
  }
  func.func @transform_4(%arg0: i32) -> (i32, i32) {
    %c0_i32 = arith.constant 0 : i32
    %c0_i32_0 = arith.constant 0 : i32
    %c0_i32_1 = arith.constant 0 : i32
    return %c0_i32, %c0_i32_0 : i32, i32
  }
  func.func @transform_5(%arg0: i32) -> (i32, i32, i32, i32) {
    %c0_i32 = arith.constant 0 : i32
    %c0_i32_0 = arith.constant 0 : i32
    %c0_i32_1 = arith.constant 0 : i32
    %c0_i32_2 = arith.constant 0 : i32
    return %arg0, %c0_i32, %c0_i32_0, %c0_i32_1 : i32, i32, i32, i32
  }
  func.func @transform_6(%arg0: i32) -> (i32, i32, i32, i32) {
    %c0_i32 = arith.constant 0 : i32
    %c0_i32_0 = arith.constant 0 : i32
    %c0_i32_1 = arith.constant 0 : i32
    %c0_i32_2 = arith.constant 0 : i32
    return %arg0, %c0_i32, %c0_i32_0, %c0_i32_1 : i32, i32, i32, i32
  }
}

module attributes {stable_mosaic.version = 11 : i64} {
  func.func @_conv_bn_kernel(%arg0: i32, %arg1: memref<1x4x4x64xf32, #tpu.memory_space<vmem>>, %arg2: memref<576x32xf32, #tpu.memory_space<vmem>>, %arg3: memref<1x32xf32, #tpu.memory_space<vmem>>, %arg4: memref<1x32xf32, #tpu.memory_space<vmem>>, %arg5: memref<1x2x2x32xf32, #tpu.memory_space<vmem>>) attributes {dimension_semantics = [#tpu.dimension_semantics<parallel>], iteration_bounds = array<i64: 2>, scalar_prefetch = 0 : i64, scratch_operands = 0 : i64, tpu.core_type = #tpu.core_type<tc>, window_params = [{transform_indices = @transform_0, window_bounds = array<i64: 1, 4, 4, 64>}, {pipeline_mode = #tpu.pipeline_mode<synchronous>, transform_indices = @transform_1, window_bounds = array<i64: 576, 32>}, {pipeline_mode = #tpu.pipeline_mode<synchronous>, transform_indices = @transform_2, window_bounds = array<i64: 1, 32>}, {pipeline_mode = #tpu.pipeline_mode<synchronous>, transform_indices = @transform_3, window_bounds = array<i64: 1, 32>}, {transform_indices = @transform_4, window_bounds = array<i64: 1, 2, 2, 32>}]} {
    %c0 = arith.constant 0 : index
    %c0_0 = arith.constant 0 : index
    %c0_1 = arith.constant 0 : index
    %c0_2 = arith.constant 0 : index
    %0 = vector.load %arg1[%c0, %c0_0, %c0_1, %c0_2] : memref<1x4x4x64xf32, #tpu.memory_space<vmem>>, vector<1x2x2x64xf32>
    %1 = vector.shape_cast %0 : vector<1x2x2x64xf32> to vector<2x2x64xf32>
    %2 = vector.shape_cast %1 : vector<2x2x64xf32> to vector<4x64xf32>
    %c0_3 = arith.constant 0 : index
    %c0_4 = arith.constant 0 : index
    %c1 = arith.constant 1 : index
    %c0_5 = arith.constant 0 : index
    %3 = vector.load %arg1[%c0_3, %c0_4, %c1, %c0_5] : memref<1x4x4x64xf32, #tpu.memory_space<vmem>>, vector<1x2x2x64xf32>
    %4 = vector.shape_cast %3 : vector<1x2x2x64xf32> to vector<2x2x64xf32>
    %5 = vector.shape_cast %4 : vector<2x2x64xf32> to vector<4x64xf32>
    %c0_6 = arith.constant 0 : index
    %c0_7 = arith.constant 0 : index
    %c2 = arith.constant 2 : index
    %c0_8 = arith.constant 0 : index
    %6 = vector.load %arg1[%c0_6, %c0_7, %c2, %c0_8] : memref<1x4x4x64xf32, #tpu.memory_space<vmem>>, vector<1x2x2x64xf32>
    %7 = vector.shape_cast %6 : vector<1x2x2x64xf32> to vector<2x2x64xf32>
    %8 = vector.shape_cast %7 : vector<2x2x64xf32> to vector<4x64xf32>
    %c0_9 = arith.constant 0 : index
    %c1_10 = arith.constant 1 : index
    %c0_11 = arith.constant 0 : index
    %c0_12 = arith.constant 0 : index
    %9 = vector.load %arg1[%c0_9, %c1_10, %c0_11, %c0_12] : memref<1x4x4x64xf32, #tpu.memory_space<vmem>>, vector<1x2x2x64xf32>
    %10 = vector.shape_cast %9 : vector<1x2x2x64xf32> to vector<2x2x64xf32>
    %11 = vector.shape_cast %10 : vector<2x2x64xf32> to vector<4x64xf32>
    %c0_13 = arith.constant 0 : index
    %c1_14 = arith.constant 1 : index
    %c1_15 = arith.constant 1 : index
    %c0_16 = arith.constant 0 : index
    %12 = vector.load %arg1[%c0_13, %c1_14, %c1_15, %c0_16] : memref<1x4x4x64xf32, #tpu.memory_space<vmem>>, vector<1x2x2x64xf32>
    %13 = vector.shape_cast %12 : vector<1x2x2x64xf32> to vector<2x2x64xf32>
    %14 = vector.shape_cast %13 : vector<2x2x64xf32> to vector<4x64xf32>
    %c0_17 = arith.constant 0 : index
    %c1_18 = arith.constant 1 : index
    %c2_19 = arith.constant 2 : index
    %c0_20 = arith.constant 0 : index
    %15 = vector.load %arg1[%c0_17, %c1_18, %c2_19, %c0_20] : memref<1x4x4x64xf32, #tpu.memory_space<vmem>>, vector<1x2x2x64xf32>
    %16 = vector.shape_cast %15 : vector<1x2x2x64xf32> to vector<2x2x64xf32>
    %17 = vector.shape_cast %16 : vector<2x2x64xf32> to vector<4x64xf32>
    %c0_21 = arith.constant 0 : index
    %c2_22 = arith.constant 2 : index
    %c0_23 = arith.constant 0 : index
    %c0_24 = arith.constant 0 : index
    %18 = vector.load %arg1[%c0_21, %c2_22, %c0_23, %c0_24] : memref<1x4x4x64xf32, #tpu.memory_space<vmem>>, vector<1x2x2x64xf32>
    %19 = vector.shape_cast %18 : vector<1x2x2x64xf32> to vector<2x2x64xf32>
    %20 = vector.shape_cast %19 : vector<2x2x64xf32> to vector<4x64xf32>
    %c0_25 = arith.constant 0 : index
    %c2_26 = arith.constant 2 : index
    %c1_27 = arith.constant 1 : index
    %c0_28 = arith.constant 0 : index
    %21 = vector.load %arg1[%c0_25, %c2_26, %c1_27, %c0_28] : memref<1x4x4x64xf32, #tpu.memory_space<vmem>>, vector<1x2x2x64xf32>
    %22 = vector.shape_cast %21 : vector<1x2x2x64xf32> to vector<2x2x64xf32>
    %23 = vector.shape_cast %22 : vector<2x2x64xf32> to vector<4x64xf32>
    %c0_29 = arith.constant 0 : index
    %c2_30 = arith.constant 2 : index
    %c2_31 = arith.constant 2 : index
    %c0_32 = arith.constant 0 : index
    %24 = vector.load %arg1[%c0_29, %c2_30, %c2_31, %c0_32] : memref<1x4x4x64xf32, #tpu.memory_space<vmem>>, vector<1x2x2x64xf32>
    %25 = vector.shape_cast %24 : vector<1x2x2x64xf32> to vector<2x2x64xf32>
    %26 = vector.shape_cast %25 : vector<2x2x64xf32> to vector<4x64xf32>
    %27 = tpu.concatenate %2, %5, %8, %11, %14, %17, %20, %23, %26 in 1 : vector<4x64xf32>, vector<4x64xf32>, vector<4x64xf32>, vector<4x64xf32>, vector<4x64xf32>, vector<4x64xf32>, vector<4x64xf32>, vector<4x64xf32>, vector<4x64xf32> -> vector<4x576xf32>
    %cst = arith.constant 0.000000e+00 : f32
    %28 = vector.broadcast %cst : f32 to vector<4x576xf32>
    %29 = arith.maximumf %27, %28 : vector<4x576xf32>
    %30 = arith.truncf %29 : vector<4x576xf32> to vector<4x576xbf16>
    %c0_33 = arith.constant 0 : index
    %c0_34 = arith.constant 0 : index
    %31 = vector.load %arg2[%c0_33, %c0_34] : memref<576x32xf32, #tpu.memory_space<vmem>>, vector<576x32xf32>
    %32 = arith.truncf %31 : vector<576x32xf32> to vector<576x32xbf16>
    %cst_35 = arith.constant dense<0.000000e+00> : vector<4x32xf32>
    %33 = tpu.matmul %30, %32, %cst_35 {dimension_numbers = #tpu.dot_dimension_numbers<[1], [0], [0], [1], [0, 0, 1, 1], [], []>} : vector<4x576xbf16>, vector<576x32xbf16>, vector<4x32xf32> -> vector<4x32xf32>
    %c0_36 = arith.constant 0 : index
    %c0_37 = arith.constant 0 : index
    %34 = vector.load %arg3[%c0_36, %c0_37] : memref<1x32xf32, #tpu.memory_space<vmem>>, vector<1x32xf32>
    %35 = vector.broadcast %34 : vector<1x32xf32> to vector<4x32xf32>
    %36 = arith.mulf %33, %35 : vector<4x32xf32>
    %c0_38 = arith.constant 0 : index
    %c0_39 = arith.constant 0 : index
    %37 = vector.load %arg4[%c0_38, %c0_39] : memref<1x32xf32, #tpu.memory_space<vmem>>, vector<1x32xf32>
    %38 = vector.broadcast %37 : vector<1x32xf32> to vector<4x32xf32>
    %39 = arith.addf %36, %38 : vector<4x32xf32>
    %40 = vector.shape_cast %39 : vector<4x32xf32> to vector<2x2x32xf32>
    %c0_40 = arith.constant 0 : index
    %c0_41 = arith.constant 0 : index
    %c0_42 = arith.constant 0 : index
    %c0_43 = arith.constant 0 : index
    %41 = vector.load %arg5[%c0_40, %c0_41, %c0_42, %c0_43] : memref<1x2x2x32xf32, #tpu.memory_space<vmem>>, vector<1x2x2x32xf32>
    %42 = vector.shape_cast %41 : vector<1x2x2x32xf32> to vector<2x2x32xf32>
    %43 = vector.shape_cast %40 : vector<2x2x32xf32> to vector<1x2x2x32xf32>
    tpu.vector_store %arg5[%c0_40, %c0_41, %c0_42, %c0_43], %43 {strides = array<i32>} : memref<1x2x2x32xf32, #tpu.memory_space<vmem>>, vector<1x2x2x32xf32>,
    return
  }
  func.func @transform_0(%arg0: i32) -> (i32, i32, i32, i32) {
    %c0_i32 = arith.constant 0 : i32
    %c0_i32_0 = arith.constant 0 : i32
    %c0_i32_1 = arith.constant 0 : i32
    %c0_i32_2 = arith.constant 0 : i32
    return %arg0, %c0_i32, %c0_i32_0, %c0_i32_1 : i32, i32, i32, i32
  }
  func.func @transform_1(%arg0: i32) -> (i32, i32) {
    %c0_i32 = arith.constant 0 : i32
    %c0_i32_0 = arith.constant 0 : i32
    %c0_i32_1 = arith.constant 0 : i32
    return %c0_i32, %c0_i32_0 : i32, i32
  }
  func.func @transform_2(%arg0: i32) -> (i32, i32) {
    %c0_i32 = arith.constant 0 : i32
    %c0_i32_0 = arith.constant 0 : i32
    %c0_i32_1 = arith.constant 0 : i32
    return %c0_i32, %c0_i32_0 : i32, i32
  }
  func.func @transform_3(%arg0: i32) -> (i32, i32) {
    %c0_i32 = arith.constant 0 : i32
    %c0_i32_0 = arith.constant 0 : i32
    %c0_i32_1 = arith.constant 0 : i32
    return %c0_i32, %c0_i32_0 : i32, i32
  }
  func.func @transform_4(%arg0: i32) -> (i32, i32, i32, i32) {
    %c0_i32 = arith.constant 0 : i32
    %c0_i32_0 = arith.constant 0 : i32
    %c0_i32_1 = arith.constant 0 : i32
    %c0_i32_2 = arith.constant 0 : i32
    return %arg0, %c0_i32, %c0_i32_0, %c0_i32_1 : i32, i32, i32, i32
  }
}

module attributes {stable_mosaic.version = 11 : i64} {
  func.func @_pconv_kernel(%arg0: i32, %arg1: memref<1x1x4x4x65xf32, #tpu.memory_space<vmem>>, %arg2: memref<585x16xf32, #tpu.memory_space<vmem>>, %arg3: memref<585x1xf32, #tpu.memory_space<vmem>>, %arg4: memref<1x16xf32, #tpu.memory_space<vmem>>, %arg5: memref<1x16xf32, #tpu.memory_space<vmem>>, %arg6: memref<1x2x2x16xf32, #tpu.memory_space<vmem>>, %arg7: memref<1x2x2x1xf32, #tpu.memory_space<vmem>>) attributes {dimension_semantics = [#tpu.dimension_semantics<parallel>], iteration_bounds = array<i64: 2>, scalar_prefetch = 0 : i64, scratch_operands = 0 : i64, tpu.core_type = #tpu.core_type<tc>, window_params = [{transform_indices = @transform_0, window_bounds = array<i64: 1, 1, 4, 4, 65>}, {pipeline_mode = #tpu.pipeline_mode<synchronous>, transform_indices = @transform_1, window_bounds = array<i64: 585, 16>}, {pipeline_mode = #tpu.pipeline_mode<synchronous>, transform_indices = @transform_2, window_bounds = array<i64: 585, 1>}, {pipeline_mode = #tpu.pipeline_mode<synchronous>, transform_indices = @transform_3, window_bounds = array<i64: 1, 16>}, {pipeline_mode = #tpu.pipeline_mode<synchronous>, transform_indices = @transform_4, window_bounds = array<i64: 1, 16>}, {transform_indices = @transform_5, window_bounds = array<i64: 1, 2, 2, 16>}, {transform_indices = @transform_6, window_bounds = array<i64: 1, 2, 2, 1>}]} {
    %c0 = arith.constant 0 : index
    %c0_0 = arith.constant 0 : index
    %c0_1 = arith.constant 0 : index
    %c0_2 = arith.constant 0 : index
    %c0_3 = arith.constant 0 : index
    %0 = vector.load %arg1[%c0, %c0_0, %c0_1, %c0_2, %c0_3] : memref<1x1x4x4x65xf32, #tpu.memory_space<vmem>>, vector<1x1x2x2x65xf32>
    %1 = vector.shape_cast %0 : vector<1x1x2x2x65xf32> to vector<2x2x65xf32>
    %2 = vector.shape_cast %1 : vector<2x2x65xf32> to vector<4x65xf32>
    %c0_4 = arith.constant 0 : index
    %c0_5 = arith.constant 0 : index
    %c0_6 = arith.constant 0 : index
    %c1 = arith.constant 1 : index
    %c0_7 = arith.constant 0 : index
    %3 = vector.load %arg1[%c0_4, %c0_5, %c0_6, %c1, %c0_7] : memref<1x1x4x4x65xf32, #tpu.memory_space<vmem>>, vector<1x1x2x2x65xf32>
    %4 = vector.shape_cast %3 : vector<1x1x2x2x65xf32> to vector<2x2x65xf32>
    %5 = vector.shape_cast %4 : vector<2x2x65xf32> to vector<4x65xf32>
    %c0_8 = arith.constant 0 : index
    %c0_9 = arith.constant 0 : index
    %c0_10 = arith.constant 0 : index
    %c2 = arith.constant 2 : index
    %c0_11 = arith.constant 0 : index
    %6 = vector.load %arg1[%c0_8, %c0_9, %c0_10, %c2, %c0_11] : memref<1x1x4x4x65xf32, #tpu.memory_space<vmem>>, vector<1x1x2x2x65xf32>
    %7 = vector.shape_cast %6 : vector<1x1x2x2x65xf32> to vector<2x2x65xf32>
    %8 = vector.shape_cast %7 : vector<2x2x65xf32> to vector<4x65xf32>
    %c0_12 = arith.constant 0 : index
    %c0_13 = arith.constant 0 : index
    %c1_14 = arith.constant 1 : index
    %c0_15 = arith.constant 0 : index
    %c0_16 = arith.constant 0 : index
    %9 = vector.load %arg1[%c0_12, %c0_13, %c1_14, %c0_15, %c0_16] : memref<1x1x4x4x65xf32, #tpu.memory_space<vmem>>, vector<1x1x2x2x65xf32>
    %10 = vector.shape_cast %9 : vector<1x1x2x2x65xf32> to vector<2x2x65xf32>
    %11 = vector.shape_cast %10 : vector<2x2x65xf32> to vector<4x65xf32>
    %c0_17 = arith.constant 0 : index
    %c0_18 = arith.constant 0 : index
    %c1_19 = arith.constant 1 : index
    %c1_20 = arith.constant 1 : index
    %c0_21 = arith.constant 0 : index
    %12 = vector.load %arg1[%c0_17, %c0_18, %c1_19, %c1_20, %c0_21] : memref<1x1x4x4x65xf32, #tpu.memory_space<vmem>>, vector<1x1x2x2x65xf32>
    %13 = vector.shape_cast %12 : vector<1x1x2x2x65xf32> to vector<2x2x65xf32>
    %14 = vector.shape_cast %13 : vector<2x2x65xf32> to vector<4x65xf32>
    %c0_22 = arith.constant 0 : index
    %c0_23 = arith.constant 0 : index
    %c1_24 = arith.constant 1 : index
    %c2_25 = arith.constant 2 : index
    %c0_26 = arith.constant 0 : index
    %15 = vector.load %arg1[%c0_22, %c0_23, %c1_24, %c2_25, %c0_26] : memref<1x1x4x4x65xf32, #tpu.memory_space<vmem>>, vector<1x1x2x2x65xf32>
    %16 = vector.shape_cast %15 : vector<1x1x2x2x65xf32> to vector<2x2x65xf32>
    %17 = vector.shape_cast %16 : vector<2x2x65xf32> to vector<4x65xf32>
    %c0_27 = arith.constant 0 : index
    %c0_28 = arith.constant 0 : index
    %c2_29 = arith.constant 2 : index
    %c0_30 = arith.constant 0 : index
    %c0_31 = arith.constant 0 : index
    %18 = vector.load %arg1[%c0_27, %c0_28, %c2_29, %c0_30, %c0_31] : memref<1x1x4x4x65xf32, #tpu.memory_space<vmem>>, vector<1x1x2x2x65xf32>
    %19 = vector.shape_cast %18 : vector<1x1x2x2x65xf32> to vector<2x2x65xf32>
    %20 = vector.shape_cast %19 : vector<2x2x65xf32> to vector<4x65xf32>
    %c0_32 = arith.constant 0 : index
    %c0_33 = arith.constant 0 : index
    %c2_34 = arith.constant 2 : index
    %c1_35 = arith.constant 1 : index
    %c0_36 = arith.constant 0 : index
    %21 = vector.load %arg1[%c0_32, %c0_33, %c2_34, %c1_35, %c0_36] : memref<1x1x4x4x65xf32, #tpu.memory_space<vmem>>, vector<1x1x2x2x65xf32>
    %22 = vector.shape_cast %21 : vector<1x1x2x2x65xf32> to vector<2x2x65xf32>
    %23 = vector.shape_cast %22 : vector<2x2x65xf32> to vector<4x65xf32>
    %c0_37 = arith.constant 0 : index
    %c0_38 = arith.constant 0 : index
    %c2_39 = arith.constant 2 : index
    %c2_40 = arith.constant 2 : index
    %c0_41 = arith.constant 0 : index
    %24 = vector.load %arg1[%c0_37, %c0_38, %c2_39, %c2_40, %c0_41] : memref<1x1x4x4x65xf32, #tpu.memory_space<vmem>>, vector<1x1x2x2x65xf32>
    %25 = vector.shape_cast %24 : vector<1x1x2x2x65xf32> to vector<2x2x65xf32>
    %26 = vector.shape_cast %25 : vector<2x2x65xf32> to vector<4x65xf32>
    %27 = tpu.concatenate %2, %5, %8, %11, %14, %17, %20, %23, %26 in 1 : vector<4x65xf32>, vector<4x65xf32>, vector<4x65xf32>, vector<4x65xf32>, vector<4x65xf32>, vector<4x65xf32>, vector<4x65xf32>, vector<4x65xf32>, vector<4x65xf32> -> vector<4x585xf32>
    %28 = arith.truncf %27 : vector<4x585xf32> to vector<4x585xbf16>
    %c0_42 = arith.constant 0 : index
    %c0_43 = arith.constant 0 : index
    %29 = vector.load %arg2[%c0_42, %c0_43] : memref<585x16xf32, #tpu.memory_space<vmem>>, vector<585x16xf32>
    %30 = arith.truncf %29 : vector<585x16xf32> to vector<585x16xbf16>
    %cst = arith.constant dense<0.000000e+00> : vector<4x16xf32>
    %31 = tpu.matmul %28, %30, %cst {dimension_numbers = #tpu.dot_dimension_numbers<[1], [0], [0], [1], [0, 0, 1, 1], [], []>} : vector<4x585xbf16>, vector<585x16xbf16>, vector<4x16xf32> -> vector<4x16xf32>
    %c0_44 = arith.constant 0 : index
    %c0_45 = arith.constant 0 : index
    %32 = vector.load %arg3[%c0_44, %c0_45] : memref<585x1xf32, #tpu.memory_space<vmem>>, vector<585x1xf32>
    %33 = arith.truncf %32 : vector<585x1xf32> to vector<585x1xbf16>
    %cst_46 = arith.constant dense<0.000000e+00> : vector<4x1xf32>
    %34 = tpu.matmul %28, %33, %cst_46 {dimension_numbers = #tpu.dot_dimension_numbers<[1], [0], [0], [1], [0, 0, 1, 1], [], []>} : vector<4x585xbf16>, vector<585x1xbf16>, vector<4x1xf32> -> vector<4x1xf32>
    %cst_47 = arith.constant 0.000000e+00 : f32
    %35 = vector.broadcast %cst_47 : f32 to vector<4x1xf32>
    %36 = arith.cmpf ogt, %34, %35 : vector<4x1xf32>
    %37 = arith.extui %36 : vector<4x1xi1> to vector<4x1xi32>
    %38 = arith.sitofp %37 : vector<4x1xi32> to vector<4x1xf32>
    %cst_48 = arith.constant 9.99999993E-9 : f32
    %39 = vector.broadcast %cst_48 : f32 to vector<4x1xf32>
    %40 = arith.addf %34, %39 : vector<4x1xf32>
    %41 = tpu.reciprocal %40 {approx = true} : vector<4x1xf32> -> vector<4x1xf32>
    %cst_49 = arith.constant 9.000000e+00 : f32
    %42 = vector.broadcast %cst_49 : f32 to vector<4x1xf32>
    %43 = arith.mulf %42, %41 : vector<4x1xf32>
    %44 = arith.mulf %43, %38 : vector<4x1xf32>
    %45 = vector.broadcast %44 : vector<4x1xf32> to vector<4x16xf32>
    %46 = arith.mulf %31, %45 : vector<4x16xf32>
    %c0_50 = arith.constant 0 : index
    %c0_51 = arith.constant 0 : index
    %47 = vector.load %arg4[%c0_50, %c0_51] : memref<1x16xf32, #tpu.memory_space<vmem>>, vector<1x16xf32>
    %48 = vector.broadcast %47 : vector<1x16xf32> to vector<4x16xf32>
    %49 = arith.mulf %46, %48 : vector<4x16xf32>
    %c0_52 = arith.constant 0 : index
    %c0_53 = arith.constant 0 : index
    %50 = vector.load %arg5[%c0_52, %c0_53] : memref<1x16xf32, #tpu.memory_space<vmem>>, vector<1x16xf32>
    %51 = vector.broadcast %50 : vector<1x16xf32> to vector<4x16xf32>
    %52 = arith.addf %49, %51 : vector<4x16xf32>
    %cst_54 = arith.constant 0.000000e+00 : f32
    %53 = vector.broadcast %cst_54 : f32 to vector<4x16xf32>
    %54 = arith.maximumf %52, %53 : vector<4x16xf32>
    %55 = vector.shape_cast %54 : vector<4x16xf32> to vector<2x2x16xf32>
    %c0_55 = arith.constant 0 : index
    %c0_56 = arith.constant 0 : index
    %c0_57 = arith.constant 0 : index
    %c0_58 = arith.constant 0 : index
    %56 = vector.load %arg6[%c0_55, %c0_56, %c0_57, %c0_58] : memref<1x2x2x16xf32, #tpu.memory_space<vmem>>, vector<1x2x2x16xf32>
    %57 = vector.shape_cast %56 : vector<1x2x2x16xf32> to vector<2x2x16xf32>
    %58 = vector.shape_cast %55 : vector<2x2x16xf32> to vector<1x2x2x16xf32>
    tpu.vector_store %arg6[%c0_55, %c0_56, %c0_57, %c0_58], %58 {strides = array<i32>} : memref<1x2x2x16xf32, #tpu.memory_space<vmem>>, vector<1x2x2x16xf32>,
    %59 = vector.shape_cast %38 : vector<4x1xf32> to vector<2x2x1xf32>
    %c0_59 = arith.constant 0 : index
    %c0_60 = arith.constant 0 : index
    %c0_61 = arith.constant 0 : index
    %c0_62 = arith.constant 0 : index
    %60 = vector.load %arg7[%c0_59, %c0_60, %c0_61, %c0_62] : memref<1x2x2x1xf32, #tpu.memory_space<vmem>>, vector<1x2x2x1xf32>
    %61 = vector.shape_cast %60 : vector<1x2x2x1xf32> to vector<2x2x1xf32>
    %62 = vector.shape_cast %59 : vector<2x2x1xf32> to vector<1x2x2x1xf32>
    tpu.vector_store %arg7[%c0_59, %c0_60, %c0_61, %c0_62], %62 {strides = array<i32>} : memref<1x2x2x1xf32, #tpu.memory_space<vmem>>, vector<1x2x2x1xf32>,
    return
  }
  func.func @transform_0(%arg0: i32) -> (i32, i32, i32, i32, i32) {
    %c0_i32 = arith.constant 0 : i32
    %c0_i32_0 = arith.constant 0 : i32
    %c0_i32_1 = arith.constant 0 : i32
    %c0_i32_2 = arith.constant 0 : i32
    %c0_i32_3 = arith.constant 0 : i32
    return %arg0, %c0_i32, %c0_i32_0, %c0_i32_1, %c0_i32_2 : i32, i32, i32, i32, i32
  }
  func.func @transform_1(%arg0: i32) -> (i32, i32) {
    %c0_i32 = arith.constant 0 : i32
    %c0_i32_0 = arith.constant 0 : i32
    %c0_i32_1 = arith.constant 0 : i32
    return %c0_i32, %c0_i32_0 : i32, i32
  }
  func.func @transform_2(%arg0: i32) -> (i32, i32) {
    %c0_i32 = arith.constant 0 : i32
    %c0_i32_0 = arith.constant 0 : i32
    %c0_i32_1 = arith.constant 0 : i32
    return %c0_i32, %c0_i32_0 : i32, i32
  }
  func.func @transform_3(%arg0: i32) -> (i32, i32) {
    %c0_i32 = arith.constant 0 : i32
    %c0_i32_0 = arith.constant 0 : i32
    %c0_i32_1 = arith.constant 0 : i32
    return %c0_i32, %c0_i32_0 : i32, i32
  }
  func.func @transform_4(%arg0: i32) -> (i32, i32) {
    %c0_i32 = arith.constant 0 : i32
    %c0_i32_0 = arith.constant 0 : i32
    %c0_i32_1 = arith.constant 0 : i32
    return %c0_i32, %c0_i32_0 : i32, i32
  }
  func.func @transform_5(%arg0: i32) -> (i32, i32, i32, i32) {
    %c0_i32 = arith.constant 0 : i32
    %c0_i32_0 = arith.constant 0 : i32
    %c0_i32_1 = arith.constant 0 : i32
    %c0_i32_2 = arith.constant 0 : i32
    return %arg0, %c0_i32, %c0_i32_0, %c0_i32_1 : i32, i32, i32, i32
  }
  func.func @transform_6(%arg0: i32) -> (i32, i32, i32, i32) {
    %c0_i32 = arith.constant 0 : i32
    %c0_i32_0 = arith.constant 0 : i32
    %c0_i32_1 = arith.constant 0 : i32
    %c0_i32_2 = arith.constant 0 : i32
    return %arg0, %c0_i32, %c0_i32_0, %c0_i32_1 : i32, i32, i32, i32
  }
}

module attributes {stable_mosaic.version = 11 : i64} {
  func.func @_conv_bn_kernel(%arg0: i32, %arg1: memref<1x4x4x64xf32, #tpu.memory_space<vmem>>, %arg2: memref<576x16xf32, #tpu.memory_space<vmem>>, %arg3: memref<1x16xf32, #tpu.memory_space<vmem>>, %arg4: memref<1x16xf32, #tpu.memory_space<vmem>>, %arg5: memref<1x2x2x16xf32, #tpu.memory_space<vmem>>) attributes {dimension_semantics = [#tpu.dimension_semantics<parallel>], iteration_bounds = array<i64: 2>, scalar_prefetch = 0 : i64, scratch_operands = 0 : i64, tpu.core_type = #tpu.core_type<tc>, window_params = [{transform_indices = @transform_0, window_bounds = array<i64: 1, 4, 4, 64>}, {pipeline_mode = #tpu.pipeline_mode<synchronous>, transform_indices = @transform_1, window_bounds = array<i64: 576, 16>}, {pipeline_mode = #tpu.pipeline_mode<synchronous>, transform_indices = @transform_2, window_bounds = array<i64: 1, 16>}, {pipeline_mode = #tpu.pipeline_mode<synchronous>, transform_indices = @transform_3, window_bounds = array<i64: 1, 16>}, {transform_indices = @transform_4, window_bounds = array<i64: 1, 2, 2, 16>}]} {
    %c0 = arith.constant 0 : index
    %c0_0 = arith.constant 0 : index
    %c0_1 = arith.constant 0 : index
    %c0_2 = arith.constant 0 : index
    %0 = vector.load %arg1[%c0, %c0_0, %c0_1, %c0_2] : memref<1x4x4x64xf32, #tpu.memory_space<vmem>>, vector<1x2x2x64xf32>
    %1 = vector.shape_cast %0 : vector<1x2x2x64xf32> to vector<2x2x64xf32>
    %2 = vector.shape_cast %1 : vector<2x2x64xf32> to vector<4x64xf32>
    %c0_3 = arith.constant 0 : index
    %c0_4 = arith.constant 0 : index
    %c1 = arith.constant 1 : index
    %c0_5 = arith.constant 0 : index
    %3 = vector.load %arg1[%c0_3, %c0_4, %c1, %c0_5] : memref<1x4x4x64xf32, #tpu.memory_space<vmem>>, vector<1x2x2x64xf32>
    %4 = vector.shape_cast %3 : vector<1x2x2x64xf32> to vector<2x2x64xf32>
    %5 = vector.shape_cast %4 : vector<2x2x64xf32> to vector<4x64xf32>
    %c0_6 = arith.constant 0 : index
    %c0_7 = arith.constant 0 : index
    %c2 = arith.constant 2 : index
    %c0_8 = arith.constant 0 : index
    %6 = vector.load %arg1[%c0_6, %c0_7, %c2, %c0_8] : memref<1x4x4x64xf32, #tpu.memory_space<vmem>>, vector<1x2x2x64xf32>
    %7 = vector.shape_cast %6 : vector<1x2x2x64xf32> to vector<2x2x64xf32>
    %8 = vector.shape_cast %7 : vector<2x2x64xf32> to vector<4x64xf32>
    %c0_9 = arith.constant 0 : index
    %c1_10 = arith.constant 1 : index
    %c0_11 = arith.constant 0 : index
    %c0_12 = arith.constant 0 : index
    %9 = vector.load %arg1[%c0_9, %c1_10, %c0_11, %c0_12] : memref<1x4x4x64xf32, #tpu.memory_space<vmem>>, vector<1x2x2x64xf32>
    %10 = vector.shape_cast %9 : vector<1x2x2x64xf32> to vector<2x2x64xf32>
    %11 = vector.shape_cast %10 : vector<2x2x64xf32> to vector<4x64xf32>
    %c0_13 = arith.constant 0 : index
    %c1_14 = arith.constant 1 : index
    %c1_15 = arith.constant 1 : index
    %c0_16 = arith.constant 0 : index
    %12 = vector.load %arg1[%c0_13, %c1_14, %c1_15, %c0_16] : memref<1x4x4x64xf32, #tpu.memory_space<vmem>>, vector<1x2x2x64xf32>
    %13 = vector.shape_cast %12 : vector<1x2x2x64xf32> to vector<2x2x64xf32>
    %14 = vector.shape_cast %13 : vector<2x2x64xf32> to vector<4x64xf32>
    %c0_17 = arith.constant 0 : index
    %c1_18 = arith.constant 1 : index
    %c2_19 = arith.constant 2 : index
    %c0_20 = arith.constant 0 : index
    %15 = vector.load %arg1[%c0_17, %c1_18, %c2_19, %c0_20] : memref<1x4x4x64xf32, #tpu.memory_space<vmem>>, vector<1x2x2x64xf32>
    %16 = vector.shape_cast %15 : vector<1x2x2x64xf32> to vector<2x2x64xf32>
    %17 = vector.shape_cast %16 : vector<2x2x64xf32> to vector<4x64xf32>
    %c0_21 = arith.constant 0 : index
    %c2_22 = arith.constant 2 : index
    %c0_23 = arith.constant 0 : index
    %c0_24 = arith.constant 0 : index
    %18 = vector.load %arg1[%c0_21, %c2_22, %c0_23, %c0_24] : memref<1x4x4x64xf32, #tpu.memory_space<vmem>>, vector<1x2x2x64xf32>
    %19 = vector.shape_cast %18 : vector<1x2x2x64xf32> to vector<2x2x64xf32>
    %20 = vector.shape_cast %19 : vector<2x2x64xf32> to vector<4x64xf32>
    %c0_25 = arith.constant 0 : index
    %c2_26 = arith.constant 2 : index
    %c1_27 = arith.constant 1 : index
    %c0_28 = arith.constant 0 : index
    %21 = vector.load %arg1[%c0_25, %c2_26, %c1_27, %c0_28] : memref<1x4x4x64xf32, #tpu.memory_space<vmem>>, vector<1x2x2x64xf32>
    %22 = vector.shape_cast %21 : vector<1x2x2x64xf32> to vector<2x2x64xf32>
    %23 = vector.shape_cast %22 : vector<2x2x64xf32> to vector<4x64xf32>
    %c0_29 = arith.constant 0 : index
    %c2_30 = arith.constant 2 : index
    %c2_31 = arith.constant 2 : index
    %c0_32 = arith.constant 0 : index
    %24 = vector.load %arg1[%c0_29, %c2_30, %c2_31, %c0_32] : memref<1x4x4x64xf32, #tpu.memory_space<vmem>>, vector<1x2x2x64xf32>
    %25 = vector.shape_cast %24 : vector<1x2x2x64xf32> to vector<2x2x64xf32>
    %26 = vector.shape_cast %25 : vector<2x2x64xf32> to vector<4x64xf32>
    %27 = tpu.concatenate %2, %5, %8, %11, %14, %17, %20, %23, %26 in 1 : vector<4x64xf32>, vector<4x64xf32>, vector<4x64xf32>, vector<4x64xf32>, vector<4x64xf32>, vector<4x64xf32>, vector<4x64xf32>, vector<4x64xf32>, vector<4x64xf32> -> vector<4x576xf32>
    %cst = arith.constant 0.000000e+00 : f32
    %28 = vector.broadcast %cst : f32 to vector<4x576xf32>
    %29 = arith.maximumf %27, %28 : vector<4x576xf32>
    %30 = arith.truncf %29 : vector<4x576xf32> to vector<4x576xbf16>
    %c0_33 = arith.constant 0 : index
    %c0_34 = arith.constant 0 : index
    %31 = vector.load %arg2[%c0_33, %c0_34] : memref<576x16xf32, #tpu.memory_space<vmem>>, vector<576x16xf32>
    %32 = arith.truncf %31 : vector<576x16xf32> to vector<576x16xbf16>
    %cst_35 = arith.constant dense<0.000000e+00> : vector<4x16xf32>
    %33 = tpu.matmul %30, %32, %cst_35 {dimension_numbers = #tpu.dot_dimension_numbers<[1], [0], [0], [1], [0, 0, 1, 1], [], []>} : vector<4x576xbf16>, vector<576x16xbf16>, vector<4x16xf32> -> vector<4x16xf32>
    %c0_36 = arith.constant 0 : index
    %c0_37 = arith.constant 0 : index
    %34 = vector.load %arg3[%c0_36, %c0_37] : memref<1x16xf32, #tpu.memory_space<vmem>>, vector<1x16xf32>
    %35 = vector.broadcast %34 : vector<1x16xf32> to vector<4x16xf32>
    %36 = arith.mulf %33, %35 : vector<4x16xf32>
    %c0_38 = arith.constant 0 : index
    %c0_39 = arith.constant 0 : index
    %37 = vector.load %arg4[%c0_38, %c0_39] : memref<1x16xf32, #tpu.memory_space<vmem>>, vector<1x16xf32>
    %38 = vector.broadcast %37 : vector<1x16xf32> to vector<4x16xf32>
    %39 = arith.addf %36, %38 : vector<4x16xf32>
    %40 = vector.shape_cast %39 : vector<4x16xf32> to vector<2x2x16xf32>
    %c0_40 = arith.constant 0 : index
    %c0_41 = arith.constant 0 : index
    %c0_42 = arith.constant 0 : index
    %c0_43 = arith.constant 0 : index
    %41 = vector.load %arg5[%c0_40, %c0_41, %c0_42, %c0_43] : memref<1x2x2x16xf32, #tpu.memory_space<vmem>>, vector<1x2x2x16xf32>
    %42 = vector.shape_cast %41 : vector<1x2x2x16xf32> to vector<2x2x16xf32>
    %43 = vector.shape_cast %40 : vector<2x2x16xf32> to vector<1x2x2x16xf32>
    tpu.vector_store %arg5[%c0_40, %c0_41, %c0_42, %c0_43], %43 {strides = array<i32>} : memref<1x2x2x16xf32, #tpu.memory_space<vmem>>, vector<1x2x2x16xf32>,
    return
  }
  func.func @transform_0(%arg0: i32) -> (i32, i32, i32, i32) {
    %c0_i32 = arith.constant 0 : i32
    %c0_i32_0 = arith.constant 0 : i32
    %c0_i32_1 = arith.constant 0 : i32
    %c0_i32_2 = arith.constant 0 : i32
    return %arg0, %c0_i32, %c0_i32_0, %c0_i32_1 : i32, i32, i32, i32
  }
  func.func @transform_1(%arg0: i32) -> (i32, i32) {
    %c0_i32 = arith.constant 0 : i32
    %c0_i32_0 = arith.constant 0 : i32
    %c0_i32_1 = arith.constant 0 : i32
    return %c0_i32, %c0_i32_0 : i32, i32
  }
  func.func @transform_2(%arg0: i32) -> (i32, i32) {
    %c0_i32 = arith.constant 0 : i32
    %c0_i32_0 = arith.constant 0 : i32
    %c0_i32_1 = arith.constant 0 : i32
    return %c0_i32, %c0_i32_0 : i32, i32
  }
  func.func @transform_3(%arg0: i32) -> (i32, i32) {
    %c0_i32 = arith.constant 0 : i32
    %c0_i32_0 = arith.constant 0 : i32
    %c0_i32_1 = arith.constant 0 : i32
    return %c0_i32, %c0_i32_0 : i32, i32
  }
  func.func @transform_4(%arg0: i32) -> (i32, i32, i32, i32) {
    %c0_i32 = arith.constant 0 : i32
    %c0_i32_0 = arith.constant 0 : i32
    %c0_i32_1 = arith.constant 0 : i32
    %c0_i32_2 = arith.constant 0 : i32
    return %arg0, %c0_i32, %c0_i32_0, %c0_i32_1 : i32, i32, i32, i32
  }
}

module attributes {stable_mosaic.version = 11 : i64} {
  func.func @_se_combine_kernel(%arg0: i32, %arg1: memref<1x2x2x32xf32, #tpu.memory_space<vmem>>, %arg2: memref<32x32xf32, #tpu.memory_space<vmem>>, %arg3: memref<1x32xf32, #tpu.memory_space<vmem>>, %arg4: memref<32x32xf32, #tpu.memory_space<vmem>>, %arg5: memref<1x32xf32, #tpu.memory_space<vmem>>, %arg6: memref<32x16xf32, #tpu.memory_space<vmem>>, %arg7: memref<1x16xf32, #tpu.memory_space<vmem>>, %arg8: memref<1x16xf32, #tpu.memory_space<vmem>>, %arg9: memref<1x2x2x16xf32, #tpu.memory_space<vmem>>) attributes {dimension_semantics = [#tpu.dimension_semantics<parallel>], iteration_bounds = array<i64: 2>, scalar_prefetch = 0 : i64, scratch_operands = 0 : i64, tpu.core_type = #tpu.core_type<tc>, window_params = [{transform_indices = @transform_0, window_bounds = array<i64: 1, 2, 2, 32>}, {pipeline_mode = #tpu.pipeline_mode<synchronous>, transform_indices = @transform_1, window_bounds = array<i64: 32, 32>}, {pipeline_mode = #tpu.pipeline_mode<synchronous>, transform_indices = @transform_2, window_bounds = array<i64: 1, 32>}, {pipeline_mode = #tpu.pipeline_mode<synchronous>, transform_indices = @transform_3, window_bounds = array<i64: 32, 32>}, {pipeline_mode = #tpu.pipeline_mode<synchronous>, transform_indices = @transform_4, window_bounds = array<i64: 1, 32>}, {pipeline_mode = #tpu.pipeline_mode<synchronous>, transform_indices = @transform_5, window_bounds = array<i64: 32, 16>}, {pipeline_mode = #tpu.pipeline_mode<synchronous>, transform_indices = @transform_6, window_bounds = array<i64: 1, 16>}, {pipeline_mode = #tpu.pipeline_mode<synchronous>, transform_indices = @transform_7, window_bounds = array<i64: 1, 16>}, {transform_indices = @transform_8, window_bounds = array<i64: 1, 2, 2, 16>}]} {
    %c0 = arith.constant 0 : index
    %c0_0 = arith.constant 0 : index
    %c0_1 = arith.constant 0 : index
    %c0_2 = arith.constant 0 : index
    %0 = vector.load %arg1[%c0, %c0_0, %c0_1, %c0_2] : memref<1x2x2x32xf32, #tpu.memory_space<vmem>>, vector<1x2x2x32xf32>
    %1 = vector.shape_cast %0 : vector<1x2x2x32xf32> to vector<2x2x32xf32>
    %2 = vector.shape_cast %1 : vector<2x2x32xf32> to vector<4x32xf32>
    %cst = arith.constant dense<0.000000e+00> : vector<32xf32>
    %3 = vector.multi_reduction <add>, %2, %cst [0] : vector<4x32xf32> to vector<32xf32>
    %4 = vector.shape_cast %3 : vector<32xf32> to vector<1x32xf32>
    %cst_3 = arith.constant 4.000000e+00 : f32
    %5 = vector.broadcast %cst_3 : f32 to vector<1x32xf32>
    %6 = arith.divf %4, %5 : vector<1x32xf32>
    %c0_4 = arith.constant 0 : index
    %c0_5 = arith.constant 0 : index
    %7 = vector.load %arg2[%c0_4, %c0_5] : memref<32x32xf32, #tpu.memory_space<vmem>>, vector<32x32xf32>
    %cst_6 = arith.constant dense<0.000000e+00> : vector<1x32xf32>
    %8 = tpu.matmul %6, %7, %cst_6 {dimension_numbers = #tpu.dot_dimension_numbers<[1], [0], [0], [1], [0, 0, 1, 1], [], []>} : vector<1x32xf32>, vector<32x32xf32>, vector<1x32xf32> -> vector<1x32xf32>
    %c0_7 = arith.constant 0 : index
    %c0_8 = arith.constant 0 : index
    %9 = vector.load %arg3[%c0_7, %c0_8] : memref<1x32xf32, #tpu.memory_space<vmem>>, vector<1x32xf32>
    %10 = arith.addf %8, %9 : vector<1x32xf32>
    %cst_9 = arith.constant 0.000000e+00 : f32
    %11 = vector.broadcast %cst_9 : f32 to vector<1x32xf32>
    %12 = arith.maximumf %10, %11 : vector<1x32xf32>
    %c0_10 = arith.constant 0 : index
    %c0_11 = arith.constant 0 : index
    %13 = vector.load %arg4[%c0_10, %c0_11] : memref<32x32xf32, #tpu.memory_space<vmem>>, vector<32x32xf32>
    %cst_12 = arith.constant dense<0.000000e+00> : vector<1x32xf32>
    %14 = tpu.matmul %12, %13, %cst_12 {dimension_numbers = #tpu.dot_dimension_numbers<[1], [0], [0], [1], [0, 0, 1, 1], [], []>} : vector<1x32xf32>, vector<32x32xf32>, vector<1x32xf32> -> vector<1x32xf32>
    %c0_13 = arith.constant 0 : index
    %c0_14 = arith.constant 0 : index
    %15 = vector.load %arg5[%c0_13, %c0_14] : memref<1x32xf32, #tpu.memory_space<vmem>>, vector<1x32xf32>
    %16 = arith.addf %14, %15 : vector<1x32xf32>
    %17 = arith.negf %16 : vector<1x32xf32>
    %18 = math.exp %17 : vector<1x32xf32>
    %cst_15 = arith.constant 1.000000e+00 : f32
    %19 = vector.broadcast %cst_15 : f32 to vector<1x32xf32>
    %20 = arith.addf %19, %18 : vector<1x32xf32>
    %21 = arith.divf %19, %20 : vector<1x32xf32>
    %22 = vector.broadcast %21 : vector<1x32xf32> to vector<4x32xf32>
    %23 = arith.mulf %2, %22 : vector<4x32xf32>
    %24 = arith.truncf %23 : vector<4x32xf32> to vector<4x32xbf16>
    %c0_16 = arith.constant 0 : index
    %c0_17 = arith.constant 0 : index
    %25 = vector.load %arg6[%c0_16, %c0_17] : memref<32x16xf32, #tpu.memory_space<vmem>>, vector<32x16xf32>
    %26 = arith.truncf %25 : vector<32x16xf32> to vector<32x16xbf16>
    %cst_18 = arith.constant dense<0.000000e+00> : vector<4x16xf32>
    %27 = tpu.matmul %24, %26, %cst_18 {dimension_numbers = #tpu.dot_dimension_numbers<[1], [0], [0], [1], [0, 0, 1, 1], [], []>} : vector<4x32xbf16>, vector<32x16xbf16>, vector<4x16xf32> -> vector<4x16xf32>
    %c0_19 = arith.constant 0 : index
    %c0_20 = arith.constant 0 : index
    %28 = vector.load %arg7[%c0_19, %c0_20] : memref<1x16xf32, #tpu.memory_space<vmem>>, vector<1x16xf32>
    %29 = vector.broadcast %28 : vector<1x16xf32> to vector<4x16xf32>
    %30 = arith.mulf %27, %29 : vector<4x16xf32>
    %c0_21 = arith.constant 0 : index
    %c0_22 = arith.constant 0 : index
    %31 = vector.load %arg8[%c0_21, %c0_22] : memref<1x16xf32, #tpu.memory_space<vmem>>, vector<1x16xf32>
    %32 = vector.broadcast %31 : vector<1x16xf32> to vector<4x16xf32>
    %33 = arith.addf %30, %32 : vector<4x16xf32>
    %34 = vector.shape_cast %33 : vector<4x16xf32> to vector<2x2x16xf32>
    %c0_23 = arith.constant 0 : index
    %c0_24 = arith.constant 0 : index
    %c0_25 = arith.constant 0 : index
    %c0_26 = arith.constant 0 : index
    %35 = vector.load %arg9[%c0_23, %c0_24, %c0_25, %c0_26] : memref<1x2x2x16xf32, #tpu.memory_space<vmem>>, vector<1x2x2x16xf32>
    %36 = vector.shape_cast %35 : vector<1x2x2x16xf32> to vector<2x2x16xf32>
    %37 = vector.shape_cast %34 : vector<2x2x16xf32> to vector<1x2x2x16xf32>
    tpu.vector_store %arg9[%c0_23, %c0_24, %c0_25, %c0_26], %37 {strides = array<i32>} : memref<1x2x2x16xf32, #tpu.memory_space<vmem>>, vector<1x2x2x16xf32>,
    return
  }
  func.func @transform_0(%arg0: i32) -> (i32, i32, i32, i32) {
    %c0_i32 = arith.constant 0 : i32
    %c0_i32_0 = arith.constant 0 : i32
    %c0_i32_1 = arith.constant 0 : i32
    %c0_i32_2 = arith.constant 0 : i32
    return %arg0, %c0_i32, %c0_i32_0, %c0_i32_1 : i32, i32, i32, i32
  }
  func.func @transform_1(%arg0: i32) -> (i32, i32) {
    %c0_i32 = arith.constant 0 : i32
    %c0_i32_0 = arith.constant 0 : i32
    %c0_i32_1 = arith.constant 0 : i32
    return %c0_i32, %c0_i32_0 : i32, i32
  }
  func.func @transform_2(%arg0: i32) -> (i32, i32) {
    %c0_i32 = arith.constant 0 : i32
    %c0_i32_0 = arith.constant 0 : i32
    %c0_i32_1 = arith.constant 0 : i32
    return %c0_i32, %c0_i32_0 : i32, i32
  }
  func.func @transform_3(%arg0: i32) -> (i32, i32) {
    %c0_i32 = arith.constant 0 : i32
    %c0_i32_0 = arith.constant 0 : i32
    %c0_i32_1 = arith.constant 0 : i32
    return %c0_i32, %c0_i32_0 : i32, i32
  }
  func.func @transform_4(%arg0: i32) -> (i32, i32) {
    %c0_i32 = arith.constant 0 : i32
    %c0_i32_0 = arith.constant 0 : i32
    %c0_i32_1 = arith.constant 0 : i32
    return %c0_i32, %c0_i32_0 : i32, i32
  }
  func.func @transform_5(%arg0: i32) -> (i32, i32) {
    %c0_i32 = arith.constant 0 : i32
    %c0_i32_0 = arith.constant 0 : i32
    %c0_i32_1 = arith.constant 0 : i32
    return %c0_i32, %c0_i32_0 : i32, i32
  }
  func.func @transform_6(%arg0: i32) -> (i32, i32) {
    %c0_i32 = arith.constant 0 : i32
    %c0_i32_0 = arith.constant 0 : i32
    %c0_i32_1 = arith.constant 0 : i32
    return %c0_i32, %c0_i32_0 : i32, i32
  }
  func.func @transform_7(%arg0: i32) -> (i32, i32) {
    %c0_i32 = arith.constant 0 : i32
    %c0_i32_0 = arith.constant 0 : i32
    %c0_i32_1 = arith.constant 0 : i32
    return %c0_i32, %c0_i32_0 : i32, i32
  }
  func.func @transform_8(%arg0: i32) -> (i32, i32, i32, i32) {
    %c0_i32 = arith.constant 0 : i32
    %c0_i32_0 = arith.constant 0 : i32
    %c0_i32_1 = arith.constant 0 : i32
    %c0_i32_2 = arith.constant 0 : i32
    return %arg0, %c0_i32, %c0_i32_0, %c0_i32_1 : i32, i32, i32, i32
  }
}

module attributes {stable_mosaic.version = 11 : i64} {
  func.func @_conv_bn_kernel(%arg0: i32, %arg1: memref<1x6x6x32xf32, #tpu.memory_space<vmem>>, %arg2: memref<288x8xf32, #tpu.memory_space<vmem>>, %arg3: memref<1x8xf32, #tpu.memory_space<vmem>>, %arg4: memref<1x8xf32, #tpu.memory_space<vmem>>, %arg5: memref<1x4x4x8xf32, #tpu.memory_space<vmem>>) attributes {dimension_semantics = [#tpu.dimension_semantics<parallel>], iteration_bounds = array<i64: 2>, scalar_prefetch = 0 : i64, scratch_operands = 0 : i64, tpu.core_type = #tpu.core_type<tc>, window_params = [{transform_indices = @transform_0, window_bounds = array<i64: 1, 6, 6, 32>}, {pipeline_mode = #tpu.pipeline_mode<synchronous>, transform_indices = @transform_1, window_bounds = array<i64: 288, 8>}, {pipeline_mode = #tpu.pipeline_mode<synchronous>, transform_indices = @transform_2, window_bounds = array<i64: 1, 8>}, {pipeline_mode = #tpu.pipeline_mode<synchronous>, transform_indices = @transform_3, window_bounds = array<i64: 1, 8>}, {transform_indices = @transform_4, window_bounds = array<i64: 1, 4, 4, 8>}]} {
    %c0 = arith.constant 0 : index
    %c0_0 = arith.constant 0 : index
    %c0_1 = arith.constant 0 : index
    %c0_2 = arith.constant 0 : index
    %0 = vector.load %arg1[%c0, %c0_0, %c0_1, %c0_2] : memref<1x6x6x32xf32, #tpu.memory_space<vmem>>, vector<1x4x4x32xf32>
    %1 = vector.shape_cast %0 : vector<1x4x4x32xf32> to vector<4x4x32xf32>
    %2 = vector.shape_cast %1 : vector<4x4x32xf32> to vector<16x32xf32>
    %c0_3 = arith.constant 0 : index
    %c0_4 = arith.constant 0 : index
    %c1 = arith.constant 1 : index
    %c0_5 = arith.constant 0 : index
    %3 = vector.load %arg1[%c0_3, %c0_4, %c1, %c0_5] : memref<1x6x6x32xf32, #tpu.memory_space<vmem>>, vector<1x4x4x32xf32>
    %4 = vector.shape_cast %3 : vector<1x4x4x32xf32> to vector<4x4x32xf32>
    %5 = vector.shape_cast %4 : vector<4x4x32xf32> to vector<16x32xf32>
    %c0_6 = arith.constant 0 : index
    %c0_7 = arith.constant 0 : index
    %c2 = arith.constant 2 : index
    %c0_8 = arith.constant 0 : index
    %6 = vector.load %arg1[%c0_6, %c0_7, %c2, %c0_8] : memref<1x6x6x32xf32, #tpu.memory_space<vmem>>, vector<1x4x4x32xf32>
    %7 = vector.shape_cast %6 : vector<1x4x4x32xf32> to vector<4x4x32xf32>
    %8 = vector.shape_cast %7 : vector<4x4x32xf32> to vector<16x32xf32>
    %c0_9 = arith.constant 0 : index
    %c1_10 = arith.constant 1 : index
    %c0_11 = arith.constant 0 : index
    %c0_12 = arith.constant 0 : index
    %9 = vector.load %arg1[%c0_9, %c1_10, %c0_11, %c0_12] : memref<1x6x6x32xf32, #tpu.memory_space<vmem>>, vector<1x4x4x32xf32>
    %10 = vector.shape_cast %9 : vector<1x4x4x32xf32> to vector<4x4x32xf32>
    %11 = vector.shape_cast %10 : vector<4x4x32xf32> to vector<16x32xf32>
    %c0_13 = arith.constant 0 : index
    %c1_14 = arith.constant 1 : index
    %c1_15 = arith.constant 1 : index
    %c0_16 = arith.constant 0 : index
    %12 = vector.load %arg1[%c0_13, %c1_14, %c1_15, %c0_16] : memref<1x6x6x32xf32, #tpu.memory_space<vmem>>, vector<1x4x4x32xf32>
    %13 = vector.shape_cast %12 : vector<1x4x4x32xf32> to vector<4x4x32xf32>
    %14 = vector.shape_cast %13 : vector<4x4x32xf32> to vector<16x32xf32>
    %c0_17 = arith.constant 0 : index
    %c1_18 = arith.constant 1 : index
    %c2_19 = arith.constant 2 : index
    %c0_20 = arith.constant 0 : index
    %15 = vector.load %arg1[%c0_17, %c1_18, %c2_19, %c0_20] : memref<1x6x6x32xf32, #tpu.memory_space<vmem>>, vector<1x4x4x32xf32>
    %16 = vector.shape_cast %15 : vector<1x4x4x32xf32> to vector<4x4x32xf32>
    %17 = vector.shape_cast %16 : vector<4x4x32xf32> to vector<16x32xf32>
    %c0_21 = arith.constant 0 : index
    %c2_22 = arith.constant 2 : index
    %c0_23 = arith.constant 0 : index
    %c0_24 = arith.constant 0 : index
    %18 = vector.load %arg1[%c0_21, %c2_22, %c0_23, %c0_24] : memref<1x6x6x32xf32, #tpu.memory_space<vmem>>, vector<1x4x4x32xf32>
    %19 = vector.shape_cast %18 : vector<1x4x4x32xf32> to vector<4x4x32xf32>
    %20 = vector.shape_cast %19 : vector<4x4x32xf32> to vector<16x32xf32>
    %c0_25 = arith.constant 0 : index
    %c2_26 = arith.constant 2 : index
    %c1_27 = arith.constant 1 : index
    %c0_28 = arith.constant 0 : index
    %21 = vector.load %arg1[%c0_25, %c2_26, %c1_27, %c0_28] : memref<1x6x6x32xf32, #tpu.memory_space<vmem>>, vector<1x4x4x32xf32>
    %22 = vector.shape_cast %21 : vector<1x4x4x32xf32> to vector<4x4x32xf32>
    %23 = vector.shape_cast %22 : vector<4x4x32xf32> to vector<16x32xf32>
    %c0_29 = arith.constant 0 : index
    %c2_30 = arith.constant 2 : index
    %c2_31 = arith.constant 2 : index
    %c0_32 = arith.constant 0 : index
    %24 = vector.load %arg1[%c0_29, %c2_30, %c2_31, %c0_32] : memref<1x6x6x32xf32, #tpu.memory_space<vmem>>, vector<1x4x4x32xf32>
    %25 = vector.shape_cast %24 : vector<1x4x4x32xf32> to vector<4x4x32xf32>
    %26 = vector.shape_cast %25 : vector<4x4x32xf32> to vector<16x32xf32>
    %27 = tpu.concatenate %2, %5, %8, %11, %14, %17, %20, %23, %26 in 1 : vector<16x32xf32>, vector<16x32xf32>, vector<16x32xf32>, vector<16x32xf32>, vector<16x32xf32>, vector<16x32xf32>, vector<16x32xf32>, vector<16x32xf32>, vector<16x32xf32> -> vector<16x288xf32>
    %cst = arith.constant 0.000000e+00 : f32
    %28 = vector.broadcast %cst : f32 to vector<16x288xf32>
    %29 = arith.maximumf %27, %28 : vector<16x288xf32>
    %30 = arith.truncf %29 : vector<16x288xf32> to vector<16x288xbf16>
    %c0_33 = arith.constant 0 : index
    %c0_34 = arith.constant 0 : index
    %31 = vector.load %arg2[%c0_33, %c0_34] : memref<288x8xf32, #tpu.memory_space<vmem>>, vector<288x8xf32>
    %32 = arith.truncf %31 : vector<288x8xf32> to vector<288x8xbf16>
    %cst_35 = arith.constant dense<0.000000e+00> : vector<16x8xf32>
    %33 = tpu.matmul %30, %32, %cst_35 {dimension_numbers = #tpu.dot_dimension_numbers<[1], [0], [0], [1], [0, 0, 1, 1], [], []>} : vector<16x288xbf16>, vector<288x8xbf16>, vector<16x8xf32> -> vector<16x8xf32>
    %c0_36 = arith.constant 0 : index
    %c0_37 = arith.constant 0 : index
    %34 = vector.load %arg3[%c0_36, %c0_37] : memref<1x8xf32, #tpu.memory_space<vmem>>, vector<1x8xf32>
    %35 = vector.broadcast %34 : vector<1x8xf32> to vector<16x8xf32>
    %36 = arith.mulf %33, %35 : vector<16x8xf32>
    %c0_38 = arith.constant 0 : index
    %c0_39 = arith.constant 0 : index
    %37 = vector.load %arg4[%c0_38, %c0_39] : memref<1x8xf32, #tpu.memory_space<vmem>>, vector<1x8xf32>
    %38 = vector.broadcast %37 : vector<1x8xf32> to vector<16x8xf32>
    %39 = arith.addf %36, %38 : vector<16x8xf32>
    %40 = vector.shape_cast %39 : vector<16x8xf32> to vector<4x4x8xf32>
    %c0_40 = arith.constant 0 : index
    %c0_41 = arith.constant 0 : index
    %c0_42 = arith.constant 0 : index
    %c0_43 = arith.constant 0 : index
    %41 = vector.load %arg5[%c0_40, %c0_41, %c0_42, %c0_43] : memref<1x4x4x8xf32, #tpu.memory_space<vmem>>, vector<1x4x4x8xf32>
    %42 = vector.shape_cast %41 : vector<1x4x4x8xf32> to vector<4x4x8xf32>
    %43 = vector.shape_cast %40 : vector<4x4x8xf32> to vector<1x4x4x8xf32>
    tpu.vector_store %arg5[%c0_40, %c0_41, %c0_42, %c0_43], %43 {strides = array<i32>} : memref<1x4x4x8xf32, #tpu.memory_space<vmem>>, vector<1x4x4x8xf32>,
    return
  }
  func.func @transform_0(%arg0: i32) -> (i32, i32, i32, i32) {
    %c0_i32 = arith.constant 0 : i32
    %c0_i32_0 = arith.constant 0 : i32
    %c0_i32_1 = arith.constant 0 : i32
    %c0_i32_2 = arith.constant 0 : i32
    return %arg0, %c0_i32, %c0_i32_0, %c0_i32_1 : i32, i32, i32, i32
  }
  func.func @transform_1(%arg0: i32) -> (i32, i32) {
    %c0_i32 = arith.constant 0 : i32
    %c0_i32_0 = arith.constant 0 : i32
    %c0_i32_1 = arith.constant 0 : i32
    return %c0_i32, %c0_i32_0 : i32, i32
  }
  func.func @transform_2(%arg0: i32) -> (i32, i32) {
    %c0_i32 = arith.constant 0 : i32
    %c0_i32_0 = arith.constant 0 : i32
    %c0_i32_1 = arith.constant 0 : i32
    return %c0_i32, %c0_i32_0 : i32, i32
  }
  func.func @transform_3(%arg0: i32) -> (i32, i32) {
    %c0_i32 = arith.constant 0 : i32
    %c0_i32_0 = arith.constant 0 : i32
    %c0_i32_1 = arith.constant 0 : i32
    return %c0_i32, %c0_i32_0 : i32, i32
  }
  func.func @transform_4(%arg0: i32) -> (i32, i32, i32, i32) {
    %c0_i32 = arith.constant 0 : i32
    %c0_i32_0 = arith.constant 0 : i32
    %c0_i32_1 = arith.constant 0 : i32
    %c0_i32_2 = arith.constant 0 : i32
    return %arg0, %c0_i32, %c0_i32_0, %c0_i32_1 : i32, i32, i32, i32
  }
}

module attributes {stable_mosaic.version = 11 : i64} {
  func.func @_conv_bn_kernel(%arg0: i32, %arg1: memref<1x10x10x16xf32, #tpu.memory_space<vmem>>, %arg2: memref<144x3xf32, #tpu.memory_space<vmem>>, %arg3: memref<1x3xf32, #tpu.memory_space<vmem>>, %arg4: memref<1x3xf32, #tpu.memory_space<vmem>>, %arg5: memref<1x8x8x3xf32, #tpu.memory_space<vmem>>) attributes {dimension_semantics = [#tpu.dimension_semantics<parallel>], iteration_bounds = array<i64: 2>, scalar_prefetch = 0 : i64, scratch_operands = 0 : i64, tpu.core_type = #tpu.core_type<tc>, window_params = [{transform_indices = @transform_0, window_bounds = array<i64: 1, 10, 10, 16>}, {pipeline_mode = #tpu.pipeline_mode<synchronous>, transform_indices = @transform_1, window_bounds = array<i64: 144, 3>}, {pipeline_mode = #tpu.pipeline_mode<synchronous>, transform_indices = @transform_2, window_bounds = array<i64: 1, 3>}, {pipeline_mode = #tpu.pipeline_mode<synchronous>, transform_indices = @transform_3, window_bounds = array<i64: 1, 3>}, {transform_indices = @transform_4, window_bounds = array<i64: 1, 8, 8, 3>}]} {
    %c0 = arith.constant 0 : index
    %c0_0 = arith.constant 0 : index
    %c0_1 = arith.constant 0 : index
    %c0_2 = arith.constant 0 : index
    %0 = vector.load %arg1[%c0, %c0_0, %c0_1, %c0_2] : memref<1x10x10x16xf32, #tpu.memory_space<vmem>>, vector<1x8x8x16xf32>
    %1 = vector.shape_cast %0 : vector<1x8x8x16xf32> to vector<8x8x16xf32>
    %2 = vector.shape_cast %1 : vector<8x8x16xf32> to vector<64x16xf32>
    %c0_3 = arith.constant 0 : index
    %c0_4 = arith.constant 0 : index
    %c1 = arith.constant 1 : index
    %c0_5 = arith.constant 0 : index
    %3 = vector.load %arg1[%c0_3, %c0_4, %c1, %c0_5] : memref<1x10x10x16xf32, #tpu.memory_space<vmem>>, vector<1x8x8x16xf32>
    %4 = vector.shape_cast %3 : vector<1x8x8x16xf32> to vector<8x8x16xf32>
    %5 = vector.shape_cast %4 : vector<8x8x16xf32> to vector<64x16xf32>
    %c0_6 = arith.constant 0 : index
    %c0_7 = arith.constant 0 : index
    %c2 = arith.constant 2 : index
    %c0_8 = arith.constant 0 : index
    %6 = vector.load %arg1[%c0_6, %c0_7, %c2, %c0_8] : memref<1x10x10x16xf32, #tpu.memory_space<vmem>>, vector<1x8x8x16xf32>
    %7 = vector.shape_cast %6 : vector<1x8x8x16xf32> to vector<8x8x16xf32>
    %8 = vector.shape_cast %7 : vector<8x8x16xf32> to vector<64x16xf32>
    %c0_9 = arith.constant 0 : index
    %c1_10 = arith.constant 1 : index
    %c0_11 = arith.constant 0 : index
    %c0_12 = arith.constant 0 : index
    %9 = vector.load %arg1[%c0_9, %c1_10, %c0_11, %c0_12] : memref<1x10x10x16xf32, #tpu.memory_space<vmem>>, vector<1x8x8x16xf32>
    %10 = vector.shape_cast %9 : vector<1x8x8x16xf32> to vector<8x8x16xf32>
    %11 = vector.shape_cast %10 : vector<8x8x16xf32> to vector<64x16xf32>
    %c0_13 = arith.constant 0 : index
    %c1_14 = arith.constant 1 : index
    %c1_15 = arith.constant 1 : index
    %c0_16 = arith.constant 0 : index
    %12 = vector.load %arg1[%c0_13, %c1_14, %c1_15, %c0_16] : memref<1x10x10x16xf32, #tpu.memory_space<vmem>>, vector<1x8x8x16xf32>
    %13 = vector.shape_cast %12 : vector<1x8x8x16xf32> to vector<8x8x16xf32>
    %14 = vector.shape_cast %13 : vector<8x8x16xf32> to vector<64x16xf32>
    %c0_17 = arith.constant 0 : index
    %c1_18 = arith.constant 1 : index
    %c2_19 = arith.constant 2 : index
    %c0_20 = arith.constant 0 : index
    %15 = vector.load %arg1[%c0_17, %c1_18, %c2_19, %c0_20] : memref<1x10x10x16xf32, #tpu.memory_space<vmem>>, vector<1x8x8x16xf32>
    %16 = vector.shape_cast %15 : vector<1x8x8x16xf32> to vector<8x8x16xf32>
    %17 = vector.shape_cast %16 : vector<8x8x16xf32> to vector<64x16xf32>
    %c0_21 = arith.constant 0 : index
    %c2_22 = arith.constant 2 : index
    %c0_23 = arith.constant 0 : index
    %c0_24 = arith.constant 0 : index
    %18 = vector.load %arg1[%c0_21, %c2_22, %c0_23, %c0_24] : memref<1x10x10x16xf32, #tpu.memory_space<vmem>>, vector<1x8x8x16xf32>
    %19 = vector.shape_cast %18 : vector<1x8x8x16xf32> to vector<8x8x16xf32>
    %20 = vector.shape_cast %19 : vector<8x8x16xf32> to vector<64x16xf32>
    %c0_25 = arith.constant 0 : index
    %c2_26 = arith.constant 2 : index
    %c1_27 = arith.constant 1 : index
    %c0_28 = arith.constant 0 : index
    %21 = vector.load %arg1[%c0_25, %c2_26, %c1_27, %c0_28] : memref<1x10x10x16xf32, #tpu.memory_space<vmem>>, vector<1x8x8x16xf32>
    %22 = vector.shape_cast %21 : vector<1x8x8x16xf32> to vector<8x8x16xf32>
    %23 = vector.shape_cast %22 : vector<8x8x16xf32> to vector<64x16xf32>
    %c0_29 = arith.constant 0 : index
    %c2_30 = arith.constant 2 : index
    %c2_31 = arith.constant 2 : index
    %c0_32 = arith.constant 0 : index
    %24 = vector.load %arg1[%c0_29, %c2_30, %c2_31, %c0_32] : memref<1x10x10x16xf32, #tpu.memory_space<vmem>>, vector<1x8x8x16xf32>
    %25 = vector.shape_cast %24 : vector<1x8x8x16xf32> to vector<8x8x16xf32>
    %26 = vector.shape_cast %25 : vector<8x8x16xf32> to vector<64x16xf32>
    %27 = tpu.concatenate %2, %5, %8, %11, %14, %17, %20, %23, %26 in 1 : vector<64x16xf32>, vector<64x16xf32>, vector<64x16xf32>, vector<64x16xf32>, vector<64x16xf32>, vector<64x16xf32>, vector<64x16xf32>, vector<64x16xf32>, vector<64x16xf32> -> vector<64x144xf32>
    %cst = arith.constant 0.000000e+00 : f32
    %28 = vector.broadcast %cst : f32 to vector<64x144xf32>
    %29 = arith.maximumf %27, %28 : vector<64x144xf32>
    %30 = arith.truncf %29 : vector<64x144xf32> to vector<64x144xbf16>
    %c0_33 = arith.constant 0 : index
    %c0_34 = arith.constant 0 : index
    %31 = vector.load %arg2[%c0_33, %c0_34] : memref<144x3xf32, #tpu.memory_space<vmem>>, vector<144x3xf32>
    %32 = arith.truncf %31 : vector<144x3xf32> to vector<144x3xbf16>
    %cst_35 = arith.constant dense<0.000000e+00> : vector<64x3xf32>
    %33 = tpu.matmul %30, %32, %cst_35 {dimension_numbers = #tpu.dot_dimension_numbers<[1], [0], [0], [1], [0, 0, 1, 1], [], []>} : vector<64x144xbf16>, vector<144x3xbf16>, vector<64x3xf32> -> vector<64x3xf32>
    %c0_36 = arith.constant 0 : index
    %c0_37 = arith.constant 0 : index
    %34 = vector.load %arg3[%c0_36, %c0_37] : memref<1x3xf32, #tpu.memory_space<vmem>>, vector<1x3xf32>
    %35 = vector.broadcast %34 : vector<1x3xf32> to vector<64x3xf32>
    %36 = arith.mulf %33, %35 : vector<64x3xf32>
    %c0_38 = arith.constant 0 : index
    %c0_39 = arith.constant 0 : index
    %37 = vector.load %arg4[%c0_38, %c0_39] : memref<1x3xf32, #tpu.memory_space<vmem>>, vector<1x3xf32>
    %38 = vector.broadcast %37 : vector<1x3xf32> to vector<64x3xf32>
    %39 = arith.addf %36, %38 : vector<64x3xf32>
    %40 = vector.shape_cast %39 : vector<64x3xf32> to vector<8x8x3xf32>
    %c0_40 = arith.constant 0 : index
    %c0_41 = arith.constant 0 : index
    %c0_42 = arith.constant 0 : index
    %c0_43 = arith.constant 0 : index
    %41 = vector.load %arg5[%c0_40, %c0_41, %c0_42, %c0_43] : memref<1x8x8x3xf32, #tpu.memory_space<vmem>>, vector<1x8x8x3xf32>
    %42 = vector.shape_cast %41 : vector<1x8x8x3xf32> to vector<8x8x3xf32>
    %43 = vector.shape_cast %40 : vector<8x8x3xf32> to vector<1x8x8x3xf32>
    tpu.vector_store %arg5[%c0_40, %c0_41, %c0_42, %c0_43], %43 {strides = array<i32>} : memref<1x8x8x3xf32, #tpu.memory_space<vmem>>, vector<1x8x8x3xf32>,
    return
  }
  func.func @transform_0(%arg0: i32) -> (i32, i32, i32, i32) {
    %c0_i32 = arith.constant 0 : i32
    %c0_i32_0 = arith.constant 0 : i32
    %c0_i32_1 = arith.constant 0 : i32
    %c0_i32_2 = arith.constant 0 : i32
    return %arg0, %c0_i32, %c0_i32_0, %c0_i32_1 : i32, i32, i32, i32
  }
  func.func @transform_1(%arg0: i32) -> (i32, i32) {
    %c0_i32 = arith.constant 0 : i32
    %c0_i32_0 = arith.constant 0 : i32
    %c0_i32_1 = arith.constant 0 : i32
    return %c0_i32, %c0_i32_0 : i32, i32
  }
  func.func @transform_2(%arg0: i32) -> (i32, i32) {
    %c0_i32 = arith.constant 0 : i32
    %c0_i32_0 = arith.constant 0 : i32
    %c0_i32_1 = arith.constant 0 : i32
    return %c0_i32, %c0_i32_0 : i32, i32
  }
  func.func @transform_3(%arg0: i32) -> (i32, i32) {
    %c0_i32 = arith.constant 0 : i32
    %c0_i32_0 = arith.constant 0 : i32
    %c0_i32_1 = arith.constant 0 : i32
    return %c0_i32, %c0_i32_0 : i32, i32
  }
  func.func @transform_4(%arg0: i32) -> (i32, i32, i32, i32) {
    %c0_i32 = arith.constant 0 : i32
    %c0_i32_0 = arith.constant 0 : i32
    %c0_i32_1 = arith.constant 0 : i32
    %c0_i32_2 = arith.constant 0 : i32
    return %arg0, %c0_i32, %c0_i32_0, %c0_i32_1 : i32, i32, i32, i32
  }
}

module attributes {stable_mosaic.version = 11 : i64} {
  func.func @_pconv_kernel(%arg0: i32, %arg1: memref<1x1x4x4x65xf32, #tpu.memory_space<vmem>>, %arg2: memref<585x16xf32, #tpu.memory_space<vmem>>, %arg3: memref<585x1xf32, #tpu.memory_space<vmem>>, %arg4: memref<1x16xf32, #tpu.memory_space<vmem>>, %arg5: memref<1x16xf32, #tpu.memory_space<vmem>>, %arg6: memref<1x2x2x16xf32, #tpu.memory_space<vmem>>, %arg7: memref<1x2x2x1xf32, #tpu.memory_space<vmem>>) attributes {dimension_semantics = [#tpu.dimension_semantics<parallel>], iteration_bounds = array<i64: 2>, scalar_prefetch = 0 : i64, scratch_operands = 0 : i64, tpu.core_type = #tpu.core_type<tc>, window_params = [{transform_indices = @transform_0, window_bounds = array<i64: 1, 1, 4, 4, 65>}, {pipeline_mode = #tpu.pipeline_mode<synchronous>, transform_indices = @transform_1, window_bounds = array<i64: 585, 16>}, {pipeline_mode = #tpu.pipeline_mode<synchronous>, transform_indices = @transform_2, window_bounds = array<i64: 585, 1>}, {pipeline_mode = #tpu.pipeline_mode<synchronous>, transform_indices = @transform_3, window_bounds = array<i64: 1, 16>}, {pipeline_mode = #tpu.pipeline_mode<synchronous>, transform_indices = @transform_4, window_bounds = array<i64: 1, 16>}, {transform_indices = @transform_5, window_bounds = array<i64: 1, 2, 2, 16>}, {transform_indices = @transform_6, window_bounds = array<i64: 1, 2, 2, 1>}]} {
    %c0 = arith.constant 0 : index
    %c0_0 = arith.constant 0 : index
    %c0_1 = arith.constant 0 : index
    %c0_2 = arith.constant 0 : index
    %c0_3 = arith.constant 0 : index
    %0 = vector.load %arg1[%c0, %c0_0, %c0_1, %c0_2, %c0_3] : memref<1x1x4x4x65xf32, #tpu.memory_space<vmem>>, vector<1x1x2x2x65xf32>
    %1 = vector.shape_cast %0 : vector<1x1x2x2x65xf32> to vector<2x2x65xf32>
    %2 = vector.shape_cast %1 : vector<2x2x65xf32> to vector<4x65xf32>
    %c0_4 = arith.constant 0 : index
    %c0_5 = arith.constant 0 : index
    %c0_6 = arith.constant 0 : index
    %c1 = arith.constant 1 : index
    %c0_7 = arith.constant 0 : index
    %3 = vector.load %arg1[%c0_4, %c0_5, %c0_6, %c1, %c0_7] : memref<1x1x4x4x65xf32, #tpu.memory_space<vmem>>, vector<1x1x2x2x65xf32>
    %4 = vector.shape_cast %3 : vector<1x1x2x2x65xf32> to vector<2x2x65xf32>
    %5 = vector.shape_cast %4 : vector<2x2x65xf32> to vector<4x65xf32>
    %c0_8 = arith.constant 0 : index
    %c0_9 = arith.constant 0 : index
    %c0_10 = arith.constant 0 : index
    %c2 = arith.constant 2 : index
    %c0_11 = arith.constant 0 : index
    %6 = vector.load %arg1[%c0_8, %c0_9, %c0_10, %c2, %c0_11] : memref<1x1x4x4x65xf32, #tpu.memory_space<vmem>>, vector<1x1x2x2x65xf32>
    %7 = vector.shape_cast %6 : vector<1x1x2x2x65xf32> to vector<2x2x65xf32>
    %8 = vector.shape_cast %7 : vector<2x2x65xf32> to vector<4x65xf32>
    %c0_12 = arith.constant 0 : index
    %c0_13 = arith.constant 0 : index
    %c1_14 = arith.constant 1 : index
    %c0_15 = arith.constant 0 : index
    %c0_16 = arith.constant 0 : index
    %9 = vector.load %arg1[%c0_12, %c0_13, %c1_14, %c0_15, %c0_16] : memref<1x1x4x4x65xf32, #tpu.memory_space<vmem>>, vector<1x1x2x2x65xf32>
    %10 = vector.shape_cast %9 : vector<1x1x2x2x65xf32> to vector<2x2x65xf32>
    %11 = vector.shape_cast %10 : vector<2x2x65xf32> to vector<4x65xf32>
    %c0_17 = arith.constant 0 : index
    %c0_18 = arith.constant 0 : index
    %c1_19 = arith.constant 1 : index
    %c1_20 = arith.constant 1 : index
    %c0_21 = arith.constant 0 : index
    %12 = vector.load %arg1[%c0_17, %c0_18, %c1_19, %c1_20, %c0_21] : memref<1x1x4x4x65xf32, #tpu.memory_space<vmem>>, vector<1x1x2x2x65xf32>
    %13 = vector.shape_cast %12 : vector<1x1x2x2x65xf32> to vector<2x2x65xf32>
    %14 = vector.shape_cast %13 : vector<2x2x65xf32> to vector<4x65xf32>
    %c0_22 = arith.constant 0 : index
    %c0_23 = arith.constant 0 : index
    %c1_24 = arith.constant 1 : index
    %c2_25 = arith.constant 2 : index
    %c0_26 = arith.constant 0 : index
    %15 = vector.load %arg1[%c0_22, %c0_23, %c1_24, %c2_25, %c0_26] : memref<1x1x4x4x65xf32, #tpu.memory_space<vmem>>, vector<1x1x2x2x65xf32>
    %16 = vector.shape_cast %15 : vector<1x1x2x2x65xf32> to vector<2x2x65xf32>
    %17 = vector.shape_cast %16 : vector<2x2x65xf32> to vector<4x65xf32>
    %c0_27 = arith.constant 0 : index
    %c0_28 = arith.constant 0 : index
    %c2_29 = arith.constant 2 : index
    %c0_30 = arith.constant 0 : index
    %c0_31 = arith.constant 0 : index
    %18 = vector.load %arg1[%c0_27, %c0_28, %c2_29, %c0_30, %c0_31] : memref<1x1x4x4x65xf32, #tpu.memory_space<vmem>>, vector<1x1x2x2x65xf32>
    %19 = vector.shape_cast %18 : vector<1x1x2x2x65xf32> to vector<2x2x65xf32>
    %20 = vector.shape_cast %19 : vector<2x2x65xf32> to vector<4x65xf32>
    %c0_32 = arith.constant 0 : index
    %c0_33 = arith.constant 0 : index
    %c2_34 = arith.constant 2 : index
    %c1_35 = arith.constant 1 : index
    %c0_36 = arith.constant 0 : index
    %21 = vector.load %arg1[%c0_32, %c0_33, %c2_34, %c1_35, %c0_36] : memref<1x1x4x4x65xf32, #tpu.memory_space<vmem>>, vector<1x1x2x2x65xf32>
    %22 = vector.shape_cast %21 : vector<1x1x2x2x65xf32> to vector<2x2x65xf32>
    %23 = vector.shape_cast %22 : vector<2x2x65xf32> to vector<4x65xf32>
    %c0_37 = arith.constant 0 : index
    %c0_38 = arith.constant 0 : index
    %c2_39 = arith.constant 2 : index
    %c2_40 = arith.constant 2 : index
    %c0_41 = arith.constant 0 : index
    %24 = vector.load %arg1[%c0_37, %c0_38, %c2_39, %c2_40, %c0_41] : memref<1x1x4x4x65xf32, #tpu.memory_space<vmem>>, vector<1x1x2x2x65xf32>
    %25 = vector.shape_cast %24 : vector<1x1x2x2x65xf32> to vector<2x2x65xf32>
    %26 = vector.shape_cast %25 : vector<2x2x65xf32> to vector<4x65xf32>
    %27 = tpu.concatenate %2, %5, %8, %11, %14, %17, %20, %23, %26 in 1 : vector<4x65xf32>, vector<4x65xf32>, vector<4x65xf32>, vector<4x65xf32>, vector<4x65xf32>, vector<4x65xf32>, vector<4x65xf32>, vector<4x65xf32>, vector<4x65xf32> -> vector<4x585xf32>
    %28 = arith.truncf %27 : vector<4x585xf32> to vector<4x585xbf16>
    %c0_42 = arith.constant 0 : index
    %c0_43 = arith.constant 0 : index
    %29 = vector.load %arg2[%c0_42, %c0_43] : memref<585x16xf32, #tpu.memory_space<vmem>>, vector<585x16xf32>
    %30 = arith.truncf %29 : vector<585x16xf32> to vector<585x16xbf16>
    %cst = arith.constant dense<0.000000e+00> : vector<4x16xf32>
    %31 = tpu.matmul %28, %30, %cst {dimension_numbers = #tpu.dot_dimension_numbers<[1], [0], [0], [1], [0, 0, 1, 1], [], []>} : vector<4x585xbf16>, vector<585x16xbf16>, vector<4x16xf32> -> vector<4x16xf32>
    %c0_44 = arith.constant 0 : index
    %c0_45 = arith.constant 0 : index
    %32 = vector.load %arg3[%c0_44, %c0_45] : memref<585x1xf32, #tpu.memory_space<vmem>>, vector<585x1xf32>
    %33 = arith.truncf %32 : vector<585x1xf32> to vector<585x1xbf16>
    %cst_46 = arith.constant dense<0.000000e+00> : vector<4x1xf32>
    %34 = tpu.matmul %28, %33, %cst_46 {dimension_numbers = #tpu.dot_dimension_numbers<[1], [0], [0], [1], [0, 0, 1, 1], [], []>} : vector<4x585xbf16>, vector<585x1xbf16>, vector<4x1xf32> -> vector<4x1xf32>
    %cst_47 = arith.constant 0.000000e+00 : f32
    %35 = vector.broadcast %cst_47 : f32 to vector<4x1xf32>
    %36 = arith.cmpf ogt, %34, %35 : vector<4x1xf32>
    %37 = arith.extui %36 : vector<4x1xi1> to vector<4x1xi32>
    %38 = arith.sitofp %37 : vector<4x1xi32> to vector<4x1xf32>
    %cst_48 = arith.constant 9.99999993E-9 : f32
    %39 = vector.broadcast %cst_48 : f32 to vector<4x1xf32>
    %40 = arith.addf %34, %39 : vector<4x1xf32>
    %41 = tpu.reciprocal %40 {approx = true} : vector<4x1xf32> -> vector<4x1xf32>
    %cst_49 = arith.constant 9.000000e+00 : f32
    %42 = vector.broadcast %cst_49 : f32 to vector<4x1xf32>
    %43 = arith.mulf %42, %41 : vector<4x1xf32>
    %44 = arith.mulf %43, %38 : vector<4x1xf32>
    %45 = vector.broadcast %44 : vector<4x1xf32> to vector<4x16xf32>
    %46 = arith.mulf %31, %45 : vector<4x16xf32>
    %c0_50 = arith.constant 0 : index
    %c0_51 = arith.constant 0 : index
    %47 = vector.load %arg4[%c0_50, %c0_51] : memref<1x16xf32, #tpu.memory_space<vmem>>, vector<1x16xf32>
    %48 = vector.broadcast %47 : vector<1x16xf32> to vector<4x16xf32>
    %49 = arith.mulf %46, %48 : vector<4x16xf32>
    %c0_52 = arith.constant 0 : index
    %c0_53 = arith.constant 0 : index
    %50 = vector.load %arg5[%c0_52, %c0_53] : memref<1x16xf32, #tpu.memory_space<vmem>>, vector<1x16xf32>
    %51 = vector.broadcast %50 : vector<1x16xf32> to vector<4x16xf32>
    %52 = arith.addf %49, %51 : vector<4x16xf32>
    %cst_54 = arith.constant 0.000000e+00 : f32
    %53 = vector.broadcast %cst_54 : f32 to vector<4x16xf32>
    %54 = arith.maximumf %52, %53 : vector<4x16xf32>
    %55 = vector.shape_cast %54 : vector<4x16xf32> to vector<2x2x16xf32>
    %c0_55 = arith.constant 0 : index
    %c0_56 = arith.constant 0 : index
    %c0_57 = arith.constant 0 : index
    %c0_58 = arith.constant 0 : index
    %56 = vector.load %arg6[%c0_55, %c0_56, %c0_57, %c0_58] : memref<1x2x2x16xf32, #tpu.memory_space<vmem>>, vector<1x2x2x16xf32>
    %57 = vector.shape_cast %56 : vector<1x2x2x16xf32> to vector<2x2x16xf32>
    %58 = vector.shape_cast %55 : vector<2x2x16xf32> to vector<1x2x2x16xf32>
    tpu.vector_store %arg6[%c0_55, %c0_56, %c0_57, %c0_58], %58 {strides = array<i32>} : memref<1x2x2x16xf32, #tpu.memory_space<vmem>>, vector<1x2x2x16xf32>,
    %59 = vector.shape_cast %38 : vector<4x1xf32> to vector<2x2x1xf32>
    %c0_59 = arith.constant 0 : index
    %c0_60 = arith.constant 0 : index
    %c0_61 = arith.constant 0 : index
    %c0_62 = arith.constant 0 : index
    %60 = vector.load %arg7[%c0_59, %c0_60, %c0_61, %c0_62] : memref<1x2x2x1xf32, #tpu.memory_space<vmem>>, vector<1x2x2x1xf32>
    %61 = vector.shape_cast %60 : vector<1x2x2x1xf32> to vector<2x2x1xf32>
    %62 = vector.shape_cast %59 : vector<2x2x1xf32> to vector<1x2x2x1xf32>
    tpu.vector_store %arg7[%c0_59, %c0_60, %c0_61, %c0_62], %62 {strides = array<i32>} : memref<1x2x2x1xf32, #tpu.memory_space<vmem>>, vector<1x2x2x1xf32>,
    return
  }
  func.func @transform_0(%arg0: i32) -> (i32, i32, i32, i32, i32) {
    %c0_i32 = arith.constant 0 : i32
    %c0_i32_0 = arith.constant 0 : i32
    %c0_i32_1 = arith.constant 0 : i32
    %c0_i32_2 = arith.constant 0 : i32
    %c0_i32_3 = arith.constant 0 : i32
    return %arg0, %c0_i32, %c0_i32_0, %c0_i32_1, %c0_i32_2 : i32, i32, i32, i32, i32
  }
  func.func @transform_1(%arg0: i32) -> (i32, i32) {
    %c0_i32 = arith.constant 0 : i32
    %c0_i32_0 = arith.constant 0 : i32
    %c0_i32_1 = arith.constant 0 : i32
    return %c0_i32, %c0_i32_0 : i32, i32
  }
  func.func @transform_2(%arg0: i32) -> (i32, i32) {
    %c0_i32 = arith.constant 0 : i32
    %c0_i32_0 = arith.constant 0 : i32
    %c0_i32_1 = arith.constant 0 : i32
    return %c0_i32, %c0_i32_0 : i32, i32
  }
  func.func @transform_3(%arg0: i32) -> (i32, i32) {
    %c0_i32 = arith.constant 0 : i32
    %c0_i32_0 = arith.constant 0 : i32
    %c0_i32_1 = arith.constant 0 : i32
    return %c0_i32, %c0_i32_0 : i32, i32
  }
  func.func @transform_4(%arg0: i32) -> (i32, i32) {
    %c0_i32 = arith.constant 0 : i32
    %c0_i32_0 = arith.constant 0 : i32
    %c0_i32_1 = arith.constant 0 : i32
    return %c0_i32, %c0_i32_0 : i32, i32
  }
  func.func @transform_5(%arg0: i32) -> (i32, i32, i32, i32) {
    %c0_i32 = arith.constant 0 : i32
    %c0_i32_0 = arith.constant 0 : i32
    %c0_i32_1 = arith.constant 0 : i32
    %c0_i32_2 = arith.constant 0 : i32
    return %arg0, %c0_i32, %c0_i32_0, %c0_i32_1 : i32, i32, i32, i32
  }
  func.func @transform_6(%arg0: i32) -> (i32, i32, i32, i32) {
    %c0_i32 = arith.constant 0 : i32
    %c0_i32_0 = arith.constant 0 : i32
    %c0_i32_1 = arith.constant 0 : i32
    %c0_i32_2 = arith.constant 0 : i32
    return %arg0, %c0_i32, %c0_i32_0, %c0_i32_1 : i32, i32, i32, i32
  }
}

module attributes {stable_mosaic.version = 11 : i64} {
  func.func @_pconv_kernel(%arg0: i32, %arg1: memref<1x4x9x9x7xf32, #tpu.memory_space<vmem>>, %arg2: memref<63x8xf32, #tpu.memory_space<vmem>>, %arg3: memref<63x1xf32, #tpu.memory_space<vmem>>, %arg4: memref<1x8xf32, #tpu.memory_space<vmem>>, %arg5: memref<1x8xf32, #tpu.memory_space<vmem>>, %arg6: memref<1x8x8x8xf32, #tpu.memory_space<vmem>>, %arg7: memref<1x8x8x1xf32, #tpu.memory_space<vmem>>) attributes {dimension_semantics = [#tpu.dimension_semantics<parallel>], iteration_bounds = array<i64: 2>, scalar_prefetch = 0 : i64, scratch_operands = 0 : i64, tpu.core_type = #tpu.core_type<tc>, window_params = [{transform_indices = @transform_0, window_bounds = array<i64: 1, 4, 9, 9, 7>}, {pipeline_mode = #tpu.pipeline_mode<synchronous>, transform_indices = @transform_1, window_bounds = array<i64: 63, 8>}, {pipeline_mode = #tpu.pipeline_mode<synchronous>, transform_indices = @transform_2, window_bounds = array<i64: 63, 1>}, {pipeline_mode = #tpu.pipeline_mode<synchronous>, transform_indices = @transform_3, window_bounds = array<i64: 1, 8>}, {pipeline_mode = #tpu.pipeline_mode<synchronous>, transform_indices = @transform_4, window_bounds = array<i64: 1, 8>}, {transform_indices = @transform_5, window_bounds = array<i64: 1, 8, 8, 8>}, {transform_indices = @transform_6, window_bounds = array<i64: 1, 8, 8, 1>}]} {
    %c0 = arith.constant 0 : index
    %c0_0 = arith.constant 0 : index
    %c0_1 = arith.constant 0 : index
    %c0_2 = arith.constant 0 : index
    %c0_3 = arith.constant 0 : index
    %0 = vector.load %arg1[%c0, %c0_0, %c0_1, %c0_2, %c0_3] : memref<1x4x9x9x7xf32, #tpu.memory_space<vmem>>, vector<1x1x8x8x7xf32>
    %1 = vector.shape_cast %0 : vector<1x1x8x8x7xf32> to vector<8x8x7xf32>
    %2 = vector.shape_cast %1 : vector<8x8x7xf32> to vector<64x7xf32>
    %c0_4 = arith.constant 0 : index
    %c1 = arith.constant 1 : index
    %c0_5 = arith.constant 0 : index
    %c0_6 = arith.constant 0 : index
    %c0_7 = arith.constant 0 : index
    %3 = vector.load %arg1[%c0_4, %c1, %c0_5, %c0_6, %c0_7] : memref<1x4x9x9x7xf32, #tpu.memory_space<vmem>>, vector<1x1x8x8x7xf32>
    %4 = vector.shape_cast %3 : vector<1x1x8x8x7xf32> to vector<8x8x7xf32>
    %5 = vector.shape_cast %4 : vector<8x8x7xf32> to vector<64x7xf32>
    %c0_8 = arith.constant 0 : index
    %c0_9 = arith.constant 0 : index
    %c0_10 = arith.constant 0 : index
    %c1_11 = arith.constant 1 : index
    %c0_12 = arith.constant 0 : index
    %6 = vector.load %arg1[%c0_8, %c0_9, %c0_10, %c1_11, %c0_12] : memref<1x4x9x9x7xf32, #tpu.memory_space<vmem>>, vector<1x1x8x8x7xf32>
    %7 = vector.shape_cast %6 : vector<1x1x8x8x7xf32> to vector<8x8x7xf32>
    %8 = vector.shape_cast %7 : vector<8x8x7xf32> to vector<64x7xf32>
    %c0_13 = arith.constant 0 : index
    %c2 = arith.constant 2 : index
    %c0_14 = arith.constant 0 : index
    %c0_15 = arith.constant 0 : index
    %c0_16 = arith.constant 0 : index
    %9 = vector.load %arg1[%c0_13, %c2, %c0_14, %c0_15, %c0_16] : memref<1x4x9x9x7xf32, #tpu.memory_space<vmem>>, vector<1x1x8x8x7xf32>
    %10 = vector.shape_cast %9 : vector<1x1x8x8x7xf32> to vector<8x8x7xf32>
    %11 = vector.shape_cast %10 : vector<8x8x7xf32> to vector<64x7xf32>
    %c0_17 = arith.constant 0 : index
    %c3 = arith.constant 3 : index
    %c0_18 = arith.constant 0 : index
    %c0_19 = arith.constant 0 : index
    %c0_20 = arith.constant 0 : index
    %12 = vector.load %arg1[%c0_17, %c3, %c0_18, %c0_19, %c0_20] : memref<1x4x9x9x7xf32, #tpu.memory_space<vmem>>, vector<1x1x8x8x7xf32>
    %13 = vector.shape_cast %12 : vector<1x1x8x8x7xf32> to vector<8x8x7xf32>
    %14 = vector.shape_cast %13 : vector<8x8x7xf32> to vector<64x7xf32>
    %c0_21 = arith.constant 0 : index
    %c2_22 = arith.constant 2 : index
    %c0_23 = arith.constant 0 : index
    %c1_24 = arith.constant 1 : index
    %c0_25 = arith.constant 0 : index
    %15 = vector.load %arg1[%c0_21, %c2_22, %c0_23, %c1_24, %c0_25] : memref<1x4x9x9x7xf32, #tpu.memory_space<vmem>>, vector<1x1x8x8x7xf32>
    %16 = vector.shape_cast %15 : vector<1x1x8x8x7xf32> to vector<8x8x7xf32>
    %17 = vector.shape_cast %16 : vector<8x8x7xf32> to vector<64x7xf32>
    %c0_26 = arith.constant 0 : index
    %c0_27 = arith.constant 0 : index
    %c1_28 = arith.constant 1 : index
    %c0_29 = arith.constant 0 : index
    %c0_30 = arith.constant 0 : index
    %18 = vector.load %arg1[%c0_26, %c0_27, %c1_28, %c0_29, %c0_30] : memref<1x4x9x9x7xf32, #tpu.memory_space<vmem>>, vector<1x1x8x8x7xf32>
    %19 = vector.shape_cast %18 : vector<1x1x8x8x7xf32> to vector<8x8x7xf32>
    %20 = vector.shape_cast %19 : vector<8x8x7xf32> to vector<64x7xf32>
    %c0_31 = arith.constant 0 : index
    %c1_32 = arith.constant 1 : index
    %c1_33 = arith.constant 1 : index
    %c0_34 = arith.constant 0 : index
    %c0_35 = arith.constant 0 : index
    %21 = vector.load %arg1[%c0_31, %c1_32, %c1_33, %c0_34, %c0_35] : memref<1x4x9x9x7xf32, #tpu.memory_space<vmem>>, vector<1x1x8x8x7xf32>
    %22 = vector.shape_cast %21 : vector<1x1x8x8x7xf32> to vector<8x8x7xf32>
    %23 = vector.shape_cast %22 : vector<8x8x7xf32> to vector<64x7xf32>
    %c0_36 = arith.constant 0 : index
    %c0_37 = arith.constant 0 : index
    %c1_38 = arith.constant 1 : index
    %c1_39 = arith.constant 1 : index
    %c0_40 = arith.constant 0 : index
    %24 = vector.load %arg1[%c0_36, %c0_37, %c1_38, %c1_39, %c0_40] : memref<1x4x9x9x7xf32, #tpu.memory_space<vmem>>, vector<1x1x8x8x7xf32>
    %25 = vector.shape_cast %24 : vector<1x1x8x8x7xf32> to vector<8x8x7xf32>
    %26 = vector.shape_cast %25 : vector<8x8x7xf32> to vector<64x7xf32>
    %27 = tpu.concatenate %2, %5, %8, %11, %14, %17, %20, %23, %26 in 1 : vector<64x7xf32>, vector<64x7xf32>, vector<64x7xf32>, vector<64x7xf32>, vector<64x7xf32>, vector<64x7xf32>, vector<64x7xf32>, vector<64x7xf32>, vector<64x7xf32> -> vector<64x63xf32>
    %28 = arith.truncf %27 : vector<64x63xf32> to vector<64x63xbf16>
    %c0_41 = arith.constant 0 : index
    %c0_42 = arith.constant 0 : index
    %29 = vector.load %arg2[%c0_41, %c0_42] : memref<63x8xf32, #tpu.memory_space<vmem>>, vector<63x8xf32>
    %30 = arith.truncf %29 : vector<63x8xf32> to vector<63x8xbf16>
    %cst = arith.constant dense<0.000000e+00> : vector<64x8xf32>
    %31 = tpu.matmul %28, %30, %cst {dimension_numbers = #tpu.dot_dimension_numbers<[1], [0], [0], [1], [0, 0, 1, 1], [], []>} : vector<64x63xbf16>, vector<63x8xbf16>, vector<64x8xf32> -> vector<64x8xf32>
    %c0_43 = arith.constant 0 : index
    %c0_44 = arith.constant 0 : index
    %32 = vector.load %arg3[%c0_43, %c0_44] : memref<63x1xf32, #tpu.memory_space<vmem>>, vector<63x1xf32>
    %33 = arith.truncf %32 : vector<63x1xf32> to vector<63x1xbf16>
    %cst_45 = arith.constant dense<0.000000e+00> : vector<64x1xf32>
    %34 = tpu.matmul %28, %33, %cst_45 {dimension_numbers = #tpu.dot_dimension_numbers<[1], [0], [0], [1], [0, 0, 1, 1], [], []>} : vector<64x63xbf16>, vector<63x1xbf16>, vector<64x1xf32> -> vector<64x1xf32>
    %cst_46 = arith.constant 0.000000e+00 : f32
    %35 = vector.broadcast %cst_46 : f32 to vector<64x1xf32>
    %36 = arith.cmpf ogt, %34, %35 : vector<64x1xf32>
    %37 = arith.extui %36 : vector<64x1xi1> to vector<64x1xi32>
    %38 = arith.sitofp %37 : vector<64x1xi32> to vector<64x1xf32>
    %cst_47 = arith.constant 9.99999993E-9 : f32
    %39 = vector.broadcast %cst_47 : f32 to vector<64x1xf32>
    %40 = arith.addf %34, %39 : vector<64x1xf32>
    %41 = tpu.reciprocal %40 {approx = true} : vector<64x1xf32> -> vector<64x1xf32>
    %cst_48 = arith.constant 9.000000e+00 : f32
    %42 = vector.broadcast %cst_48 : f32 to vector<64x1xf32>
    %43 = arith.mulf %42, %41 : vector<64x1xf32>
    %44 = arith.mulf %43, %38 : vector<64x1xf32>
    %45 = vector.broadcast %44 : vector<64x1xf32> to vector<64x8xf32>
    %46 = arith.mulf %31, %45 : vector<64x8xf32>
    %c0_49 = arith.constant 0 : index
    %c0_50 = arith.constant 0 : index
    %47 = vector.load %arg4[%c0_49, %c0_50] : memref<1x8xf32, #tpu.memory_space<vmem>>, vector<1x8xf32>
    %48 = vector.broadcast %47 : vector<1x8xf32> to vector<64x8xf32>
    %49 = arith.mulf %46, %48 : vector<64x8xf32>
    %c0_51 = arith.constant 0 : index
    %c0_52 = arith.constant 0 : index
    %50 = vector.load %arg5[%c0_51, %c0_52] : memref<1x8xf32, #tpu.memory_space<vmem>>, vector<1x8xf32>
    %51 = vector.broadcast %50 : vector<1x8xf32> to vector<64x8xf32>
    %52 = arith.addf %49, %51 : vector<64x8xf32>
    %cst_53 = arith.constant 0.000000e+00 : f32
    %53 = vector.broadcast %cst_53 : f32 to vector<64x8xf32>
    %54 = arith.cmpf oge, %52, %53 : vector<64x8xf32>
    %cst_54 = arith.constant 2.000000e-01 : f32
    %55 = vector.broadcast %cst_54 : f32 to vector<64x8xf32>
    %56 = arith.mulf %55, %52 : vector<64x8xf32>
    %57 = arith.select %54, %52, %56 : vector<64x8xi1>, vector<64x8xf32>
    %58 = vector.shape_cast %57 : vector<64x8xf32> to vector<8x8x8xf32>
    %c0_55 = arith.constant 0 : index
    %c0_56 = arith.constant 0 : index
    %c0_57 = arith.constant 0 : index
    %c0_58 = arith.constant 0 : index
    %59 = vector.load %arg6[%c0_55, %c0_56, %c0_57, %c0_58] : memref<1x8x8x8xf32, #tpu.memory_space<vmem>>, vector<1x8x8x8xf32>
    %60 = vector.shape_cast %59 : vector<1x8x8x8xf32> to vector<8x8x8xf32>
    %61 = vector.shape_cast %58 : vector<8x8x8xf32> to vector<1x8x8x8xf32>
    tpu.vector_store %arg6[%c0_55, %c0_56, %c0_57, %c0_58], %61 {strides = array<i32>} : memref<1x8x8x8xf32, #tpu.memory_space<vmem>>, vector<1x8x8x8xf32>,
    %62 = vector.shape_cast %38 : vector<64x1xf32> to vector<8x8x1xf32>
    %c0_59 = arith.constant 0 : index
    %c0_60 = arith.constant 0 : index
    %c0_61 = arith.constant 0 : index
    %c0_62 = arith.constant 0 : index
    %63 = vector.load %arg7[%c0_59, %c0_60, %c0_61, %c0_62] : memref<1x8x8x1xf32, #tpu.memory_space<vmem>>, vector<1x8x8x1xf32>
    %64 = vector.shape_cast %63 : vector<1x8x8x1xf32> to vector<8x8x1xf32>
    %65 = vector.shape_cast %62 : vector<8x8x1xf32> to vector<1x8x8x1xf32>
    tpu.vector_store %arg7[%c0_59, %c0_60, %c0_61, %c0_62], %65 {strides = array<i32>} : memref<1x8x8x1xf32, #tpu.memory_space<vmem>>, vector<1x8x8x1xf32>,
    return
  }
  func.func @transform_0(%arg0: i32) -> (i32, i32, i32, i32, i32) {
    %c0_i32 = arith.constant 0 : i32
    %c0_i32_0 = arith.constant 0 : i32
    %c0_i32_1 = arith.constant 0 : i32
    %c0_i32_2 = arith.constant 0 : i32
    %c0_i32_3 = arith.constant 0 : i32
    return %arg0, %c0_i32, %c0_i32_0, %c0_i32_1, %c0_i32_2 : i32, i32, i32, i32, i32
  }
  func.func @transform_1(%arg0: i32) -> (i32, i32) {
    %c0_i32 = arith.constant 0 : i32
    %c0_i32_0 = arith.constant 0 : i32
    %c0_i32_1 = arith.constant 0 : i32
    return %c0_i32, %c0_i32_0 : i32, i32
  }
  func.func @transform_2(%arg0: i32) -> (i32, i32) {
    %c0_i32 = arith.constant 0 : i32
    %c0_i32_0 = arith.constant 0 : i32
    %c0_i32_1 = arith.constant 0 : i32
    return %c0_i32, %c0_i32_0 : i32, i32
  }
  func.func @transform_3(%arg0: i32) -> (i32, i32) {
    %c0_i32 = arith.constant 0 : i32
    %c0_i32_0 = arith.constant 0 : i32
    %c0_i32_1 = arith.constant 0 : i32
    return %c0_i32, %c0_i32_0 : i32, i32
  }
  func.func @transform_4(%arg0: i32) -> (i32, i32) {
    %c0_i32 = arith.constant 0 : i32
    %c0_i32_0 = arith.constant 0 : i32
    %c0_i32_1 = arith.constant 0 : i32
    return %c0_i32, %c0_i32_0 : i32, i32
  }
  func.func @transform_5(%arg0: i32) -> (i32, i32, i32, i32) {
    %c0_i32 = arith.constant 0 : i32
    %c0_i32_0 = arith.constant 0 : i32
    %c0_i32_1 = arith.constant 0 : i32
    %c0_i32_2 = arith.constant 0 : i32
    return %arg0, %c0_i32, %c0_i32_0, %c0_i32_1 : i32, i32, i32, i32
  }
  func.func @transform_6(%arg0: i32) -> (i32, i32, i32, i32) {
    %c0_i32 = arith.constant 0 : i32
    %c0_i32_0 = arith.constant 0 : i32
    %c0_i32_1 = arith.constant 0 : i32
    %c0_i32_2 = arith.constant 0 : i32
    return %arg0, %c0_i32, %c0_i32_0, %c0_i32_1 : i32, i32, i32, i32
  }
}

</mosaic_0001>

<bundles_post_ra>
// kernel: generator_forward.54
= control target key start
LH: loop header
LB: loop body
LE: loop exit
PB: predicated region body
PF: predicated region fallthrough
CT: control target
= control target key end

     0   :  { %s852_s21 = smov 0   ;;  %s1043_s0 = inlined_call_operand.vmem [shape: f32[2,4,3,3,17], index: 0, kind: input, shape index: {}]   ;;  %s1044_s1 = inlined_call_operand.vmem [shape: f32[153,32], index: 1, kind: input, shape index: {}]   ;;  %s1045_s2 = inlined_call_operand.vmem [shape: f32[153,1], index: 2, kind: input, shape index: {}]   ;;  %s1046_s3 = inlined_call_operand.vmem [shape: f32[1,32], index: 3, kind: input, shape index: {}]   ;;  %s1047_s4 = inlined_call_operand.vmem [shape: f32[1,32], index: 4, kind: input, shape index: {}]   ;;  %s1048_s5 = inlined_call_operand.vmem [shape: f32[2,2,2,32], index: 5, kind: output, shape index: {0}]   ;;  %s1049_s6 = inlined_call_operand.vmem [shape: f32[2,2,2,1], index: 6, kind: output, shape index: {1}]  }
   0x1 LB: > { %s722_s22 = sadd.s32 4294967295, %s803_s21   ;;  %p726_p0 = scmp.ge.s32.totalorder %s803_s21, 1  ;;  %s803_s21 = sphi %s852_s21, %s17_s21  }
   0x2   : > { %p215_p1 = scmp.lt.s32.totalorder %s803_s21, 3 }
   0x4   : > { %p216_p2 = pnand %p726_p0, %p215_p1 }
   0x5   : > { %p250_p3 = scmp.lt.s32.totalorder (!%p216_p2), %s722_s22, 1  ;;  %s807_s13 = smov (!%p216_p2), 51  }
   0x6   : > { %219 = sbr.rel (%p216_p2) target bundleno = 499 (0x1f3), region = 40  ;;  %s808_s16 = smov (!%p216_p2), 17  }
   0x7   : > { %s809_s23 = smov (!%p216_p2), 68   ;;  %s810_s27 = smov (!%p216_p2), 34  }
   0x8   : > { %s811_s12 = smov (!%p216_p2), 102   ;;  %s813_s25 = smov (!%p216_p2), 8  }
   0x9   : > { %s814_s26 = smov (!%p216_p2), 119  }
   0xb   : > { %v295_v0 = vlaneseq  ;;  %v436_v1 = vld [vmem:[%s1044_s1 + $0x70] sm:$0xff]  ;;  %v805_v2 = vmov 1983009808   ;;  %v806_v4 = vmov 0   ;;  %v437_v5 = vld [vmem:[%s1044_s1 + $0x78] sm:$0xff]  ;;  %s1051_s22 = smov (!%p250_p3, %s722_s22), 1 }
   0xc   : > { %v293_v3 = vunpack.c.l.s4 %v805_v2  ;;  %463 = vmatprep.subr.bf16.mxu0 %v806_v4  ;;  %536 = vmatprep.subr.bf16.mxu1 %v806_v4  ;;  %v517_v6 = vld [vmem:[%s1045_s2 + $0x70] sm:$0xff]  ;;  %v518_v7 = vld [vmem:[%s1045_s2 + $0x78] sm:$0xff]  ;;  %v449_v9 = vpack.c.bf16 %v437_v5, %v436_v1  ;;  %v434_v11 = vld [vmem:[%s1044_s1 + $0x60] sm:$0xff]  ;;  %s755_s15 = smul.u32 48, %s1051_s22  ;;  %vm456_vm0 = vcmask 1043456   ;;  %vm457_vm1 = vcmask 1044480  }
   0xd   : > { %v296_v8 = vshrl.u32 %v295_v0, 7  ;;  %v530_v10 = vpack.c.bf16 %v518_v7, %v517_v6  ;;  %v435_v12 = vld [vmem:[%s1044_s1 + $0x68] sm:$0xff]  ;;  %v515_v13 = vld [vmem:[%s1045_s2 + $0x60] sm:$0xff]  ;;  %776 = vset.pattern.permute.xlu0 %v806_v4  ;;  %v432_v19 = vld [vmem:[%s1044_s1 + $0x50] sm:$0xff]  ;;  %v815_v63 = vmov 65535   ;;  %vm404_vm2 = vcmask 138240  }
   0xe   : > { %v294_v14 = vunpack.c.0.s8 %v293_v3  ;;  %v516_v15 = vld [vmem:[%s1045_s2 + $0x68] sm:$0xff]  ;;  %464 = vmatpush1.bf16.msra.mxu0 %v449_v9  ;;  %v448_v16 = vpack.c.bf16 %v435_v12, %v434_v11  ;;  %v433_v20 = vld [vmem:[%s1044_s1 + $0x58] sm:$0xff]  ;;  %s903_s24 = scalar_lea.vmem %s1043_s0, %s755_s15  ;;  %v513_v21 = vld [vmem:[%s1045_s2 + $0x50] sm:$0xff]  ;;  %v458_v0 = vsel %vm456_vm0, 4294967295, %v815_v63  ;;  %vm406_vm3 = vcmask 277504  }
   0xf   : > { %537 = vmatpush1.bf16.msra.mxu1 %v530_v10  ;;  %v529_v17 = vpack.c.bf16 %v516_v15, %v515_v13  ;;  %465 = vmatprep.subr.bf16.mxu0 %v806_v4  ;;  %v514_v22 = vld [vmem:[%s1045_s2 + $0x58] sm:$0xff]  ;;  %v430_v24 = vld [vmem:[%s1044_s1 + $0x40] sm:$0xff]  ;;  %v431_v25 = vld [vmem:[%s1044_s1 + $0x48] sm:$0xff]  ;;  %v447_v27 = vpack.c.bf16 %v433_v20, %v432_v19  ;;  %v459_v7 = vsel %vm457_vm1, %v458_v0, 0  ;;  %vm408_vm4 = vcmask 416768  }
  0x10   : > { %v890_v18 = vsub.s32 %v294_v14, %v296_v8  ;;  %538 = vmatprep.subr.bf16.mxu1 %v806_v4  ;;  %v788_v23 = vld.sshfl [vmem:[%s903_s24 + $0x18] sm:$0xf pattern:$0x76325410]  ;;  %v511_v28 = vld [vmem:[%s1045_s2 + $0x40] sm:$0xff]  ;;  %v512_v29 = vld [vmem:[%s1045_s2 + $0x48] sm:$0xff]  ;;  %v528_v31 = vpack.c.bf16 %v514_v22, %v513_v21  ;;  %v446_v36 = vpack.c.bf16 %v431_v25, %v430_v24 }
  0x11   : > { %v789_v26 = vld.sshfl [vmem:[%s903_s24 + $0xc] sm:$0xf pattern:$0x76325410]  ;;  %336 = vrot.lane.b32.xlu1 %v788_v23, %s807_s13  ;;  %v527_v37 = vpack.c.bf16 %v512_v29, %v511_v28  ;;  %v429_v38 = vld [vmem:[%s1044_s1 + $0x38] sm:$0xff]  ;;  %v426_v45 = vld [vmem:[%s1044_s1 + $0x20] sm:$0xff] }
  0x12   : > { %466 = vmatpush1.bf16.msra.mxu0 %v448_v16  ;;  %v790_v30 = vld.sshfl [vmem:[%s903_s24 + $0x24] sm:$0xf pattern:$0x76325410]  ;;  %v428_v34 = vld [vmem:[%s1044_s1 + $0x30] sm:$0xff]  ;;  %310 = vrot.lane.b32.xlu0 %v789_v26, %s808_s16  ;;  %v510_v41 = vld [vmem:[%s1045_s2 + $0x38] sm:$0xff] }
  0x13   : > { %539 = vmatpush1.bf16.msra.mxu1 %v529_v17  ;;  %467 = vmatprep.subr.bf16.mxu0 %v806_v4  ;;  %v791_v32 = vld.sshfl [vmem:[%s903_s24 + $0x1] sm:$0xf pattern:$0x76325410]  ;;  %v509_v39 = vld [vmem:[%s1045_s2 + $0x30] sm:$0xff]  ;;  %v445_v43 = vpack.c.bf16 %v429_v38, %v428_v34  ;;  %v427_v46 = vld [vmem:[%s1044_s1 + $0x28] sm:$0xff] }
  0x14   : > { %540 = vmatprep.subr.bf16.mxu1 %v806_v4  ;;  %v792_v33 = vld.sshfl [vmem:[%s903_s24 + $0x4] sm:$0xf pattern:$0x76325410]  ;;  %v526_v44 = vpack.c.bf16 %v510_v41, %v509_v39  ;;  %s812_s13 = smov 85   ;;  %v444_v49 = vpack.c.bf16 %v427_v46, %v426_v45  ;;  %v424_v51 = vld [vmem:[%s1044_s1 + $0x10] sm:$0xff] }
  0x15   : > { %v793_v35 = vld.sshfl [vmem:[%s903_s24 + $0x19] sm:$0xf pattern:$0x76325410]  ;;  %349 = vrot.lane.b32.xlu1 %v790_v30, %s809_s23  ;;  %v507_v47 = vld [vmem:[%s1045_s2 + $0x20] sm:$0xff]  ;;  %v508_v48 = vld [vmem:[%s1045_s2 + $0x28] sm:$0xff] }
  0x16   : > { %468 = vmatpush1.bf16.msra.mxu0 %v447_v27  ;;  %v794_v40 = vld.sshfl [vmem:[%s903_s24 + $0x5] sm:$0xf pattern:$0x76325410]  ;;  %323 = vrot.lane.b32.xlu0 %v791_v32, %s810_s27  ;;  %v525_v50 = vpack.c.bf16 %v508_v48, %v507_v47  ;;  %v425_v52 = vld [vmem:[%s1044_s1 + $0x18] sm:$0xff]  ;;  %v505_v53 = vld [vmem:[%s1045_s2 + $0x10] sm:$0xff] }
  0x17   : > { %541 = vmatpush1.bf16.msra.mxu1 %v528_v31  ;;  %469 = vmatprep.subr.bf16.mxu0 %v806_v4  ;;  %v795_v42 = vld.sshfl [vmem:[%s903_s24 + $0x10] sm:$0xf pattern:$0x76325410]  ;;  %v506_v54 = vld [vmem:[%s1045_s2 + $0x18] sm:$0xff]  ;;  %v443_v55 = vpack.c.bf16 %v425_v52, %v424_v51  ;;  %v422_v56 = vld [vmem:[%s1044_s1] sm:$0xff] }
  0x18   : > { %542 = vmatprep.subr.bf16.mxu1 %v806_v4  ;;  %v423_v57 = vld [vmem:[%s1044_s1 + $0x8] sm:$0xff]  ;;  %v524_v58 = vpack.c.bf16 %v506_v54, %v505_v53  ;;  %v503_v59 = vld [vmem:[%s1045_s2] sm:$0xff]  ;;  %v440_v60 = vld [vmem:[%s1044_s1 + $0x90] sm:$0xff]  ;;  %vm410_vm5 = vcmask 556032   ;;  %vm412_vm6 = vcmask 695296   ;;  %vm414_vm7 = vcmask 834560  }
  0x19   : > { %375 = vrot.lane.b32.xlu1 %v792_v33, %s811_s12  ;;  %v441_v61 = vld [vmem:[%s1044_s1 + $0x98] sm:$0x1]  ;;  %v504_v62 = vld [vmem:[%s1045_s2 + $0x8] sm:$0xff]  ;;  %v521_v1 = vld [vmem:[%s1045_s2 + $0x90] sm:$0xff]  ;;  %v442_v3 = vpack.c.bf16 %v423_v57, %v422_v56  ;;  %vm416_vm8 = vcmask 973824   ;;  %vm418_vm9 = vcmask 64512  }
  0x1a   : > { %470 = vmatpush1.bf16.msra.mxu0 %v446_v36  ;;  %362 = vrot.lane.b32.xlu0 %v793_v35, %s812_s13  ;;  %v522_v2 = vld [vmem:[%s1045_s2 + $0x98] sm:$0x1]  ;;  %v451_v5 = vpack.c.bf16 %v441_v61, %v440_v60  ;;  %v523_v6 = vpack.c.bf16 %v504_v62, %v503_v59  ;;  %v438_v11 = vld [vmem:[%s1044_s1 + $0x80] sm:$0xff]  ;;  %v439_v12 = vld [vmem:[%s1044_s1 + $0x88] sm:$0xff]  ;;  %vm452_vm10 = vcmask 203776   ;;  %v816_v39 = vmov 0.0  }
  0x1b   : > { %543 = vmatpush1.bf16.msra.mxu1 %v527_v37  ;;  %471 = vmatprep.subr.bf16.mxu0 %v806_v4  ;;  %v532_v8 = vpack.c.bf16 %v522_v2, %v521_v1  ;;  %v519_v13 = vld [vmem:[%s1045_s2 + $0x80] sm:$0xff]  ;;  %v520_v14 = vld [vmem:[%s1045_s2 + $0x88] sm:$0xff]  ;;  %v450_v15 = vpack.c.bf16 %v439_v12, %v438_v11  ;;  %vm631_vm12 = vcmask 1024   ;;  %vm617_vm13 = vcmask 254976  }
  0x1c   : > { %544 = vmatprep.subr.bf16.mxu1 %v806_v4  ;;  %v461_v9 = vand.u32 %v459_v7, %v451_v5  ;;  %v531_v16 = vpack.c.bf16 %v520_v14, %v519_v13  ;;  %v796_v17 = vld.sshfl [vmem:[%s903_s24] sm:$0xf pattern:$0x76325410]  ;;  %s753_s24 = sshll.u32 %s1051_s22, 2 }
  0x1d   : > { %401 = vrot.lane.b32.xlu1 %v794_v40, %s813_s25  ;;  %v534_v10 = vand.u32 %v532_v8, %v459_v7  ;;  %s264_s8 = scalar_lea.vmem %s1049_s6, %s753_s24  ;;  %v749_v52 = vld [vmem:[%s1046_s3] ss:$0 sm:$0xff]  ;;  %s259_s15 = scalar_lea.vmem %s1048_s5, %s753_s24 }
  0x1e   : > { %472 = vmatpush1.bf16.msra.mxu0 %v445_v43  ;;  %388 = vrot.lane.b32.xlu0 %v795_v42, %s814_s26 }
  0x1f   : > { %545 = vmatpush1.bf16.msra.mxu1 %v526_v44  ;;  %473 = vmatprep.subr.bf16.mxu0 %v806_v4 }
  0x20   : > { %546 = vmatprep.subr.bf16.mxu1 %v806_v4 }
  0x22   : > { %474 = vmatpush1.bf16.msra.mxu0 %v444_v49 }
  0x23   : > { %547 = vmatpush1.bf16.msra.mxu1 %v525_v50  ;;  %475 = vmatprep.subr.bf16.mxu0 %v806_v4 }
  0x24   : > { %548 = vmatprep.subr.bf16.mxu1 %v806_v4 }
  0x26   : > { %476 = vmatpush1.bf16.msra.mxu0 %v443_v55  ;;  %v750_v55 = vld [vmem:[%s1047_s4] ss:$0 sm:$0xff] }
  0x27   : > { %549 = vmatpush1.bf16.msra.mxu1 %v524_v58  ;;  %477 = vmatprep.subr.bf16.mxu0 %v806_v4 }
  0x28   : > { %550 = vmatprep.subr.bf16.mxu1 %v806_v4 }
  0x2a   : > { %478 = vmatpush1.bf16.msra.mxu0 %v442_v3 }
  0x2b   : > { %551 = vmatpush1.bf16.msra.mxu1 %v523_v6  ;;  %491 = vmatprep.subr.bf16.mxu0 %v806_v4 }
  0x2c   : > { %564 = vmatprep.subr.bf16.mxu1 %v806_v4 }
  0x2e   : > { %492 = vmatpush2.bf16.msra.mxu0 %v461_v9 }
  0x2f   : > { %565 = vmatpush2.bf16.msra.mxu1 %v534_v10  ;;  %493 = vmatprep.subr.bf16.mxu0 %v806_v4 }
  0x30   : > { %566 = vmatprep.subr.bf16.mxu1 %v806_v4 }
  0x32   : > { %494 = vmatpush2.bf16.msra.mxu0 %v450_v15 }
  0x33   : > { %567 = vmatpush2.bf16.msra.mxu1 %v531_v16 }
  0x83   : > { %v337_v19 = vpop.permute.xlu1 %336 }
  0x84   : > { %v311_v20 = vpop.permute.xlu0 %310 }
  0x85   : > { %v405_v22 = vsel %vm404_vm2, %v796_v17, %v311_v20 }
  0x87   : > { %v350_v21 = vpop.permute.xlu1 %349 }
  0x88   : > { %v324_v23 = vpop.permute.xlu0 %323 }
  0x89   : > { %v407_v24 = vsel %vm406_vm3, %v405_v22, %v324_v23 }
  0x8a   : > { %v409_v25 = vsel %vm408_vm4, %v407_v24, %v337_v19 }
  0x8b   : > { %v376_v26 = vpop.permute.xlu1 %375  ;;  %v411_v27 = vsel %vm410_vm5, %v409_v25, %v350_v21 }
  0x8c   : > { %v363_v28 = vpop.permute.xlu0 %362 }
  0x8d   : > { %v413_v29 = vsel %vm412_vm6, %v411_v27, %v363_v28 }
  0x8e   : > { %v415_v31 = vsel %vm414_vm7, %v413_v29, %v376_v26 }
  0x8f   : > { %v402_v4 = vpop.permute.xlu1 %401 }
  0x90   : > { %v389_v30 = vpop.permute.xlu0 %388 }
  0x91   : > { %v417_v32 = vsel %vm416_vm8, %v415_v31, %v389_v30  ;;  %v419_v33 = vsel %vm418_vm9, %v389_v30, %v402_v4 }
  0x92   : > { %v420_v34 = vpack.c.bf16 %v417_v32, %v417_v32  ;;  %v421_v35 = vpack.c.bf16 %v419_v33, %v419_v33 }
  0x94   : > { %746 = vmatprep.mubr.msk.bf16.mxu0 %vm452_vm10, %v421_v35  ;;  %747 = vmatprep.mubr.msk.bf16.mxu1 %vm452_vm10, %v421_v35 }
  0x95   : > { %496 = vmatmul.mubr.bf16.vlgmr.msra.gmra.mxu0 %v420_v34  ;;  %569 = vmatmul.mubr.bf16.vlgmr.msra.gmra.mxu1 %v420_v34 }
 0x155   : > { %v497_v36 = vpop.f32.mrf.mxu0  ;;  %v570_v37 = vpop.f32.mrf.mxu1 }
 0x156   : > { %vm576_vm11 = vcmp.gt.f32.partialorder %v570_v37, 0.0  ;;  %v579_v38 = vadd.f32 1e-08, %v570_v37 }
 0x157   : > { %v748_v40 = vsel %vm576_vm11, 1.0, %v816_v39  ;;  %v499_v41 = vpop.f32.mrf.mxu0  ;;  %v572_v42 = vpop.f32.mrf.mxu1 }
 0x158   : > { %786 = vrcp.f32 %v579_v38  ;;  %v627_v43 = vrot.slane %v748_v40, %v890_v18 }
 0x159   : > { %v500_v44 = vpop.f32.mrf.mxu0  ;;  %v573_v45 = vpop.f32.mrf.mxu1 }
 0x15a   : > { %v628_v46 = vcombine.high %v627_v43, %v627_v43  ;;  %632 = vst.msk [vmem:[%s264_s8] sm:$0x3] %vm631_vm12, %v627_v43 }
 0x15b   : > { %v501_v47 = vpop.f32.mrf.mxu0  ;;  %v574_v48 = vpop.f32.mrf.mxu1 }
 0x15c   : > { %633 = vst.msk [vmem:[%s264_s8 + $0x2] sm:$0x3] %vm631_vm12, %v628_v46 }
 0x165   : > { %v787_v49 = vpop.eup %786 }
 0x166   : > { %v581_v50 = vmul.f32 9.0, %v787_v49 }
 0x168   : > { %v582_v51 = vmul.f32 %v748_v40, %v581_v50 }
 0x16a   : > { %585 = vperm.xlu0 %776, %v582_v51  }
 0x1e5   : > { %v586_v53 = vpop.permute.xlu0 %585 }
 0x1e6   : > { %v588_v54 = vmul.f32 %v586_v53, %v497_v36 }
 0x1e8   : > { %v596_v56 = vmul.f32 %v749_v52, %v588_v54 }
 0x1ea   : > { %v604_v57 = vadd.f32 %v750_v55, %v596_v56 }
 0x1ec   : > { %v605_v58 = vmax.f32 %v604_v57, 0.0 }
 0x1ee   : > { %v613_v59 = vrot.slane %v605_v58, %v890_v18 }
 0x1f0   : > { %v614_v60 = vcombine.high %v613_v59, %v613_v59  ;;  %618 = vst.msk [vmem:[%s259_s15] sm:$0x3] %vm617_vm13, %v613_v59 }
 0x1f2   : > { %619 = vst.msk [vmem:[%s259_s15 + $0x2] sm:$0x3] %vm617_vm13, %v614_v60 }
 0x1f3 PF: > { %s17_s21 = sadd.s32 1, %s803_s21  }
 0x1f4   : > { %p14_p4 = scmp.ge.s32.totalorder %s17_s21, 4  }
 0x1f6   :  { %16 = sbr.rel (!%p14_p4) target bundleno = 1 (0x1), region = 87 }

// kernel: generator_forward.53
= control target key start
LH: loop header
LB: loop body
LE: loop exit
PB: predicated region body
PF: predicated region fallthrough
CT: control target
= control target key end

     0   :  { %s957_s21 = smov 0   ;;  %s1097_s0 = inlined_call_operand.vmem [shape: f32[2,4,5,5,9], index: 0, kind: input, shape index: {}]   ;;  %s1098_s1 = inlined_call_operand.vmem [shape: f32[81,16], index: 1, kind: input, shape index: {}]   ;;  %s1099_s2 = inlined_call_operand.vmem [shape: f32[81,1], index: 2, kind: input, shape index: {}]   ;;  %s1100_s3 = inlined_call_operand.vmem [shape: f32[1,16], index: 3, kind: input, shape index: {}]   ;;  %s1101_s4 = inlined_call_operand.vmem [shape: f32[1,16], index: 4, kind: input, shape index: {}]   ;;  %s1102_s5 = inlined_call_operand.vmem [shape: f32[2,4,4,16], index: 5, kind: output, shape index: {0}]   ;;  %s1103_s6 = inlined_call_operand.vmem [shape: f32[2,4,4,1], index: 6, kind: output, shape index: {1}]  }
   0x1 LB: > { %s725_s22 = sadd.s32 4294967295, %s909_s21   ;;  %p729_p0 = scmp.ge.s32.totalorder %s909_s21, 1  ;;  %s909_s21 = sphi %s957_s21, %s17_s21  }
   0x2   : > { %p215_p1 = scmp.lt.s32.totalorder %s909_s21, 3 }
   0x4   : > { %p216_p2 = pnand %p729_p0, %p215_p1 }
   0x5   : > { %p250_p3 = scmp.lt.s32.totalorder (!%p216_p2), %s725_s22, 1  ;;  %s913_s9 = smov (!%p216_p2), 9  }
   0x6   : > { %219 = sbr.rel (%p216_p2) target bundleno = 507 (0x1fb), region = 40  ;;  %s914_s10 = smov (!%p216_p2), 27  }
   0x7   : > { %s916_s12 = smov (!%p216_p2), 36   ;;  %s917_s13 = smov (!%p216_p2), 45  }
   0x8   : > { %s918_s14 = smov (!%p216_p2), 54   ;;  %s919_s15 = smov (!%p216_p2), 63  }
   0x9   : > { %s920_s25 = smov (!%p216_p2), 72  }
   0xb   : > { %v446_v0 = vld [vmem:[%s1098_s1 + $0x50] sm:$0x1]  ;;  %vm457_vm0 = vcmask 1040384   ;;  %v911_v1 = vmov 0.0   ;;  %s1105_s22 = smov (!%p250_p3, %s725_s22), 1  ;;  %v912_v4 = vmov 0  }
   0xc   : > { %787 = vmatprep.subr.bf16.mxu0 %v911_v1  ;;  %803 = vmatprep.subr.bf16.mxu1 %v911_v1  ;;  %v452_v2 = vpack.c.bf16 %v446_v0, %v446_v0  ;;  %v514_v3 = vld [vmem:[%s1099_s2 + $0x50] sm:$0x1]  ;;  %v459_v5 = vsel %vm457_vm0, 65535, %v912_v4  ;;  %v444_v7 = vld [vmem:[%s1098_s1 + $0x40] sm:$0xff]  ;;  %v445_v8 = vld [vmem:[%s1098_s1 + $0x48] sm:$0xff]  ;;  %s819_s11 = smul.u32 160, %s1105_s22 }
   0xd   : > { %v520_v6 = vpack.c.bf16 %v514_v3, %v514_v3  ;;  %879 = vset.pattern.permute.xlu0 %v912_v4  ;;  %880 = vset.pattern.permute.xlu1 %v912_v4  ;;  %v512_v10 = vld [vmem:[%s1099_s2 + $0x40] sm:$0xff]  ;;  %v513_v11 = vld [vmem:[%s1099_s2 + $0x48] sm:$0xff]  ;;  %v451_v13 = vpack.c.bf16 %v445_v8, %v444_v7  ;;  %v442_v14 = vld [vmem:[%s1098_s1 + $0x30] sm:$0xff]  ;;  %vm921_vm1 = vmmov 0   ;;  %vm411_vm2 = vcmask 72704  }
   0xe   : > { %v461_v9 = vand.u32 %v459_v5, %v452_v2  ;;  %s994_s16 = scalar_lea.vmem %s1097_s0, %s819_s11  ;;  %v519_v15 = vpack.c.bf16 %v513_v11, %v512_v10  ;;  %v443_v16 = vld [vmem:[%s1098_s1 + $0x38] sm:$0xff]  ;;  %v510_v17 = vld [vmem:[%s1099_s2 + $0x30] sm:$0xff]  ;;  %v440_v21 = vld [vmem:[%s1098_s1 + $0x20] sm:$0xff]  ;;  %s915_s11 = smov 18   ;;  %799 = vmatprep.mubr.msk.bf16.mxu0 %vm921_vm1, %v911_v1  ;;  %815 = vmatprep.mubr.msk.bf16.mxu1 %vm921_vm1, %v911_v1  ;;  %vm414_vm3 = vcmask 146432   ;;  %vm417_vm4 = vcmask 220160  }
   0xf   : > { %v522_v12 = vand.u32 %v520_v6, %v459_v5  ;;  %v511_v18 = vld [vmem:[%s1099_s2 + $0x38] sm:$0xff]  ;;  %v881_v19 = vld [vmem:[%s994_s16 + $0x28] ss:$8 sps:$4 sm:$0xff]   ;;  %v450_v23 = vpack.c.bf16 %v443_v16, %v442_v14  ;;  %v508_v24 = vld [vmem:[%s1099_s2 + $0x20] sm:$0xff]  ;;  %vm420_vm5 = vcmask 293888   ;;  %vm423_vm6 = vcmask 367616  }
  0x10   : > { %788 = vmatpush3.bf16.msra.mxu0 %v461_v9  ;;  %v882_v20 = vld [vmem:[%s994_s16 + $0x38] ss:$8 sps:$4 sm:$0xff]   ;;  %v441_v22 = vld [vmem:[%s1098_s1 + $0x28] sm:$0xff]  ;;  %v518_v29 = vpack.c.bf16 %v511_v18, %v510_v17  ;;  %v438_v51 = vld [vmem:[%s1098_s1 + $0x10] sm:$0xff]  ;;  %vm426_vm7 = vcmask 441344   ;;  %vm429_vm8 = vcmask 515072  }
  0x11   : > { %804 = vmatpush3.bf16.msra.mxu1 %v522_v12  ;;  %789 = vmatprep.subr.bf16.mxu0 %v911_v1  ;;  %v509_v25 = vld [vmem:[%s1099_s2 + $0x28] sm:$0xff]  ;;  %v839_v26 = vpack.i.bf16 %v882_v20, %v881_v19  ;;  %v883_v27 = vld [vmem:[%s994_s16 + $0x50] ss:$8 sps:$4 sm:$0xff]   ;;  %v449_v33 = vpack.c.bf16 %v441_v22, %v440_v21  ;;  %v436_v56 = vld [vmem:[%s1098_s1] sm:$0xff]  ;;  %vm432_vm9 = vcmask 588800   ;;  %vm453_vm10 = vcmask 662528  }
  0x12   : > { %805 = vmatprep.subr.bf16.mxu1 %v911_v1  ;;  %v884_v28 = vld [vmem:[%s994_s16 + $0x60] ss:$8 sps:$4 sm:$0xff]   ;;  %v886_v32 = vld [vmem:[%s994_s16 + $0x11] ss:$8 sps:$4 sm:$0xff]   ;;  %v517_v37 = vpack.c.bf16 %v509_v25, %v508_v24  ;;  %vm632_vm11 = vcmask 3072   ;;  %vm621_vm14 = vcmask 125952  }
  0x13   : > { %840 = vrot.lane.b32.xlu0 %v839_v26, %s913_s9  ;;  %v849_v30 = vpack.i.bf16 %v884_v28, %v883_v27  ;;  %v885_v31 = vld [vmem:[%s994_s16 + $0x1] ss:$8 sps:$4 sm:$0xff]   ;;  %v889_v39 = vld [vmem:[%s994_s16 + $0x51] ss:$8 sps:$4 sm:$0xff]  }
  0x14   : > { %790 = vmatpush3.bf16.msra.mxu0 %v451_v13  ;;  %v844_v34 = vpack.i.bf16 %v886_v32, %v885_v31  ;;  %v887_v35 = vld [vmem:[%s994_s16 + $0x78] ss:$8 sps:$4 sm:$0xff]   ;;  %v888_v36 = vld [vmem:[%s994_s16 + $0x88] ss:$8 sps:$4 sm:$0xff]  }
  0x15   : > { %806 = vmatpush3.bf16.msra.mxu1 %v519_v15  ;;  %791 = vmatprep.subr.bf16.mxu0 %v911_v1  ;;  %v854_v38 = vpack.i.bf16 %v888_v36, %v887_v35  ;;  %v890_v40 = vld [vmem:[%s994_s16 + $0x61] ss:$8 sps:$4 sm:$0xff]   ;;  %v893_v45 = vld [vmem:[%s994_s16 + $0x30] ss:$8 sps:$4 sm:$0xff]  }
  0x16   : > { %807 = vmatprep.subr.bf16.mxu1 %v911_v1  ;;  %850 = vrot.lane.b32.xlu1 %v849_v30, %s914_s10  ;;  %v859_v41 = vpack.i.bf16 %v890_v40, %v889_v39  ;;  %v891_v42 = vld [vmem:[%s994_s16 + $0x8] ss:$8 sps:$4 sm:$0xff]   ;;  %v892_v43 = vld [vmem:[%s994_s16 + $0x18] ss:$8 sps:$4 sm:$0xff]  }
  0x17   : > { %845 = vrot.lane.b32.xlu0 %v844_v34, %s915_s11  ;;  %v864_v44 = vpack.i.bf16 %v892_v43, %v891_v42  ;;  %v894_v46 = vld [vmem:[%s994_s16 + $0x40] ss:$8 sps:$4 sm:$0xff]   ;;  %v439_v52 = vld [vmem:[%s1098_s1 + $0x18] sm:$0xff]  ;;  %v506_v53 = vld [vmem:[%s1099_s2 + $0x10] sm:$0xff] }
  0x18   : > { %792 = vmatpush3.bf16.msra.mxu0 %v450_v23  ;;  %v869_v47 = vpack.i.bf16 %v894_v46, %v893_v45  ;;  %v895_v48 = vld [vmem:[%s994_s16 + $0x9] ss:$8 sps:$4 sm:$0xff]   ;;  %v896_v49 = vld [vmem:[%s994_s16 + $0x19] ss:$8 sps:$4 sm:$0xff]   ;;  %v448_v54 = vpack.c.bf16 %v439_v52, %v438_v51 }
  0x19   : > { %808 = vmatpush3.bf16.msra.mxu1 %v518_v29  ;;  %793 = vmatprep.subr.bf16.mxu0 %v911_v1  ;;  %v874_v50 = vpack.i.bf16 %v896_v49, %v895_v48  ;;  %v507_v55 = vld [vmem:[%s1099_s2 + $0x18] sm:$0xff]  ;;  %v437_v57 = vld [vmem:[%s1098_s1 + $0x8] sm:$0xff]  ;;  %v504_v59 = vld [vmem:[%s1099_s2] sm:$0xff] }
  0x1a   : > { %809 = vmatprep.subr.bf16.mxu1 %v911_v1  ;;  %855 = vrot.lane.b32.xlu1 %v854_v38, %s916_s12  ;;  %v516_v58 = vpack.c.bf16 %v507_v55, %v506_v53  ;;  %v505_v60 = vld [vmem:[%s1099_s2 + $0x8] sm:$0xff]  ;;  %v447_v61 = vpack.c.bf16 %v437_v57, %v436_v56  ;;  %v898_v4 = vld [vmem:[%s994_s16 + $0x10] ss:$8 sps:$4 sm:$0xff]  }
  0x1b   : > { %860 = vrot.lane.b32.xlu0 %v859_v41, %s917_s13  ;;  %v515_v62 = vpack.c.bf16 %v505_v60, %v504_v59  ;;  %v897_v3 = vld [vmem:[%s994_s16] ss:$8 sps:$4 sm:$0xff]   ;;  %s771_s16 = sshll.u32 %s1105_s22, 4 }
  0x1c   : > { %794 = vmatpush3.bf16.msra.mxu0 %v449_v33  ;;  %s259_s24 = scalar_lea.vmem %s1102_s5, %s771_s16 }
  0x1d   : > { %810 = vmatpush3.bf16.msra.mxu1 %v517_v37  ;;  %795 = vmatprep.subr.bf16.mxu0 %v911_v1 }
  0x1e   : > { %811 = vmatprep.subr.bf16.mxu1 %v911_v1  ;;  %865 = vrot.lane.b32.xlu1 %v864_v44, %s918_s14  ;;  %s264_s14 = scalar_lea.vmem %s1103_s6, %s771_s16 }
  0x1f   : > { %870 = vrot.lane.b32.xlu0 %v869_v47, %s919_s15 }
  0x20   : > { %796 = vmatpush3.bf16.msra.mxu0 %v448_v54 }
  0x21   : > { %812 = vmatpush3.bf16.msra.mxu1 %v516_v58  ;;  %797 = vmatprep.subr.bf16.mxu0 %v911_v1 }
  0x22   : > { %875 = vrot.lane.b32.xlu1 %v874_v50, %s920_s25  ;;  %813 = vmatprep.subr.bf16.mxu1 %v911_v1 }
  0x24   : > { %798 = vmatpush3.bf16.msra.mxu0 %v447_v61 }
  0x25   : > { %814 = vmatpush3.bf16.msra.mxu1 %v515_v62 }
  0x85   : > { %v841_v63 = vpop.permute.xlu0 %840 }
  0x86   : > { %v843_v0 = vunpack.i.h.bf16 %v841_v63  ;;  %v842_v2 = vunpack.i.l.bf16 %v841_v63 }
  0x88   : > { %v851_v5 = vpop.permute.xlu1 %850  ;;  %v412_v9 = vsel %vm411_vm2, %v897_v3, %v842_v2  ;;  %v413_v10 = vsel %vm411_vm2, %v898_v4, %v843_v0  ;;  %v768_v2 = vld [vmem:[%s1101_s4] ss:$0 sm:$0xff] }
  0x89   : > { %v846_v6 = vpop.permute.xlu0 %845  ;;  %v853_v11 = vunpack.i.h.bf16 %v851_v5  ;;  %v852_v12 = vunpack.i.l.bf16 %v851_v5 }
  0x8a   : > { %v848_v7 = vunpack.i.h.bf16 %v846_v6  ;;  %v847_v8 = vunpack.i.l.bf16 %v846_v6 }
  0x8c   : > { %v856_v13 = vpop.permute.xlu1 %855  ;;  %v415_v14 = vsel %vm414_vm3, %v412_v9, %v847_v8  ;;  %v416_v15 = vsel %vm414_vm3, %v413_v10, %v848_v7 }
  0x8d   : > { %v858_v16 = vunpack.i.h.bf16 %v856_v13  ;;  %v857_v17 = vunpack.i.l.bf16 %v856_v13  ;;  %v418_v18 = vsel %vm417_vm4, %v415_v14, %v852_v12  ;;  %v419_v19 = vsel %vm417_vm4, %v416_v15, %v853_v11  ;;  %v861_v20 = vpop.permute.xlu0 %860 }
  0x8e   : > { %v863_v23 = vunpack.i.h.bf16 %v861_v20  ;;  %v862_v24 = vunpack.i.l.bf16 %v861_v20 }
  0x8f   : > { %v421_v21 = vsel %vm420_vm5, %v418_v18, %v857_v17  ;;  %v422_v22 = vsel %vm420_vm5, %v419_v19, %v858_v16 }
  0x90   : > { %v866_v25 = vpop.permute.xlu1 %865  ;;  %v424_v26 = vsel %vm423_vm6, %v421_v21, %v862_v24  ;;  %v425_v27 = vsel %vm423_vm6, %v422_v22, %v863_v23 }
  0x91   : > { %v868_v28 = vunpack.i.h.bf16 %v866_v25  ;;  %v867_v29 = vunpack.i.l.bf16 %v866_v25  ;;  %v871_v30 = vpop.permute.xlu0 %870 }
  0x92   : > { %v873_v31 = vunpack.i.h.bf16 %v871_v30  ;;  %v872_v32 = vunpack.i.l.bf16 %v871_v30 }
  0x93   : > { %v427_v33 = vsel %vm426_vm7, %v424_v26, %v867_v29  ;;  %v428_v34 = vsel %vm426_vm7, %v425_v27, %v868_v28 }
  0x94   : > { %v876_v35 = vpop.permute.xlu1 %875  ;;  %v430_v36 = vsel %vm429_vm8, %v427_v33, %v872_v32  ;;  %v431_v37 = vsel %vm429_vm8, %v428_v34, %v873_v31 }
  0x95   : > { %v878_v38 = vunpack.i.h.bf16 %v876_v35  ;;  %v877_v39 = vunpack.i.l.bf16 %v876_v35 }
  0x97   : > { %v433_v40 = vsel %vm432_vm9, %v430_v36, %v877_v39  ;;  %v434_v41 = vsel %vm432_vm9, %v431_v37, %v878_v38 }
  0x98   : > { %v435_v42 = vpack.c.bf16 %v434_v41, %v433_v40 }
  0x9a   : > { %800 = vmatmul.mubr.msk.bf16.vlgmr.msra.gmra.mxu0 %vm453_vm10, %v435_v42  ;;  %816 = vmatmul.mubr.msk.bf16.vlgmr.msra.gmra.mxu1 %vm453_vm10, %v435_v42 }
 0x15a   : > { %v497_v43 = vpop.f32.mrf.mxu0  ;;  %v558_v44 = vpop.f32.mrf.mxu1 }
 0x15b   : > { %vm565_vm12 = vcmp.gt.f32.partialorder %v558_v44, 0.0  ;;  %v571_v45 = vadd.f32 1e-08, %v558_v44 }
 0x15c   : > { %v765_v46 = vsel %vm565_vm12, 1.0, %v911_v1  ;;  %v801_v47 = vpop.f32.mrf.mxu0  ;;  %v817_v48 = vpop.f32.mrf.mxu1 }
 0x15d   : > { %899 = vrcp.f32 %v571_v45  ;;  %v628_v49 = vcombine.high %v765_v46, %v765_v46  ;;  %633 = vst.msk [vmem:[%s264_s14] sm:$0xf] %vm632_vm11, %v765_v46 }
 0x15e   : > { %v500_v50 = vpop.f32.mrf.mxu0  ;;  %v561_v51 = vpop.f32.mrf.mxu1 }
 0x15f   : > { %634 = vst.msk [vmem:[%s264_s14 + $0x4] sm:$0xf] %vm632_vm11, %v628_v49  ;;  %vm566_vm13 = vcmp.gt.f32.partialorder %v561_v51, 0.0  ;;  %v572_v52 = vadd.f32 1e-08, %v561_v51 }
 0x160   : > { %v766_v53 = vsel %vm566_vm13, 1.0, %v911_v1  ;;  %v802_v54 = vpop.f32.mrf.mxu0  ;;  %v818_v55 = vpop.f32.mrf.mxu1  ;;  %v767_v1 = vld [vmem:[%s1100_s3] ss:$0 sm:$0xff] }
 0x161   : > { %901 = vrcp.f32 %v572_v52  ;;  %v629_v56 = vcombine.high %v766_v53, %v766_v53  ;;  %635 = vst.msk [vmem:[%s264_s14 + $0x8] sm:$0xf] %vm632_vm11, %v766_v53 }
 0x163   : > { %636 = vst.msk [vmem:[%s264_s14 + $0xc] sm:$0xf] %vm632_vm11, %v629_v56 }
 0x16a   : > { %v900_v57 = vpop.eup %899 }
 0x16b   : > { %v575_v58 = vmul.f32 9.0, %v900_v57 }
 0x16d   : > { %v577_v59 = vmul.f32 %v765_v46, %v575_v58 }
 0x16e   : > { %v902_v60 = vpop.eup %901 }
 0x16f   : > { %v576_v61 = vmul.f32 9.0, %v902_v60  ;;  %581 = vperm.xlu0 %879, %v577_v59  }
 0x171   : > { %v578_v62 = vmul.f32 %v766_v53, %v576_v61 }
 0x173   : > { %586 = vperm.xlu1 %880, %v578_v62  }
 0x1ea   : > { %v582_v63 = vpop.permute.xlu0 %581 }
 0x1eb   : > { %v589_v0 = vmul.f32 %v582_v63, %v497_v43 }
 0x1ed   : > { %v598_v3 = vmul.f32 %v767_v1, %v589_v0 }
 0x1ee   : > { %v587_v4 = vpop.permute.xlu1 %586 }
 0x1ef   : > { %v607_v5 = vadd.f32 %v768_v2, %v598_v3  ;;  %v590_v6 = vmul.f32 %v587_v4, %v500_v50 }
 0x1f1   : > { %vm609_vm15 = vcmp.ge.f32.partialorder %v607_v5, 0.0  ;;  %v611_v7 = vmul.f32 0.2, %v607_v5  ;;  %v599_v8 = vmul.f32 %v767_v1, %v590_v6 }
 0x1f3   : > { %v613_v9 = vsel %vm609_vm15, %v607_v5, %v611_v7  ;;  %v608_v10 = vadd.f32 %v768_v2, %v599_v8 }
 0x1f4   : > { %v617_v11 = vcombine.high %v613_v9, %v613_v9  ;;  %622 = vst.msk [vmem:[%s259_s24] sm:$0xf] %vm621_vm14, %v613_v9 }
 0x1f5   : > { %vm610_vm0 = vcmp.ge.f32.partialorder %v608_v10, 0.0  ;;  %v612_v12 = vmul.f32 0.2, %v608_v10 }
 0x1f6   : > { %623 = vst.msk [vmem:[%s259_s24 + $0x4] sm:$0xf] %vm621_vm14, %v617_v11 }
 0x1f7   : > { %v614_v13 = vsel %vm610_vm0, %v608_v10, %v612_v12 }
 0x1f8   : > { %v618_v14 = vcombine.high %v614_v13, %v614_v13  ;;  %624 = vst.msk [vmem:[%s259_s24 + $0x8] sm:$0xf] %vm621_vm14, %v614_v13 }
 0x1fa   : > { %625 = vst.msk [vmem:[%s259_s24 + $0xc] sm:$0xf] %vm621_vm14, %v618_v14 }
 0x1fb PF: > { %s17_s21 = sadd.s32 1, %s909_s21  }
 0x1fc   : > { %p14_p4 = scmp.ge.s32.totalorder %s17_s21, 4  }
 0x1fe   :  { %16 = sbr.rel (!%p14_p4) target bundleno = 1 (0x1), region = 87 }

// kernel: generator_forward.52
= control target key start
LH: loop header
LB: loop body
LE: loop exit
PB: predicated region body
PF: predicated region fallthrough
CT: control target
= control target key end

     0   :  { %s1492_s21 = smov 0   ;;  %s1843_s0 = inlined_call_operand.vmem [shape: f32[2,4,9,9,5], index: 0, kind: input, shape index: {}]   ;;  %s1844_s1 = inlined_call_operand.vmem [shape: f32[45,8], index: 1, kind: input, shape index: {}]   ;;  %s1845_s2 = inlined_call_operand.vmem [shape: f32[45,1], index: 2, kind: input, shape index: {}]   ;;  %s1846_s3 = inlined_call_operand.vmem [shape: f32[1,8], index: 3, kind: input, shape index: {}]   ;;  %s1847_s4 = inlined_call_operand.vmem [shape: f32[1,8], index: 4, kind: input, shape index: {}]   ;;  %s1848_s5 = inlined_call_operand.vmem [shape: f32[2,8,8,8], index: 5, kind: output, shape index: {0}]   ;;  %s1849_s6 = inlined_call_operand.vmem [shape: f32[2,8,8,1], index: 6, kind: output, shape index: {1}]  }
   0x1 LB: > { %s1110_s22 = sadd.s32 4294967295, %s1444_s21   ;;  %p1114_p0 = scmp.ge.s32.totalorder %s1444_s21, 1  ;;  %s1444_s21 = sphi %s1492_s21, %s17_s21  }
   0x2   : > { %p215_p1 = scmp.lt.s32.totalorder %s1444_s21, 3 }
   0x4   : > { %p216_p2 = pnand %p1114_p0, %p215_p1 }
   0x5   : > { %p250_p3 = scmp.lt.s32.totalorder (!%p216_p2), %s1110_s22, 1  ;;  %s1446_s27 = smov (!%p216_p2), 10  }
   0x6   : > { %219 = sbr.rel (%p216_p2) target bundleno = 558 (0x22e), region = 40  ;;  %s1447_s28 = smov (!%p216_p2), 5  }
   0x7   : > { %s1448_s29 = smov (!%p216_p2), 15   ;;  %s1450_s30 = smov (!%p216_p2), 20  }
   0x8   : > { %s1451_s19 = smov (!%p216_p2), 25   ;;  %s1452_s11 = smov (!%p216_p2), 30  }
   0x9   : > { %s1453_s16 = smov (!%p216_p2), 35   ;;  %s1454_s17 = smov (!%p216_p2), 40  }
   0xb   : > { %s1851_s22 = smov (!%p250_p3, %s1110_s22), 1  ;;  %vm697_vm0 = vcmask 1045504   ;;  %vm698_vm1 = vcmask 1046528   ;;  %v1449_v28 = vmov 65535   ;;  %v679_v36 = vld [vmem:[%s1844_s1 + $0x20] sm:$0xff]  ;;  %v677_v42 = vld [vmem:[%s1844_s1 + $0x10] sm:$0xff] }
   0xc   : > { %s1240_s23 = smul.u32 576, %s1851_s22  ;;  %v699_v29 = vsel %vm697_vm0, 4294967295, %v1449_v28  ;;  %v680_v37 = vld [vmem:[%s1844_s1 + $0x28] sm:$0x1f]  ;;  %v773_v39 = vld [vmem:[%s1845_s2 + $0x20] sm:$0xff]  ;;  %v678_v43 = vld [vmem:[%s1844_s1 + $0x18] sm:$0xff] }
   0xd   : > { %v700_v38 = vsel %vm698_vm1, %v699_v29, 0  ;;  %v683_v40 = vpack.c.bf16 %v680_v37, %v679_v36  ;;  %v774_v41 = vld [vmem:[%s1845_s2 + $0x28] sm:$0x1f]  ;;  %v771_v46 = vld [vmem:[%s1845_s2 + $0x10] sm:$0xff]  ;;  %v772_v47 = vld [vmem:[%s1845_s2 + $0x18] sm:$0xff]  ;;  %v682_v52 = vpack.c.bf16 %v678_v43, %v677_v42  ;;  %vm599_vm2 = vcmask 39936  }
   0xe   : > { %s1506_s26 = scalar_lea.vmem %s1843_s0, %s1240_s23  ;;  %v777_v45 = vpack.c.bf16 %v774_v41, %v773_v39  ;;  %v776_v53 = vpack.c.bf16 %v772_v47, %v771_v46  ;;  %v675_v54 = vld [vmem:[%s1844_s1] sm:$0xff]  ;;  %v676_v55 = vld [vmem:[%s1844_s1 + $0x8] sm:$0xff]  ;;  %vm608_vm3 = vcmask 80896   ;;  %vm617_vm4 = vcmask 121856  }
   0xf   : > { %v283_v0 = vld [vmem:[%s1506_s26 + $0x1] sm:$0xff]  ;;  %v1510_v1 = vld [vmem:[%s1506_s26 + $0x11] sm:$0xff]  ;;  %v702_v50 = vand.u32 %v700_v38, %v683_v40  ;;  %v681_v61 = vpack.c.bf16 %v676_v55, %v675_v54  ;;  %vm626_vm5 = vcmask 162816   ;;  %vm635_vm6 = vcmask 203776  }
  0x10   : > { %v1120_v2 = vld [vmem:[%s1506_s26 + $0x90] sm:$0xff]  ;;  %v1270_v3 = vpack.i.bf16 %v1510_v1, %v283_v0  ;;  %v1515_v4 = vld [vmem:[%s1506_s26 + $0xa0] sm:$0xff]  ;;  %v779_v51 = vand.u32 %v777_v45, %v700_v38  ;;  %v770_v58 = vld [vmem:[%s1845_s2 + $0x8] sm:$0xff]  ;;  %vm644_vm7 = vcmask 244736   ;;  %vm653_vm8 = vcmask 285696  }
  0x11   : > { %v1518_v5 = vld [vmem:[%s1506_s26 + $0x21] sm:$0xff]  ;;  %v1521_v6 = vld [vmem:[%s1506_s26 + $0x31] sm:$0xff]  ;;  %v1260_v7 = vpack.i.bf16 %v1515_v4, %v1120_v2  ;;  %1212 = vmatprep.subr.bf16.mxu0 %v702_v50  ;;  %vm662_vm9 = vcmask 326656   ;;  %vm684_vm10 = vcmask 367616   ;;  %vm1013_vm11 = vcmask 7168  }
  0x12   : > { %v1525_v8 = vld [vmem:[%s1506_s26 + $0xb0] sm:$0xff]  ;;  %v1528_v9 = vld [vmem:[%s1506_s26 + $0xc0] sm:$0xff]  ;;  %1271 = vrot.lane.b32.xlu1 %v1270_v3, %s1446_s27  ;;  %v1275_v10 = vpack.i.bf16 %v1521_v6, %v1518_v5  ;;  %1226 = vmatprep.subr.bf16.mxu1 %v779_v51  ;;  %v1330_v0 = vpack.i.bf16 %v1518_v5, %v1510_v1 }
  0x13   : > { %1261 = vrot.lane.b32.xlu0 %v1260_v7, %s1447_s28  ;;  %v1265_v11 = vpack.i.bf16 %v1528_v9, %v1525_v8  ;;  %v1130_v12 = vld [vmem:[%s1506_s26 + $0x140] sm:$0xff]  ;;  %v1131_v13 = vld [vmem:[%s1506_s26 + $0x150] sm:$0xff]  ;;  %v1320_v59 = vpack.i.bf16 %v1525_v8, %v1515_v4  ;;  %1213 = vmatpush3.bf16.msra.mxu0 %v702_v50 }
  0x14   : > { %v1128_v14 = vld [vmem:[%s1506_s26 + $0x120] sm:$0xff]  ;;  %v1129_v15 = vld [vmem:[%s1506_s26 + $0x130] sm:$0xff]  ;;  %v1285_v16 = vpack.i.bf16 %v1131_v13, %v1130_v12  ;;  %1227 = vmatpush3.bf16.msra.mxu1 %v779_v51  ;;  %1214 = vmatprep.subr.bf16.mxu0 %v682_v52 }
  0x15   : > { %v1280_v17 = vpack.i.bf16 %v1129_v15, %v1128_v14  ;;  %v1138_v18 = vld [vmem:[%s1506_s26 + $0x1d0] sm:$0xff]  ;;  %v1139_v19 = vld [vmem:[%s1506_s26 + $0x1e0] sm:$0xff]  ;;  %1228 = vmatprep.subr.bf16.mxu1 %v776_v53 }
  0x16   : > { %1276 = vrot.lane.b32.xlu1 %v1275_v10, %s1446_s27  ;;  %v1136_v20 = vld [vmem:[%s1506_s26 + $0x1b0] sm:$0xff]  ;;  %v1137_v21 = vld [vmem:[%s1506_s26 + $0x1c0] sm:$0xff]  ;;  %v1295_v22 = vpack.i.bf16 %v1139_v19, %v1138_v18 }
  0x17   : > { %1266 = vrot.lane.b32.xlu0 %v1265_v11, %s1447_s28  ;;  %v1290_v23 = vpack.i.bf16 %v1137_v21, %v1136_v20  ;;  %v1146_v24 = vld [vmem:[%s1506_s26 + $0x141] sm:$0xff]  ;;  %v1147_v25 = vld [vmem:[%s1506_s26 + $0x151] sm:$0xff]  ;;  %1215 = vmatpush3.bf16.msra.mxu0 %v682_v52 }
  0x18   : > { %v1144_v26 = vld [vmem:[%s1506_s26 + $0x121] sm:$0xff]  ;;  %v1145_v27 = vld [vmem:[%s1506_s26 + $0x131] sm:$0xff]  ;;  %v1305_v30 = vpack.i.bf16 %v1147_v25, %v1146_v24  ;;  %1229 = vmatpush3.bf16.msra.mxu1 %v776_v53  ;;  %1216 = vmatprep.subr.bf16.mxu0 %v681_v61 }
  0x19   : > { %v1554_v31 = vld [vmem:[%s1506_s26 + $0x30] sm:$0xff]  ;;  %v1300_v32 = vpack.i.bf16 %v1145_v27, %v1144_v26  ;;  %v1558_v33 = vld [vmem:[%s1506_s26 + $0x40] sm:$0xff] }
  0x1a   : > { %1286 = vrot.lane.b32.xlu1 %v1285_v16, %s1448_s29  ;;  %v1561_v34 = vld [vmem:[%s1506_s26 + $0x10] sm:$0xff]  ;;  %v1564_v35 = vld [vmem:[%s1506_s26 + $0x20] sm:$0xff]  ;;  %v1315_v44 = vpack.i.bf16 %v1558_v33, %v1554_v31 }
  0x1b   : > { %1281 = vrot.lane.b32.xlu0 %v1280_v17, %s1448_s29  ;;  %v1310_v48 = vpack.i.bf16 %v1564_v35, %v1561_v34  ;;  %v1163_v49 = vld [vmem:[%s1506_s26 + $0xd0] sm:$0xff]  ;;  %v769_v57 = vld [vmem:[%s1845_s2] sm:$0xff]  ;;  %1217 = vmatpush3.bf16.msra.mxu0 %v681_v61 }
  0x1c   : > { %v1325_v56 = vpack.i.bf16 %v1163_v49, %v1528_v9  ;;  %v1615_v60 = vld [vmem:[%s1506_s26 + $0xe0] sm:$0xff]  ;;  %v775_v62 = vpack.c.bf16 %v770_v58, %v769_v57  ;;  %v1126_v2 = vld [vmem:[%s1506_s26 + $0xf0] sm:$0xff] }
  0x1d   : > { %v1335_v63 = vpack.i.bf16 %v1615_v60, %v1163_v49  ;;  %v1127_v3 = vld [vmem:[%s1506_s26 + $0x100] sm:$0xff]  ;;  %v290_v8 = vld [vmem:[%s1506_s26 + $0x71] sm:$0xff]  ;;  %v1400_v41 = vpack.i.bf16 %v1126_v2, %v1615_v60 }
  0x1e   : > { %1296 = vrot.lane.b32.xlu1 %v1295_v22, %s1450_s30  ;;  %v1171_v4 = vld [vmem:[%s1506_s26 + $0x41] sm:$0xff]  ;;  %1230 = vmatprep.subr.bf16.mxu1 %v775_v62  ;;  %v1345_v7 = vpack.i.bf16 %v1127_v3, %v1126_v2  ;;  %v288_v9 = vld [vmem:[%s1506_s26 + $0x51] sm:$0xff] }
  0x1f   : > { %1291 = vrot.lane.b32.xlu0 %v1290_v23, %s1450_s30  ;;  %v1340_v1 = vpack.i.bf16 %v1171_v4, %v1521_v6  ;;  %v289_v5 = vld [vmem:[%s1506_s26 + $0x61] sm:$0xff]  ;;  %1231 = vmatpush3.bf16.msra.mxu1 %v775_v62  ;;  %v1350_v11 = vpack.i.bf16 %v288_v9, %v1171_v4  ;;  %v1135_v13 = vld [vmem:[%s1506_s26 + $0x190] sm:$0xff] }
  0x20   : > { %v1355_v10 = vpack.i.bf16 %v290_v8, %v289_v5  ;;  %v1134_v12 = vld [vmem:[%s1506_s26 + $0x180] sm:$0xff]  ;;  %v1133_v14 = vld [vmem:[%s1506_s26 + $0x170] sm:$0xff] }
  0x21   : > { %v1132_v6 = vld [vmem:[%s1506_s26 + $0x160] sm:$0xff]  ;;  %v1365_v15 = vpack.i.bf16 %v1135_v13, %v1134_v12  ;;  %v1142_v17 = vld [vmem:[%s1506_s26 + $0x210] sm:$0xff] }
  0x22   : > { %1306 = vrot.lane.b32.xlu1 %v1305_v30, %s1451_s19  ;;  %v1360_v16 = vpack.i.bf16 %v1133_v14, %v1132_v6  ;;  %v1143_v18 = vld [vmem:[%s1506_s26 + $0x220] sm:$0xff]  ;;  %v1140_v19 = vld [vmem:[%s1506_s26 + $0x1f0] sm:$0xff] }
  0x23   : > { %1301 = vrot.lane.b32.xlu0 %v1300_v32, %s1451_s19  ;;  %v1141_v20 = vld [vmem:[%s1506_s26 + $0x200] sm:$0xff]  ;;  %v1375_v21 = vpack.i.bf16 %v1143_v18, %v1142_v17  ;;  %v1151_v24 = vld [vmem:[%s1506_s26 + $0x191] sm:$0xff] }
  0x24   : > { %v1370_v22 = vpack.i.bf16 %v1141_v20, %v1140_v19  ;;  %v1150_v23 = vld [vmem:[%s1506_s26 + $0x181] sm:$0xff]  ;;  %v1149_v26 = vld [vmem:[%s1506_s26 + $0x171] sm:$0xff] }
  0x25   : > { %v1148_v25 = vld [vmem:[%s1506_s26 + $0x161] sm:$0xff]  ;;  %v1385_v27 = vpack.i.bf16 %v1151_v24, %v1150_v23  ;;  %v1652_v29 = vld [vmem:[%s1506_s26 + $0x70] sm:$0xff] }
  0x26   : > { %1316 = vrot.lane.b32.xlu1 %v1315_v44, %s1452_s11  ;;  %v1380_v28 = vpack.i.bf16 %v1149_v26, %v1148_v25  ;;  %v1159_v30 = vld [vmem:[%s1506_s26 + $0x80] sm:$0xff]  ;;  %v1656_v32 = vld [vmem:[%s1506_s26 + $0x50] sm:$0xff]  ;;  %v1410_v44 = vpack.i.bf16 %v289_v5, %v288_v9 }
  0x27   : > { %1311 = vrot.lane.b32.xlu0 %v1310_v48, %s1452_s11  ;;  %v1659_v36 = vld [vmem:[%s1506_s26 + $0x60] sm:$0xff]  ;;  %v1395_v37 = vpack.i.bf16 %v1159_v30, %v1652_v29  ;;  %v1167_v39 = vld [vmem:[%s1506_s26 + $0x110] sm:$0xff] }
  0x28   : > { %v1390_v38 = vpack.i.bf16 %v1659_v36, %v1656_v32  ;;  %v1405_v40 = vpack.i.bf16 %v1167_v39, %v1127_v3  ;;  %v1175_v42 = vld [vmem:[%s1506_s26 + $0x81] sm:$0xff] }
  0x29   : > { %v1415_v43 = vpack.i.bf16 %v1175_v42, %v290_v8 }
  0x2a   : > { %1326 = vrot.lane.b32.xlu1 %v1325_v56, %s1453_s16  ;;  %v266_v56 = vld [vmem:[%s1506_s26] sm:$0xff]  ;;  %s1196_s26 = sshll.u32 %s1851_s22, 6 }
  0x2b   : > { %1321 = vrot.lane.b32.xlu0 %v1320_v59, %s1453_s16  ;;  %s1809_s25 = scalar_lea.vmem %s1848_s5, %s1196_s26 }
  0x2e   : > { %1336 = vrot.lane.b32.xlu1 %v1335_v63, %s1447_s28 }
  0x2f   : > { %1331 = vrot.lane.b32.xlu0 %v1330_v0, %s1454_s17 }
  0x32   : > { %1346 = vrot.lane.b32.xlu1 %v1345_v7, %s1447_s28 }
  0x33   : > { %1341 = vrot.lane.b32.xlu0 %v1340_v1, %s1454_s17 }
  0x36   : > { %1356 = vrot.lane.b32.xlu1 %v1355_v10, %s1446_s27 }
  0x37   : > { %1351 = vrot.lane.b32.xlu0 %v1350_v11, %s1446_s27 }
  0x3a   : > { %1366 = vrot.lane.b32.xlu1 %v1365_v15, %s1448_s29 }
  0x3b   : > { %1361 = vrot.lane.b32.xlu0 %v1360_v16, %s1448_s29  ;;  %s1773_s29 = scalar_lea.vmem %s1849_s6, %s1196_s26 }
  0x3e   : > { %1376 = vrot.lane.b32.xlu1 %v1375_v21, %s1450_s30 }
  0x3f   : > { %1371 = vrot.lane.b32.xlu0 %v1370_v22, %s1450_s30 }
  0x42   : > { %1386 = vrot.lane.b32.xlu1 %v1385_v27, %s1451_s19 }
  0x43   : > { %1381 = vrot.lane.b32.xlu0 %v1380_v28, %s1451_s19 }
  0x46   : > { %1396 = vrot.lane.b32.xlu1 %v1395_v37, %s1452_s11 }
  0x47   : > { %1391 = vrot.lane.b32.xlu0 %v1390_v38, %s1452_s11 }
  0x4a   : > { %1406 = vrot.lane.b32.xlu1 %v1405_v40, %s1453_s16 }
  0x4b   : > { %1401 = vrot.lane.b32.xlu0 %v1400_v41, %s1453_s16 }
  0x4e   : > { %1416 = vrot.lane.b32.xlu1 %v1415_v43, %s1454_s17 }
  0x4f   : > { %1411 = vrot.lane.b32.xlu0 %v1410_v44, %s1454_s17 }
  0x84   : > { %v1272_v45 = vpop.permute.xlu1 %1271 }
  0x85   : > { %v1262_v46 = vpop.permute.xlu0 %1261  ;;  %v1274_v60 = vunpack.i.h.bf16 %v1272_v45  ;;  %v1273_v61 = vunpack.i.l.bf16 %v1272_v45 }
  0x86   : > { %v1264_v53 = vunpack.i.h.bf16 %v1262_v46  ;;  %v1263_v54 = vunpack.i.l.bf16 %v1262_v46 }
  0x88   : > { %v1277_v47 = vpop.permute.xlu1 %1276  ;;  %v600_v62 = vsel %vm599_vm2, %v266_v56, %v1263_v54  ;;  %v601_v63 = vsel %vm599_vm2, %v1561_v34, %v1264_v53 }
  0x89   : > { %v1267_v48 = vpop.permute.xlu0 %1266  ;;  %v1279_v0 = vunpack.i.h.bf16 %v1277_v47  ;;  %v1278_v2 = vunpack.i.l.bf16 %v1277_v47  ;;  %v609_v11 = vsel %vm608_vm3, %v600_v62, %v1273_v61  ;;  %v610_v34 = vsel %vm608_vm3, %v601_v63, %v1274_v60 }
  0x8a   : > { %v1269_v57 = vunpack.i.h.bf16 %v1267_v48  ;;  %v1268_v58 = vunpack.i.l.bf16 %v1267_v48 }
  0x8c   : > { %v1287_v49 = vpop.permute.xlu1 %1286  ;;  %v602_v4 = vsel %vm599_vm2, %v1564_v35, %v1268_v58  ;;  %v603_v7 = vsel %vm599_vm2, %v1554_v31, %v1269_v57 }
  0x8d   : > { %v1282_v50 = vpop.permute.xlu0 %1281  ;;  %v1289_v1 = vunpack.i.h.bf16 %v1287_v49  ;;  %v1288_v5 = vunpack.i.l.bf16 %v1287_v49  ;;  %v611_v12 = vsel %vm608_vm3, %v602_v4, %v1278_v2  ;;  %v612_v35 = vsel %vm608_vm3, %v603_v7, %v1279_v0 }
  0x8e   : > { %v1284_v9 = vunpack.i.h.bf16 %v1282_v50  ;;  %v1283_v10 = vunpack.i.l.bf16 %v1282_v50 }
  0x8f   : > { %v620_v14 = vsel %vm617_vm4, %v611_v12, %v1288_v5  ;;  %v621_v15 = vsel %vm617_vm4, %v612_v35, %v1289_v1 }
  0x90   : > { %v1675_v51 = vpop.permute.xlu1 %1296  ;;  %v618_v19 = vsel %vm617_vm4, %v609_v11, %v1283_v10  ;;  %v619_v20 = vsel %vm617_vm4, %v610_v34, %v1284_v9 }
  0x91   : > { %v1292_v52 = vpop.permute.xlu0 %1291  ;;  %v1299_v23 = vunpack.i.h.bf16 %v1675_v51  ;;  %v1298_v24 = vunpack.i.l.bf16 %v1675_v51 }
  0x92   : > { %v1294_v13 = vunpack.i.h.bf16 %v1292_v52  ;;  %v1293_v6 = vunpack.i.l.bf16 %v1292_v52 }
  0x93   : > { %v629_v52 = vsel %vm626_vm5, %v620_v14, %v1298_v24  ;;  %v630_v53 = vsel %vm626_vm5, %v621_v15, %v1299_v23 }
  0x94   : > { %v1677_v55 = vpop.permute.xlu1 %1306  ;;  %v627_v27 = vsel %vm626_vm5, %v618_v19, %v1293_v6  ;;  %v628_v28 = vsel %vm626_vm5, %v619_v20, %v1294_v13 }
  0x95   : > { %v1302_v59 = vpop.permute.xlu0 %1301  ;;  %v1309_v30 = vunpack.i.h.bf16 %v1677_v55  ;;  %v1308_v37 = vunpack.i.l.bf16 %v1677_v55 }
  0x96   : > { %v1304_v16 = vunpack.i.h.bf16 %v1302_v59  ;;  %v1303_v17 = vunpack.i.l.bf16 %v1302_v59 }
  0x97   : > { %v638_v57 = vsel %vm635_vm6, %v629_v52, %v1308_v37  ;;  %v639_v58 = vsel %vm635_vm6, %v630_v53, %v1309_v30 }
  0x98   : > { %v1683_v3 = vpop.permute.xlu1 %1316  ;;  %v636_v39 = vsel %vm635_vm6, %v627_v27, %v1303_v17  ;;  %v637_v40 = vsel %vm635_vm6, %v628_v28, %v1304_v16 }
  0x99   : > { %v1312_v8 = vpop.permute.xlu0 %1311  ;;  %v1319_v41 = vunpack.i.h.bf16 %v1683_v3  ;;  %v1318_v42 = vunpack.i.l.bf16 %v1683_v3 }
  0x9a   : > { %v1314_v21 = vunpack.i.h.bf16 %v1312_v8  ;;  %v1313_v22 = vunpack.i.l.bf16 %v1312_v8 }
  0x9b   : > { %v647_v61 = vsel %vm644_vm7, %v638_v57, %v1318_v42  ;;  %v648_v62 = vsel %vm644_vm7, %v639_v58, %v1319_v41 }
  0x9c   : > { %v1327_v31 = vpop.permute.xlu1 %1326  ;;  %v645_v44 = vsel %vm644_vm7, %v636_v39, %v1313_v22  ;;  %v646_v45 = vsel %vm644_vm7, %v637_v40, %v1314_v21 }
  0x9d   : > { %v1322_v18 = vpop.permute.xlu0 %1321  ;;  %v1329_v48 = vunpack.i.h.bf16 %v1327_v31  ;;  %v1328_v49 = vunpack.i.l.bf16 %v1327_v31 }
  0x9e   : > { %v1324_v25 = vunpack.i.h.bf16 %v1322_v18  ;;  %v1323_v26 = vunpack.i.l.bf16 %v1322_v18 }
  0x9f   : > { %v656_v2 = vsel %vm653_vm8, %v647_v61, %v1328_v49  ;;  %v657_v3 = vsel %vm653_vm8, %v648_v62, %v1329_v48 }
  0xa0   : > { %v1337_v38 = vpop.permute.xlu1 %1336  ;;  %v654_v50 = vsel %vm653_vm8, %v645_v44, %v1323_v26  ;;  %v655_v51 = vsel %vm653_vm8, %v646_v45, %v1324_v25 }
  0xa1   : > { %v1332_v43 = vpop.permute.xlu0 %1331  ;;  %v1339_v13 = vunpack.i.h.bf16 %v1337_v38  ;;  %v1338_v6 = vunpack.i.l.bf16 %v1337_v38 }
  0xa2   : > { %v1334_v46 = vunpack.i.h.bf16 %v1332_v43  ;;  %v1333_v47 = vunpack.i.l.bf16 %v1332_v43 }
  0xa3   : > { %v604_v25 = vsel %vm599_vm2, %v1558_v33, %v1338_v6  ;;  %v605_v26 = vsel %vm599_vm2, %v1656_v32, %v1339_v13 }
  0xa4   : > { %v1347_v54 = vpop.permute.xlu1 %1346  ;;  %v663_v55 = vsel %vm662_vm9, %v654_v50, %v1333_v47  ;;  %v664_v56 = vsel %vm662_vm9, %v655_v51, %v1334_v46 }
  0xa5   : > { %v1342_v59 = vpop.permute.xlu0 %1341  ;;  %v671_v60 = vpack.c.bf16 %v664_v56, %v663_v55  ;;  %v1349_v12 = vunpack.i.h.bf16 %v1347_v54  ;;  %v1348_v35 = vunpack.i.l.bf16 %v1347_v54 }
  0xa6   : > { %v1344_v63 = vunpack.i.h.bf16 %v1342_v59  ;;  %v1343_v0 = vunpack.i.l.bf16 %v1342_v59 }
  0xa7   : > { %1218 = vmatprep.mubr.msk.bf16.mxu0 %vm684_vm10, %v671_v60  ;;  %1232 = vmatprep.mubr.msk.bf16.mxu1 %vm684_vm10, %v671_v60  ;;  %v606_v21 = vsel %vm599_vm2, %v1659_v36, %v1348_v35  ;;  %v607_v22 = vsel %vm599_vm2, %v1652_v29, %v1349_v12 }
  0xa8   : > { %v665_v4 = vsel %vm662_vm9, %v656_v2, %v1343_v0  ;;  %v666_v7 = vsel %vm662_vm9, %v657_v3, %v1344_v63  ;;  %v1357_v1 = vpop.permute.xlu1 %1356 }
  0xa9   : > { %v672_v5 = vpack.c.bf16 %v666_v7, %v665_v4  ;;  %v1352_v8 = vpop.permute.xlu0 %1351  ;;  %v1359_v31 = vunpack.i.h.bf16 %v1357_v1  ;;  %v1358_v14 = vunpack.i.l.bf16 %v1357_v1 }
  0xaa   : > { %v1354_v16 = vunpack.i.h.bf16 %v1352_v8  ;;  %v1353_v17 = vunpack.i.l.bf16 %v1352_v8 }
  0xab   : > { %1219 = vmatmul.mubr.msk.bf16.vlgmr.msra.gmra.mxu0 %vm684_vm10, %v672_v5  ;;  %1233 = vmatmul.mubr.msk.bf16.vlgmr.msra.gmra.mxu1 %vm684_vm10, %v672_v5  ;;  %v615_v27 = vsel %vm608_vm3, %v606_v21, %v1358_v14  ;;  %v616_v28 = vsel %vm608_vm3, %v607_v22, %v1359_v31  ;;  %v1456_v22 = vmov 0.0  }
  0xac   : > { %v1367_v9 = vpop.permute.xlu1 %1366  ;;  %v613_v37 = vsel %vm608_vm3, %v604_v25, %v1353_v17  ;;  %v614_v36 = vsel %vm608_vm3, %v605_v26, %v1354_v16 }
  0xad   : > { %v1362_v10 = vpop.permute.xlu0 %1361  ;;  %v1369_v19 = vunpack.i.h.bf16 %v1367_v9  ;;  %v1368_v20 = vunpack.i.l.bf16 %v1367_v9 }
  0xae   : > { %v1364_v23 = vunpack.i.h.bf16 %v1362_v10  ;;  %v1363_v24 = vunpack.i.l.bf16 %v1362_v10 }
  0xaf   : > { %v624_v40 = vsel %vm617_vm4, %v615_v27, %v1368_v20  ;;  %v625_v41 = vsel %vm617_vm4, %v616_v28, %v1369_v19  ;;  %v1455_v19 = vmov 0  }
  0xb0   : > { %v1377_v11 = vpop.permute.xlu1 %1376  ;;  %v622_v32 = vsel %vm617_vm4, %v613_v37, %v1363_v24  ;;  %v623_v43 = vsel %vm617_vm4, %v614_v36, %v1364_v23  ;;  %1420 = vset.pattern.permute.xlu1 %v1455_v19  ;;  %1421 = vset.pattern.permute.xlu0 %v1455_v19  ;;  %vm1004_vm4 = vcmask 64512  }
  0xb1   : > { %v1372_v34 = vpop.permute.xlu0 %1371  ;;  %v1379_v38 = vunpack.i.h.bf16 %v1377_v11  ;;  %v1378_v39 = vunpack.i.l.bf16 %v1377_v11 }
  0xb2   : > { %v1374_v33 = vunpack.i.h.bf16 %v1372_v34  ;;  %v1373_v42 = vunpack.i.l.bf16 %v1372_v34 }
  0xb3   : > { %v633_v51 = vsel %vm626_vm5, %v624_v40, %v1378_v39  ;;  %v634_v52 = vsel %vm626_vm5, %v625_v41, %v1379_v38 }
  0xb4   : > { %v1387_v15 = vpop.permute.xlu1 %1386  ;;  %v631_v56 = vsel %vm626_vm5, %v622_v32, %v1373_v42  ;;  %v632_v57 = vsel %vm626_vm5, %v623_v43, %v1374_v33 }
  0xb5   : > { %v1382_v18 = vpop.permute.xlu0 %1381  ;;  %v1389_v44 = vunpack.i.h.bf16 %v1387_v15  ;;  %v1388_v45 = vunpack.i.l.bf16 %v1387_v15 }
  0xb6   : > { %v1384_v46 = vunpack.i.h.bf16 %v1382_v18  ;;  %v1383_v47 = vunpack.i.l.bf16 %v1382_v18 }
  0xb7   : > { %v642_v60 = vsel %vm635_vm6, %v633_v51, %v1388_v45  ;;  %v643_v61 = vsel %vm635_vm6, %v634_v52, %v1389_v44 }
  0xb8   : > { %v1397_v30 = vpop.permute.xlu1 %1396  ;;  %v640_v0 = vsel %vm635_vm6, %v631_v56, %v1383_v47  ;;  %v641_v2 = vsel %vm635_vm6, %v632_v57, %v1384_v46 }
  0xb9   : > { %v1392_v29 = vpop.permute.xlu0 %1391  ;;  %v1399_v48 = vunpack.i.h.bf16 %v1397_v30  ;;  %v1398_v49 = vunpack.i.l.bf16 %v1397_v30 }
  0xba   : > { %v1394_v53 = vunpack.i.h.bf16 %v1392_v29  ;;  %v1393_v54 = vunpack.i.l.bf16 %v1392_v29 }
  0xbb   : > { %v651_v3 = vsel %vm644_vm7, %v642_v60, %v1398_v49  ;;  %v652_v4 = vsel %vm644_vm7, %v643_v61, %v1399_v48 }
  0xbc   : > { %v1407_v50 = vpop.permute.xlu1 %1406  ;;  %v649_v1 = vsel %vm644_vm7, %v640_v0, %v1393_v54  ;;  %v650_v5 = vsel %vm644_vm7, %v641_v2, %v1394_v53 }
  0xbd   : > { %v1402_v55 = vpop.permute.xlu0 %1401  ;;  %v1409_v58 = vunpack.i.h.bf16 %v1407_v50  ;;  %v1408_v59 = vunpack.i.l.bf16 %v1407_v50 }
  0xbe   : > { %v1404_v62 = vunpack.i.h.bf16 %v1402_v55  ;;  %v1403_v63 = vunpack.i.l.bf16 %v1402_v55 }
  0xbf   : > { %v660_v11 = vsel %vm653_vm8, %v651_v3, %v1408_v59  ;;  %v661_v34 = vsel %vm653_vm8, %v652_v4, %v1409_v58 }
  0xc0   : > { %v1417_v7 = vpop.permute.xlu1 %1416  ;;  %v658_v13 = vsel %vm653_vm8, %v649_v1, %v1403_v63  ;;  %v659_v6 = vsel %vm653_vm8, %v650_v5, %v1404_v62 }
  0xc1   : > { %v1419_v8 = vunpack.i.h.bf16 %v1417_v7  ;;  %v1418_v9 = vunpack.i.l.bf16 %v1417_v7  ;;  %v1412_v10 = vpop.permute.xlu0 %1411 }
  0xc2   : > { %v1414_v12 = vunpack.i.h.bf16 %v1412_v10  ;;  %v1413_v35 = vunpack.i.l.bf16 %v1412_v10 }
  0xc3   : > { %v669_v31 = vsel %vm662_vm9, %v660_v11, %v1418_v9  ;;  %v670_v14 = vsel %vm662_vm9, %v661_v34, %v1419_v8  ;;  %v1794_v11 = vld [vmem:[%s1846_s3] ss:$0 sm:$0xff] }
  0xc4   : > { %v674_v15 = vpack.c.bf16 %v670_v14, %v669_v31  ;;  %v667_v16 = vsel %vm662_vm9, %v658_v13, %v1413_v35  ;;  %v668_v17 = vsel %vm662_vm9, %v659_v6, %v1414_v12  ;;  %v1799_v35 = vld [vmem:[%s1847_s4] ss:$0 sm:$0xff] }
  0xc5   : > { %v673_v18 = vpack.c.bf16 %v668_v17, %v667_v16 }
  0xc7   : > { %1222 = vmatprep.mubr.msk.bf16.mxu0 %vm684_vm10, %v673_v18  ;;  %1236 = vmatprep.mubr.msk.bf16.mxu1 %vm684_vm10, %v673_v18 }
  0xc8   : > { %1223 = vmatmul.mubr.msk.bf16.gmra.mxu0 %vm684_vm10, %v674_v15  ;;  %1237 = vmatmul.mubr.msk.bf16.gmra.mxu1 %vm684_vm10, %v674_v15 }
 0x16b   : > { %v1234_v20 = vpop.f32.mrf.mxu1  ;;  %v1220_v9 = vpop.f32.mrf.mxu0 }
 0x16c   : > { %vm848_vm12 = vcmp.gt.f32.partialorder %v1234_v20, 0.0  ;;  %v872_v21 = vadd.f32 1e-08, %v1234_v20 }
 0x16d   : > { %v1186_v23 = vsel %vm848_vm12, 1.0, %v1456_v22  ;;  %v815_v24 = vpop.f32.mrf.mxu1  ;;  %v738_v10 = vpop.f32.mrf.mxu0 }
 0x16e   : > { %1422 = vrcp.f32 %v872_v21  ;;  %1016 = vst.msk [vmem:[%s1773_s29 + $0x10] sm:$0xff] %vm1013_vm11, %v1186_v23  ;;  %vm846_vm13 = vcmp.gt.f32.partialorder %v815_v24, 0.0  ;;  %v870_v25 = vadd.f32 1e-08, %v815_v24 }
 0x16f   : > { %v1184_v26 = vsel %vm846_vm13, 1.0, %v1456_v22  ;;  %v1235_v27 = vpop.f32.mrf.mxu1  ;;  %v1221_v6 = vpop.f32.mrf.mxu0 }
 0x170   : > { %1424 = vrcp.f32 %v870_v25  ;;  %1014 = vst.msk [vmem:[%s1773_s29] sm:$0xff] %vm1013_vm11, %v1184_v26  ;;  %vm849_vm14 = vcmp.gt.f32.partialorder %v1235_v27, 0.0  ;;  %v873_v28 = vadd.f32 1e-08, %v1235_v27 }
 0x171   : > { %v1187_v30 = vsel %vm849_vm14, 1.0, %v1456_v22  ;;  %v818_v37 = vpop.f32.mrf.mxu1  ;;  %v741_v19 = vpop.f32.mrf.mxu0 }
 0x172   : > { %1426 = vrcp.f32 %v873_v28  ;;  %1017 = vst.msk [vmem:[%s1773_s29 + $0x18] sm:$0xff] %vm1013_vm11, %v1187_v30  ;;  %vm847_vm15 = vcmp.gt.f32.partialorder %v818_v37, 0.0  ;;  %v871_v36 = vadd.f32 1e-08, %v818_v37 }
 0x173   : > { %v1185_v38 = vsel %vm847_vm15, 1.0, %v1456_v22 }
 0x174   : > { %1428 = vrcp.f32 %v871_v36  ;;  %1015 = vst.msk [vmem:[%s1773_s29 + $0x8] sm:$0xff] %vm1013_vm11, %v1185_v38 }
 0x17b   : > { %v1423_v39 = vpop.eup %1422 }
 0x17c   : > { %v888_v29 = vmul.f32 9.0, %v1423_v39 }
 0x17d   : > { %v1425_v40 = vpop.eup %1424 }
 0x17e   : > { %v896_v41 = vmul.f32 %v1186_v23, %v888_v29  ;;  %v886_v33 = vmul.f32 9.0, %v1425_v40 }
 0x17f   : > { %v1427_v42 = vpop.eup %1426 }
 0x180   : > { %v894_v32 = vmul.f32 %v1184_v26, %v886_v33  ;;  %v889_v43 = vmul.f32 9.0, %v1427_v42  ;;  %914 = vperm.xlu1 %1420, %v896_v41  }
 0x181   : > { %v1429_v44 = vpop.eup %1428 }
 0x182   : > { %v887_v45 = vmul.f32 9.0, %v1429_v44  ;;  %904 = vperm.xlu0 %1421, %v894_v32   ;;  %v897_v46 = vmul.f32 %v1187_v30, %v889_v43 }
 0x184   : > { %v895_v47 = vmul.f32 %v1185_v38, %v887_v45 }
 0x186   : > { %919 = vperm.xlu0 %1421, %v897_v46   ;;  %909 = vperm.xlu1 %1420, %v895_v47  }
 0x188   : > { %v1238_v48 = vpop.f32.mrf.mxu1  ;;  %v1224_v40 = vpop.f32.mrf.mxu0 }
 0x189   : > { %vm852_vm0 = vcmp.gt.f32.partialorder %v1238_v48, 0.0  ;;  %v876_v49 = vadd.f32 1e-08, %v1238_v48 }
 0x18a   : > { %v1190_v50 = vsel %vm852_vm0, 1.0, %v1456_v22  ;;  %v831_v51 = vpop.f32.mrf.mxu1  ;;  %v754_v41 = vpop.f32.mrf.mxu0 }
 0x18b   : > { %1020 = vst.msk [vmem:[%s1773_s29 + $0x30] sm:$0xff] %vm1013_vm11, %v1190_v50  ;;  %vm850_vm1 = vcmp.gt.f32.partialorder %v831_v51, 0.0  ;;  %v874_v52 = vadd.f32 1e-08, %v831_v51  ;;  %1430 = vrcp.f32 %v876_v49 }
 0x18c   : > { %v1188_v53 = vsel %vm850_vm1, 1.0, %v1456_v22  ;;  %v1239_v54 = vpop.f32.mrf.mxu1  ;;  %v1225_v33 = vpop.f32.mrf.mxu0 }
 0x18d   : > { %1432 = vrcp.f32 %v874_v52  ;;  %1018 = vst.msk [vmem:[%s1773_s29 + $0x20] sm:$0xff] %vm1013_vm11, %v1188_v53  ;;  %vm853_vm2 = vcmp.gt.f32.partialorder %v1239_v54, 0.0  ;;  %v877_v55 = vadd.f32 1e-08, %v1239_v54 }
 0x18e   : > { %v1191_v56 = vsel %vm853_vm2, 1.0, %v1456_v22  ;;  %v834_v57 = vpop.f32.mrf.mxu1  ;;  %v757_v43 = vpop.f32.mrf.mxu0 }
 0x18f   : > { %1021 = vst.msk [vmem:[%s1773_s29 + $0x38] sm:$0xff] %vm1013_vm11, %v1191_v56  ;;  %vm851_vm3 = vcmp.gt.f32.partialorder %v834_v57, 0.0  ;;  %v875_v58 = vadd.f32 1e-08, %v834_v57  ;;  %1434 = vrcp.f32 %v877_v55 }
 0x190   : > { %v1189_v59 = vsel %vm851_vm3, 1.0, %v1456_v22 }
 0x191   : > { %1436 = vrcp.f32 %v875_v58  ;;  %1019 = vst.msk [vmem:[%s1773_s29 + $0x28] sm:$0xff] %vm1013_vm11, %v1189_v59 }
 0x198   : > { %v1431_v60 = vpop.eup %1430 }
 0x199   : > { %v892_v0 = vmul.f32 9.0, %v1431_v60 }
 0x19a   : > { %v1433_v61 = vpop.eup %1432 }
 0x19b   : > { %v890_v62 = vmul.f32 9.0, %v1433_v61  ;;  %v900_v7 = vmul.f32 %v1190_v50, %v892_v0 }
 0x19c   : > { %v1435_v63 = vpop.eup %1434 }
 0x19d   : > { %v898_v2 = vmul.f32 %v1188_v53, %v890_v62  ;;  %v893_v1 = vmul.f32 9.0, %v1435_v63 }
 0x19e   : > { %v1437_v3 = vpop.eup %1436 }
 0x19f   : > { %v891_v4 = vmul.f32 9.0, %v1437_v3  ;;  %924 = vperm.xlu1 %1420, %v898_v2   ;;  %v901_v8 = vmul.f32 %v1191_v56, %v893_v1 }
 0x1a1   : > { %v899_v5 = vmul.f32 %v1189_v59, %v891_v4 }
 0x1a3   : > { %934 = vperm.xlu1 %1420, %v900_v7   ;;  %929 = vperm.xlu0 %1421, %v899_v5  }
 0x1a7   : > { %939 = vperm.xlu0 %1421, %v901_v8  }
 0x1fb   : > { %v915_v34 = vpop.permute.xlu1 %914 }
 0x1fc   : > { %v944_v12 = vmul.f32 %v1220_v9, %v915_v34 }
 0x1fd   : > { %v905_v13 = vpop.permute.xlu0 %904 }
 0x1fe   : > { %v959_v31 = vmul.f32 %v1794_v11, %v944_v12  ;;  %v942_v14 = vmul.f32 %v905_v13, %v738_v10 }
 0x200   : > { %v974_v15 = vadd.f32 %v1799_v35, %v959_v31  ;;  %v957_v16 = vmul.f32 %v1794_v11, %v942_v14 }
 0x201   : > { %v920_v17 = vpop.permute.xlu0 %919  ;;  %v910_v18 = vpop.permute.xlu1 %909 }
 0x202   : > { %vm982_vm5 = vcmp.ge.f32.partialorder %v974_v15, 0.0  ;;  %v990_v20 = vmul.f32 0.2, %v974_v15  ;;  %v972_v21 = vadd.f32 %v1799_v35, %v957_v16  ;;  %v945_v22 = vmul.f32 %v1221_v6, %v920_v17 }
 0x203   : > { %v943_v23 = vmul.f32 %v910_v18, %v741_v19 }
 0x204   : > { %v998_v24 = vsel %vm982_vm5, %v974_v15, %v990_v20  ;;  %vm980_vm6 = vcmp.ge.f32.partialorder %v972_v21, 0.0  ;;  %v988_v25 = vmul.f32 0.2, %v972_v21  ;;  %v960_v26 = vmul.f32 %v1794_v11, %v945_v22 }
 0x205   : > { %1007 = vst.msk [vmem:[%s1809_s25 + $0x10] sm:$0xff] %vm1004_vm4, %v998_v24  ;;  %v958_v27 = vmul.f32 %v1794_v11, %v943_v23 }
 0x206   : > { %v996_v28 = vsel %vm980_vm6, %v972_v21, %v988_v25  ;;  %v975_v30 = vadd.f32 %v1799_v35, %v960_v26 }
 0x207   : > { %1005 = vst.msk [vmem:[%s1809_s25] sm:$0xff] %vm1004_vm4, %v996_v28  ;;  %v973_v37 = vadd.f32 %v1799_v35, %v958_v27 }
 0x208   : > { %vm983_vm7 = vcmp.ge.f32.partialorder %v975_v30, 0.0  ;;  %v991_v36 = vmul.f32 0.2, %v975_v30 }
 0x209   : > { %vm981_vm8 = vcmp.ge.f32.partialorder %v973_v37, 0.0  ;;  %v989_v38 = vmul.f32 0.2, %v973_v37 }
 0x20a   : > { %v999_v39 = vsel %vm983_vm7, %v975_v30, %v991_v36 }
 0x20b   : > { %1008 = vst.msk [vmem:[%s1809_s25 + $0x18] sm:$0xff] %vm1004_vm4, %v999_v39  ;;  %v997_v29 = vsel %vm981_vm8, %v973_v37, %v989_v38 }
 0x20c   : > { %1006 = vst.msk [vmem:[%s1809_s25 + $0x8] sm:$0xff] %vm1004_vm4, %v997_v29 }
 0x21a   : > { %v925_v42 = vpop.permute.xlu1 %924 }
 0x21b   : > { %v946_v32 = vmul.f32 %v925_v42, %v754_v41 }
 0x21d   : > { %v961_v44 = vmul.f32 %v1794_v11, %v946_v32 }
 0x21e   : > { %v935_v45 = vpop.permute.xlu1 %934  ;;  %v930_v46 = vpop.permute.xlu0 %929 }
 0x21f   : > { %v976_v47 = vadd.f32 %v1799_v35, %v961_v44  ;;  %v948_v48 = vmul.f32 %v1224_v40, %v935_v45  ;;  %v947_v49 = vmul.f32 %v930_v46, %v757_v43 }
 0x221   : > { %vm984_vm9 = vcmp.ge.f32.partialorder %v976_v47, 0.0  ;;  %v992_v50 = vmul.f32 0.2, %v976_v47  ;;  %v963_v51 = vmul.f32 %v1794_v11, %v948_v48  ;;  %v962_v52 = vmul.f32 %v1794_v11, %v947_v49 }
 0x222   : > { %v940_v53 = vpop.permute.xlu0 %939 }
 0x223   : > { %v1000_v54 = vsel %vm984_vm9, %v976_v47, %v992_v50  ;;  %v978_v55 = vadd.f32 %v1799_v35, %v963_v51  ;;  %v977_v56 = vadd.f32 %v1799_v35, %v962_v52  ;;  %v949_v57 = vmul.f32 %v1225_v33, %v940_v53 }
 0x224   : > { %1009 = vst.msk [vmem:[%s1809_s25 + $0x20] sm:$0xff] %vm1004_vm4, %v1000_v54 }
 0x225   : > { %vm986_vm10 = vcmp.ge.f32.partialorder %v978_v55, 0.0  ;;  %v994_v58 = vmul.f32 0.2, %v978_v55  ;;  %vm985_vm11 = vcmp.ge.f32.partialorder %v977_v56, 0.0  ;;  %v993_v59 = vmul.f32 0.2, %v977_v56 }
 0x226   : > { %v964_v60 = vmul.f32 %v1794_v11, %v949_v57 }
 0x227   : > { %v1002_v61 = vsel %vm986_vm10, %v978_v55, %v994_v58  ;;  %v1001_v62 = vsel %vm985_vm11, %v977_v56, %v993_v59 }
 0x228   : > { %1011 = vst.msk [vmem:[%s1809_s25 + $0x30] sm:$0xff] %vm1004_vm4, %v1002_v61  ;;  %1010 = vst.msk [vmem:[%s1809_s25 + $0x28] sm:$0xff] %vm1004_vm4, %v1001_v62  ;;  %v979_v63 = vadd.f32 %v1799_v35, %v964_v60 }
 0x22a   : > { %vm987_vm12 = vcmp.ge.f32.partialorder %v979_v63, 0.0  ;;  %v995_v0 = vmul.f32 0.2, %v979_v63 }
 0x22c   : > { %v1003_v2 = vsel %vm987_vm12, %v979_v63, %v995_v0 }
 0x22d   : > { %1012 = vst.msk [vmem:[%s1809_s25 + $0x38] sm:$0xff] %vm1004_vm4, %v1003_v2 }
 0x22e PF: > { %s17_s21 = sadd.s32 1, %s1444_s21  }
 0x22f   : > { %p14_p4 = scmp.ge.s32.totalorder %s17_s21, 4  }
 0x231   :  { %16 = sbr.rel (!%p14_p4) target bundleno = 1 (0x1), region = 87 }

// kernel: generator_forward.55
= control target key start
LH: loop header
LB: loop body
LE: loop exit
PB: predicated region body
PF: predicated region fallthrough
CT: control target
= control target key end

     0   :  { %s1057_s21 = smov 0   ;;  %s1353_s0 = inlined_call_operand.vmem [shape: f32[2,1,4,4,33], index: 0, kind: input, shape index: {}]   ;;  %s1354_s1 = inlined_call_operand.vmem [shape: f32[297,32], index: 1, kind: input, shape index: {}]   ;;  %s1355_s2 = inlined_call_operand.vmem [shape: f32[297,1], index: 2, kind: input, shape index: {}]   ;;  %s1356_s3 = inlined_call_operand.vmem [shape: f32[1,32], index: 3, kind: input, shape index: {}]   ;;  %s1357_s4 = inlined_call_operand.vmem [shape: f32[1,32], index: 4, kind: input, shape index: {}]   ;;  %s1358_s5 = inlined_call_operand.vmem [shape: f32[2,2,2,32], index: 5, kind: output, shape index: {0}]   ;;  %s1359_s6 = inlined_call_operand.vmem [shape: f32[2,2,2,1], index: 6, kind: output, shape index: {1}]  }
   0x1 LB: > { %s854_s22 = sadd.s32 4294967295, %s1007_s21   ;;  %p858_p0 = scmp.ge.s32.totalorder %s1007_s21, 1  ;;  %s1007_s21 = sphi %s1057_s21, %s17_s21  }
   0x2   : > { %p215_p1 = scmp.lt.s32.totalorder %s1007_s21, 3 }
   0x4   : > { %p216_p2 = pnand %p858_p0, %p215_p1 }
   0x5   : > { %p250_p3 = scmp.lt.s32.totalorder (!%p216_p2), %s854_s22, 1  ;;  %s1011_s9 = smov (!%p216_p2), 103  }
   0x6   : > { %219 = sbr.rel (%p216_p2) target bundleno = 525 (0x20d), region = 40  ;;  %s1012_s12 = smov (!%p216_p2), 99  }
   0x7   : > { %s1013_s13 = smov (!%p216_p2), 8   ;;  %s1015_s20 = smov (!%p216_p2), 4  }
   0x8   : > { %s1016_s14 = smov (!%p216_p2), 37  }
   0xb   : > { %v292_v0 = vlaneseq  ;;  %v450_v1 = vld [vmem:[%s1354_s1 + $0xf0] sm:$0xff]  ;;  %v451_v2 = vld [vmem:[%s1354_s1 + $0xf8] sm:$0xff]  ;;  %v1009_v3 = vmov 1983009808   ;;  %v448_v8 = vld [vmem:[%s1354_s1 + $0xe0] sm:$0xff]  ;;  %s1361_s22 = smov (!%p250_p3, %s854_s22), 1 }
   0xc   : > { %v290_v4 = vunpack.c.l.s4 %v1009_v3  ;;  %v473_v5 = vpack.c.bf16 %v451_v2, %v450_v1  ;;  %v434_v6 = vld [vmem:[%s1354_s1 + $0x70] sm:$0xff]  ;;  %v435_v7 = vld [vmem:[%s1354_s1 + $0x78] sm:$0xff]  ;;  %v449_v11 = vld [vmem:[%s1354_s1 + $0xe8] sm:$0xff]  ;;  %v1010_v14 = vmov 0.0   ;;  %s884_s19 = sshll.u32 %s1361_s22, 4  ;;  %vm481_vm0 = vcmask 1043456  }
   0xd   : > { %v293_v9 = vshrl.u32 %v292_v0, 7  ;;  %v465_v10 = vpack.c.bf16 %v435_v7, %v434_v6  ;;  %v432_v12 = vld [vmem:[%s1354_s1 + $0x60] sm:$0xff]  ;;  %v433_v13 = vld [vmem:[%s1354_s1 + $0x68] sm:$0xff]  ;;  %939 = vmatprep.subr.bf16.mxu1 %v1010_v14  ;;  %v472_v16 = vpack.c.bf16 %v449_v11, %v448_v8  ;;  %v446_v17 = vld [vmem:[%s1354_s1 + $0xd0] sm:$0xff]  ;;  %s1102_s24 = scalar_lea.vmem %s1353_s0, %s884_s19  ;;  %vm482_vm1 = vcmask 1044480   ;;  %s1017_s19 = smov 33  }
   0xe   : > { %v291_v15 = vunpack.c.0.s8 %v290_v4  ;;  %887 = vmatprep.subr.bf16.mxu0 %v473_v5  ;;  %v447_v18 = vld [vmem:[%s1354_s1 + $0xd8] sm:$0xff]  ;;  %v464_v19 = vpack.c.bf16 %v433_v13, %v432_v12  ;;  %v430_v22 = vld [vmem:[%s1354_s1 + $0x50] sm:$0xff]  ;;  %v992_v24 = vld.sshfl [vmem:[%s1102_s24 + $0x9] sm:$0xf pattern:$0x76325410] }
   0xf   : > { %888 = vmatpush3.bf16.msra.mxu0 %v465_v10  ;;  %v471_v21 = vpack.c.bf16 %v447_v18, %v446_v17  ;;  %v431_v23 = vld [vmem:[%s1354_s1 + $0x58] sm:$0xff]  ;;  %v993_v25 = vld.sshfl [vmem:[%s1102_s24 + $0x4] sm:$0xf pattern:$0x76325410]  ;;  %385 = vrot.lane.b32.xlu0 %v992_v24, %s1011_s9  ;;  %v1014_v37 = vmov 65535  }
  0x10   : > { %v1104_v20 = vsub.s32 %v291_v15, %v293_v9  ;;  %889 = vmatprep.subr.bf16.mxu0 %v472_v16  ;;  %v456_v26 = vld [vmem:[%s1354_s1 + $0x120] sm:$0xff]  ;;  %v457_v27 = vld [vmem:[%s1354_s1 + $0x128] sm:$0x1]  ;;  %v463_v29 = vpack.c.bf16 %v431_v23, %v430_v22  ;;  %333 = vrot.lane.b32.xlu1 %v993_v25, %s1012_s12  ;;  %v483_v38 = vsel %vm481_vm0, 4294967295, %v1014_v37  ;;  %v454_v45 = vld [vmem:[%s1354_s1 + $0x110] sm:$0xff]  ;;  %vm1018_vm2 = vmmov 0  }
  0x11   : > { %v994_v28 = vld.sshfl [vmem:[%s1102_s24 + $0xa] sm:$0xf pattern:$0x76325410]  ;;  %v444_v32 = vld [vmem:[%s1354_s1 + $0xc0] sm:$0xff]  ;;  %v476_v35 = vpack.c.bf16 %v457_v27, %v456_v26  ;;  %v1140_v42 = vsel %vm482_vm1, %v483_v38, 0  ;;  %945 = vmatprep.mubr.msk.bf16.mxu1 %vm1018_vm2, %v1010_v14 }
  0x12   : > { %v995_v30 = vld.sshfl [vmem:[%s1102_s24 + $0x5] sm:$0xf pattern:$0x76325410]  ;;  %v455_v46 = vld [vmem:[%s1354_s1 + $0x118] sm:$0xff]  ;;  %v442_v47 = vld [vmem:[%s1354_s1 + $0xb0] sm:$0xff] }
  0x13   : > { %890 = vmatpush3.bf16.msra.mxu0 %v464_v19  ;;  %v996_v31 = vld.sshfl [vmem:[%s1102_s24 + $0x6] sm:$0xf pattern:$0x76325410]  ;;  %398 = vrot.lane.b32.xlu0 %v994_v28, %s1013_s13  ;;  %v486_v48 = vand.u32 %v1140_v42, %v476_v35  ;;  %v443_v49 = vld [vmem:[%s1354_s1 + $0xb8] sm:$0xff]  ;;  %v426_v50 = vld [vmem:[%s1354_s1 + $0x30] sm:$0xff]  ;;  %v475_v54 = vpack.c.bf16 %v455_v46, %v454_v45 }
  0x14   : > { %891 = vmatprep.subr.bf16.mxu0 %v471_v21  ;;  %v997_v33 = vld.sshfl [vmem:[%s1102_s24 + $0x1] sm:$0xf pattern:$0x76325410]  ;;  %v445_v39 = vld [vmem:[%s1354_s1 + $0xc8] sm:$0xff]  ;;  %346 = vrot.lane.b32.xlu1 %v995_v30, %s1015_s20  ;;  %v427_v51 = vld [vmem:[%s1354_s1 + $0x38] sm:$0xff]  ;;  %v469_v52 = vpack.c.bf16 %v443_v49, %v442_v47 }
  0x15   : > { %v998_v34 = vld.sshfl [vmem:[%s1102_s24 + $0x8] sm:$0xf pattern:$0x76325410]  ;;  %v428_v40 = vld [vmem:[%s1354_s1 + $0x40] sm:$0xff]  ;;  %v470_v43 = vpack.c.bf16 %v445_v39, %v444_v32  ;;  %940 = vmatpush3.bf16.msra.mxu1 %v486_v48  ;;  %v461_v57 = vpack.c.bf16 %v427_v51, %v426_v50  ;;  %v598_v62 = vld [vmem:[%s1355_s2 + $0xf0] sm:$0xff] }
  0x16   : > { %v999_v36 = vld.sshfl [vmem:[%s1102_s24 + $0x2] sm:$0xf pattern:$0x76325410]  ;;  %v429_v41 = vld [vmem:[%s1354_s1 + $0x48] sm:$0xff]  ;;  %941 = vmatprep.subr.bf16.mxu1 %v1010_v14  ;;  %v599_v63 = vld [vmem:[%s1355_s2 + $0xf8] sm:$0xff] }
  0x17   : > { %892 = vmatpush3.bf16.msra.mxu0 %v463_v29  ;;  %v462_v44 = vpack.c.bf16 %v429_v41, %v428_v40  ;;  %v440_v53 = vld [vmem:[%s1354_s1 + $0xa0] sm:$0xff]  ;;  %359 = vrot.lane.b32.xlu0 %v996_v31, %s1016_s14  ;;  %v441_v56 = vld [vmem:[%s1354_s1 + $0xa8] sm:$0xff]  ;;  %v438_v0 = vld [vmem:[%s1354_s1 + $0x90] sm:$0xff]  ;;  %s1019_s13 = smov 70   ;;  %s1020_s14 = smov 66   ;;  %v621_v4 = vpack.c.bf16 %v599_v63, %v598_v62  ;;  %vm415_vm3 = vcmask 64512  }
  0x18   : > { %893 = vmatprep.subr.bf16.mxu0 %v470_v43  ;;  %v452_v55 = vld [vmem:[%s1354_s1 + $0x100] sm:$0xff]  ;;  %307 = vrot.lane.b32.xlu1 %v997_v33, %s1017_s19  ;;  %v453_v58 = vld [vmem:[%s1354_s1 + $0x108] sm:$0xff]  ;;  %v468_v61 = vpack.c.bf16 %v441_v56, %v440_v53  ;;  %v439_v1 = vld [vmem:[%s1354_s1 + $0x98] sm:$0xff]  ;;  %vm407_vm4 = vcmask 31744   ;;  %vm477_vm5 = vcmask 334848   ;;  %vm409_vm6 = vcmask 302080  }
  0x19   : > { %v424_v59 = vld [vmem:[%s1354_s1 + $0x20] sm:$0xff]  ;;  %v425_v60 = vld [vmem:[%s1354_s1 + $0x28] sm:$0xff]  ;;  %942 = vmatpush3.bf16.msra.mxu1 %v475_v54  ;;  %v474_v2 = vpack.c.bf16 %v453_v58, %v452_v55  ;;  %v467_v5 = vpack.c.bf16 %v439_v1, %v438_v0  ;;  %v422_v6 = vld [vmem:[%s1354_s1 + $0x10] sm:$0xff]  ;;  %vm401_vm7 = vcmask 269312   ;;  %vm411_vm8 = vcmask 572416   ;;  %s885_s12 = sshll.u32 %s1361_s22, 2 }
  0x1a   : > { %v460_v3 = vpack.c.bf16 %v425_v60, %v424_v59  ;;  %943 = vmatprep.subr.bf16.mxu1 %v1010_v14  ;;  %v423_v7 = vld [vmem:[%s1354_s1 + $0x18] sm:$0xff]  ;;  %v436_v8 = vld [vmem:[%s1354_s1 + $0x80] sm:$0xff]  ;;  %v437_v9 = vld [vmem:[%s1354_s1 + $0x88] sm:$0xff]  ;;  %vm403_vm9 = vcmask 539648   ;;  %vm413_vm10 = vcmask 842752   ;;  %vm405_vm11 = vcmask 809984   ;;  %s264_s15 = scalar_lea.vmem %s1359_s6, %s885_s12  ;;  %s259_s20 = scalar_lea.vmem %s1358_s5, %s885_s12 }
  0x1b   : > { %894 = vmatpush3.bf16.msra.mxu0 %v462_v44  ;;  %372 = vrot.lane.b32.xlu0 %v998_v34, %s1019_s13  ;;  %v459_v10 = vpack.c.bf16 %v423_v7, %v422_v6  ;;  %v466_v11 = vpack.c.bf16 %v437_v9, %v436_v8  ;;  %v420_v12 = vld [vmem:[%s1354_s1] sm:$0xff]  ;;  %v421_v13 = vld [vmem:[%s1354_s1 + $0x8] sm:$0xff]  ;;  %v582_v18 = vld [vmem:[%s1355_s2 + $0x70] sm:$0xff]  ;;  %vm763_vm13 = vcmask 1024   ;;  %vm749_vm14 = vcmask 254976  }
  0x1c   : > { %895 = vmatprep.subr.bf16.mxu0 %v469_v52  ;;  %320 = vrot.lane.b32.xlu1 %v999_v36, %s1020_s14  ;;  %v458_v15 = vpack.c.bf16 %v421_v13, %v420_v12  ;;  %v583_v19 = vld [vmem:[%s1355_s2 + $0x78] sm:$0xff]  ;;  %v1000_v21 = vld.sshfl [vmem:[%s1102_s24] sm:$0xf pattern:$0x76325410]  ;;  %v597_v23 = vld [vmem:[%s1355_s2 + $0xe8] sm:$0xff] }
  0x1d   : > { %944 = vmatpush3.bf16.msra.mxu1 %v474_v2  ;;  %v596_v22 = vld [vmem:[%s1355_s2 + $0xe0] sm:$0xff]  ;;  %v613_v27 = vpack.c.bf16 %v583_v19, %v582_v18  ;;  %v581_v31 = vld [vmem:[%s1355_s2 + $0x68] sm:$0xff]  ;;  %v594_v33 = vld [vmem:[%s1355_s2 + $0xd0] sm:$0xff] }
  0x1e   : > { %913 = vmatprep.subr.bf16.mxu1 %v621_v4  ;;  %v620_v29 = vpack.c.bf16 %v597_v23, %v596_v22  ;;  %v580_v30 = vld [vmem:[%s1355_s2 + $0x60] sm:$0xff]  ;;  %v595_v34 = vld [vmem:[%s1355_s2 + $0xd8] sm:$0xff]  ;;  %v605_v36 = vld [vmem:[%s1355_s2 + $0x128] sm:$0x1] }
  0x1f   : > { %896 = vmatpush3.bf16.msra.mxu0 %v461_v57  ;;  %v604_v35 = vld [vmem:[%s1355_s2 + $0x120] sm:$0xff]  ;;  %v612_v39 = vpack.c.bf16 %v581_v31, %v580_v30  ;;  %v619_v41 = vpack.c.bf16 %v595_v34, %v594_v33  ;;  %v578_v43 = vld [vmem:[%s1355_s2 + $0x50] sm:$0xff]  ;;  %v579_v44 = vld [vmem:[%s1355_s2 + $0x58] sm:$0xff]  ;;  %v1021_v31 = vmov 0  }
  0x20   : > { %897 = vmatprep.subr.bf16.mxu0 %v468_v61  ;;  %v624_v45 = vpack.c.bf16 %v605_v36, %v604_v35  ;;  %v592_v48 = vld [vmem:[%s1355_s2 + $0xc0] sm:$0xff]  ;;  %v593_v49 = vld [vmem:[%s1355_s2 + $0xc8] sm:$0xff]  ;;  %v611_v52 = vpack.c.bf16 %v579_v44, %v578_v43  ;;  %v590_v61 = vld [vmem:[%s1355_s2 + $0xb0] sm:$0xff]  ;;  %980 = vset.pattern.permute.xlu0 %v1021_v31 }
  0x21   : > { %v576_v55 = vld [vmem:[%s1355_s2 + $0x40] sm:$0xff]  ;;  %v577_v56 = vld [vmem:[%s1355_s2 + $0x48] sm:$0xff]  ;;  %v618_v60 = vpack.c.bf16 %v593_v49, %v592_v48  ;;  %v591_v62 = vld [vmem:[%s1355_s2 + $0xb8] sm:$0xff] }
  0x22   : > { %v626_v57 = vand.u32 %v624_v45, %v1140_v42  ;;  %v602_v0 = vld [vmem:[%s1355_s2 + $0x110] sm:$0xff]  ;;  %v603_v42 = vld [vmem:[%s1355_s2 + $0x118] sm:$0xff]  ;;  %v610_v1 = vpack.c.bf16 %v577_v56, %v576_v55  ;;  %v617_v2 = vpack.c.bf16 %v591_v62, %v590_v61  ;;  %v588_v6 = vld [vmem:[%s1355_s2 + $0xa0] sm:$0xff] }
  0x23   : > { %898 = vmatpush3.bf16.msra.mxu0 %v460_v3  ;;  %v574_v3 = vld [vmem:[%s1355_s2 + $0x30] sm:$0xff]  ;;  %v575_v4 = vld [vmem:[%s1355_s2 + $0x38] sm:$0xff]  ;;  %v589_v7 = vld [vmem:[%s1355_s2 + $0xa8] sm:$0xff] }
  0x24   : > { %899 = vmatprep.subr.bf16.mxu0 %v467_v5  ;;  %v623_v5 = vpack.c.bf16 %v603_v42, %v602_v0  ;;  %v600_v8 = vld [vmem:[%s1355_s2 + $0x100] sm:$0xff]  ;;  %v601_v9 = vld [vmem:[%s1355_s2 + $0x108] sm:$0xff]  ;;  %v571_v22 = vld [vmem:[%s1355_s2 + $0x18] sm:$0xff] }
  0x25   : > { %v572_v12 = vld [vmem:[%s1355_s2 + $0x20] sm:$0xff]  ;;  %v573_v13 = vld [vmem:[%s1355_s2 + $0x28] sm:$0xff] }
  0x26   : > { %v608_v18 = vpack.c.bf16 %v573_v13, %v572_v12  ;;  %v584_v23 = vld [vmem:[%s1355_s2 + $0x80] sm:$0xff] }
  0x27   : > { %900 = vmatpush3.bf16.msra.mxu0 %v459_v10  ;;  %v609_v10 = vpack.c.bf16 %v575_v4, %v574_v3 }
  0x28   : > { %901 = vmatprep.subr.bf16.mxu0 %v466_v11  ;;  %v616_v11 = vpack.c.bf16 %v589_v7, %v588_v6 }
  0x2b   : > { %902 = vmatpush3.bf16.msra.mxu0 %v458_v15  ;;  %v622_v15 = vpack.c.bf16 %v601_v9, %v600_v8 }
  0x2c   : > { %949 = vmatprep.subr.bf16.mxu0 %v1010_v14 }
  0x81   : > { %v386_v16 = vpop.permute.xlu0 %385 }
  0x82   : > { %v334_v17 = vpop.permute.xlu1 %333 }
  0x85   : > { %v399_v24 = vpop.permute.xlu0 %398 }
  0x86   : > { %v416_v25 = vsel %vm415_vm3, %v386_v16, %v399_v24  ;;  %v347_v26 = vpop.permute.xlu1 %346  ;;  %v585_v24 = vld [vmem:[%s1355_s2 + $0x88] sm:$0xff] }
  0x87   : > { %v1227_v28 = vpack.c.bf16 %v416_v25, %v416_v25  ;;  %v408_v32 = vsel %vm407_vm4, %v334_v17, %v347_v26  ;;  %v614_v26 = vpack.c.bf16 %v585_v24, %v584_v23 }
  0x89   : > { %946 = vmatmul.mubr.msk.bf16.vlgmr.msra.gmra.mxu1 %vm477_vm5, %v1227_v28  ;;  %v360_v37 = vpop.permute.xlu0 %359 }
  0x8a   : > { %914 = vmatpush3.bf16.msra.mxu1 %v613_v27  ;;  %v308_v38 = vpop.permute.xlu1 %307  ;;  %v410_v40 = vsel %vm409_vm6, %v408_v32, %v360_v37  ;;  %v568_v27 = vld [vmem:[%s1355_s2] sm:$0xff] }
  0x8b   : > { %915 = vmatprep.subr.bf16.mxu1 %v620_v29  ;;  %v402_v46 = vsel %vm401_vm7, %v1000_v21, %v308_v38  ;;  %v570_v21 = vld [vmem:[%s1355_s2 + $0x10] sm:$0xff]  ;;  %v569_v29 = vld [vmem:[%s1355_s2 + $0x8] sm:$0xff] }
  0x8c   : > { %v607_v25 = vpack.c.bf16 %v571_v22, %v570_v21  ;;  %v606_v30 = vpack.c.bf16 %v569_v29, %v568_v27 }
  0x8d   : > { %v373_v47 = vpop.permute.xlu0 %372 }
  0x8e   : > { %916 = vmatpush3.bf16.msra.mxu1 %v612_v39  ;;  %v412_v50 = vsel %vm411_vm8, %v410_v40, %v373_v47  ;;  %v321_v51 = vpop.permute.xlu1 %320 }
  0x8f   : > { %v404_v53 = vsel %vm403_vm9, %v402_v46, %v321_v51  ;;  %917 = vmatprep.subr.bf16.mxu1 %v619_v41  ;;  %v414_v54 = vsel %vm413_vm10, %v412_v50, %v386_v16  ;;  %v586_v16 = vld [vmem:[%s1355_s2 + $0x90] sm:$0xff] }
  0x90   : > { %v406_v58 = vsel %vm405_vm11, %v404_v53, %v334_v17  ;;  %v418_v59 = vpack.c.bf16 %v414_v54, %v414_v54  ;;  %v587_v17 = vld [vmem:[%s1355_s2 + $0x98] sm:$0xff] }
  0x91   : > { %v417_v63 = vpack.c.bf16 %v406_v58, %v406_v58  ;;  %v615_v19 = vpack.c.bf16 %v587_v17, %v586_v16 }
  0x92   : > { %918 = vmatpush3.bf16.msra.mxu1 %v611_v52  ;;  %520 = vmatprep.mubr.bf16.mxu0 %v418_v59 }
  0x93   : > { %660 = vmatprep.mubr.bf16.mxu1 %v418_v59  ;;  %521 = vmatmul.mubr.bf16.vlgmr.msra.gmra.mxu0 %v417_v63  ;;  %v880_v59 = vld [vmem:[%s1356_s3] ss:$0 sm:$0xff] }
  0x94   : > { %950 = vmatpush3.bf16.msra.mxu0 %v626_v57  ;;  %919 = vmatprep.subr.bf16.mxu1 %v618_v60 }
  0x95   : > { %951 = vmatprep.subr.bf16.mxu0 %v1010_v14  ;;  %955 = vmatprep.mubr.msk.bf16.mxu0 %vm1018_vm2, %v1010_v14 }
  0x96   : > { %920 = vmatpush3.bf16.msra.mxu1 %v610_v1 }
  0x97   : > { %921 = vmatprep.subr.bf16.mxu1 %v617_v2 }
  0x98   : > { %952 = vmatpush3.bf16.msra.mxu0 %v623_v5 }
  0x99   : > { %953 = vmatprep.subr.bf16.mxu0 %v1010_v14 }
  0x9a   : > { %922 = vmatpush3.bf16.msra.mxu1 %v609_v10 }
  0x9b   : > { %923 = vmatprep.subr.bf16.mxu1 %v616_v11 }
  0x9c   : > { %954 = vmatpush3.bf16.msra.mxu0 %v622_v15 }
  0x9e   : > { %924 = vmatpush3.bf16.msra.mxu1 %v608_v18 }
  0x9f   : > { %956 = vmatmul.mubr.msk.bf16.vlgmr.msra.gmra.mxu0 %vm477_vm5, %v1227_v28  ;;  %925 = vmatprep.subr.bf16.mxu1 %v615_v19 }
  0xa2   : > { %926 = vmatpush3.bf16.msra.mxu1 %v607_v25 }
  0xa3   : > { %927 = vmatprep.subr.bf16.mxu1 %v614_v26 }
  0xa6   : > { %928 = vmatpush3.bf16.msra.mxu1 %v606_v30 }
  0xa9   : > { %661 = vmatmul.mubr.bf16.vlgmr.msra.gmra.mxu1 %v417_v63 }
 0x149   : > { %v562_v32 = vpop.f32.mrf.mxu1 }
 0x14b   : > { %v947_v33 = vpop.f32.mrf.mxu1 }
 0x14d   : > { %v565_v28 = vpop.f32.mrf.mxu1 }
 0x14f   : > { %v948_v34 = vpop.f32.mrf.mxu1 }
 0x153   : > { %v903_v35 = vpop.f32.mrf.mxu0 }
 0x155   : > { %v904_v36 = vpop.f32.mrf.mxu0 }
 0x156   : > { %v905_v37 = vadd.f32 %v904_v36, %v903_v35 }
 0x157   : > { %v906_v38 = vpop.f32.mrf.mxu0 }
 0x158   : > { %v563_v39 = vadd.f32 %v905_v37, %v562_v32 }
 0x159   : > { %v907_v40 = vpop.f32.mrf.mxu0 }
 0x15f   : > { %v702_v41 = vpop.f32.mrf.mxu0 }
 0x161   : > { %v957_v43 = vpop.f32.mrf.mxu0 }
 0x163   : > { %v705_v44 = vpop.f32.mrf.mxu0 }
 0x165   : > { %v958_v45 = vpop.f32.mrf.mxu0 }
 0x169   : > { %v929_v46 = vpop.f32.mrf.mxu1 }
 0x16b   : > { %v930_v47 = vpop.f32.mrf.mxu1 }
 0x16c   : > { %v931_v48 = vadd.f32 %v930_v47, %v929_v46 }
 0x16d   : > { %v932_v49 = vpop.f32.mrf.mxu1 }
 0x16e   : > { %v703_v50 = vadd.f32 %v931_v48, %v702_v41 }
 0x16f   : > { %v933_v51 = vpop.f32.mrf.mxu1 }
 0x170   : > { %vm708_vm12 = vcmp.gt.f32.partialorder %v703_v50, 0.0  ;;  %v711_v52 = vadd.f32 1e-08, %v703_v50 }
 0x171   : > { %v879_v53 = vsel %vm708_vm12, 1.0, %v1010_v14  ;;  %v881_v14 = vld [vmem:[%s1357_s4] ss:$0 sm:$0xff] }
 0x172   : > { %990 = vrcp.f32 %v711_v52  ;;  %v759_v54 = vrot.slane %v879_v53, %v1104_v20 }
 0x174   : > { %v760_v55 = vcombine.high %v759_v54, %v759_v54  ;;  %764 = vst.msk [vmem:[%s264_s15] sm:$0x3] %vm763_vm13, %v759_v54 }
 0x176   : > { %765 = vst.msk [vmem:[%s264_s15 + $0x2] sm:$0x3] %vm763_vm13, %v760_v55 }
 0x17f   : > { %v991_v56 = vpop.eup %990 }
 0x180   : > { %v713_v57 = vmul.f32 9.0, %v991_v56 }
 0x182   : > { %v714_v58 = vmul.f32 %v879_v53, %v713_v57 }
 0x184   : > { %717 = vperm.xlu0 %980, %v714_v58  }
 0x1ff   : > { %v718_v60 = vpop.permute.xlu0 %717 }
 0x200   : > { %v720_v61 = vmul.f32 %v718_v60, %v563_v39 }
 0x202   : > { %v728_v62 = vmul.f32 %v880_v59, %v720_v61 }
 0x204   : > { %v736_v63 = vadd.f32 %v881_v14, %v728_v62 }
 0x206   : > { %v737_v0 = vmax.f32 %v736_v63, 0.0 }
 0x208   : > { %v745_v42 = vrot.slane %v737_v0, %v1104_v20 }
 0x20a   : > { %v746_v1 = vcombine.high %v745_v42, %v745_v42  ;;  %750 = vst.msk [vmem:[%s259_s20] sm:$0x3] %vm749_vm14, %v745_v42 }
 0x20c   : > { %751 = vst.msk [vmem:[%s259_s20 + $0x2] sm:$0x3] %vm749_vm14, %v746_v1 }
 0x20d PF: > { %s17_s21 = sadd.s32 1, %s1007_s21  }
 0x20e   : > { %p14_p4 = scmp.ge.s32.totalorder %s17_s21, 4  }
 0x210   :  { %16 = sbr.rel (!%p14_p4) target bundleno = 1 (0x1), region = 84 }

// kernel: generator_forward.58
= control target key start
LH: loop header
LB: loop body
LE: loop exit
PB: predicated region body
PF: predicated region fallthrough
CT: control target
= control target key end

     0   :  { %s823_s15 = smov 0   ;;  %s1085_s0 = inlined_call_operand.vmem [shape: f32[2,4,4,64], index: 0, kind: input, shape index: {}]   ;;  %s1086_s1 = inlined_call_operand.vmem [shape: f32[576,32], index: 1, kind: input, shape index: {}]   ;;  %s1087_s2 = inlined_call_operand.vmem [shape: f32[1,32], index: 2, kind: input, shape index: {}]   ;;  %s1088_s3 = inlined_call_operand.vmem [shape: f32[1,32], index: 3, kind: input, shape index: {}]   ;;  %s1089_s4 = inlined_call_operand.vmem [shape: f32[2,2,2,32], index: 4, kind: output, shape index: {}]  }
   0x1 LB: > { %s657_s16 = sadd.s32 4294967295, %s792_s15   ;;  %p661_p0 = scmp.ge.s32.totalorder %s792_s15, 1  ;;  %s792_s15 = sphi %s823_s15, %s14_s15  }
   0x2   : > { %p162_p1 = scmp.lt.s32.totalorder %s792_s15, 3 }
   0x4   : > { %p163_p2 = pnand %p661_p0, %p162_p1 }
   0x5   : > { %p188_p3 = scmp.lt.s32.totalorder (!%p163_p2), %s657_s16, 1  ;;  %s795_s26 = smov (!%p163_p2), 64  }
   0x6   : > { %166 = sbr.rel (%p163_p2) target bundleno = 362 (0x16a), region = 36 }
   0xb   : > { %v225_v0 = vlaneseq  ;;  %v371_v1 = vld [vmem:[%s1086_s1 + $0xf0] sm:$0xff]  ;;  %v372_v2 = vld [vmem:[%s1086_s1 + $0xf8] sm:$0xff]  ;;  %v794_v3 = vmov 1983009808   ;;  %v369_v8 = vld [vmem:[%s1086_s1 + $0xe0] sm:$0xff]  ;;  %s1091_s16 = smov (!%p188_p3, %s657_s16), 1 }
   0xc   : > { %v223_v4 = vunpack.c.l.s4 %v794_v3  ;;  %v428_v5 = vpack.c.bf16 %v372_v2, %v371_v1  ;;  %v355_v6 = vld [vmem:[%s1086_s1 + $0x70] sm:$0xff]  ;;  %v356_v7 = vld [vmem:[%s1086_s1 + $0x78] sm:$0xff]  ;;  %v370_v11 = vld [vmem:[%s1086_s1 + $0xe8] sm:$0xff]  ;;  %s683_s13 = sshll.u32 %s1091_s16, 4  ;;  %vm326_vm0 = vcmask 523264   ;;  %vm797_vm1 = vmmov 0  }
   0xd   : > { %v226_v9 = vshrl.u32 %v225_v0, 7  ;;  %v420_v10 = vpack.c.bf16 %v356_v7, %v355_v6  ;;  %v353_v12 = vld [vmem:[%s1086_s1 + $0x60] sm:$0xff]  ;;  %v354_v13 = vld [vmem:[%s1086_s1 + $0x68] sm:$0xff]  ;;  %v427_v15 = vpack.c.bf16 %v370_v11, %v369_v8  ;;  %v403_v16 = vld [vmem:[%s1086_s1 + $0x1f0] sm:$0xff]  ;;  %s879_s24 = scalar_lea.vmem %s1085_s0, %s683_s13  ;;  %s684_s5 = sshll.u32 %s1091_s16, 2  ;;  %vm599_vm2 = vcmask 254976  }
   0xe   : > { %v224_v14 = vunpack.c.0.s8 %v223_v4  ;;  %685 = vmatprep.subr.bf16.mxu0 %v428_v5  ;;  %v404_v17 = vld [vmem:[%s1086_s1 + $0x1f8] sm:$0xff]  ;;  %v387_v18 = vld [vmem:[%s1086_s1 + $0x170] sm:$0xff]  ;;  %v419_v19 = vpack.c.bf16 %v354_v13, %v353_v12  ;;  %v401_v29 = vld [vmem:[%s1086_s1 + $0x1e0] sm:$0xff]  ;;  %s197_s8 = scalar_lea.vmem %s1089_s4, %s684_s5 }
   0xf   : > { %686 = vmatpush3.bf16.msra.mxu0 %v420_v10  ;;  %v444_v20 = vpack.c.bf16 %v404_v17, %v403_v16  ;;  %v388_v21 = vld [vmem:[%s1086_s1 + $0x178] sm:$0xff]  ;;  %v367_v22 = vld [vmem:[%s1086_s1 + $0xd0] sm:$0xff]  ;;  %v777_v30 = vld.sshfl [vmem:[%s879_s24 + $0x1] sm:$0xf pattern:$0x76325410] }
  0x10   : > { %v368_v23 = vld [vmem:[%s1086_s1 + $0xd8] sm:$0xff]  ;;  %v881_v24 = vsub.s32 %v224_v14, %v226_v9  ;;  %687 = vmatprep.subr.bf16.mxu0 %v427_v15  ;;  %v436_v25 = vpack.c.bf16 %v388_v21, %v387_v18  ;;  %v351_v27 = vld [vmem:[%s1086_s1 + $0x50] sm:$0xff]  ;;  %v778_v31 = vld.sshfl [vmem:[%s879_s24 + $0x4] sm:$0xf pattern:$0x76325410] }
  0x11   : > { %v426_v26 = vpack.c.bf16 %v368_v23, %v367_v22  ;;  %v352_v28 = vld [vmem:[%s1086_s1 + $0x58] sm:$0xff]  ;;  %707 = vmatprep.subr.bf16.mxu1 %v444_v20  ;;  %v779_v33 = vld.sshfl [vmem:[%s879_s24 + $0x6] sm:$0xf pattern:$0x76325410]  ;;  %v758_v38 = vpack.i.bf16 %v777_v30, %v778_v31  ;;  %v399_v46 = vld [vmem:[%s1086_s1 + $0x1d0] sm:$0xff] }
  0x12   : > { %708 = vmatpush3.bf16.msra.mxu1 %v436_v25  ;;  %v418_v32 = vpack.c.bf16 %v352_v28, %v351_v27  ;;  %v780_v34 = vld.sshfl [vmem:[%s879_s24 + $0x9] sm:$0xf pattern:$0x76325410]  ;;  %v385_v36 = vld [vmem:[%s1086_s1 + $0x160] sm:$0xff]  ;;  %v400_v47 = vld [vmem:[%s1086_s1 + $0x1d8] sm:$0xff] }
  0x13   : > { %688 = vmatpush3.bf16.msra.mxu0 %v419_v19  ;;  %v402_v35 = vld [vmem:[%s1086_s1 + $0x1e8] sm:$0xff]  ;;  %v365_v40 = vld [vmem:[%s1086_s1 + $0xc0] sm:$0xff]  ;;  %759 = vrot.lane.b32.xlu0 %v758_v38, %s795_s26  ;;  %v763_v48 = vpack.i.bf16 %v779_v33, %v780_v34  ;;  %v442_v50 = vpack.c.bf16 %v400_v47, %v399_v46  ;;  %v383_v51 = vld [vmem:[%s1086_s1 + $0x150] sm:$0xff] }
  0x14   : > { %689 = vmatprep.subr.bf16.mxu0 %v426_v26  ;;  %v386_v37 = vld [vmem:[%s1086_s1 + $0x168] sm:$0xff]  ;;  %v443_v39 = vpack.c.bf16 %v402_v35, %v401_v29  ;;  %v349_v42 = vld [vmem:[%s1086_s1 + $0x40] sm:$0xff]  ;;  %v384_v52 = vld [vmem:[%s1086_s1 + $0x158] sm:$0xff] }
  0x15   : > { %v366_v41 = vld [vmem:[%s1086_s1 + $0xc8] sm:$0xff]  ;;  %v435_v43 = vpack.c.bf16 %v386_v37, %v385_v36  ;;  %v363_v53 = vld [vmem:[%s1086_s1 + $0xb0] sm:$0xff]  ;;  %v434_v54 = vpack.c.bf16 %v384_v52, %v383_v51  ;;  %v364_v55 = vld [vmem:[%s1086_s1 + $0xb8] sm:$0xff] }
  0x16   : > { %v425_v44 = vpack.c.bf16 %v366_v41, %v365_v40  ;;  %v350_v45 = vld [vmem:[%s1086_s1 + $0x48] sm:$0xff]  ;;  %709 = vmatprep.subr.bf16.mxu1 %v443_v39  ;;  %v347_v56 = vld [vmem:[%s1086_s1 + $0x30] sm:$0xff]  ;;  %v348_v57 = vld [vmem:[%s1086_s1 + $0x38] sm:$0xff]  ;;  %v424_v58 = vpack.c.bf16 %v364_v55, %v363_v53 }
  0x17   : > { %690 = vmatpush3.bf16.msra.mxu0 %v418_v32  ;;  %v417_v49 = vpack.c.bf16 %v350_v45, %v349_v42  ;;  %710 = vmatpush3.bf16.msra.mxu1 %v435_v43  ;;  %v397_v59 = vld [vmem:[%s1086_s1 + $0x1c0] sm:$0xff]  ;;  %v398_v60 = vld [vmem:[%s1086_s1 + $0x1c8] sm:$0xff]  ;;  %v416_v62 = vpack.c.bf16 %v348_v57, %v347_v56  ;;  %v395_v6 = vld [vmem:[%s1086_s1 + $0x1b0] sm:$0xff] }
  0x18   : > { %691 = vmatprep.subr.bf16.mxu0 %v425_v44  ;;  %711 = vmatprep.subr.bf16.mxu1 %v442_v50  ;;  %v381_v61 = vld [vmem:[%s1086_s1 + $0x140] sm:$0xff]  ;;  %v441_v63 = vpack.c.bf16 %v398_v60, %v397_v59  ;;  %v382_v0 = vld [vmem:[%s1086_s1 + $0x148] sm:$0xff]  ;;  %v396_v8 = vld [vmem:[%s1086_s1 + $0x1b8] sm:$0xff]  ;;  %v796_v44 = vmov 0.0  }
  0x19   : > { %v361_v1 = vld [vmem:[%s1086_s1 + $0xa0] sm:$0xff]  ;;  %v362_v2 = vld [vmem:[%s1086_s1 + $0xa8] sm:$0xff]  ;;  %764 = vrot.lane.b32.xlu0 %v763_v48, %s795_s26  ;;  %v433_v7 = vpack.c.bf16 %v382_v0, %v381_v61  ;;  %v379_v9 = vld [vmem:[%s1086_s1 + $0x130] sm:$0xff]  ;;  %v440_v10 = vpack.c.bf16 %v396_v8, %v395_v6 }
  0x1a   : > { %v423_v3 = vpack.c.bf16 %v362_v2, %v361_v1  ;;  %v345_v4 = vld [vmem:[%s1086_s1 + $0x20] sm:$0xff]  ;;  %v346_v5 = vld [vmem:[%s1086_s1 + $0x28] sm:$0xff]  ;;  %v380_v11 = vld [vmem:[%s1086_s1 + $0x138] sm:$0xff] }
  0x1b   : > { %692 = vmatpush3.bf16.msra.mxu0 %v417_v49  ;;  %712 = vmatpush3.bf16.msra.mxu1 %v434_v54  ;;  %v359_v12 = vld [vmem:[%s1086_s1 + $0x90] sm:$0xff]  ;;  %v360_v13 = vld [vmem:[%s1086_s1 + $0x98] sm:$0xff]  ;;  %v415_v14 = vpack.c.bf16 %v346_v5, %v345_v4  ;;  %v393_v15 = vld [vmem:[%s1086_s1 + $0x1a0] sm:$0xff]  ;;  %v432_v20 = vpack.c.bf16 %v380_v11, %v379_v9 }
  0x1c   : > { %693 = vmatprep.subr.bf16.mxu0 %v424_v58  ;;  %713 = vmatprep.subr.bf16.mxu1 %v441_v63  ;;  %v394_v16 = vld [vmem:[%s1086_s1 + $0x1a8] sm:$0xff]  ;;  %v422_v17 = vpack.c.bf16 %v360_v13, %v359_v12  ;;  %v343_v18 = vld [vmem:[%s1086_s1 + $0x10] sm:$0xff]  ;;  %v344_v19 = vld [vmem:[%s1086_s1 + $0x18] sm:$0xff] }
  0x1d   : > { %v377_v21 = vld [vmem:[%s1086_s1 + $0x120] sm:$0xff]  ;;  %v358_v23 = vld [vmem:[%s1086_s1 + $0x88] sm:$0xff]  ;;  %v439_v25 = vpack.c.bf16 %v394_v16, %v393_v15  ;;  %v391_v28 = vld [vmem:[%s1086_s1 + $0x190] sm:$0xff]  ;;  %v414_v29 = vpack.c.bf16 %v344_v19, %v343_v18 }
  0x1e   : > { %v357_v22 = vld [vmem:[%s1086_s1 + $0x80] sm:$0xff]  ;;  %v378_v26 = vld [vmem:[%s1086_s1 + $0x128] sm:$0xff]  ;;  %v392_v30 = vld [vmem:[%s1086_s1 + $0x198] sm:$0xff] }
  0x1f   : > { %694 = vmatpush3.bf16.msra.mxu0 %v416_v62  ;;  %714 = vmatpush3.bf16.msra.mxu1 %v433_v7  ;;  %v341_v27 = vld [vmem:[%s1086_s1] sm:$0xff]  ;;  %v421_v31 = vpack.c.bf16 %v358_v23, %v357_v22  ;;  %v342_v32 = vld [vmem:[%s1086_s1 + $0x8] sm:$0xff]  ;;  %v431_v33 = vpack.c.bf16 %v378_v26, %v377_v21  ;;  %v438_v34 = vpack.c.bf16 %v392_v30, %v391_v28  ;;  %v375_v35 = vld [vmem:[%s1086_s1 + $0x110] sm:$0xff] }
  0x20   : > { %695 = vmatprep.subr.bf16.mxu0 %v423_v3  ;;  %715 = vmatprep.subr.bf16.mxu1 %v440_v10  ;;  %v376_v36 = vld [vmem:[%s1086_s1 + $0x118] sm:$0xff]  ;;  %v389_v37 = vld [vmem:[%s1086_s1 + $0x180] sm:$0xff]  ;;  %v413_v38 = vpack.c.bf16 %v342_v32, %v341_v27  ;;  %v390_v39 = vld [vmem:[%s1086_s1 + $0x188] sm:$0xff] }
  0x21   : > { %v430_v40 = vpack.c.bf16 %v376_v36, %v375_v35  ;;  %v437_v41 = vpack.c.bf16 %v390_v39, %v389_v37  ;;  %v373_v42 = vld [vmem:[%s1086_s1 + $0x100] sm:$0xff]  ;;  %v374_v43 = vld [vmem:[%s1086_s1 + $0x108] sm:$0xff]  ;;  %v411_v55 = vld [vmem:[%s1086_s1 + $0x230] sm:$0xff] }
  0x22   : > { %v429_v45 = vpack.c.bf16 %v374_v43, %v373_v42  ;;  %v781_v46 = vld.sshfl [vmem:[%s879_s24 + $0x2] sm:$0xf pattern:$0x76325410]  ;;  %v412_v56 = vld [vmem:[%s1086_s1 + $0x238] sm:$0xff]  ;;  %v410_v4 = vld [vmem:[%s1086_s1 + $0x228] sm:$0xff] }
  0x23   : > { %696 = vmatpush3.bf16.msra.mxu0 %v415_v14  ;;  %716 = vmatpush3.bf16.msra.mxu1 %v432_v20  ;;  %v782_v47 = vld.sshfl [vmem:[%s879_s24] sm:$0xf pattern:$0x76325410]  ;;  %v448_v0 = vpack.c.bf16 %v412_v56, %v411_v55  ;;  %v407_v11 = vld [vmem:[%s1086_s1 + $0x210] sm:$0xff]  ;;  %v408_v12 = vld [vmem:[%s1086_s1 + $0x218] sm:$0xff] }
  0x24   : > { %697 = vmatprep.subr.bf16.mxu0 %v422_v17  ;;  %717 = vmatprep.subr.bf16.mxu1 %v439_v25  ;;  %v783_v48 = vld.sshfl [vmem:[%s879_s24 + $0x8] sm:$0xf pattern:$0x76325410]  ;;  %v409_v3 = vld [vmem:[%s1086_s1 + $0x220] sm:$0xff]  ;;  %v446_v13 = vpack.c.bf16 %v408_v12, %v407_v11 }
  0x25   : > { %v784_v49 = vld.sshfl [vmem:[%s879_s24 + $0x5] sm:$0xf pattern:$0x76325410]  ;;  %v447_v10 = vpack.c.bf16 %v410_v4, %v409_v3  ;;  %v679_v32 = vld [vmem:[%s1087_s2] ss:$0 sm:$0xff] }
  0x26   : > { %v785_v7 = vld.sshfl [vmem:[%s879_s24 + $0xa] sm:$0xf pattern:$0x76325410]  ;;  %v405_v14 = vld [vmem:[%s1086_s1 + $0x200] sm:$0xff] }
  0x27   : > { %698 = vmatpush3.bf16.msra.mxu0 %v414_v29  ;;  %718 = vmatpush3.bf16.msra.mxu1 %v431_v33  ;;  %v406_v15 = vld [vmem:[%s1086_s1 + $0x208] sm:$0xff]  ;;  %v335_v16 = vmax.f32 %v785_v7, 0.0 }
  0x28   : > { %699 = vmatprep.subr.bf16.mxu0 %v421_v31  ;;  %719 = vmatprep.subr.bf16.mxu1 %v438_v34  ;;  %v445_v17 = vpack.c.bf16 %v406_v15, %v405_v14  ;;  %v680_v34 = vld [vmem:[%s1088_s3] ss:$0 sm:$0xff] }
  0x29   : > { %v340_v18 = vpack.c.bf16 %v335_v16, %v335_v16 }
  0x2b   : > { %700 = vmatpush3.bf16.msra.mxu0 %v413_v38  ;;  %720 = vmatpush3.bf16.msra.mxu1 %v430_v40 }
  0x2c   : > { %734 = vmatprep.subr.bf16.mxu0 %v796_v44  ;;  %721 = vmatprep.subr.bf16.mxu1 %v437_v41 }
  0x2f   : > { %722 = vmatpush3.bf16.msra.mxu1 %v429_v45 }
  0x85   : > { %v760_v50 = vpop.permute.xlu0 %759 }
  0x86   : > { %v762_v51 = vunpack.i.h.bf16 %v760_v50  ;;  %v761_v52 = vunpack.i.l.bf16 %v760_v50 }
  0x88   : > { %v328_v53 = vsel %vm326_vm0, %v781_v46, %v761_v52  ;;  %v327_v54 = vsel %vm326_vm0, %v782_v47, %v762_v51 }
  0x89   : > { %v332_v58 = vmax.f32 %v328_v53, 0.0  ;;  %v331_v59 = vmax.f32 %v327_v54, 0.0 }
  0x8b   : > { %v765_v57 = vpop.permute.xlu0 %764  ;;  %v337_v62 = vpack.c.bf16 %v332_v58, %v332_v58  ;;  %v336_v63 = vpack.c.bf16 %v331_v59, %v331_v59 }
  0x8c   : > { %v767_v60 = vunpack.i.h.bf16 %v765_v57  ;;  %v766_v61 = vunpack.i.l.bf16 %v765_v57 }
  0x8d   : > { %484 = vmatprep.mubr.bf16.mxu0 %v337_v62 }
  0x8e   : > { %v330_v1 = vsel %vm326_vm0, %v783_v48, %v766_v61  ;;  %v329_v2 = vsel %vm326_vm0, %v784_v49, %v767_v60  ;;  %485 = vmatmul.mubr.bf16.vlgmr.msra.gmra.mxu0 %v336_v63 }
  0x8f   : > { %v334_v5 = vmax.f32 %v330_v1, 0.0  ;;  %v333_v6 = vmax.f32 %v329_v2, 0.0  ;;  %735 = vmatpush3.bf16.msra.mxu0 %v448_v0  ;;  %742 = vmatprep.mubr.msk.bf16.mxu0 %vm797_vm1, %v796_v44 }
  0x90   : > { %736 = vmatprep.subr.bf16.mxu0 %v796_v44 }
  0x91   : > { %v339_v8 = vpack.c.bf16 %v334_v5, %v334_v5  ;;  %v338_v9 = vpack.c.bf16 %v333_v6, %v333_v6 }
  0x93   : > { %524 = vmatprep.mubr.bf16.mxu1 %v339_v8  ;;  %737 = vmatpush3.bf16.msra.mxu0 %v447_v10 }
  0x94   : > { %525 = vmatmul.mubr.bf16.vlgmr.msra.gmra.mxu1 %v338_v9  ;;  %738 = vmatprep.subr.bf16.mxu0 %v796_v44 }
  0x97   : > { %739 = vmatpush3.bf16.msra.mxu0 %v446_v13 }
  0x98   : > { %740 = vmatprep.subr.bf16.mxu0 %v796_v44 }
  0x9b   : > { %741 = vmatpush3.bf16.msra.mxu0 %v445_v17 }
  0x9e   : > { %743 = vmatmul.mubr.msk.bf16.vlgmr.msra.gmra.mxu0 %vm326_vm0, %v340_v18 }
 0x14e   : > { %v701_v19 = vpop.f32.mrf.mxu0 }
 0x150   : > { %v702_v20 = vpop.f32.mrf.mxu0 }
 0x151   : > { %v703_v29 = vadd.f32 %v702_v20, %v701_v19 }
 0x152   : > { %v704_v21 = vpop.f32.mrf.mxu0 }
 0x154   : > { %v723_v22 = vpop.f32.mrf.mxu1  ;;  %v705_v23 = vpop.f32.mrf.mxu0 }
 0x156   : > { %v724_v25 = vpop.f32.mrf.mxu1 }
 0x157   : > { %v725_v28 = vadd.f32 %v724_v25, %v723_v22 }
 0x158   : > { %v726_v26 = vpop.f32.mrf.mxu1 }
 0x159   : > { %v527_v30 = vadd.f32 %v725_v28, %v703_v29 }
 0x15a   : > { %v727_v27 = vpop.f32.mrf.mxu1 }
 0x15e   : > { %v566_v31 = vpop.f32.mrf.mxu0 }
 0x15f   : > { %v567_v33 = vadd.f32 %v566_v31, %v527_v30 }
 0x160   : > { %v744_v35 = vpop.f32.mrf.mxu0 }
 0x161   : > { %v579_v36 = vmul.f32 %v679_v32, %v567_v33 }
 0x162   : > { %v569_v37 = vpop.f32.mrf.mxu0 }
 0x163   : > { %v587_v38 = vadd.f32 %v680_v34, %v579_v36 }
 0x164   : > { %v745_v39 = vpop.f32.mrf.mxu0 }
 0x165   : > { %v595_v40 = vrot.slane %v587_v38, %v881_v24 }
 0x167   : > { %v596_v41 = vcombine.high %v595_v40, %v595_v40  ;;  %600 = vst.msk [vmem:[%s197_s8] sm:$0x3] %vm599_vm2, %v595_v40 }
 0x169   : > { %601 = vst.msk [vmem:[%s197_s8 + $0x2] sm:$0x3] %vm599_vm2, %v596_v41 }
 0x16a PF: > { %s14_s15 = sadd.s32 1, %s792_s15  }
 0x16b   : > { %p11_p4 = scmp.ge.s32.totalorder %s14_s15, 4  }
 0x16d   :  { %13 = sbr.rel (!%p11_p4) target bundleno = 1 (0x1), region = 68 }

// kernel: generator_forward.59
= control target key start
LH: loop header
LB: loop body
LE: loop exit
PB: predicated region body
PF: predicated region fallthrough
CT: control target
= control target key end

     0   :  { %s1303_s21 = smov 0   ;;  %s1829_s0 = inlined_call_operand.vmem [shape: f32[2,1,4,4,65], index: 0, kind: input, shape index: {}]   ;;  %s1830_s1 = inlined_call_operand.vmem [shape: f32[585,32], index: 1, kind: input, shape index: {}]   ;;  %s1831_s2 = inlined_call_operand.vmem [shape: f32[585,1], index: 2, kind: input, shape index: {}]   ;;  %s1832_s3 = inlined_call_operand.vmem [shape: f32[1,32], index: 3, kind: input, shape index: {}]   ;;  %s1833_s4 = inlined_call_operand.vmem [shape: f32[1,32], index: 4, kind: input, shape index: {}]   ;;  %s1834_s5 = inlined_call_operand.vmem [shape: f32[2,2,2,32], index: 5, kind: output, shape index: {0}]   ;;  %s1835_s6 = inlined_call_operand.vmem [shape: f32[2,2,2,1], index: 6, kind: output, shape index: {1}]  }
   0x1 LB: > { %s1044_s22 = sadd.s32 4294967295, %s1253_s21   ;;  %p1048_p0 = scmp.ge.s32.totalorder %s1253_s21, 1  ;;  %s1253_s21 = sphi %s1303_s21, %s17_s21  }
   0x2   : > { %p215_p1 = scmp.lt.s32.totalorder %s1253_s21, 3 }
   0x4   : > { %p216_p2 = pnand %p1048_p0, %p215_p1 }
   0x5   : > { %p250_p3 = scmp.lt.s32.totalorder (!%p216_p2), %s1044_s22, 1  ;;  %s1256_s13 = smov (!%p216_p2), 67  }
   0x6   : > { %219 = sbr.rel (%p216_p2) target bundleno = 552 (0x228), region = 40  ;;  %s1257_s16 = smov (!%p216_p2), 65  }
   0x7   : > { %s1258_s17 = smov (!%p216_p2), 69   ;;  %s1259_s26 = smov (!%p216_p2), 2  }
   0x8   : > { %s1260_s24 = smov (!%p216_p2), 4   ;;  %s1261_s7 = smov (!%p216_p2), 6  }
   0x9   : > { %s1262_s29 = smov (!%p216_p2), 8   ;;  %s1263_s9 = smov (!%p216_p2), 71  }
   0xb   : > { %v292_v0 = vlaneseq  ;;  %v452_v1 = vld [vmem:[%s1830_s1 + $0xf0] sm:$0xff]  ;;  %v453_v2 = vld [vmem:[%s1830_s1 + $0xf8] sm:$0xff]  ;;  %v1255_v3 = vmov 1983009808   ;;  %v450_v8 = vld [vmem:[%s1830_s1 + $0xe0] sm:$0xff]  ;;  %s1837_s22 = smov (!%p250_p3, %s1044_s22), 1 }
   0xc   : > { %v290_v4 = vunpack.c.l.s4 %v1255_v3  ;;  %v511_v5 = vpack.c.bf16 %v453_v2, %v452_v1  ;;  %v436_v6 = vld [vmem:[%s1830_s1 + $0x70] sm:$0xff]  ;;  %v437_v7 = vld [vmem:[%s1830_s1 + $0x78] sm:$0xff]  ;;  %v451_v11 = vld [vmem:[%s1830_s1 + $0xe8] sm:$0xff]  ;;  %s1074_s23 = sshll.u32 %s1837_s22, 4  ;;  %vm537_vm0 = vcmask 1043456   ;;  %vm538_vm1 = vcmask 1044480  }
   0xd   : > { %v293_v9 = vshrl.u32 %v292_v0, 7  ;;  %v503_v10 = vpack.c.bf16 %v437_v7, %v436_v6  ;;  %v434_v12 = vld [vmem:[%s1830_s1 + $0x60] sm:$0xff]  ;;  %v435_v13 = vld [vmem:[%s1830_s1 + $0x68] sm:$0xff]  ;;  %v510_v15 = vpack.c.bf16 %v451_v11, %v450_v8  ;;  %v484_v16 = vld [vmem:[%s1830_s1 + $0x1f0] sm:$0xff]  ;;  %s1359_s8 = scalar_lea.vmem %s1829_s0, %s1074_s23  ;;  %vm401_vm2 = vcmask 531456   ;;  %s1075_s27 = sshll.u32 %s1837_s22, 2 }
   0xe   : > { %v291_v14 = vunpack.c.0.s8 %v290_v4  ;;  %1077 = vmatprep.subr.bf16.mxu0 %v511_v5  ;;  %v485_v17 = vld [vmem:[%s1830_s1 + $0x1f8] sm:$0xff]  ;;  %v448_v18 = vld [vmem:[%s1830_s1 + $0xd0] sm:$0xff]  ;;  %v502_v19 = vpack.c.bf16 %v435_v13, %v434_v12  ;;  %v1238_v29 = vld.sshfl [vmem:[%s1359_s8 + $0x4] sm:$0xf pattern:$0x76325410]  ;;  %s264_s30 = scalar_lea.vmem %s1835_s6, %s1075_s27 }
   0xf   : > { %1078 = vmatpush3.bf16.msra.mxu0 %v503_v10  ;;  %v527_v20 = vpack.c.bf16 %v485_v17, %v484_v16  ;;  %v449_v21 = vld [vmem:[%s1830_s1 + $0xd8] sm:$0xff]  ;;  %v468_v22 = vld [vmem:[%s1830_s1 + $0x170] sm:$0xff]  ;;  %v1239_v30 = vld.sshfl [vmem:[%s1359_s8 + $0x1] sm:$0xf pattern:$0x76325410]  ;;  %333 = vrot.lane.b32.xlu1 %v1238_v29, %s1256_s13  ;;  %s259_s13 = scalar_lea.vmem %s1834_s5, %s1075_s27 }
  0x10   : > { %v469_v23 = vld [vmem:[%s1830_s1 + $0x178] sm:$0xff]  ;;  %v1361_v24 = vsub.s32 %v291_v14, %v293_v9  ;;  %1079 = vmatprep.subr.bf16.mxu0 %v510_v15  ;;  %v509_v25 = vpack.c.bf16 %v449_v21, %v448_v18  ;;  %v432_v27 = vld [vmem:[%s1830_s1 + $0x50] sm:$0xff]  ;;  %v1240_v31 = vld.sshfl [vmem:[%s1359_s8 + $0x6] sm:$0xf pattern:$0x76325410]  ;;  %307 = vrot.lane.b32.xlu0 %v1239_v30, %s1257_s16 }
  0x11   : > { %v519_v26 = vpack.c.bf16 %v469_v23, %v468_v22  ;;  %v433_v28 = vld [vmem:[%s1830_s1 + $0x58] sm:$0xff]  ;;  %1099 = vmatprep.subr.bf16.mxu1 %v527_v20  ;;  %v1241_v33 = vld.sshfl [vmem:[%s1359_s8 + $0x2] sm:$0xf pattern:$0x76325410]  ;;  %v483_v39 = vld [vmem:[%s1830_s1 + $0x1e8] sm:$0xff] }
  0x12   : > { %v501_v32 = vpack.c.bf16 %v433_v28, %v432_v27  ;;  %v1242_v34 = vld.sshfl [vmem:[%s1359_s8 + $0x5] sm:$0xf pattern:$0x76325410]  ;;  %v480_v49 = vld [vmem:[%s1830_s1 + $0x1d0] sm:$0xff]  ;;  %v481_v50 = vld [vmem:[%s1830_s1 + $0x1d8] sm:$0xff] }
  0x13   : > { %1100 = vmatpush3.bf16.msra.mxu1 %v519_v26  ;;  %1080 = vmatpush3.bf16.msra.mxu0 %v502_v19  ;;  %v482_v35 = vld [vmem:[%s1830_s1 + $0x1e0] sm:$0xff]  ;;  %v1243_v36 = vld.sshfl [vmem:[%s1359_s8 + $0x8] sm:$0xf pattern:$0x76325410]  ;;  %v525_v52 = vpack.c.bf16 %v481_v50, %v480_v49  ;;  %v444_v53 = vld [vmem:[%s1830_s1 + $0xb0] sm:$0xff] }
  0x14   : > { %1081 = vmatprep.subr.bf16.mxu0 %v509_v25  ;;  %v1244_v37 = vld.sshfl [vmem:[%s1359_s8 + $0xa] sm:$0xf pattern:$0x76325410]  ;;  %359 = vrot.lane.b32.xlu1 %v1240_v31, %s1258_s17  ;;  %v446_v40 = vld [vmem:[%s1830_s1 + $0xc0] sm:$0xff]  ;;  %v526_v42 = vpack.c.bf16 %v483_v39, %v482_v35  ;;  %v445_v54 = vld [vmem:[%s1830_s1 + $0xb8] sm:$0xff] }
  0x15   : > { %v1245_v38 = vld.sshfl [vmem:[%s1359_s8 + $0x9] sm:$0xf pattern:$0x76325410]  ;;  %320 = vrot.lane.b32.xlu0 %v1241_v33, %s1259_s26  ;;  %v466_v44 = vld [vmem:[%s1830_s1 + $0x160] sm:$0xff]  ;;  %v464_v55 = vld [vmem:[%s1830_s1 + $0x150] sm:$0xff]  ;;  %v507_v56 = vpack.c.bf16 %v445_v54, %v444_v53 }
  0x16   : > { %v447_v41 = vld [vmem:[%s1830_s1 + $0xc8] sm:$0xff]  ;;  %v430_v46 = vld [vmem:[%s1830_s1 + $0x40] sm:$0xff]  ;;  %1101 = vmatprep.subr.bf16.mxu1 %v526_v42  ;;  %v465_v57 = vld [vmem:[%s1830_s1 + $0x158] sm:$0xff]  ;;  %vm403_vm3 = vcmask 15360   ;;  %vm405_vm4 = vcmask 547840   ;;  %vm407_vm5 = vcmask 31744  }
  0x17   : > { %1082 = vmatpush3.bf16.msra.mxu0 %v501_v32  ;;  %v508_v43 = vpack.c.bf16 %v447_v41, %v446_v40  ;;  %v467_v45 = vld [vmem:[%s1830_s1 + $0x168] sm:$0xff]  ;;  %v428_v58 = vld [vmem:[%s1830_s1 + $0x30] sm:$0xff]  ;;  %v429_v59 = vld [vmem:[%s1830_s1 + $0x38] sm:$0xff]  ;;  %v517_v60 = vpack.c.bf16 %v465_v57, %v464_v55  ;;  %vm409_vm6 = vcmask 564224   ;;  %vm411_vm7 = vcmask 48128  }
  0x18   : > { %v518_v47 = vpack.c.bf16 %v467_v45, %v466_v44  ;;  %v431_v48 = vld [vmem:[%s1830_s1 + $0x48] sm:$0xff]  ;;  %346 = vrot.lane.b32.xlu1 %v1242_v34, %s1260_s24  ;;  %v499_v61 = vpack.c.bf16 %v429_v59, %v428_v58  ;;  %v478_v62 = vld [vmem:[%s1830_s1 + $0x1c0] sm:$0xff]  ;;  %v476_v8 = vld [vmem:[%s1830_s1 + $0x1b0] sm:$0xff]  ;;  %vm413_vm8 = vcmask 580608   ;;  %vm1266_vm9 = vmmov 0  }
  0x19   : > { %1083 = vmatprep.subr.bf16.mxu0 %v508_v43  ;;  %v500_v51 = vpack.c.bf16 %v431_v48, %v430_v46  ;;  %372 = vrot.lane.b32.xlu0 %v1243_v36, %s1261_s7  ;;  %v479_v63 = vld [vmem:[%s1830_s1 + $0x1c8] sm:$0xff]  ;;  %v442_v0 = vld [vmem:[%s1830_s1 + $0xa0] sm:$0xff]  ;;  %v477_v10 = vld [vmem:[%s1830_s1 + $0x1b8] sm:$0xff]  ;;  %v1264_v46 = vmov 0.0   ;;  %vm415_vm10 = vcmask 64512   ;;  %vm533_vm11 = vcmask 596992  }
  0x1a   : > { %1102 = vmatpush3.bf16.msra.mxu1 %v518_v47  ;;  %v524_v1 = vpack.c.bf16 %v479_v63, %v478_v62  ;;  %v443_v2 = vld [vmem:[%s1830_s1 + $0xa8] sm:$0xff]  ;;  %v462_v3 = vld [vmem:[%s1830_s1 + $0x140] sm:$0xff]  ;;  %v523_v12 = vpack.c.bf16 %v477_v10, %v476_v8  ;;  %v440_v13 = vld [vmem:[%s1830_s1 + $0x90] sm:$0xff]  ;;  %vm953_vm13 = vcmask 1024   ;;  %vm939_vm14 = vcmask 254976  }
  0x1b   : > { %1084 = vmatpush3.bf16.msra.mxu0 %v500_v51  ;;  %1103 = vmatprep.subr.bf16.mxu1 %v525_v52  ;;  %v463_v4 = vld [vmem:[%s1830_s1 + $0x148] sm:$0xff]  ;;  %v506_v5 = vpack.c.bf16 %v443_v2, %v442_v0  ;;  %v426_v6 = vld [vmem:[%s1830_s1 + $0x20] sm:$0xff]  ;;  %v441_v14 = vld [vmem:[%s1830_s1 + $0x98] sm:$0xff] }
  0x1c   : > { %1085 = vmatprep.subr.bf16.mxu0 %v507_v56  ;;  %v427_v7 = vld [vmem:[%s1830_s1 + $0x28] sm:$0xff]  ;;  %398 = vrot.lane.b32.xlu1 %v1244_v37, %s1262_s29  ;;  %v516_v9 = vpack.c.bf16 %v463_v4, %v462_v3  ;;  %v505_v15 = vpack.c.bf16 %v441_v14, %v440_v13  ;;  %v460_v16 = vld [vmem:[%s1830_s1 + $0x130] sm:$0xff]  ;;  %v461_v17 = vld [vmem:[%s1830_s1 + $0x138] sm:$0xff]  ;;  %v1265_v56 = vmov 65535  }
  0x1d   : > { %385 = vrot.lane.b32.xlu0 %v1245_v38, %s1263_s9  ;;  %v498_v11 = vpack.c.bf16 %v427_v7, %v426_v6  ;;  %v424_v18 = vld [vmem:[%s1830_s1 + $0x10] sm:$0xff]  ;;  %v425_v19 = vld [vmem:[%s1830_s1 + $0x18] sm:$0xff]  ;;  %v474_v20 = vld [vmem:[%s1830_s1 + $0x1a0] sm:$0xff]  ;;  %v515_v22 = vpack.c.bf16 %v461_v17, %v460_v16  ;;  %v539_v57 = vsel %vm537_vm0, 4294967295, %v1265_v56 }
  0x1e   : > { %1104 = vmatpush3.bf16.msra.mxu1 %v517_v60  ;;  %v475_v21 = vld [vmem:[%s1830_s1 + $0x1a8] sm:$0xff]  ;;  %v438_v23 = vld [vmem:[%s1830_s1 + $0x80] sm:$0xff]  ;;  %v497_v26 = vpack.c.bf16 %v425_v19, %v424_v18  ;;  %v472_v33 = vld [vmem:[%s1830_s1 + $0x190] sm:$0xff] }
  0x1f   : > { %1086 = vmatpush3.bf16.msra.mxu0 %v499_v61  ;;  %1105 = vmatprep.subr.bf16.mxu1 %v524_v1  ;;  %v439_v25 = vld [vmem:[%s1830_s1 + $0x88] sm:$0xff]  ;;  %v522_v27 = vpack.c.bf16 %v475_v21, %v474_v20  ;;  %v458_v28 = vld [vmem:[%s1830_s1 + $0x120] sm:$0xff]  ;;  %v473_v34 = vld [vmem:[%s1830_s1 + $0x198] sm:$0xff]  ;;  %v1535_v61 = vsel %vm538_vm1, %v539_v57, 0 }
  0x20   : > { %1087 = vmatprep.subr.bf16.mxu0 %v506_v5  ;;  %v459_v29 = vld [vmem:[%s1830_s1 + $0x128] sm:$0xff]  ;;  %v422_v30 = vld [vmem:[%s1830_s1] sm:$0xff]  ;;  %v504_v31 = vpack.c.bf16 %v439_v25, %v438_v23  ;;  %v521_v37 = vpack.c.bf16 %v473_v34, %v472_v33  ;;  %v456_v38 = vld [vmem:[%s1830_s1 + $0x110] sm:$0xff] }
  0x21   : > { %v423_v32 = vld [vmem:[%s1830_s1 + $0x8] sm:$0xff]  ;;  %v514_v35 = vpack.c.bf16 %v459_v29, %v458_v28  ;;  %v457_v39 = vld [vmem:[%s1830_s1 + $0x118] sm:$0xff]  ;;  %v470_v40 = vld [vmem:[%s1830_s1 + $0x180] sm:$0xff] }
  0x22   : > { %1106 = vmatpush3.bf16.msra.mxu1 %v516_v9  ;;  %v496_v36 = vpack.c.bf16 %v423_v32, %v422_v30  ;;  %v471_v41 = vld [vmem:[%s1830_s1 + $0x188] sm:$0xff]  ;;  %v513_v42 = vpack.c.bf16 %v457_v39, %v456_v38  ;;  %v454_v44 = vld [vmem:[%s1830_s1 + $0x100] sm:$0xff]  ;;  %v694_v47 = vld [vmem:[%s1831_s2 + $0xf0] sm:$0xff] }
  0x23   : > { %1088 = vmatpush3.bf16.msra.mxu0 %v498_v11  ;;  %1107 = vmatprep.subr.bf16.mxu1 %v523_v12  ;;  %v520_v43 = vpack.c.bf16 %v471_v41, %v470_v40  ;;  %v455_v45 = vld [vmem:[%s1830_s1 + $0x108] sm:$0xff]  ;;  %v695_v48 = vld [vmem:[%s1831_s2 + $0xf8] sm:$0xff]  ;;  %v1246_v51 = vld.sshfl [vmem:[%s1359_s8] sm:$0xf pattern:$0x76325410] }
  0x24   : > { %1089 = vmatprep.subr.bf16.mxu0 %v505_v15  ;;  %v512_v49 = vpack.c.bf16 %v455_v45, %v454_v44  ;;  %v753_v50 = vpack.c.bf16 %v695_v48, %v694_v47  ;;  %v494_v54 = vld [vmem:[%s1830_s1 + $0x240] sm:$0xff]  ;;  %v495_v55 = vld [vmem:[%s1830_s1 + $0x248] sm:$0x1]  ;;  %v492_v6 = vld [vmem:[%s1830_s1 + $0x230] sm:$0xff] }
  0x25   : > { %v532_v59 = vpack.c.bf16 %v495_v55, %v494_v54  ;;  %v493_v7 = vld [vmem:[%s1830_s1 + $0x238] sm:$0xff]  ;;  %v678_v10 = vld [vmem:[%s1831_s2 + $0x70] sm:$0xff]  ;;  %v490_v12 = vld [vmem:[%s1830_s1 + $0x220] sm:$0xff] }
  0x26   : > { %1108 = vmatpush3.bf16.msra.mxu1 %v515_v22  ;;  %v531_v9 = vpack.c.bf16 %v493_v7, %v492_v6  ;;  %v679_v11 = vld [vmem:[%s1831_s2 + $0x78] sm:$0xff]  ;;  %v491_v16 = vld [vmem:[%s1830_s1 + $0x228] sm:$0xff]  ;;  %v692_v17 = vld [vmem:[%s1831_s2 + $0xe0] sm:$0xff] }
  0x27   : > { %1090 = vmatpush3.bf16.msra.mxu0 %v497_v26  ;;  %1109 = vmatprep.subr.bf16.mxu1 %v522_v27  ;;  %v542_v3 = vand.u32 %v1535_v61, %v532_v59  ;;  %v693_v18 = vld [vmem:[%s1831_s2 + $0xe8] sm:$0xff]  ;;  %v745_v21 = vpack.c.bf16 %v679_v11, %v678_v10  ;;  %v530_v23 = vpack.c.bf16 %v491_v16, %v490_v12  ;;  %v676_v26 = vld [vmem:[%s1831_s2 + $0x60] sm:$0xff]  ;;  %v488_v28 = vld [vmem:[%s1830_s1 + $0x210] sm:$0xff] }
  0x28   : > { %1091 = vmatprep.subr.bf16.mxu0 %v504_v31  ;;  %v752_v25 = vpack.c.bf16 %v693_v18, %v692_v17  ;;  %v677_v27 = vld [vmem:[%s1831_s2 + $0x68] sm:$0xff]  ;;  %v489_v29 = vld [vmem:[%s1830_s1 + $0x218] sm:$0xff]  ;;  %v690_v30 = vld [vmem:[%s1831_s2 + $0xd0] sm:$0xff] }
  0x29   : > { %v691_v31 = vld [vmem:[%s1831_s2 + $0xd8] sm:$0xff]  ;;  %v744_v32 = vpack.c.bf16 %v677_v27, %v676_v26  ;;  %v529_v33 = vpack.c.bf16 %v489_v29, %v488_v28  ;;  %v487_v38 = vld [vmem:[%s1830_s1 + $0x208] sm:$0xff]  ;;  %v688_v39 = vld [vmem:[%s1831_s2 + $0xc0] sm:$0xff] }
  0x2a   : > { %1110 = vmatpush3.bf16.msra.mxu1 %v514_v35  ;;  %v751_v34 = vpack.c.bf16 %v691_v31, %v690_v30  ;;  %v674_v35 = vld [vmem:[%s1831_s2 + $0x50] sm:$0xff]  ;;  %v689_v40 = vld [vmem:[%s1831_s2 + $0xc8] sm:$0xff]  ;;  %v672_v48 = vld [vmem:[%s1831_s2 + $0x40] sm:$0xff] }
  0x2b   : > { %1092 = vmatpush3.bf16.msra.mxu0 %v496_v36  ;;  %1111 = vmatprep.subr.bf16.mxu1 %v521_v37  ;;  %v675_v36 = vld [vmem:[%s1831_s2 + $0x58] sm:$0xff]  ;;  %v486_v37 = vld [vmem:[%s1830_s1 + $0x200] sm:$0xff]  ;;  %v726_v41 = vld [vmem:[%s1831_s2 + $0x1f0] sm:$0xff]  ;;  %v750_v47 = vpack.c.bf16 %v689_v40, %v688_v39 }
  0x2c   : > { %1177 = vmatprep.subr.bf16.mxu0 %v1264_v46  ;;  %v743_v44 = vpack.c.bf16 %v675_v36, %v674_v35  ;;  %v528_v45 = vpack.c.bf16 %v487_v38, %v486_v37  ;;  %v687_v55 = vld [vmem:[%s1831_s2 + $0xb8] sm:$0xff]  ;;  %v724_v56 = vld [vmem:[%s1831_s2 + $0x1e0] sm:$0xff]  ;;  %v725_v57 = vld [vmem:[%s1831_s2 + $0x1e8] sm:$0xff] }
  0x2d   : > { %v685_v6 = vld [vmem:[%s1831_s2 + $0xa8] sm:$0xff]  ;;  %v722_v7 = vld [vmem:[%s1831_s2 + $0x1d0] sm:$0xff]  ;;  %v668_v12 = vld [vmem:[%s1831_s2 + $0x20] sm:$0xff] }
  0x2e   : > { %1112 = vmatpush3.bf16.msra.mxu1 %v513_v42  ;;  %v727_v42 = vld [vmem:[%s1831_s2 + $0x1f8] sm:$0xff]  ;;  %v682_v17 = vld [vmem:[%s1831_s2 + $0x90] sm:$0xff]  ;;  %v704_v28 = vld [vmem:[%s1831_s2 + $0x140] sm:$0xff] }
  0x2f   : > { %1113 = vmatprep.subr.bf16.mxu1 %v520_v43  ;;  %v707_v16 = vld [vmem:[%s1831_s2 + $0x158] sm:$0xff]  ;;  %v666_v26 = vld [vmem:[%s1831_s2 + $0x10] sm:$0xff]  ;;  %v705_v30 = vld [vmem:[%s1831_s2 + $0x148] sm:$0xff] }
  0x30   : > { %v683_v18 = vld [vmem:[%s1831_s2 + $0x98] sm:$0xff]  ;;  %v680_v31 = vld [vmem:[%s1831_s2 + $0x80] sm:$0xff]  ;;  %v758_v37 = vpack.c.bf16 %v705_v30, %v704_v28  ;;  %v665_v39 = vld [vmem:[%s1831_s2 + $0x8] sm:$0xff] }
  0x31   : > { %v667_v27 = vld [vmem:[%s1831_s2 + $0x18] sm:$0xff]  ;;  %v664_v36 = vld [vmem:[%s1831_s2] sm:$0xff] }
  0x32   : > { %1114 = vmatpush3.bf16.msra.mxu1 %v512_v49  ;;  %v673_v49 = vld [vmem:[%s1831_s2 + $0x48] sm:$0xff]  ;;  %v739_v35 = vpack.c.bf16 %v667_v27, %v666_v26  ;;  %v736_v40 = vld [vmem:[%s1831_s2 + $0x240] sm:$0xff] }
  0x33   : > { %1127 = vmatprep.subr.bf16.mxu1 %v753_v50  ;;  %v769_v50 = vpack.c.bf16 %v727_v42, %v726_v41  ;;  %v737_v41 = vld [vmem:[%s1831_s2 + $0x248] sm:$0x1] }
  0x81   : > { %v334_v52 = vpop.permute.xlu1 %333 }
  0x82   : > { %v308_v53 = vpop.permute.xlu0 %307 }
  0x83   : > { %v402_v62 = vsel %vm401_vm2, %v1246_v51, %v308_v53  ;;  %v710_v51 = vld [vmem:[%s1831_s2 + $0x170] sm:$0xff] }
  0x84   : > { %v1538_v4 = vpack.c.bf16 %v402_v62, %v402_v62  ;;  %v671_v62 = vld [vmem:[%s1831_s2 + $0x38] sm:$0xff] }
  0x86   : > { %v360_v58 = vpop.permute.xlu1 %359 }
  0x87   : > { %v321_v60 = vpop.permute.xlu0 %320 }
  0x88   : > { %v404_v63 = vsel %vm403_vm3, %v308_v53, %v321_v60  ;;  %v686_v53 = vld [vmem:[%s1831_s2 + $0xb0] sm:$0xff] }
  0x89   : > { %v406_v0 = vsel %vm405_vm4, %v404_v63, %v334_v52  ;;  %v670_v60 = vld [vmem:[%s1831_s2 + $0x30] sm:$0xff]  ;;  %v708_v63 = vld [vmem:[%s1831_s2 + $0x160] sm:$0xff] }
  0x8a   : > { %v347_v1 = vpop.permute.xlu1 %346  ;;  %v418_v2 = vpack.c.bf16 %v406_v0, %v406_v0 }
  0x8b   : > { %v373_v5 = vpop.permute.xlu0 %372  ;;  %v408_v8 = vsel %vm407_vm5, %v334_v52, %v347_v1  ;;  %v711_v52 = vld [vmem:[%s1831_s2 + $0x178] sm:$0xff]  ;;  %v749_v1 = vpack.c.bf16 %v687_v55, %v686_v53  ;;  %v701_v53 = vld [vmem:[%s1831_s2 + $0x128] sm:$0xff] }
  0x8c   : > { %576 = vmatprep.mubr.bf16.mxu0 %v418_v2  ;;  %v410_v13 = vsel %vm409_vm6, %v408_v8, %v360_v58  ;;  %v412_v14 = vsel %vm411_vm7, %v360_v58, %v373_v5  ;;  %v742_v58 = vpack.c.bf16 %v673_v49, %v672_v48  ;;  %v761_v59 = vpack.c.bf16 %v711_v52, %v710_v51  ;;  %v684_v5 = vld [vmem:[%s1831_s2 + $0xa0] sm:$0xff]  ;;  %v723_v8 = vld [vmem:[%s1831_s2 + $0x1d8] sm:$0xff] }
  0x8d   : > { %577 = vmatmul.mubr.bf16.vlgmr.msra.gmra.mxu0 %v1538_v4  ;;  %v1570_v22 = vpack.c.bf16 %v410_v13, %v410_v13  ;;  %v748_v11 = vpack.c.bf16 %v685_v6, %v684_v5  ;;  %v669_v13 = vld [vmem:[%s1831_s2 + $0x28] sm:$0xff]  ;;  %v738_v48 = vpack.c.bf16 %v665_v39, %v664_v36  ;;  %v774_v49 = vpack.c.bf16 %v737_v41, %v736_v40  ;;  %v700_v52 = vld [vmem:[%s1831_s2 + $0x120] sm:$0xff]  ;;  %v715_v55 = vld [vmem:[%s1831_s2 + $0x198] sm:$0xff] }
  0x8e   : > { %1178 = vmatpush3.bf16.msra.mxu0 %v542_v3  ;;  %1187 = vmatprep.mubr.msk.bf16.mxu0 %vm1266_vm9, %v1264_v46  ;;  %v399_v43 = vpop.permute.xlu1 %398  ;;  %v709_v3 = vld [vmem:[%s1831_s2 + $0x168] sm:$0xff] }
  0x8f   : > { %v386_v15 = vpop.permute.xlu0 %385  ;;  %1179 = vmatprep.subr.bf16.mxu0 %v1264_v46  ;;  %v760_v10 = vpack.c.bf16 %v709_v3, %v708_v63  ;;  %v712_v63 = vld [vmem:[%s1831_s2 + $0x180] sm:$0xff]  ;;  %v733_v5 = vld [vmem:[%s1831_s2 + $0x228] sm:$0xff] }
  0x90   : > { %v414_v19 = vsel %vm413_vm8, %v412_v14, %v386_v15  ;;  %v416_v54 = vsel %vm415_vm10, %v386_v15, %v399_v43  ;;  %v706_v14 = vld [vmem:[%s1831_s2 + $0x150] sm:$0xff]  ;;  %v767_v15 = vpack.c.bf16 %v723_v8, %v722_v7  ;;  %v696_v7 = vld [vmem:[%s1831_s2 + $0x100] sm:$0xff]  ;;  %v697_v8 = vld [vmem:[%s1831_s2 + $0x108] sm:$0xff] }
  0x91   : > { %v1568_v20 = vpack.c.bf16 %v414_v19, %v414_v19  ;;  %v1652_v0 = vpack.c.bf16 %v416_v54, %v416_v54  ;;  %v720_v19 = vld [vmem:[%s1831_s2 + $0x1c0] sm:$0xff]  ;;  %v702_v43 = vld [vmem:[%s1831_s2 + $0x130] sm:$0xff] }
  0x92   : > { %1180 = vmatpush3.bf16.msra.mxu0 %v531_v9  ;;  %v741_v9 = vpack.c.bf16 %v671_v62, %v670_v60  ;;  %v714_v54 = vld [vmem:[%s1831_s2 + $0x190] sm:$0xff] }
  0x93   : > { %616 = vmatprep.mubr.bf16.mxu1 %v1568_v20  ;;  %1181 = vmatprep.subr.bf16.mxu0 %v1264_v46  ;;  %v763_v60 = vpack.c.bf16 %v715_v55, %v714_v54  ;;  %v698_v62 = vld [vmem:[%s1831_s2 + $0x110] sm:$0xff] }
  0x94   : > { %617 = vmatmul.mubr.bf16.vlgmr.msra.gmra.mxu1 %v1570_v22 }
  0x95   : > { %1128 = vmatpush3.bf16.msra.mxu1 %v745_v21  ;;  %810 = vmatprep.mubr.bf16.mxu1 %v418_v2  ;;  %v768_v2 = vpack.c.bf16 %v725_v57, %v724_v56  ;;  %v740_v21 = vpack.c.bf16 %v669_v13, %v668_v12  ;;  %v776_v56 = vand.u32 %v774_v49, %v1535_v61  ;;  %v699_v61 = vld [vmem:[%s1831_s2 + $0x118] sm:$0xff] }
  0x96   : > { %1182 = vmatpush3.bf16.msra.mxu0 %v530_v23  ;;  %1129 = vmatprep.subr.bf16.mxu1 %v752_v25  ;;  %v759_v23 = vpack.c.bf16 %v707_v16, %v706_v14  ;;  %v747_v25 = vpack.c.bf16 %v683_v18, %v682_v17  ;;  %v756_v57 = vpack.c.bf16 %v701_v53, %v700_v52  ;;  %v731_v12 = vld [vmem:[%s1831_s2 + $0x218] sm:$0xff]  ;;  %v728_v14 = vld [vmem:[%s1831_s2 + $0x200] sm:$0xff]  ;;  %v1267_v17 = vmov 0  }
  0x97   : > { %1183 = vmatprep.subr.bf16.mxu0 %v1264_v46  ;;  %v755_v3 = vpack.c.bf16 %v699_v61, %v698_v62  ;;  %1226 = vset.pattern.permute.xlu0 %v1267_v17 }
  0x99   : > { %1130 = vmatpush3.bf16.msra.mxu1 %v744_v32  ;;  %v681_v32 = vld [vmem:[%s1831_s2 + $0x88] sm:$0xff] }
  0x9a   : > { %1184 = vmatpush3.bf16.msra.mxu0 %v529_v33  ;;  %1131 = vmatprep.subr.bf16.mxu1 %v751_v34  ;;  %v718_v33 = vld [vmem:[%s1831_s2 + $0x1b0] sm:$0xff]  ;;  %v719_v34 = vld [vmem:[%s1831_s2 + $0x1b8] sm:$0xff]  ;;  %v746_v38 = vpack.c.bf16 %v681_v32, %v680_v31 }
  0x9b   : > { %1185 = vmatprep.subr.bf16.mxu0 %v1264_v46  ;;  %v765_v42 = vpack.c.bf16 %v719_v34, %v718_v33 }
  0x9d   : > { %1132 = vmatpush3.bf16.msra.mxu1 %v743_v44  ;;  %v703_v44 = vld [vmem:[%s1831_s2 + $0x138] sm:$0xff] }
  0x9e   : > { %1186 = vmatpush3.bf16.msra.mxu0 %v528_v45  ;;  %1133 = vmatprep.subr.bf16.mxu1 %v750_v47  ;;  %v716_v45 = vld [vmem:[%s1831_s2 + $0x1a0] sm:$0xff]  ;;  %v717_v47 = vld [vmem:[%s1831_s2 + $0x1a8] sm:$0xff] }
  0x9f   : > { %1149 = vmatprep.subr.bf16.mxu0 %v769_v50  ;;  %v757_v50 = vpack.c.bf16 %v703_v44, %v702_v43  ;;  %v764_v51 = vpack.c.bf16 %v717_v47, %v716_v45 }
  0xa1   : > { %1188 = vmatmul.mubr.msk.bf16.vlgmr.msra.gmra.mxu0 %vm533_vm11, %v1652_v0  ;;  %1134 = vmatpush3.bf16.msra.mxu1 %v742_v58  ;;  %v734_v58 = vld [vmem:[%s1831_s2 + $0x230] sm:$0xff] }
  0xa2   : > { %1150 = vmatpush3.bf16.msra.mxu0 %v761_v59  ;;  %850 = vmatprep.mubr.bf16.mxu0 %v1568_v20  ;;  %v721_v20 = vld [vmem:[%s1831_s2 + $0x1c8] sm:$0xff]  ;;  %v735_v59 = vld [vmem:[%s1831_s2 + $0x238] sm:$0xff] }
  0xa3   : > { %1135 = vmatprep.subr.bf16.mxu1 %v749_v1  ;;  %1151 = vmatprep.subr.bf16.mxu0 %v768_v2  ;;  %v766_v29 = vpack.c.bf16 %v721_v20, %v720_v19  ;;  %v713_v1 = vld [vmem:[%s1831_s2 + $0x188] sm:$0xff]  ;;  %v773_v2 = vpack.c.bf16 %v735_v59, %v734_v58  ;;  %v1070_v58 = vld [vmem:[%s1832_s3] ss:$0 sm:$0xff] }
  0xa4   : > { %v762_v6 = vpack.c.bf16 %v713_v1, %v712_v63 }
  0xa5   : > { %1136 = vmatpush3.bf16.msra.mxu1 %v741_v9 }
  0xa6   : > { %1152 = vmatpush3.bf16.msra.mxu0 %v760_v10  ;;  %1137 = vmatprep.subr.bf16.mxu1 %v748_v11  ;;  %v754_v10 = vpack.c.bf16 %v697_v8, %v696_v7  ;;  %v730_v11 = vld [vmem:[%s1831_s2 + $0x210] sm:$0xff] }
  0xa7   : > { %1153 = vmatprep.subr.bf16.mxu0 %v767_v15  ;;  %v771_v13 = vpack.c.bf16 %v731_v12, %v730_v11  ;;  %v729_v15 = vld [vmem:[%s1831_s2 + $0x208] sm:$0xff] }
  0xa8   : > { %v770_v16 = vpack.c.bf16 %v729_v15, %v728_v14 }
  0xa9   : > { %1138 = vmatpush3.bf16.msra.mxu1 %v740_v21 }
  0xaa   : > { %1154 = vmatpush3.bf16.msra.mxu0 %v759_v23  ;;  %1139 = vmatprep.subr.bf16.mxu1 %v747_v25 }
  0xab   : > { %1155 = vmatprep.subr.bf16.mxu0 %v766_v29 }
  0xad   : > { %1140 = vmatpush3.bf16.msra.mxu1 %v739_v35 }
  0xae   : > { %1156 = vmatpush3.bf16.msra.mxu0 %v758_v37  ;;  %1141 = vmatprep.subr.bf16.mxu1 %v746_v38 }
  0xaf   : > { %1157 = vmatprep.subr.bf16.mxu0 %v765_v42 }
  0xb1   : > { %1142 = vmatpush3.bf16.msra.mxu1 %v738_v48 }
  0xb2   : > { %1158 = vmatpush3.bf16.msra.mxu0 %v757_v50  ;;  %1191 = vmatprep.subr.bf16.mxu1 %v1264_v46 }
  0xb3   : > { %1159 = vmatprep.subr.bf16.mxu0 %v764_v51 }
  0xb4   : > { %811 = vmatmul.mubr.bf16.vlgmr.msra.gmra.mxu1 %v1538_v4  ;;  %v732_v4 = vld [vmem:[%s1831_s2 + $0x220] sm:$0xff] }
  0xb5   : > { %1192 = vmatpush3.bf16.msra.mxu1 %v776_v56  ;;  %1201 = vmatprep.mubr.msk.bf16.mxu1 %vm1266_vm9, %v1264_v46  ;;  %v772_v9 = vpack.c.bf16 %v733_v5, %v732_v4 }
  0xb6   : > { %1160 = vmatpush3.bf16.msra.mxu0 %v756_v57  ;;  %1193 = vmatprep.subr.bf16.mxu1 %v1264_v46 }
  0xb7   : > { %1161 = vmatprep.subr.bf16.mxu0 %v763_v60 }
  0xb9   : > { %1194 = vmatpush3.bf16.msra.mxu1 %v773_v2 }
  0xba   : > { %1162 = vmatpush3.bf16.msra.mxu0 %v755_v3  ;;  %1195 = vmatprep.subr.bf16.mxu1 %v1264_v46 }
  0xbb   : > { %1163 = vmatprep.subr.bf16.mxu0 %v762_v6 }
  0xbd   : > { %1196 = vmatpush3.bf16.msra.mxu1 %v772_v9 }
  0xbe   : > { %1164 = vmatpush3.bf16.msra.mxu0 %v754_v10  ;;  %1197 = vmatprep.subr.bf16.mxu1 %v1264_v46 }
  0xc1   : > { %851 = vmatmul.mubr.bf16.vlgmr.msra.gmra.mxu0 %v1570_v22  ;;  %1198 = vmatpush3.bf16.msra.mxu1 %v771_v13 }
  0xc2   : > { %1199 = vmatprep.subr.bf16.mxu1 %v1264_v46 }
  0xc5   : > { %1200 = vmatpush3.bf16.msra.mxu1 %v770_v16 }
  0xc8   : > { %1202 = vmatmul.mubr.msk.bf16.vlgmr.msra.gmra.mxu1 %vm533_vm11, %v1652_v0 }
 0x14d   : > { %v1093_v18 = vpop.f32.mrf.mxu0 }
 0x14f   : > { %v1094_v19 = vpop.f32.mrf.mxu0 }
 0x150   : > { %v1095_v20 = vadd.f32 %v1094_v19, %v1093_v18 }
 0x151   : > { %v1096_v21 = vpop.f32.mrf.mxu0 }
 0x153   : > { %v1097_v23 = vpop.f32.mrf.mxu0 }
 0x154   : > { %v1115_v25 = vpop.f32.mrf.mxu1 }
 0x156   : > { %v1116_v26 = vpop.f32.mrf.mxu1 }
 0x157   : > { %v1117_v27 = vadd.f32 %v1116_v26, %v1115_v25 }
 0x158   : > { %v1118_v28 = vpop.f32.mrf.mxu1 }
 0x159   : > { %v619_v22 = vadd.f32 %v1117_v27, %v1095_v20 }
 0x15a   : > { %v1119_v29 = vpop.f32.mrf.mxu1 }
 0x161   : > { %v658_v30 = vpop.f32.mrf.mxu0 }
 0x162   : > { %v659_v31 = vadd.f32 %v658_v30, %v619_v22 }
 0x163   : > { %v1189_v32 = vpop.f32.mrf.mxu0 }
 0x165   : > { %v661_v33 = vpop.f32.mrf.mxu0 }
 0x167   : > { %v1190_v34 = vpop.f32.mrf.mxu0 }
 0x174   : > { %v1143_v0 = vpop.f32.mrf.mxu1 }
 0x176   : > { %v1144_v35 = vpop.f32.mrf.mxu1 }
 0x177   : > { %v1145_v40 = vadd.f32 %v1144_v35, %v1143_v0 }
 0x178   : > { %v1146_v36 = vpop.f32.mrf.mxu1 }
 0x17a   : > { %v1147_v37 = vpop.f32.mrf.mxu1 }
 0x181   : > { %v1165_v38 = vpop.f32.mrf.mxu0 }
 0x183   : > { %v1166_v39 = vpop.f32.mrf.mxu0 }
 0x184   : > { %v1167_v41 = vadd.f32 %v1166_v39, %v1165_v38 }
 0x185   : > { %v1168_v42 = vpop.f32.mrf.mxu0 }
 0x186   : > { %v853_v43 = vadd.f32 %v1167_v41, %v1145_v40 }
 0x187   : > { %v1169_v44 = vpop.f32.mrf.mxu0 }
 0x188   : > { %v892_v45 = vpop.f32.mrf.mxu1 }
 0x189   : > { %v893_v47 = vadd.f32 %v892_v45, %v853_v43 }
 0x18a   : > { %v1203_v48 = vpop.f32.mrf.mxu1 }
 0x18b   : > { %vm898_vm12 = vcmp.gt.f32.partialorder %v893_v47, 0.0  ;;  %v901_v49 = vadd.f32 1e-08, %v893_v47 }
 0x18c   : > { %v1069_v50 = vsel %vm898_vm12, 1.0, %v1264_v46  ;;  %v895_v51 = vpop.f32.mrf.mxu1  ;;  %v1071_v46 = vld [vmem:[%s1833_s4] ss:$0 sm:$0xff] }
 0x18d   : > { %1236 = vrcp.f32 %v901_v49  ;;  %v949_v52 = vrot.slane %v1069_v50, %v1361_v24 }
 0x18e   : > { %v1204_v53 = vpop.f32.mrf.mxu1 }
 0x18f   : > { %v950_v54 = vcombine.high %v949_v52, %v949_v52  ;;  %954 = vst.msk [vmem:[%s264_s30] sm:$0x3] %vm953_vm13, %v949_v52 }
 0x191   : > { %955 = vst.msk [vmem:[%s264_s30 + $0x2] sm:$0x3] %vm953_vm13, %v950_v54 }
 0x19a   : > { %v1237_v55 = vpop.eup %1236 }
 0x19b   : > { %v903_v56 = vmul.f32 9.0, %v1237_v55 }
 0x19d   : > { %v904_v57 = vmul.f32 %v1069_v50, %v903_v56 }
 0x19f   : > { %907 = vperm.xlu0 %1226, %v904_v57  }
 0x21a   : > { %v908_v59 = vpop.permute.xlu0 %907 }
 0x21b   : > { %v910_v60 = vmul.f32 %v908_v59, %v659_v31 }
 0x21d   : > { %v918_v62 = vmul.f32 %v1070_v58, %v910_v60 }
 0x21f   : > { %v926_v61 = vadd.f32 %v1071_v46, %v918_v62 }
 0x221   : > { %v927_v63 = vmax.f32 %v926_v61, 0.0 }
 0x223   : > { %v935_v1 = vrot.slane %v927_v63, %v1361_v24 }
 0x225   : > { %v936_v2 = vcombine.high %v935_v1, %v935_v1  ;;  %940 = vst.msk [vmem:[%s259_s13] sm:$0x3] %vm939_vm14, %v935_v1 }
 0x227   : > { %941 = vst.msk [vmem:[%s259_s13 + $0x2] sm:$0x3] %vm939_vm14, %v936_v2 }
 0x228 PF: > { %s17_s21 = sadd.s32 1, %s1253_s21  }
 0x229   : > { %p14_p4 = scmp.ge.s32.totalorder %s17_s21, 4  }
 0x22b   :  { %16 = sbr.rel (!%p14_p4) target bundleno = 1 (0x1), region = 84 }

// kernel: generator_forward.61
= control target key start
LH: loop header
LB: loop body
LE: loop exit
PB: predicated region body
PF: predicated region fallthrough
CT: control target
= control target key end

     0   :  { %s1303_s21 = smov 0   ;;  %s1829_s0 = inlined_call_operand.vmem [shape: f32[2,1,4,4,65], index: 0, kind: input, shape index: {}]   ;;  %s1830_s1 = inlined_call_operand.vmem [shape: f32[585,16], index: 1, kind: input, shape index: {}]   ;;  %s1831_s2 = inlined_call_operand.vmem [shape: f32[585,1], index: 2, kind: input, shape index: {}]   ;;  %s1832_s3 = inlined_call_operand.vmem [shape: f32[1,16], index: 3, kind: input, shape index: {}]   ;;  %s1833_s4 = inlined_call_operand.vmem [shape: f32[1,16], index: 4, kind: input, shape index: {}]   ;;  %s1834_s5 = inlined_call_operand.vmem [shape: f32[2,2,2,16], index: 5, kind: output, shape index: {0}]   ;;  %s1835_s6 = inlined_call_operand.vmem [shape: f32[2,2,2,1], index: 6, kind: output, shape index: {1}]  }
   0x1 LB: > { %s1044_s22 = sadd.s32 4294967295, %s1253_s21   ;;  %p1048_p0 = scmp.ge.s32.totalorder %s1253_s21, 1  ;;  %s1253_s21 = sphi %s1303_s21, %s17_s21  }
   0x2   : > { %p215_p1 = scmp.lt.s32.totalorder %s1253_s21, 3 }
   0x4   : > { %p216_p2 = pnand %p1048_p0, %p215_p1 }
   0x5   : > { %p250_p3 = scmp.lt.s32.totalorder (!%p216_p2), %s1044_s22, 1  ;;  %s1256_s13 = smov (!%p216_p2), 67  }
   0x6   : > { %219 = sbr.rel (%p216_p2) target bundleno = 552 (0x228), region = 40  ;;  %s1257_s16 = smov (!%p216_p2), 65  }
   0x7   : > { %s1258_s17 = smov (!%p216_p2), 69   ;;  %s1259_s26 = smov (!%p216_p2), 2  }
   0x8   : > { %s1260_s24 = smov (!%p216_p2), 4   ;;  %s1261_s7 = smov (!%p216_p2), 6  }
   0x9   : > { %s1262_s29 = smov (!%p216_p2), 8   ;;  %s1263_s9 = smov (!%p216_p2), 71  }
   0xb   : > { %v292_v0 = vlaneseq  ;;  %v452_v1 = vld [vmem:[%s1830_s1 + $0xf0] sm:$0xff]  ;;  %v453_v2 = vld [vmem:[%s1830_s1 + $0xf8] sm:$0xff]  ;;  %v1255_v3 = vmov 1983009808   ;;  %v450_v8 = vld [vmem:[%s1830_s1 + $0xe0] sm:$0xff]  ;;  %s1837_s22 = smov (!%p250_p3, %s1044_s22), 1 }
   0xc   : > { %v290_v4 = vunpack.c.l.s4 %v1255_v3  ;;  %v511_v5 = vpack.c.bf16 %v453_v2, %v452_v1  ;;  %v436_v6 = vld [vmem:[%s1830_s1 + $0x70] sm:$0xff]  ;;  %v437_v7 = vld [vmem:[%s1830_s1 + $0x78] sm:$0xff]  ;;  %v451_v11 = vld [vmem:[%s1830_s1 + $0xe8] sm:$0xff]  ;;  %s1074_s23 = sshll.u32 %s1837_s22, 4  ;;  %vm537_vm0 = vcmask 1043456   ;;  %vm538_vm1 = vcmask 1044480  }
   0xd   : > { %v293_v9 = vshrl.u32 %v292_v0, 7  ;;  %v503_v10 = vpack.c.bf16 %v437_v7, %v436_v6  ;;  %v434_v12 = vld [vmem:[%s1830_s1 + $0x60] sm:$0xff]  ;;  %v435_v13 = vld [vmem:[%s1830_s1 + $0x68] sm:$0xff]  ;;  %v510_v15 = vpack.c.bf16 %v451_v11, %v450_v8  ;;  %v484_v16 = vld [vmem:[%s1830_s1 + $0x1f0] sm:$0xff]  ;;  %s1359_s8 = scalar_lea.vmem %s1829_s0, %s1074_s23  ;;  %vm401_vm2 = vcmask 531456   ;;  %s1075_s27 = sshll.u32 %s1837_s22, 2 }
   0xe   : > { %v291_v14 = vunpack.c.0.s8 %v290_v4  ;;  %1077 = vmatprep.subr.bf16.mxu0 %v511_v5  ;;  %v485_v17 = vld [vmem:[%s1830_s1 + $0x1f8] sm:$0xff]  ;;  %v448_v18 = vld [vmem:[%s1830_s1 + $0xd0] sm:$0xff]  ;;  %v502_v19 = vpack.c.bf16 %v435_v13, %v434_v12  ;;  %v1238_v29 = vld.sshfl [vmem:[%s1359_s8 + $0x4] sm:$0xf pattern:$0x76325410]  ;;  %s264_s30 = scalar_lea.vmem %s1835_s6, %s1075_s27 }
   0xf   : > { %1078 = vmatpush3.bf16.msra.mxu0 %v503_v10  ;;  %v527_v20 = vpack.c.bf16 %v485_v17, %v484_v16  ;;  %v449_v21 = vld [vmem:[%s1830_s1 + $0xd8] sm:$0xff]  ;;  %v468_v22 = vld [vmem:[%s1830_s1 + $0x170] sm:$0xff]  ;;  %v1239_v30 = vld.sshfl [vmem:[%s1359_s8 + $0x1] sm:$0xf pattern:$0x76325410]  ;;  %333 = vrot.lane.b32.xlu1 %v1238_v29, %s1256_s13  ;;  %s259_s13 = scalar_lea.vmem %s1834_s5, %s1075_s27 }
  0x10   : > { %v469_v23 = vld [vmem:[%s1830_s1 + $0x178] sm:$0xff]  ;;  %v1361_v24 = vsub.s32 %v291_v14, %v293_v9  ;;  %1079 = vmatprep.subr.bf16.mxu0 %v510_v15  ;;  %v509_v25 = vpack.c.bf16 %v449_v21, %v448_v18  ;;  %v432_v27 = vld [vmem:[%s1830_s1 + $0x50] sm:$0xff]  ;;  %v1240_v31 = vld.sshfl [vmem:[%s1359_s8 + $0x6] sm:$0xf pattern:$0x76325410]  ;;  %307 = vrot.lane.b32.xlu0 %v1239_v30, %s1257_s16 }
  0x11   : > { %v519_v26 = vpack.c.bf16 %v469_v23, %v468_v22  ;;  %v433_v28 = vld [vmem:[%s1830_s1 + $0x58] sm:$0xff]  ;;  %1099 = vmatprep.subr.bf16.mxu1 %v527_v20  ;;  %v1241_v33 = vld.sshfl [vmem:[%s1359_s8 + $0x2] sm:$0xf pattern:$0x76325410]  ;;  %v483_v39 = vld [vmem:[%s1830_s1 + $0x1e8] sm:$0xff] }
  0x12   : > { %v501_v32 = vpack.c.bf16 %v433_v28, %v432_v27  ;;  %v1242_v34 = vld.sshfl [vmem:[%s1359_s8 + $0x5] sm:$0xf pattern:$0x76325410]  ;;  %v480_v49 = vld [vmem:[%s1830_s1 + $0x1d0] sm:$0xff]  ;;  %v481_v50 = vld [vmem:[%s1830_s1 + $0x1d8] sm:$0xff] }
  0x13   : > { %1100 = vmatpush3.bf16.msra.mxu1 %v519_v26  ;;  %1080 = vmatpush3.bf16.msra.mxu0 %v502_v19  ;;  %v482_v35 = vld [vmem:[%s1830_s1 + $0x1e0] sm:$0xff]  ;;  %v1243_v36 = vld.sshfl [vmem:[%s1359_s8 + $0x8] sm:$0xf pattern:$0x76325410]  ;;  %v525_v52 = vpack.c.bf16 %v481_v50, %v480_v49  ;;  %v444_v53 = vld [vmem:[%s1830_s1 + $0xb0] sm:$0xff] }
  0x14   : > { %1081 = vmatprep.subr.bf16.mxu0 %v509_v25  ;;  %v1244_v37 = vld.sshfl [vmem:[%s1359_s8 + $0xa] sm:$0xf pattern:$0x76325410]  ;;  %359 = vrot.lane.b32.xlu1 %v1240_v31, %s1258_s17  ;;  %v446_v40 = vld [vmem:[%s1830_s1 + $0xc0] sm:$0xff]  ;;  %v526_v42 = vpack.c.bf16 %v483_v39, %v482_v35  ;;  %v445_v54 = vld [vmem:[%s1830_s1 + $0xb8] sm:$0xff] }
  0x15   : > { %v1245_v38 = vld.sshfl [vmem:[%s1359_s8 + $0x9] sm:$0xf pattern:$0x76325410]  ;;  %320 = vrot.lane.b32.xlu0 %v1241_v33, %s1259_s26  ;;  %v466_v44 = vld [vmem:[%s1830_s1 + $0x160] sm:$0xff]  ;;  %v464_v55 = vld [vmem:[%s1830_s1 + $0x150] sm:$0xff]  ;;  %v507_v56 = vpack.c.bf16 %v445_v54, %v444_v53 }
  0x16   : > { %v447_v41 = vld [vmem:[%s1830_s1 + $0xc8] sm:$0xff]  ;;  %v430_v46 = vld [vmem:[%s1830_s1 + $0x40] sm:$0xff]  ;;  %1101 = vmatprep.subr.bf16.mxu1 %v526_v42  ;;  %v465_v57 = vld [vmem:[%s1830_s1 + $0x158] sm:$0xff]  ;;  %vm403_vm3 = vcmask 15360   ;;  %vm405_vm4 = vcmask 547840   ;;  %vm407_vm5 = vcmask 31744  }
  0x17   : > { %1082 = vmatpush3.bf16.msra.mxu0 %v501_v32  ;;  %v508_v43 = vpack.c.bf16 %v447_v41, %v446_v40  ;;  %v467_v45 = vld [vmem:[%s1830_s1 + $0x168] sm:$0xff]  ;;  %v428_v58 = vld [vmem:[%s1830_s1 + $0x30] sm:$0xff]  ;;  %v429_v59 = vld [vmem:[%s1830_s1 + $0x38] sm:$0xff]  ;;  %v517_v60 = vpack.c.bf16 %v465_v57, %v464_v55  ;;  %vm409_vm6 = vcmask 564224   ;;  %vm411_vm7 = vcmask 48128  }
  0x18   : > { %v518_v47 = vpack.c.bf16 %v467_v45, %v466_v44  ;;  %v431_v48 = vld [vmem:[%s1830_s1 + $0x48] sm:$0xff]  ;;  %346 = vrot.lane.b32.xlu1 %v1242_v34, %s1260_s24  ;;  %v499_v61 = vpack.c.bf16 %v429_v59, %v428_v58  ;;  %v478_v62 = vld [vmem:[%s1830_s1 + $0x1c0] sm:$0xff]  ;;  %v476_v8 = vld [vmem:[%s1830_s1 + $0x1b0] sm:$0xff]  ;;  %vm413_vm8 = vcmask 580608   ;;  %vm1266_vm9 = vmmov 0  }
  0x19   : > { %1083 = vmatprep.subr.bf16.mxu0 %v508_v43  ;;  %v500_v51 = vpack.c.bf16 %v431_v48, %v430_v46  ;;  %372 = vrot.lane.b32.xlu0 %v1243_v36, %s1261_s7  ;;  %v479_v63 = vld [vmem:[%s1830_s1 + $0x1c8] sm:$0xff]  ;;  %v442_v0 = vld [vmem:[%s1830_s1 + $0xa0] sm:$0xff]  ;;  %v477_v10 = vld [vmem:[%s1830_s1 + $0x1b8] sm:$0xff]  ;;  %v1264_v46 = vmov 0.0   ;;  %vm415_vm10 = vcmask 64512   ;;  %vm533_vm11 = vcmask 596992  }
  0x1a   : > { %1102 = vmatpush3.bf16.msra.mxu1 %v518_v47  ;;  %v524_v1 = vpack.c.bf16 %v479_v63, %v478_v62  ;;  %v443_v2 = vld [vmem:[%s1830_s1 + $0xa8] sm:$0xff]  ;;  %v462_v3 = vld [vmem:[%s1830_s1 + $0x140] sm:$0xff]  ;;  %v523_v12 = vpack.c.bf16 %v477_v10, %v476_v8  ;;  %v440_v13 = vld [vmem:[%s1830_s1 + $0x90] sm:$0xff]  ;;  %vm953_vm13 = vcmask 1024   ;;  %vm939_vm14 = vcmask 123904  }
  0x1b   : > { %1084 = vmatpush3.bf16.msra.mxu0 %v500_v51  ;;  %1103 = vmatprep.subr.bf16.mxu1 %v525_v52  ;;  %v463_v4 = vld [vmem:[%s1830_s1 + $0x148] sm:$0xff]  ;;  %v506_v5 = vpack.c.bf16 %v443_v2, %v442_v0  ;;  %v426_v6 = vld [vmem:[%s1830_s1 + $0x20] sm:$0xff]  ;;  %v441_v14 = vld [vmem:[%s1830_s1 + $0x98] sm:$0xff] }
  0x1c   : > { %1085 = vmatprep.subr.bf16.mxu0 %v507_v56  ;;  %v427_v7 = vld [vmem:[%s1830_s1 + $0x28] sm:$0xff]  ;;  %398 = vrot.lane.b32.xlu1 %v1244_v37, %s1262_s29  ;;  %v516_v9 = vpack.c.bf16 %v463_v4, %v462_v3  ;;  %v505_v15 = vpack.c.bf16 %v441_v14, %v440_v13  ;;  %v460_v16 = vld [vmem:[%s1830_s1 + $0x130] sm:$0xff]  ;;  %v461_v17 = vld [vmem:[%s1830_s1 + $0x138] sm:$0xff]  ;;  %v1265_v56 = vmov 65535  }
  0x1d   : > { %385 = vrot.lane.b32.xlu0 %v1245_v38, %s1263_s9  ;;  %v498_v11 = vpack.c.bf16 %v427_v7, %v426_v6  ;;  %v424_v18 = vld [vmem:[%s1830_s1 + $0x10] sm:$0xff]  ;;  %v425_v19 = vld [vmem:[%s1830_s1 + $0x18] sm:$0xff]  ;;  %v474_v20 = vld [vmem:[%s1830_s1 + $0x1a0] sm:$0xff]  ;;  %v515_v22 = vpack.c.bf16 %v461_v17, %v460_v16  ;;  %v539_v57 = vsel %vm537_vm0, 4294967295, %v1265_v56 }
  0x1e   : > { %1104 = vmatpush3.bf16.msra.mxu1 %v517_v60  ;;  %v475_v21 = vld [vmem:[%s1830_s1 + $0x1a8] sm:$0xff]  ;;  %v438_v23 = vld [vmem:[%s1830_s1 + $0x80] sm:$0xff]  ;;  %v497_v26 = vpack.c.bf16 %v425_v19, %v424_v18  ;;  %v472_v33 = vld [vmem:[%s1830_s1 + $0x190] sm:$0xff] }
  0x1f   : > { %1086 = vmatpush3.bf16.msra.mxu0 %v499_v61  ;;  %1105 = vmatprep.subr.bf16.mxu1 %v524_v1  ;;  %v439_v25 = vld [vmem:[%s1830_s1 + $0x88] sm:$0xff]  ;;  %v522_v27 = vpack.c.bf16 %v475_v21, %v474_v20  ;;  %v458_v28 = vld [vmem:[%s1830_s1 + $0x120] sm:$0xff]  ;;  %v473_v34 = vld [vmem:[%s1830_s1 + $0x198] sm:$0xff]  ;;  %v1535_v61 = vsel %vm538_vm1, %v539_v57, 0 }
  0x20   : > { %1087 = vmatprep.subr.bf16.mxu0 %v506_v5  ;;  %v459_v29 = vld [vmem:[%s1830_s1 + $0x128] sm:$0xff]  ;;  %v422_v30 = vld [vmem:[%s1830_s1] sm:$0xff]  ;;  %v504_v31 = vpack.c.bf16 %v439_v25, %v438_v23  ;;  %v521_v37 = vpack.c.bf16 %v473_v34, %v472_v33  ;;  %v456_v38 = vld [vmem:[%s1830_s1 + $0x110] sm:$0xff] }
  0x21   : > { %v423_v32 = vld [vmem:[%s1830_s1 + $0x8] sm:$0xff]  ;;  %v514_v35 = vpack.c.bf16 %v459_v29, %v458_v28  ;;  %v457_v39 = vld [vmem:[%s1830_s1 + $0x118] sm:$0xff]  ;;  %v470_v40 = vld [vmem:[%s1830_s1 + $0x180] sm:$0xff] }
  0x22   : > { %1106 = vmatpush3.bf16.msra.mxu1 %v516_v9  ;;  %v496_v36 = vpack.c.bf16 %v423_v32, %v422_v30  ;;  %v471_v41 = vld [vmem:[%s1830_s1 + $0x188] sm:$0xff]  ;;  %v513_v42 = vpack.c.bf16 %v457_v39, %v456_v38  ;;  %v454_v44 = vld [vmem:[%s1830_s1 + $0x100] sm:$0xff]  ;;  %v694_v47 = vld [vmem:[%s1831_s2 + $0xf0] sm:$0xff] }
  0x23   : > { %1088 = vmatpush3.bf16.msra.mxu0 %v498_v11  ;;  %1107 = vmatprep.subr.bf16.mxu1 %v523_v12  ;;  %v520_v43 = vpack.c.bf16 %v471_v41, %v470_v40  ;;  %v455_v45 = vld [vmem:[%s1830_s1 + $0x108] sm:$0xff]  ;;  %v695_v48 = vld [vmem:[%s1831_s2 + $0xf8] sm:$0xff]  ;;  %v1246_v51 = vld.sshfl [vmem:[%s1359_s8] sm:$0xf pattern:$0x76325410] }
  0x24   : > { %1089 = vmatprep.subr.bf16.mxu0 %v505_v15  ;;  %v512_v49 = vpack.c.bf16 %v455_v45, %v454_v44  ;;  %v753_v50 = vpack.c.bf16 %v695_v48, %v694_v47  ;;  %v494_v54 = vld [vmem:[%s1830_s1 + $0x240] sm:$0xff]  ;;  %v495_v55 = vld [vmem:[%s1830_s1 + $0x248] sm:$0x1]  ;;  %v492_v6 = vld [vmem:[%s1830_s1 + $0x230] sm:$0xff] }
  0x25   : > { %v532_v59 = vpack.c.bf16 %v495_v55, %v494_v54  ;;  %v493_v7 = vld [vmem:[%s1830_s1 + $0x238] sm:$0xff]  ;;  %v678_v10 = vld [vmem:[%s1831_s2 + $0x70] sm:$0xff]  ;;  %v490_v12 = vld [vmem:[%s1830_s1 + $0x220] sm:$0xff] }
  0x26   : > { %1108 = vmatpush3.bf16.msra.mxu1 %v515_v22  ;;  %v531_v9 = vpack.c.bf16 %v493_v7, %v492_v6  ;;  %v679_v11 = vld [vmem:[%s1831_s2 + $0x78] sm:$0xff]  ;;  %v491_v16 = vld [vmem:[%s1830_s1 + $0x228] sm:$0xff]  ;;  %v692_v17 = vld [vmem:[%s1831_s2 + $0xe0] sm:$0xff] }
  0x27   : > { %1090 = vmatpush3.bf16.msra.mxu0 %v497_v26  ;;  %1109 = vmatprep.subr.bf16.mxu1 %v522_v27  ;;  %v542_v3 = vand.u32 %v1535_v61, %v532_v59  ;;  %v693_v18 = vld [vmem:[%s1831_s2 + $0xe8] sm:$0xff]  ;;  %v745_v21 = vpack.c.bf16 %v679_v11, %v678_v10  ;;  %v530_v23 = vpack.c.bf16 %v491_v16, %v490_v12  ;;  %v676_v26 = vld [vmem:[%s1831_s2 + $0x60] sm:$0xff]  ;;  %v488_v28 = vld [vmem:[%s1830_s1 + $0x210] sm:$0xff] }
  0x28   : > { %1091 = vmatprep.subr.bf16.mxu0 %v504_v31  ;;  %v752_v25 = vpack.c.bf16 %v693_v18, %v692_v17  ;;  %v677_v27 = vld [vmem:[%s1831_s2 + $0x68] sm:$0xff]  ;;  %v489_v29 = vld [vmem:[%s1830_s1 + $0x218] sm:$0xff]  ;;  %v690_v30 = vld [vmem:[%s1831_s2 + $0xd0] sm:$0xff] }
  0x29   : > { %v691_v31 = vld [vmem:[%s1831_s2 + $0xd8] sm:$0xff]  ;;  %v744_v32 = vpack.c.bf16 %v677_v27, %v676_v26  ;;  %v529_v33 = vpack.c.bf16 %v489_v29, %v488_v28  ;;  %v487_v38 = vld [vmem:[%s1830_s1 + $0x208] sm:$0xff]  ;;  %v688_v39 = vld [vmem:[%s1831_s2 + $0xc0] sm:$0xff] }
  0x2a   : > { %1110 = vmatpush3.bf16.msra.mxu1 %v514_v35  ;;  %v751_v34 = vpack.c.bf16 %v691_v31, %v690_v30  ;;  %v674_v35 = vld [vmem:[%s1831_s2 + $0x50] sm:$0xff]  ;;  %v689_v40 = vld [vmem:[%s1831_s2 + $0xc8] sm:$0xff]  ;;  %v672_v48 = vld [vmem:[%s1831_s2 + $0x40] sm:$0xff] }
  0x2b   : > { %1092 = vmatpush3.bf16.msra.mxu0 %v496_v36  ;;  %1111 = vmatprep.subr.bf16.mxu1 %v521_v37  ;;  %v675_v36 = vld [vmem:[%s1831_s2 + $0x58] sm:$0xff]  ;;  %v486_v37 = vld [vmem:[%s1830_s1 + $0x200] sm:$0xff]  ;;  %v726_v41 = vld [vmem:[%s1831_s2 + $0x1f0] sm:$0xff]  ;;  %v750_v47 = vpack.c.bf16 %v689_v40, %v688_v39 }
  0x2c   : > { %1177 = vmatprep.subr.bf16.mxu0 %v1264_v46  ;;  %v743_v44 = vpack.c.bf16 %v675_v36, %v674_v35  ;;  %v528_v45 = vpack.c.bf16 %v487_v38, %v486_v37  ;;  %v687_v55 = vld [vmem:[%s1831_s2 + $0xb8] sm:$0xff]  ;;  %v724_v56 = vld [vmem:[%s1831_s2 + $0x1e0] sm:$0xff]  ;;  %v725_v57 = vld [vmem:[%s1831_s2 + $0x1e8] sm:$0xff] }
  0x2d   : > { %v685_v6 = vld [vmem:[%s1831_s2 + $0xa8] sm:$0xff]  ;;  %v722_v7 = vld [vmem:[%s1831_s2 + $0x1d0] sm:$0xff]  ;;  %v668_v12 = vld [vmem:[%s1831_s2 + $0x20] sm:$0xff] }
  0x2e   : > { %1112 = vmatpush3.bf16.msra.mxu1 %v513_v42  ;;  %v727_v42 = vld [vmem:[%s1831_s2 + $0x1f8] sm:$0xff]  ;;  %v682_v17 = vld [vmem:[%s1831_s2 + $0x90] sm:$0xff]  ;;  %v704_v28 = vld [vmem:[%s1831_s2 + $0x140] sm:$0xff] }
  0x2f   : > { %1113 = vmatprep.subr.bf16.mxu1 %v520_v43  ;;  %v707_v16 = vld [vmem:[%s1831_s2 + $0x158] sm:$0xff]  ;;  %v666_v26 = vld [vmem:[%s1831_s2 + $0x10] sm:$0xff]  ;;  %v705_v30 = vld [vmem:[%s1831_s2 + $0x148] sm:$0xff] }
  0x30   : > { %v683_v18 = vld [vmem:[%s1831_s2 + $0x98] sm:$0xff]  ;;  %v680_v31 = vld [vmem:[%s1831_s2 + $0x80] sm:$0xff]  ;;  %v758_v37 = vpack.c.bf16 %v705_v30, %v704_v28  ;;  %v665_v39 = vld [vmem:[%s1831_s2 + $0x8] sm:$0xff] }
  0x31   : > { %v667_v27 = vld [vmem:[%s1831_s2 + $0x18] sm:$0xff]  ;;  %v664_v36 = vld [vmem:[%s1831_s2] sm:$0xff] }
  0x32   : > { %1114 = vmatpush3.bf16.msra.mxu1 %v512_v49  ;;  %v673_v49 = vld [vmem:[%s1831_s2 + $0x48] sm:$0xff]  ;;  %v739_v35 = vpack.c.bf16 %v667_v27, %v666_v26  ;;  %v736_v40 = vld [vmem:[%s1831_s2 + $0x240] sm:$0xff] }
  0x33   : > { %1127 = vmatprep.subr.bf16.mxu1 %v753_v50  ;;  %v769_v50 = vpack.c.bf16 %v727_v42, %v726_v41  ;;  %v737_v41 = vld [vmem:[%s1831_s2 + $0x248] sm:$0x1] }
  0x81   : > { %v334_v52 = vpop.permute.xlu1 %333 }
  0x82   : > { %v308_v53 = vpop.permute.xlu0 %307 }
  0x83   : > { %v402_v62 = vsel %vm401_vm2, %v1246_v51, %v308_v53  ;;  %v710_v51 = vld [vmem:[%s1831_s2 + $0x170] sm:$0xff] }
  0x84   : > { %v1538_v4 = vpack.c.bf16 %v402_v62, %v402_v62  ;;  %v671_v62 = vld [vmem:[%s1831_s2 + $0x38] sm:$0xff] }
  0x86   : > { %v360_v58 = vpop.permute.xlu1 %359 }
  0x87   : > { %v321_v60 = vpop.permute.xlu0 %320 }
  0x88   : > { %v404_v63 = vsel %vm403_vm3, %v308_v53, %v321_v60  ;;  %v686_v53 = vld [vmem:[%s1831_s2 + $0xb0] sm:$0xff] }
  0x89   : > { %v406_v0 = vsel %vm405_vm4, %v404_v63, %v334_v52  ;;  %v670_v60 = vld [vmem:[%s1831_s2 + $0x30] sm:$0xff]  ;;  %v708_v63 = vld [vmem:[%s1831_s2 + $0x160] sm:$0xff] }
  0x8a   : > { %v347_v1 = vpop.permute.xlu1 %346  ;;  %v418_v2 = vpack.c.bf16 %v406_v0, %v406_v0 }
  0x8b   : > { %v373_v5 = vpop.permute.xlu0 %372  ;;  %v408_v8 = vsel %vm407_vm5, %v334_v52, %v347_v1  ;;  %v711_v52 = vld [vmem:[%s1831_s2 + $0x178] sm:$0xff]  ;;  %v749_v1 = vpack.c.bf16 %v687_v55, %v686_v53  ;;  %v701_v53 = vld [vmem:[%s1831_s2 + $0x128] sm:$0xff] }
  0x8c   : > { %576 = vmatprep.mubr.bf16.mxu0 %v418_v2  ;;  %v410_v13 = vsel %vm409_vm6, %v408_v8, %v360_v58  ;;  %v412_v14 = vsel %vm411_vm7, %v360_v58, %v373_v5  ;;  %v742_v58 = vpack.c.bf16 %v673_v49, %v672_v48  ;;  %v761_v59 = vpack.c.bf16 %v711_v52, %v710_v51  ;;  %v684_v5 = vld [vmem:[%s1831_s2 + $0xa0] sm:$0xff]  ;;  %v723_v8 = vld [vmem:[%s1831_s2 + $0x1d8] sm:$0xff] }
  0x8d   : > { %577 = vmatmul.mubr.bf16.vlgmr.msra.gmra.mxu0 %v1538_v4  ;;  %v1570_v22 = vpack.c.bf16 %v410_v13, %v410_v13  ;;  %v748_v11 = vpack.c.bf16 %v685_v6, %v684_v5  ;;  %v669_v13 = vld [vmem:[%s1831_s2 + $0x28] sm:$0xff]  ;;  %v738_v48 = vpack.c.bf16 %v665_v39, %v664_v36  ;;  %v774_v49 = vpack.c.bf16 %v737_v41, %v736_v40  ;;  %v700_v52 = vld [vmem:[%s1831_s2 + $0x120] sm:$0xff]  ;;  %v715_v55 = vld [vmem:[%s1831_s2 + $0x198] sm:$0xff] }
  0x8e   : > { %1178 = vmatpush3.bf16.msra.mxu0 %v542_v3  ;;  %1187 = vmatprep.mubr.msk.bf16.mxu0 %vm1266_vm9, %v1264_v46  ;;  %v399_v43 = vpop.permute.xlu1 %398  ;;  %v709_v3 = vld [vmem:[%s1831_s2 + $0x168] sm:$0xff] }
  0x8f   : > { %v386_v15 = vpop.permute.xlu0 %385  ;;  %1179 = vmatprep.subr.bf16.mxu0 %v1264_v46  ;;  %v760_v10 = vpack.c.bf16 %v709_v3, %v708_v63  ;;  %v712_v63 = vld [vmem:[%s1831_s2 + $0x180] sm:$0xff]  ;;  %v733_v5 = vld [vmem:[%s1831_s2 + $0x228] sm:$0xff] }
  0x90   : > { %v414_v19 = vsel %vm413_vm8, %v412_v14, %v386_v15  ;;  %v416_v54 = vsel %vm415_vm10, %v386_v15, %v399_v43  ;;  %v706_v14 = vld [vmem:[%s1831_s2 + $0x150] sm:$0xff]  ;;  %v767_v15 = vpack.c.bf16 %v723_v8, %v722_v7  ;;  %v696_v7 = vld [vmem:[%s1831_s2 + $0x100] sm:$0xff]  ;;  %v697_v8 = vld [vmem:[%s1831_s2 + $0x108] sm:$0xff] }
  0x91   : > { %v1568_v20 = vpack.c.bf16 %v414_v19, %v414_v19  ;;  %v1652_v0 = vpack.c.bf16 %v416_v54, %v416_v54  ;;  %v720_v19 = vld [vmem:[%s1831_s2 + $0x1c0] sm:$0xff]  ;;  %v702_v43 = vld [vmem:[%s1831_s2 + $0x130] sm:$0xff] }
  0x92   : > { %1180 = vmatpush3.bf16.msra.mxu0 %v531_v9  ;;  %v741_v9 = vpack.c.bf16 %v671_v62, %v670_v60  ;;  %v714_v54 = vld [vmem:[%s1831_s2 + $0x190] sm:$0xff] }
  0x93   : > { %616 = vmatprep.mubr.bf16.mxu1 %v1568_v20  ;;  %1181 = vmatprep.subr.bf16.mxu0 %v1264_v46  ;;  %v763_v60 = vpack.c.bf16 %v715_v55, %v714_v54  ;;  %v698_v62 = vld [vmem:[%s1831_s2 + $0x110] sm:$0xff] }
  0x94   : > { %617 = vmatmul.mubr.bf16.vlgmr.msra.gmra.mxu1 %v1570_v22 }
  0x95   : > { %1128 = vmatpush3.bf16.msra.mxu1 %v745_v21  ;;  %810 = vmatprep.mubr.bf16.mxu1 %v418_v2  ;;  %v768_v2 = vpack.c.bf16 %v725_v57, %v724_v56  ;;  %v740_v21 = vpack.c.bf16 %v669_v13, %v668_v12  ;;  %v776_v56 = vand.u32 %v774_v49, %v1535_v61  ;;  %v699_v61 = vld [vmem:[%s1831_s2 + $0x118] sm:$0xff] }
  0x96   : > { %1182 = vmatpush3.bf16.msra.mxu0 %v530_v23  ;;  %1129 = vmatprep.subr.bf16.mxu1 %v752_v25  ;;  %v759_v23 = vpack.c.bf16 %v707_v16, %v706_v14  ;;  %v747_v25 = vpack.c.bf16 %v683_v18, %v682_v17  ;;  %v756_v57 = vpack.c.bf16 %v701_v53, %v700_v52  ;;  %v731_v12 = vld [vmem:[%s1831_s2 + $0x218] sm:$0xff]  ;;  %v728_v14 = vld [vmem:[%s1831_s2 + $0x200] sm:$0xff]  ;;  %v1267_v17 = vmov 0  }
  0x97   : > { %1183 = vmatprep.subr.bf16.mxu0 %v1264_v46  ;;  %v755_v3 = vpack.c.bf16 %v699_v61, %v698_v62  ;;  %1226 = vset.pattern.permute.xlu0 %v1267_v17 }
  0x99   : > { %1130 = vmatpush3.bf16.msra.mxu1 %v744_v32  ;;  %v681_v32 = vld [vmem:[%s1831_s2 + $0x88] sm:$0xff] }
  0x9a   : > { %1184 = vmatpush3.bf16.msra.mxu0 %v529_v33  ;;  %1131 = vmatprep.subr.bf16.mxu1 %v751_v34  ;;  %v718_v33 = vld [vmem:[%s1831_s2 + $0x1b0] sm:$0xff]  ;;  %v719_v34 = vld [vmem:[%s1831_s2 + $0x1b8] sm:$0xff]  ;;  %v746_v38 = vpack.c.bf16 %v681_v32, %v680_v31 }
  0x9b   : > { %1185 = vmatprep.subr.bf16.mxu0 %v1264_v46  ;;  %v765_v42 = vpack.c.bf16 %v719_v34, %v718_v33 }
  0x9d   : > { %1132 = vmatpush3.bf16.msra.mxu1 %v743_v44  ;;  %v703_v44 = vld [vmem:[%s1831_s2 + $0x138] sm:$0xff] }
  0x9e   : > { %1186 = vmatpush3.bf16.msra.mxu0 %v528_v45  ;;  %1133 = vmatprep.subr.bf16.mxu1 %v750_v47  ;;  %v716_v45 = vld [vmem:[%s1831_s2 + $0x1a0] sm:$0xff]  ;;  %v717_v47 = vld [vmem:[%s1831_s2 + $0x1a8] sm:$0xff] }
  0x9f   : > { %1149 = vmatprep.subr.bf16.mxu0 %v769_v50  ;;  %v757_v50 = vpack.c.bf16 %v703_v44, %v702_v43  ;;  %v764_v51 = vpack.c.bf16 %v717_v47, %v716_v45 }
  0xa1   : > { %1188 = vmatmul.mubr.msk.bf16.vlgmr.msra.gmra.mxu0 %vm533_vm11, %v1652_v0  ;;  %1134 = vmatpush3.bf16.msra.mxu1 %v742_v58  ;;  %v734_v58 = vld [vmem:[%s1831_s2 + $0x230] sm:$0xff] }
  0xa2   : > { %1150 = vmatpush3.bf16.msra.mxu0 %v761_v59  ;;  %850 = vmatprep.mubr.bf16.mxu0 %v1568_v20  ;;  %v721_v20 = vld [vmem:[%s1831_s2 + $0x1c8] sm:$0xff]  ;;  %v735_v59 = vld [vmem:[%s1831_s2 + $0x238] sm:$0xff] }
  0xa3   : > { %1135 = vmatprep.subr.bf16.mxu1 %v749_v1  ;;  %1151 = vmatprep.subr.bf16.mxu0 %v768_v2  ;;  %v766_v29 = vpack.c.bf16 %v721_v20, %v720_v19  ;;  %v713_v1 = vld [vmem:[%s1831_s2 + $0x188] sm:$0xff]  ;;  %v773_v2 = vpack.c.bf16 %v735_v59, %v734_v58  ;;  %v1070_v58 = vld [vmem:[%s1832_s3] ss:$0 sm:$0xff] }
  0xa4   : > { %v762_v6 = vpack.c.bf16 %v713_v1, %v712_v63 }
  0xa5   : > { %1136 = vmatpush3.bf16.msra.mxu1 %v741_v9 }
  0xa6   : > { %1152 = vmatpush3.bf16.msra.mxu0 %v760_v10  ;;  %1137 = vmatprep.subr.bf16.mxu1 %v748_v11  ;;  %v754_v10 = vpack.c.bf16 %v697_v8, %v696_v7  ;;  %v730_v11 = vld [vmem:[%s1831_s2 + $0x210] sm:$0xff] }
  0xa7   : > { %1153 = vmatprep.subr.bf16.mxu0 %v767_v15  ;;  %v771_v13 = vpack.c.bf16 %v731_v12, %v730_v11  ;;  %v729_v15 = vld [vmem:[%s1831_s2 + $0x208] sm:$0xff] }
  0xa8   : > { %v770_v16 = vpack.c.bf16 %v729_v15, %v728_v14 }
  0xa9   : > { %1138 = vmatpush3.bf16.msra.mxu1 %v740_v21 }
  0xaa   : > { %1154 = vmatpush3.bf16.msra.mxu0 %v759_v23  ;;  %1139 = vmatprep.subr.bf16.mxu1 %v747_v25 }
  0xab   : > { %1155 = vmatprep.subr.bf16.mxu0 %v766_v29 }
  0xad   : > { %1140 = vmatpush3.bf16.msra.mxu1 %v739_v35 }
  0xae   : > { %1156 = vmatpush3.bf16.msra.mxu0 %v758_v37  ;;  %1141 = vmatprep.subr.bf16.mxu1 %v746_v38 }
  0xaf   : > { %1157 = vmatprep.subr.bf16.mxu0 %v765_v42 }
  0xb1   : > { %1142 = vmatpush3.bf16.msra.mxu1 %v738_v48 }
  0xb2   : > { %1158 = vmatpush3.bf16.msra.mxu0 %v757_v50  ;;  %1191 = vmatprep.subr.bf16.mxu1 %v1264_v46 }
  0xb3   : > { %1159 = vmatprep.subr.bf16.mxu0 %v764_v51 }
  0xb4   : > { %811 = vmatmul.mubr.bf16.vlgmr.msra.gmra.mxu1 %v1538_v4  ;;  %v732_v4 = vld [vmem:[%s1831_s2 + $0x220] sm:$0xff] }
  0xb5   : > { %1192 = vmatpush3.bf16.msra.mxu1 %v776_v56  ;;  %1201 = vmatprep.mubr.msk.bf16.mxu1 %vm1266_vm9, %v1264_v46  ;;  %v772_v9 = vpack.c.bf16 %v733_v5, %v732_v4 }
  0xb6   : > { %1160 = vmatpush3.bf16.msra.mxu0 %v756_v57  ;;  %1193 = vmatprep.subr.bf16.mxu1 %v1264_v46 }
  0xb7   : > { %1161 = vmatprep.subr.bf16.mxu0 %v763_v60 }
  0xb9   : > { %1194 = vmatpush3.bf16.msra.mxu1 %v773_v2 }
  0xba   : > { %1162 = vmatpush3.bf16.msra.mxu0 %v755_v3  ;;  %1195 = vmatprep.subr.bf16.mxu1 %v1264_v46 }
  0xbb   : > { %1163 = vmatprep.subr.bf16.mxu0 %v762_v6 }
  0xbd   : > { %1196 = vmatpush3.bf16.msra.mxu1 %v772_v9 }
  0xbe   : > { %1164 = vmatpush3.bf16.msra.mxu0 %v754_v10  ;;  %1197 = vmatprep.subr.bf16.mxu1 %v1264_v46 }
  0xc1   : > { %851 = vmatmul.mubr.bf16.vlgmr.msra.gmra.mxu0 %v1570_v22  ;;  %1198 = vmatpush3.bf16.msra.mxu1 %v771_v13 }
  0xc2   : > { %1199 = vmatprep.subr.bf16.mxu1 %v1264_v46 }
  0xc5   : > { %1200 = vmatpush3.bf16.msra.mxu1 %v770_v16 }
  0xc8   : > { %1202 = vmatmul.mubr.msk.bf16.vlgmr.msra.gmra.mxu1 %vm533_vm11, %v1652_v0 }
 0x14d   : > { %v1093_v18 = vpop.f32.mrf.mxu0 }
 0x14f   : > { %v1094_v19 = vpop.f32.mrf.mxu0 }
 0x150   : > { %v1095_v20 = vadd.f32 %v1094_v19, %v1093_v18 }
 0x151   : > { %v1096_v21 = vpop.f32.mrf.mxu0 }
 0x153   : > { %v1097_v23 = vpop.f32.mrf.mxu0 }
 0x154   : > { %v1115_v25 = vpop.f32.mrf.mxu1 }
 0x156   : > { %v1116_v26 = vpop.f32.mrf.mxu1 }
 0x157   : > { %v1117_v27 = vadd.f32 %v1116_v26, %v1115_v25 }
 0x158   : > { %v1118_v28 = vpop.f32.mrf.mxu1 }
 0x159   : > { %v619_v22 = vadd.f32 %v1117_v27, %v1095_v20 }
 0x15a   : > { %v1119_v29 = vpop.f32.mrf.mxu1 }
 0x161   : > { %v658_v30 = vpop.f32.mrf.mxu0 }
 0x162   : > { %v659_v31 = vadd.f32 %v658_v30, %v619_v22 }
 0x163   : > { %v1189_v32 = vpop.f32.mrf.mxu0 }
 0x165   : > { %v661_v33 = vpop.f32.mrf.mxu0 }
 0x167   : > { %v1190_v34 = vpop.f32.mrf.mxu0 }
 0x174   : > { %v1143_v0 = vpop.f32.mrf.mxu1 }
 0x176   : > { %v1144_v35 = vpop.f32.mrf.mxu1 }
 0x177   : > { %v1145_v40 = vadd.f32 %v1144_v35, %v1143_v0 }
 0x178   : > { %v1146_v36 = vpop.f32.mrf.mxu1 }
 0x17a   : > { %v1147_v37 = vpop.f32.mrf.mxu1 }
 0x181   : > { %v1165_v38 = vpop.f32.mrf.mxu0 }
 0x183   : > { %v1166_v39 = vpop.f32.mrf.mxu0 }
 0x184   : > { %v1167_v41 = vadd.f32 %v1166_v39, %v1165_v38 }
 0x185   : > { %v1168_v42 = vpop.f32.mrf.mxu0 }
 0x186   : > { %v853_v43 = vadd.f32 %v1167_v41, %v1145_v40 }
 0x187   : > { %v1169_v44 = vpop.f32.mrf.mxu0 }
 0x188   : > { %v892_v45 = vpop.f32.mrf.mxu1 }
 0x189   : > { %v893_v47 = vadd.f32 %v892_v45, %v853_v43 }
 0x18a   : > { %v1203_v48 = vpop.f32.mrf.mxu1 }
 0x18b   : > { %vm898_vm12 = vcmp.gt.f32.partialorder %v893_v47, 0.0  ;;  %v901_v49 = vadd.f32 1e-08, %v893_v47 }
 0x18c   : > { %v1069_v50 = vsel %vm898_vm12, 1.0, %v1264_v46  ;;  %v895_v51 = vpop.f32.mrf.mxu1  ;;  %v1071_v46 = vld [vmem:[%s1833_s4] ss:$0 sm:$0xff] }
 0x18d   : > { %1236 = vrcp.f32 %v901_v49  ;;  %v949_v52 = vrot.slane %v1069_v50, %v1361_v24 }
 0x18e   : > { %v1204_v53 = vpop.f32.mrf.mxu1 }
 0x18f   : > { %v950_v54 = vcombine.high %v949_v52, %v949_v52  ;;  %954 = vst.msk [vmem:[%s264_s30] sm:$0x3] %vm953_vm13, %v949_v52 }
 0x191   : > { %955 = vst.msk [vmem:[%s264_s30 + $0x2] sm:$0x3] %vm953_vm13, %v950_v54 }
 0x19a   : > { %v1237_v55 = vpop.eup %1236 }
 0x19b   : > { %v903_v56 = vmul.f32 9.0, %v1237_v55 }
 0x19d   : > { %v904_v57 = vmul.f32 %v1069_v50, %v903_v56 }
 0x19f   : > { %907 = vperm.xlu0 %1226, %v904_v57  }
 0x21a   : > { %v908_v59 = vpop.permute.xlu0 %907 }
 0x21b   : > { %v910_v60 = vmul.f32 %v908_v59, %v659_v31 }
 0x21d   : > { %v918_v62 = vmul.f32 %v1070_v58, %v910_v60 }
 0x21f   : > { %v926_v61 = vadd.f32 %v1071_v46, %v918_v62 }
 0x221   : > { %v927_v63 = vmax.f32 %v926_v61, 0.0 }
 0x223   : > { %v935_v1 = vrot.slane %v927_v63, %v1361_v24 }
 0x225   : > { %v936_v2 = vcombine.high %v935_v1, %v935_v1  ;;  %940 = vst.msk [vmem:[%s259_s13] sm:$0x3] %vm939_vm14, %v935_v1 }
 0x227   : > { %941 = vst.msk [vmem:[%s259_s13 + $0x2] sm:$0x3] %vm939_vm14, %v936_v2 }
 0x228 PF: > { %s17_s21 = sadd.s32 1, %s1253_s21  }
 0x229   : > { %p14_p4 = scmp.ge.s32.totalorder %s17_s21, 4  }
 0x22b   :  { %16 = sbr.rel (!%p14_p4) target bundleno = 1 (0x1), region = 84 }

// kernel: generator_forward.60
= control target key start
LH: loop header
LB: loop body
LE: loop exit
PB: predicated region body
PF: predicated region fallthrough
CT: control target
= control target key end

     0   :  { %s823_s15 = smov 0   ;;  %s1085_s0 = inlined_call_operand.vmem [shape: f32[2,4,4,64], index: 0, kind: input, shape index: {}]   ;;  %s1086_s1 = inlined_call_operand.vmem [shape: f32[576,16], index: 1, kind: input, shape index: {}]   ;;  %s1087_s2 = inlined_call_operand.vmem [shape: f32[1,16], index: 2, kind: input, shape index: {}]   ;;  %s1088_s3 = inlined_call_operand.vmem [shape: f32[1,16], index: 3, kind: input, shape index: {}]   ;;  %s1089_s4 = inlined_call_operand.vmem [shape: f32[2,2,2,16], index: 4, kind: output, shape index: {}]  }
   0x1 LB: > { %s657_s16 = sadd.s32 4294967295, %s792_s15   ;;  %p661_p0 = scmp.ge.s32.totalorder %s792_s15, 1  ;;  %s792_s15 = sphi %s823_s15, %s14_s15  }
   0x2   : > { %p162_p1 = scmp.lt.s32.totalorder %s792_s15, 3 }
   0x4   : > { %p163_p2 = pnand %p661_p0, %p162_p1 }
   0x5   : > { %p188_p3 = scmp.lt.s32.totalorder (!%p163_p2), %s657_s16, 1  ;;  %s795_s26 = smov (!%p163_p2), 64  }
   0x6   : > { %166 = sbr.rel (%p163_p2) target bundleno = 362 (0x16a), region = 36 }
   0xb   : > { %v225_v0 = vlaneseq  ;;  %v371_v1 = vld [vmem:[%s1086_s1 + $0xf0] sm:$0xff]  ;;  %v372_v2 = vld [vmem:[%s1086_s1 + $0xf8] sm:$0xff]  ;;  %v794_v3 = vmov 1983009808   ;;  %v369_v8 = vld [vmem:[%s1086_s1 + $0xe0] sm:$0xff]  ;;  %s1091_s16 = smov (!%p188_p3, %s657_s16), 1 }
   0xc   : > { %v223_v4 = vunpack.c.l.s4 %v794_v3  ;;  %v428_v5 = vpack.c.bf16 %v372_v2, %v371_v1  ;;  %v355_v6 = vld [vmem:[%s1086_s1 + $0x70] sm:$0xff]  ;;  %v356_v7 = vld [vmem:[%s1086_s1 + $0x78] sm:$0xff]  ;;  %v370_v11 = vld [vmem:[%s1086_s1 + $0xe8] sm:$0xff]  ;;  %s683_s13 = sshll.u32 %s1091_s16, 4  ;;  %vm326_vm0 = vcmask 523264   ;;  %vm797_vm1 = vmmov 0  }
   0xd   : > { %v226_v9 = vshrl.u32 %v225_v0, 7  ;;  %v420_v10 = vpack.c.bf16 %v356_v7, %v355_v6  ;;  %v353_v12 = vld [vmem:[%s1086_s1 + $0x60] sm:$0xff]  ;;  %v354_v13 = vld [vmem:[%s1086_s1 + $0x68] sm:$0xff]  ;;  %v427_v15 = vpack.c.bf16 %v370_v11, %v369_v8  ;;  %v403_v16 = vld [vmem:[%s1086_s1 + $0x1f0] sm:$0xff]  ;;  %s879_s24 = scalar_lea.vmem %s1085_s0, %s683_s13  ;;  %s684_s5 = sshll.u32 %s1091_s16, 2  ;;  %vm599_vm2 = vcmask 123904  }
   0xe   : > { %v224_v14 = vunpack.c.0.s8 %v223_v4  ;;  %685 = vmatprep.subr.bf16.mxu0 %v428_v5  ;;  %v404_v17 = vld [vmem:[%s1086_s1 + $0x1f8] sm:$0xff]  ;;  %v387_v18 = vld [vmem:[%s1086_s1 + $0x170] sm:$0xff]  ;;  %v419_v19 = vpack.c.bf16 %v354_v13, %v353_v12  ;;  %v401_v29 = vld [vmem:[%s1086_s1 + $0x1e0] sm:$0xff]  ;;  %s197_s8 = scalar_lea.vmem %s1089_s4, %s684_s5 }
   0xf   : > { %686 = vmatpush3.bf16.msra.mxu0 %v420_v10  ;;  %v444_v20 = vpack.c.bf16 %v404_v17, %v403_v16  ;;  %v388_v21 = vld [vmem:[%s1086_s1 + $0x178] sm:$0xff]  ;;  %v367_v22 = vld [vmem:[%s1086_s1 + $0xd0] sm:$0xff]  ;;  %v777_v30 = vld.sshfl [vmem:[%s879_s24 + $0x1] sm:$0xf pattern:$0x76325410] }
  0x10   : > { %v368_v23 = vld [vmem:[%s1086_s1 + $0xd8] sm:$0xff]  ;;  %v881_v24 = vsub.s32 %v224_v14, %v226_v9  ;;  %687 = vmatprep.subr.bf16.mxu0 %v427_v15  ;;  %v436_v25 = vpack.c.bf16 %v388_v21, %v387_v18  ;;  %v351_v27 = vld [vmem:[%s1086_s1 + $0x50] sm:$0xff]  ;;  %v778_v31 = vld.sshfl [vmem:[%s879_s24 + $0x4] sm:$0xf pattern:$0x76325410] }
  0x11   : > { %v426_v26 = vpack.c.bf16 %v368_v23, %v367_v22  ;;  %v352_v28 = vld [vmem:[%s1086_s1 + $0x58] sm:$0xff]  ;;  %707 = vmatprep.subr.bf16.mxu1 %v444_v20  ;;  %v779_v33 = vld.sshfl [vmem:[%s879_s24 + $0x6] sm:$0xf pattern:$0x76325410]  ;;  %v758_v38 = vpack.i.bf16 %v777_v30, %v778_v31  ;;  %v399_v46 = vld [vmem:[%s1086_s1 + $0x1d0] sm:$0xff] }
  0x12   : > { %708 = vmatpush3.bf16.msra.mxu1 %v436_v25  ;;  %v418_v32 = vpack.c.bf16 %v352_v28, %v351_v27  ;;  %v780_v34 = vld.sshfl [vmem:[%s879_s24 + $0x9] sm:$0xf pattern:$0x76325410]  ;;  %v385_v36 = vld [vmem:[%s1086_s1 + $0x160] sm:$0xff]  ;;  %v400_v47 = vld [vmem:[%s1086_s1 + $0x1d8] sm:$0xff] }
  0x13   : > { %688 = vmatpush3.bf16.msra.mxu0 %v419_v19  ;;  %v402_v35 = vld [vmem:[%s1086_s1 + $0x1e8] sm:$0xff]  ;;  %v365_v40 = vld [vmem:[%s1086_s1 + $0xc0] sm:$0xff]  ;;  %759 = vrot.lane.b32.xlu0 %v758_v38, %s795_s26  ;;  %v763_v48 = vpack.i.bf16 %v779_v33, %v780_v34  ;;  %v442_v50 = vpack.c.bf16 %v400_v47, %v399_v46  ;;  %v383_v51 = vld [vmem:[%s1086_s1 + $0x150] sm:$0xff] }
  0x14   : > { %689 = vmatprep.subr.bf16.mxu0 %v426_v26  ;;  %v386_v37 = vld [vmem:[%s1086_s1 + $0x168] sm:$0xff]  ;;  %v443_v39 = vpack.c.bf16 %v402_v35, %v401_v29  ;;  %v349_v42 = vld [vmem:[%s1086_s1 + $0x40] sm:$0xff]  ;;  %v384_v52 = vld [vmem:[%s1086_s1 + $0x158] sm:$0xff] }
  0x15   : > { %v366_v41 = vld [vmem:[%s1086_s1 + $0xc8] sm:$0xff]  ;;  %v435_v43 = vpack.c.bf16 %v386_v37, %v385_v36  ;;  %v363_v53 = vld [vmem:[%s1086_s1 + $0xb0] sm:$0xff]  ;;  %v434_v54 = vpack.c.bf16 %v384_v52, %v383_v51  ;;  %v364_v55 = vld [vmem:[%s1086_s1 + $0xb8] sm:$0xff] }
  0x16   : > { %v425_v44 = vpack.c.bf16 %v366_v41, %v365_v40  ;;  %v350_v45 = vld [vmem:[%s1086_s1 + $0x48] sm:$0xff]  ;;  %709 = vmatprep.subr.bf16.mxu1 %v443_v39  ;;  %v347_v56 = vld [vmem:[%s1086_s1 + $0x30] sm:$0xff]  ;;  %v348_v57 = vld [vmem:[%s1086_s1 + $0x38] sm:$0xff]  ;;  %v424_v58 = vpack.c.bf16 %v364_v55, %v363_v53 }
  0x17   : > { %690 = vmatpush3.bf16.msra.mxu0 %v418_v32  ;;  %v417_v49 = vpack.c.bf16 %v350_v45, %v349_v42  ;;  %710 = vmatpush3.bf16.msra.mxu1 %v435_v43  ;;  %v397_v59 = vld [vmem:[%s1086_s1 + $0x1c0] sm:$0xff]  ;;  %v398_v60 = vld [vmem:[%s1086_s1 + $0x1c8] sm:$0xff]  ;;  %v416_v62 = vpack.c.bf16 %v348_v57, %v347_v56  ;;  %v395_v6 = vld [vmem:[%s1086_s1 + $0x1b0] sm:$0xff] }
  0x18   : > { %691 = vmatprep.subr.bf16.mxu0 %v425_v44  ;;  %711 = vmatprep.subr.bf16.mxu1 %v442_v50  ;;  %v381_v61 = vld [vmem:[%s1086_s1 + $0x140] sm:$0xff]  ;;  %v441_v63 = vpack.c.bf16 %v398_v60, %v397_v59  ;;  %v382_v0 = vld [vmem:[%s1086_s1 + $0x148] sm:$0xff]  ;;  %v396_v8 = vld [vmem:[%s1086_s1 + $0x1b8] sm:$0xff]  ;;  %v796_v44 = vmov 0.0  }
  0x19   : > { %v361_v1 = vld [vmem:[%s1086_s1 + $0xa0] sm:$0xff]  ;;  %v362_v2 = vld [vmem:[%s1086_s1 + $0xa8] sm:$0xff]  ;;  %764 = vrot.lane.b32.xlu0 %v763_v48, %s795_s26  ;;  %v433_v7 = vpack.c.bf16 %v382_v0, %v381_v61  ;;  %v379_v9 = vld [vmem:[%s1086_s1 + $0x130] sm:$0xff]  ;;  %v440_v10 = vpack.c.bf16 %v396_v8, %v395_v6 }
  0x1a   : > { %v423_v3 = vpack.c.bf16 %v362_v2, %v361_v1  ;;  %v345_v4 = vld [vmem:[%s1086_s1 + $0x20] sm:$0xff]  ;;  %v346_v5 = vld [vmem:[%s1086_s1 + $0x28] sm:$0xff]  ;;  %v380_v11 = vld [vmem:[%s1086_s1 + $0x138] sm:$0xff] }
  0x1b   : > { %692 = vmatpush3.bf16.msra.mxu0 %v417_v49  ;;  %712 = vmatpush3.bf16.msra.mxu1 %v434_v54  ;;  %v359_v12 = vld [vmem:[%s1086_s1 + $0x90] sm:$0xff]  ;;  %v360_v13 = vld [vmem:[%s1086_s1 + $0x98] sm:$0xff]  ;;  %v415_v14 = vpack.c.bf16 %v346_v5, %v345_v4  ;;  %v393_v15 = vld [vmem:[%s1086_s1 + $0x1a0] sm:$0xff]  ;;  %v432_v20 = vpack.c.bf16 %v380_v11, %v379_v9 }
  0x1c   : > { %693 = vmatprep.subr.bf16.mxu0 %v424_v58  ;;  %713 = vmatprep.subr.bf16.mxu1 %v441_v63  ;;  %v394_v16 = vld [vmem:[%s1086_s1 + $0x1a8] sm:$0xff]  ;;  %v422_v17 = vpack.c.bf16 %v360_v13, %v359_v12  ;;  %v343_v18 = vld [vmem:[%s1086_s1 + $0x10] sm:$0xff]  ;;  %v344_v19 = vld [vmem:[%s1086_s1 + $0x18] sm:$0xff] }
  0x1d   : > { %v377_v21 = vld [vmem:[%s1086_s1 + $0x120] sm:$0xff]  ;;  %v358_v23 = vld [vmem:[%s1086_s1 + $0x88] sm:$0xff]  ;;  %v439_v25 = vpack.c.bf16 %v394_v16, %v393_v15  ;;  %v391_v28 = vld [vmem:[%s1086_s1 + $0x190] sm:$0xff]  ;;  %v414_v29 = vpack.c.bf16 %v344_v19, %v343_v18 }
  0x1e   : > { %v357_v22 = vld [vmem:[%s1086_s1 + $0x80] sm:$0xff]  ;;  %v378_v26 = vld [vmem:[%s1086_s1 + $0x128] sm:$0xff]  ;;  %v392_v30 = vld [vmem:[%s1086_s1 + $0x198] sm:$0xff] }
  0x1f   : > { %694 = vmatpush3.bf16.msra.mxu0 %v416_v62  ;;  %714 = vmatpush3.bf16.msra.mxu1 %v433_v7  ;;  %v341_v27 = vld [vmem:[%s1086_s1] sm:$0xff]  ;;  %v421_v31 = vpack.c.bf16 %v358_v23, %v357_v22  ;;  %v342_v32 = vld [vmem:[%s1086_s1 + $0x8] sm:$0xff]  ;;  %v431_v33 = vpack.c.bf16 %v378_v26, %v377_v21  ;;  %v438_v34 = vpack.c.bf16 %v392_v30, %v391_v28  ;;  %v375_v35 = vld [vmem:[%s1086_s1 + $0x110] sm:$0xff] }
  0x20   : > { %695 = vmatprep.subr.bf16.mxu0 %v423_v3  ;;  %715 = vmatprep.subr.bf16.mxu1 %v440_v10  ;;  %v376_v36 = vld [vmem:[%s1086_s1 + $0x118] sm:$0xff]  ;;  %v389_v37 = vld [vmem:[%s1086_s1 + $0x180] sm:$0xff]  ;;  %v413_v38 = vpack.c.bf16 %v342_v32, %v341_v27  ;;  %v390_v39 = vld [vmem:[%s1086_s1 + $0x188] sm:$0xff] }
  0x21   : > { %v430_v40 = vpack.c.bf16 %v376_v36, %v375_v35  ;;  %v437_v41 = vpack.c.bf16 %v390_v39, %v389_v37  ;;  %v373_v42 = vld [vmem:[%s1086_s1 + $0x100] sm:$0xff]  ;;  %v374_v43 = vld [vmem:[%s1086_s1 + $0x108] sm:$0xff]  ;;  %v411_v55 = vld [vmem:[%s1086_s1 + $0x230] sm:$0xff] }
  0x22   : > { %v429_v45 = vpack.c.bf16 %v374_v43, %v373_v42  ;;  %v781_v46 = vld.sshfl [vmem:[%s879_s24 + $0x2] sm:$0xf pattern:$0x76325410]  ;;  %v412_v56 = vld [vmem:[%s1086_s1 + $0x238] sm:$0xff]  ;;  %v410_v4 = vld [vmem:[%s1086_s1 + $0x228] sm:$0xff] }
  0x23   : > { %696 = vmatpush3.bf16.msra.mxu0 %v415_v14  ;;  %716 = vmatpush3.bf16.msra.mxu1 %v432_v20  ;;  %v782_v47 = vld.sshfl [vmem:[%s879_s24] sm:$0xf pattern:$0x76325410]  ;;  %v448_v0 = vpack.c.bf16 %v412_v56, %v411_v55  ;;  %v407_v11 = vld [vmem:[%s1086_s1 + $0x210] sm:$0xff]  ;;  %v408_v12 = vld [vmem:[%s1086_s1 + $0x218] sm:$0xff] }
  0x24   : > { %697 = vmatprep.subr.bf16.mxu0 %v422_v17  ;;  %717 = vmatprep.subr.bf16.mxu1 %v439_v25  ;;  %v783_v48 = vld.sshfl [vmem:[%s879_s24 + $0x8] sm:$0xf pattern:$0x76325410]  ;;  %v409_v3 = vld [vmem:[%s1086_s1 + $0x220] sm:$0xff]  ;;  %v446_v13 = vpack.c.bf16 %v408_v12, %v407_v11 }
  0x25   : > { %v784_v49 = vld.sshfl [vmem:[%s879_s24 + $0x5] sm:$0xf pattern:$0x76325410]  ;;  %v447_v10 = vpack.c.bf16 %v410_v4, %v409_v3  ;;  %v679_v32 = vld [vmem:[%s1087_s2] ss:$0 sm:$0xff] }
  0x26   : > { %v785_v7 = vld.sshfl [vmem:[%s879_s24 + $0xa] sm:$0xf pattern:$0x76325410]  ;;  %v405_v14 = vld [vmem:[%s1086_s1 + $0x200] sm:$0xff] }
  0x27   : > { %698 = vmatpush3.bf16.msra.mxu0 %v414_v29  ;;  %718 = vmatpush3.bf16.msra.mxu1 %v431_v33  ;;  %v406_v15 = vld [vmem:[%s1086_s1 + $0x208] sm:$0xff]  ;;  %v335_v16 = vmax.f32 %v785_v7, 0.0 }
  0x28   : > { %699 = vmatprep.subr.bf16.mxu0 %v421_v31  ;;  %719 = vmatprep.subr.bf16.mxu1 %v438_v34  ;;  %v445_v17 = vpack.c.bf16 %v406_v15, %v405_v14  ;;  %v680_v34 = vld [vmem:[%s1088_s3] ss:$0 sm:$0xff] }
  0x29   : > { %v340_v18 = vpack.c.bf16 %v335_v16, %v335_v16 }
  0x2b   : > { %700 = vmatpush3.bf16.msra.mxu0 %v413_v38  ;;  %720 = vmatpush3.bf16.msra.mxu1 %v430_v40 }
  0x2c   : > { %734 = vmatprep.subr.bf16.mxu0 %v796_v44  ;;  %721 = vmatprep.subr.bf16.mxu1 %v437_v41 }
  0x2f   : > { %722 = vmatpush3.bf16.msra.mxu1 %v429_v45 }
  0x85   : > { %v760_v50 = vpop.permute.xlu0 %759 }
  0x86   : > { %v762_v51 = vunpack.i.h.bf16 %v760_v50  ;;  %v761_v52 = vunpack.i.l.bf16 %v760_v50 }
  0x88   : > { %v328_v53 = vsel %vm326_vm0, %v781_v46, %v761_v52  ;;  %v327_v54 = vsel %vm326_vm0, %v782_v47, %v762_v51 }
  0x89   : > { %v332_v58 = vmax.f32 %v328_v53, 0.0  ;;  %v331_v59 = vmax.f32 %v327_v54, 0.0 }
  0x8b   : > { %v765_v57 = vpop.permute.xlu0 %764  ;;  %v337_v62 = vpack.c.bf16 %v332_v58, %v332_v58  ;;  %v336_v63 = vpack.c.bf16 %v331_v59, %v331_v59 }
  0x8c   : > { %v767_v60 = vunpack.i.h.bf16 %v765_v57  ;;  %v766_v61 = vunpack.i.l.bf16 %v765_v57 }
  0x8d   : > { %484 = vmatprep.mubr.bf16.mxu0 %v337_v62 }
  0x8e   : > { %v330_v1 = vsel %vm326_vm0, %v783_v48, %v766_v61  ;;  %v329_v2 = vsel %vm326_vm0, %v784_v49, %v767_v60  ;;  %485 = vmatmul.mubr.bf16.vlgmr.msra.gmra.mxu0 %v336_v63 }
  0x8f   : > { %v334_v5 = vmax.f32 %v330_v1, 0.0  ;;  %v333_v6 = vmax.f32 %v329_v2, 0.0  ;;  %735 = vmatpush3.bf16.msra.mxu0 %v448_v0  ;;  %742 = vmatprep.mubr.msk.bf16.mxu0 %vm797_vm1, %v796_v44 }
  0x90   : > { %736 = vmatprep.subr.bf16.mxu0 %v796_v44 }
  0x91   : > { %v339_v8 = vpack.c.bf16 %v334_v5, %v334_v5  ;;  %v338_v9 = vpack.c.bf16 %v333_v6, %v333_v6 }
  0x93   : > { %524 = vmatprep.mubr.bf16.mxu1 %v339_v8  ;;  %737 = vmatpush3.bf16.msra.mxu0 %v447_v10 }
  0x94   : > { %525 = vmatmul.mubr.bf16.vlgmr.msra.gmra.mxu1 %v338_v9  ;;  %738 = vmatprep.subr.bf16.mxu0 %v796_v44 }
  0x97   : > { %739 = vmatpush3.bf16.msra.mxu0 %v446_v13 }
  0x98   : > { %740 = vmatprep.subr.bf16.mxu0 %v796_v44 }
  0x9b   : > { %741 = vmatpush3.bf16.msra.mxu0 %v445_v17 }
  0x9e   : > { %743 = vmatmul.mubr.msk.bf16.vlgmr.msra.gmra.mxu0 %vm326_vm0, %v340_v18 }
 0x14e   : > { %v701_v19 = vpop.f32.mrf.mxu0 }
 0x150   : > { %v702_v20 = vpop.f32.mrf.mxu0 }
 0x151   : > { %v703_v29 = vadd.f32 %v702_v20, %v701_v19 }
 0x152   : > { %v704_v21 = vpop.f32.mrf.mxu0 }
 0x154   : > { %v723_v22 = vpop.f32.mrf.mxu1  ;;  %v705_v23 = vpop.f32.mrf.mxu0 }
 0x156   : > { %v724_v25 = vpop.f32.mrf.mxu1 }
 0x157   : > { %v725_v28 = vadd.f32 %v724_v25, %v723_v22 }
 0x158   : > { %v726_v26 = vpop.f32.mrf.mxu1 }
 0x159   : > { %v527_v30 = vadd.f32 %v725_v28, %v703_v29 }
 0x15a   : > { %v727_v27 = vpop.f32.mrf.mxu1 }
 0x15e   : > { %v566_v31 = vpop.f32.mrf.mxu0 }
 0x15f   : > { %v567_v33 = vadd.f32 %v566_v31, %v527_v30 }
 0x160   : > { %v744_v35 = vpop.f32.mrf.mxu0 }
 0x161   : > { %v579_v36 = vmul.f32 %v679_v32, %v567_v33 }
 0x162   : > { %v569_v37 = vpop.f32.mrf.mxu0 }
 0x163   : > { %v587_v38 = vadd.f32 %v680_v34, %v579_v36 }
 0x164   : > { %v745_v39 = vpop.f32.mrf.mxu0 }
 0x165   : > { %v595_v40 = vrot.slane %v587_v38, %v881_v24 }
 0x167   : > { %v596_v41 = vcombine.high %v595_v40, %v595_v40  ;;  %600 = vst.msk [vmem:[%s197_s8] sm:$0x3] %vm599_vm2, %v595_v40 }
 0x169   : > { %601 = vst.msk [vmem:[%s197_s8 + $0x2] sm:$0x3] %vm599_vm2, %v596_v41 }
 0x16a PF: > { %s14_s15 = sadd.s32 1, %s792_s15  }
 0x16b   : > { %p11_p4 = scmp.ge.s32.totalorder %s14_s15, 4  }
 0x16d   :  { %13 = sbr.rel (!%p11_p4) target bundleno = 1 (0x1), region = 68 }

// kernel: generator_forward.62
= control target key start
LH: loop header
LB: loop body
LE: loop exit
PB: predicated region body
PF: predicated region fallthrough
CT: control target
= control target key end

     0   :  { %s790_s27 = smov 0   ;;  %s891_s0 = inlined_call_operand.vmem [shape: f32[2,2,2,32], index: 0, kind: input, shape index: {}]   ;;  %s892_s1 = inlined_call_operand.vmem [shape: f32[32,32], index: 1, kind: input, shape index: {}]   ;;  %s893_s2 = inlined_call_operand.vmem [shape: f32[1,32], index: 2, kind: input, shape index: {}]   ;;  %s894_s3 = inlined_call_operand.vmem [shape: f32[32,32], index: 3, kind: input, shape index: {}]   ;;  %s895_s4 = inlined_call_operand.vmem [shape: f32[1,32], index: 4, kind: input, shape index: {}]   ;;  %s896_s5 = inlined_call_operand.vmem [shape: f32[32,16], index: 5, kind: input, shape index: {}]   ;;  %s897_s6 = inlined_call_operand.vmem [shape: f32[1,16], index: 6, kind: input, shape index: {}]   ;;  %s898_s7 = inlined_call_operand.vmem [shape: f32[1,16], index: 7, kind: input, shape index: {}]   ;;  %s899_s8 = inlined_call_operand.vmem [shape: f32[2,2,2,16], index: 8, kind: output, shape index: {}]  }
   0x1 LB: > { %s657_s28 = sadd.s32 4294967295, %s740_s27   ;;  %p661_p0 = scmp.ge.s32.totalorder %s740_s27, 1  ;;  %s740_s27 = sphi %s790_s27, %s18_s27  }
   0x2   : > { %p262_p1 = scmp.lt.s32.totalorder %s740_s27, 3 }
   0x4   : > { %p263_p2 = pnand %p661_p0, %p262_p1 }
   0x5   : > { %p296_p3 = scmp.lt.s32.totalorder (!%p263_p2), %s657_s28, 1 }
   0x6   : > { %266 = sbr.rel (%p263_p2) target bundleno = 676 (0x2a4), region = 52 }
   0xb   : > { %v333_v0 = vld [vmem:[%s892_s1 + $0x18] sm:$0xff]  ;;  %v315_v1 = vlaneseq  ;;  %v742_v2 = vmov 0.0   ;;  %v332_v3 = vld [vmem:[%s892_s1 + $0x10] sm:$0xff]  ;;  %vm743_vm0 = vmmov 0   ;;  %s901_s28 = smov (!%p296_p3, %s657_s28), 1  ;;  %v331_v7 = vld [vmem:[%s892_s1 + $0x8] sm:$0xff] }
   0xc   : > { %689 = vmatprep.subr.mxu1 %v742_v2  ;;  %697 = vmatprep.mubr.msk.f32.mxu1 %vm743_vm0, %v742_v2  ;;  %v744_v4 = vmov 1983009808   ;;  %s674_s13 = sshll.u32 %s901_s28, 2  ;;  %v330_v9 = vld [vmem:[%s892_s1] sm:$0xff]  ;;  %vm320_vm1 = vcmask 257024   ;;  %vm335_vm2 = vcmask 261120  }
   0xd   : > { %690 = vmatpush3.msra.mxu1 %v333_v0  ;;  %v313_v5 = vunpack.c.l.s4 %v744_v4  ;;  %v809_v6 = vshrl.u32 %v315_v1, 7  ;;  %711 = vmatprep.subr.bf16.mxu0 %v742_v2  ;;  %s300_s18 = scalar_lea.vmem %s891_s0, %s674_s13  ;;  %v413_v23 = vld [vmem:[%s894_s3 + $0x18] sm:$0xff]  ;;  %v412_v24 = vld [vmem:[%s894_s3 + $0x10] sm:$0xff]  ;;  %v411_v25 = vld [vmem:[%s894_s3 + $0x8] sm:$0xff]  ;;  %s305_s26 = scalar_lea.vmem %s899_s8, %s674_s13  ;;  %vm599_vm3 = vcmask 123904  }
   0xe   : > { %691 = vmatprep.subr.mxu1 %v742_v2  ;;  %715 = vmatprep.mubr.msk.bf16.mxu0 %vm743_vm0, %v742_v2  ;;  %v307_v10 = vld [vmem:[%s300_s18] sm:$0x3]  ;;  %v308_v11 = vld [vmem:[%s300_s18 + $0x2] sm:$0x3]  ;;  %v525_v32 = vld [vmem:[%s896_s5 + $0x10] sm:$0xff] }
   0xf   : > { %692 = vmatpush3.msra.mxu1 %v332_v3  ;;  %v314_v8 = vunpack.c.0.s8 %v313_v5  ;;  %v311_v13 = vcombine.low %v307_v10, %v308_v11  ;;  %v410_v26 = vld [vmem:[%s894_s3] sm:$0xff]  ;;  %v526_v33 = vld [vmem:[%s896_s5 + $0x18] sm:$0xff]  ;;  %v524_v36 = vld [vmem:[%s896_s5 + $0x8] sm:$0xff]  ;;  %v496_v45 = vsub.s32 0, %v809_v6 }
  0x10   : > { %693 = vmatprep.subr.mxu1 %v742_v2  ;;  %v334_v27 = vld [vmem:[%s893_s2] sm:$0x1]  ;;  %v528_v35 = vpack.c.bf16 %v526_v33, %v525_v32 }
  0x11   : > { %694 = vmatpush3.msra.mxu1 %v331_v7  ;;  %v829_v12 = vsub.s32 %v314_v8, %v809_v6  ;;  %v523_v34 = vld [vmem:[%s896_s5] sm:$0xff] }
  0x12   : > { %695 = vmatprep.subr.mxu1 %v742_v2  ;;  %712 = vmatpush3.bf16.msra.mxu0 %v528_v35  ;;  %v527_v37 = vpack.c.bf16 %v524_v36, %v523_v34  ;;  %v414_v38 = vld [vmem:[%s895_s4] sm:$0x1] }
  0x13   : > { %696 = vmatpush3.msra.mxu1 %v330_v9  ;;  %v318_v14 = vrot.slane %v311_v13, %v829_v12  ;;  %713 = vmatprep.subr.bf16.mxu0 %v742_v2  ;;  %v670_v55 = vld [vmem:[%s897_s6] ss:$0 sm:$0xff] }
  0x14   : > { %700 = vmatprep.subr.mxu1 %v742_v2  ;;  %v671_v57 = vld [vmem:[%s898_s7] ss:$0 sm:$0xff] }
  0x15   : > { %v321_v15 = vsel %vm320_vm1, %v318_v14, 0.0 }
  0x16   : > { %v322_v16 = vrot.slane %v321_v15, 4  ;;  %714 = vmatpush3.bf16.msra.mxu0 %v527_v37 }
  0x18   : > { %v323_v17 = vadd.f32 %v322_v16, %v321_v15 }
  0x1a   : > { %v324_v18 = vrot.slane %v323_v17, 2 }
  0x1c   : > { %v325_v19 = vadd.f32 %v324_v18, %v323_v17 }
  0x1e   : > { %v326_v20 = vrot.slane %v325_v19, 1 }
  0x20   : > { %v327_v21 = vadd.f32 %v326_v20, %v325_v19 }
  0x22   : > { %v329_v22 = vmul.f32 0.25, %v327_v21 }
  0x24   : > { %698 = vmatmul.mubr.msk.f32.vlgmr.msra.gmra.mxu1 %vm335_vm2, %v329_v22 }
  0x25   : > { %701 = vmatpush3.msra.mxu1 %v413_v23  ;;  %708 = vmatprep.mubr.msk.f32.mxu1 %vm743_vm0, %v742_v2 }
  0x26   : > { %702 = vmatprep.subr.mxu1 %v742_v2 }
  0x27   : > { %703 = vmatpush3.msra.mxu1 %v412_v24 }
  0x28   : > { %704 = vmatprep.subr.mxu1 %v742_v2 }
  0x29   : > { %705 = vmatpush3.msra.mxu1 %v411_v25 }
  0x2a   : > { %706 = vmatprep.subr.mxu1 %v742_v2 }
  0x2b   : > { %707 = vmatpush3.msra.mxu1 %v410_v26 }
  0xe4   : > { %v405_v28 = vpop.f32.mrf.mxu1 }
  0xe5   : > { %v406_v29 = vadd.f32 %v405_v28, %v334_v27 }
  0xe6   : > { %v699_v30 = vpop.f32.mrf.mxu1 }
  0xe7   : > { %v409_v31 = vmax.f32 %v406_v29, 0.0 }
  0xe9   : > { %709 = vmatmul.mubr.msk.f32.vlgmr.msra.gmra.mxu1 %vm335_vm2, %v409_v31 }
 0x1a9   : > { %v484_v39 = vpop.f32.mrf.mxu1 }
 0x1aa   : > { %v485_v40 = vadd.f32 %v484_v39, %v414_v38 }
 0x1ab   : > { %v710_v41 = vpop.f32.mrf.mxu1 }
 0x1ac   : > { %v668_v42 = vmul.f32 -1.442695, %v485_v40 }
 0x1ae   : > { %730 = vpow2.f32 %v668_v42 }
 0x1bb   : > { %v731_v43 = vpop.eup %730 }
 0x1bc   : > { %v491_v44 = vadd.f32 1.0, %v731_v43 }
 0x1be   : > { %732 = vrcp.f32 %v491_v44 }
 0x1cb   : > { %v733_v46 = vpop.eup %732 }
 0x1cc   : > { %v497_v47 = vrot.slane %v733_v46, %v496_v45 }
 0x1ce   : > { %v505_v48 = vrot.slane %v497_v47, %v829_v12 }
 0x1d0   : > { %v506_v49 = vcombine.high %v505_v48, %v505_v48  ;;  %v509_v50 = vmul.f32 %v505_v48, %v307_v10 }
 0x1d2   : > { %v510_v51 = vmul.f32 %v506_v49, %v308_v11 }
 0x1d4   : > { %v513_v52 = vcombine.low %v509_v50, %v510_v51 }
 0x1d6   : > { %v520_v53 = vrot.slane %v513_v52, %v829_v12 }
 0x1d8   : > { %v522_v54 = vpack.c.bf16 %v520_v53, %v520_v53 }
 0x1da   : > { %716 = vmatmul.mubr.msk.bf16.vlgmr.msra.gmra.mxu0 %vm335_vm2, %v522_v54 }
 0x29a   : > { %v566_v56 = vpop.f32.mrf.mxu0 }
 0x29b   : > { %v579_v58 = vmul.f32 %v670_v55, %v566_v56 }
 0x29c   : > { %v717_v59 = vpop.f32.mrf.mxu0 }
 0x29d   : > { %v587_v60 = vadd.f32 %v671_v57, %v579_v58 }
 0x29e   : > { %v569_v61 = vpop.f32.mrf.mxu0 }
 0x29f   : > { %v595_v62 = vrot.slane %v587_v60, %v829_v12 }
 0x2a0   : > { %v718_v63 = vpop.f32.mrf.mxu0 }
 0x2a1   : > { %v596_v0 = vcombine.high %v595_v62, %v595_v62  ;;  %600 = vst.msk [vmem:[%s305_s26] sm:$0x3] %vm599_vm3, %v595_v62 }
 0x2a3   : > { %601 = vst.msk [vmem:[%s305_s26 + $0x2] sm:$0x3] %vm599_vm3, %v596_v0 }
 0x2a4 PF: > { %s18_s27 = sadd.s32 1, %s740_s27  }
 0x2a5   : > { %p15_p4 = scmp.ge.s32.totalorder %s18_s27, 4  }
 0x2a7   :  { %17 = sbr.rel (!%p15_p4) target bundleno = 1 (0x1), region = 82 }

// kernel: generator_forward.63
= control target key start
LH: loop header
LB: loop body
LE: loop exit
PB: predicated region body
PF: predicated region fallthrough
CT: control target
= control target key end

     0   :  { %s751_s15 = smov 0   ;;  %s922_s0 = inlined_call_operand.vmem [shape: f32[2,6,6,32], index: 0, kind: input, shape index: {}]   ;;  %s923_s1 = inlined_call_operand.vmem [shape: f32[288,8], index: 1, kind: input, shape index: {}]   ;;  %s924_s2 = inlined_call_operand.vmem [shape: f32[1,8], index: 2, kind: input, shape index: {}]   ;;  %s925_s3 = inlined_call_operand.vmem [shape: f32[1,8], index: 3, kind: input, shape index: {}]   ;;  %s926_s4 = inlined_call_operand.vmem [shape: f32[2,4,4,8], index: 4, kind: output, shape index: {}]  }
   0x1 LB: > { %s580_s16 = sadd.s32 4294967295, %s719_s15   ;;  %p584_p0 = scmp.ge.s32.totalorder %s719_s15, 1  ;;  %s719_s15 = sphi %s751_s15, %s14_s15  }
   0x2   : > { %p162_p1 = scmp.lt.s32.totalorder %s719_s15, 3 }
   0x4   : > { %p163_p2 = pnand %p584_p0, %p162_p1 }
   0x5   : > { %p188_p3 = scmp.lt.s32.totalorder (!%p163_p2), %s580_s16, 1  ;;  %s723_s12 = smov (!%p163_p2), 32  }
   0x6   : > { %166 = sbr.rel (%p163_p2) target bundleno = 362 (0x16a), region = 36  ;;  %s724_s24 = smov (!%p163_p2), 96  }
   0xb   : > { %v387_v0 = vld [vmem:[%s923_s1 + $0xf0] sm:$0xff]  ;;  %v388_v1 = vld [vmem:[%s923_s1 + $0xf8] sm:$0xff]  ;;  %v385_v5 = vld [vmem:[%s923_s1 + $0xe0] sm:$0xff]  ;;  %s928_s16 = smov (!%p188_p3, %s580_s16), 1  ;;  %v721_v19 = vmov 0.0   ;;  %vm725_vm0 = vmmov 0  }
   0xc   : > { %v371_v2 = vld [vmem:[%s923_s1 + $0x70] sm:$0xff]  ;;  %v408_v3 = vpack.c.bf16 %v388_v1, %v387_v0  ;;  %v372_v4 = vld [vmem:[%s923_s1 + $0x78] sm:$0xff]  ;;  %v386_v6 = vld [vmem:[%s923_s1 + $0xe8] sm:$0xff]  ;;  %s651_s11 = smul.u32 48, %s928_s16  ;;  %643 = vmatprep.subr.bf16.mxu1 %v721_v19  ;;  %647 = vmatprep.mubr.msk.bf16.mxu1 %vm725_vm0, %v721_v19  ;;  %vm333_vm1 = vcmask 261120   ;;  %vm336_vm2 = vcmask 523264  }
   0xd   : > { %v400_v7 = vpack.c.bf16 %v372_v4, %v371_v2  ;;  %v407_v8 = vpack.c.bf16 %v386_v6, %v385_v5  ;;  %v369_v9 = vld [vmem:[%s923_s1 + $0x60] sm:$0xff]  ;;  %v370_v10 = vld [vmem:[%s923_s1 + $0x68] sm:$0xff]  ;;  %v383_v11 = vld [vmem:[%s923_s1 + $0xd0] sm:$0xff]  ;;  %vm339_vm3 = vcmask 785408   ;;  %s617_s27 = sshll.u32 %s928_s16, 4  ;;  %vm520_vm4 = vcmask 60416  }
   0xe   : > { %618 = vmatprep.subr.bf16.mxu0 %v408_v3  ;;  %v384_v12 = vld [vmem:[%s923_s1 + $0xd8] sm:$0xff]  ;;  %v399_v13 = vpack.c.bf16 %v370_v10, %v369_v9  ;;  %v367_v15 = vld [vmem:[%s923_s1 + $0x50] sm:$0xff]  ;;  %s801_s20 = scalar_lea.vmem %s922_s0, %s651_s11  ;;  %v381_v17 = vld [vmem:[%s923_s1 + $0xc0] sm:$0xff]  ;;  %s722_s11 = smov 64  }
   0xf   : > { %619 = vmatpush3.bf16.msra.mxu0 %v400_v7  ;;  %v406_v14 = vpack.c.bf16 %v384_v12, %v383_v11  ;;  %v368_v16 = vld [vmem:[%s923_s1 + $0x58] sm:$0xff]  ;;  %v382_v18 = vld [vmem:[%s923_s1 + $0xc8] sm:$0xff]  ;;  %v365_v20 = vld [vmem:[%s923_s1 + $0x40] sm:$0xff]  ;;  %s197_s6 = scalar_lea.vmem %s926_s4, %s617_s27 }
  0x10   : > { %620 = vmatprep.subr.bf16.mxu0 %v407_v8  ;;  %v366_v21 = vld [vmem:[%s923_s1 + $0x48] sm:$0xff]  ;;  %v695_v22 = vld [vmem:[%s801_s20 + $0x10] ss:$8 sps:$4 sm:$0xff]   ;;  %v398_v24 = vpack.c.bf16 %v368_v16, %v367_v15  ;;  %v405_v27 = vpack.c.bf16 %v382_v18, %v381_v17  ;;  %v377_v41 = vld [vmem:[%s923_s1 + $0xa0] sm:$0xff] }
  0x11   : > { %v696_v23 = vld [vmem:[%s801_s20 + $0x20] ss:$8 sps:$4 sm:$0xff]   ;;  %v379_v25 = vld [vmem:[%s923_s1 + $0xb0] sm:$0xff]  ;;  %v380_v26 = vld [vmem:[%s923_s1 + $0xb8] sm:$0xff]  ;;  %v397_v36 = vpack.c.bf16 %v366_v21, %v365_v20 }
  0x12   : > { %v675_v28 = vpack.i.bf16 %v696_v23, %v695_v22  ;;  %v697_v29 = vld [vmem:[%s801_s20 + $0xa] ss:$8 sps:$4 sm:$0xff]   ;;  %v698_v30 = vld [vmem:[%s801_s20 + $0x1a] ss:$8 sps:$4 sm:$0xff]   ;;  %v404_v37 = vpack.c.bf16 %v380_v26, %v379_v25 }
  0x13   : > { %621 = vmatpush3.bf16.msra.mxu0 %v399_v13  ;;  %v363_v31 = vld [vmem:[%s923_s1 + $0x30] sm:$0xff]  ;;  %v364_v32 = vld [vmem:[%s923_s1 + $0x38] sm:$0xff]  ;;  %v665_v33 = vpack.i.bf16 %v698_v30, %v697_v29  ;;  %v699_v34 = vld [vmem:[%s801_s20 + $0x2] ss:$8 sps:$4 sm:$0xff]  }
  0x14   : > { %622 = vmatprep.subr.bf16.mxu0 %v406_v14  ;;  %676 = vrot.lane.b32.xlu1 %v675_v28, %s722_s11  ;;  %v700_v35 = vld [vmem:[%s801_s20 + $0x12] ss:$8 sps:$4 sm:$0xff]   ;;  %v701_v39 = vld [vmem:[%s801_s20 + $0x1] ss:$8 sps:$4 sm:$0xff]   ;;  %v396_v45 = vpack.c.bf16 %v364_v32, %v363_v31 }
  0x15   : > { %666 = vrot.lane.b32.xlu0 %v665_v33, %s723_s12  ;;  %v680_v38 = vpack.i.bf16 %v700_v35, %v699_v34  ;;  %v702_v40 = vld [vmem:[%s801_s20 + $0x11] ss:$8 sps:$4 sm:$0xff]   ;;  %v706_v48 = vld [vmem:[%s801_s20 + $0x21] ss:$8 sps:$4 sm:$0xff]  }
  0x16   : > { %v670_v42 = vpack.i.bf16 %v702_v40, %v701_v39  ;;  %v703_v43 = vld [vmem:[%s801_s20 + $0x8] ss:$8 sps:$4 sm:$0xff]   ;;  %v704_v44 = vld [vmem:[%s801_s20 + $0x18] ss:$8 sps:$4 sm:$0xff]  }
  0x17   : > { %623 = vmatpush3.bf16.msra.mxu0 %v398_v24  ;;  %v690_v46 = vpack.i.bf16 %v704_v44, %v703_v43  ;;  %v705_v47 = vld [vmem:[%s801_s20 + $0x11] ss:$8 sps:$4 sm:$0xff]   ;;  %v378_v49 = vld [vmem:[%s923_s1 + $0xa8] sm:$0xff]  ;;  %v361_v50 = vld [vmem:[%s923_s1 + $0x20] sm:$0xff] }
  0x18   : > { %624 = vmatprep.subr.bf16.mxu0 %v405_v27  ;;  %681 = vrot.lane.b32.xlu1 %v680_v38, %s722_s11  ;;  %v362_v51 = vld [vmem:[%s923_s1 + $0x28] sm:$0xff]  ;;  %v685_v52 = vpack.i.bf16 %v706_v48, %v705_v47  ;;  %v403_v53 = vpack.c.bf16 %v378_v49, %v377_v41  ;;  %v391_v55 = vld [vmem:[%s923_s1 + $0x110] sm:$0xff]  ;;  %v392_v56 = vld [vmem:[%s923_s1 + $0x118] sm:$0xff] }
  0x19   : > { %671 = vrot.lane.b32.xlu0 %v670_v42, %s723_s12  ;;  %v395_v54 = vpack.c.bf16 %v362_v51, %v361_v50  ;;  %v410_v57 = vpack.c.bf16 %v392_v56, %v391_v55  ;;  %v375_v58 = vld [vmem:[%s923_s1 + $0x90] sm:$0xff]  ;;  %v376_v59 = vld [vmem:[%s923_s1 + $0x98] sm:$0xff]  ;;  %v389_v0 = vld [vmem:[%s923_s1 + $0x100] sm:$0xff] }
  0x1a   : > { %v359_v60 = vld [vmem:[%s923_s1 + $0x10] sm:$0xff]  ;;  %v360_v61 = vld [vmem:[%s923_s1 + $0x18] sm:$0xff]  ;;  %v402_v62 = vpack.c.bf16 %v376_v59, %v375_v58  ;;  %v390_v1 = vld [vmem:[%s923_s1 + $0x108] sm:$0xff] }
  0x1b   : > { %625 = vmatpush3.bf16.msra.mxu0 %v397_v36  ;;  %644 = vmatpush3.bf16.msra.mxu1 %v410_v57  ;;  %v394_v63 = vpack.c.bf16 %v360_v61, %v359_v60  ;;  %v373_v2 = vld [vmem:[%s923_s1 + $0x80] sm:$0xff]  ;;  %v409_v3 = vpack.c.bf16 %v390_v1, %v389_v0  ;;  %v374_v4 = vld [vmem:[%s923_s1 + $0x88] sm:$0xff]  ;;  %v709_v8 = vld [vmem:[%s801_s20 + $0x12] ss:$8 sps:$4 sm:$0xff]  }
  0x1c   : > { %626 = vmatprep.subr.bf16.mxu0 %v404_v37  ;;  %691 = vrot.lane.b32.xlu1 %v690_v46, %s724_s24  ;;  %v357_v5 = vld [vmem:[%s923_s1] sm:$0xff]  ;;  %v358_v6 = vld [vmem:[%s923_s1 + $0x8] sm:$0xff]  ;;  %v401_v7 = vpack.c.bf16 %v374_v4, %v373_v2  ;;  %v350_v11 = vmax.f32 %v709_v8, 0.0  ;;  %v708_v22 = vld [vmem:[%s801_s20 + $0x10] ss:$8 sps:$4 sm:$0xff]  }
  0x1d   : > { %686 = vrot.lane.b32.xlu0 %v685_v52, %s724_s24  ;;  %645 = vmatprep.subr.bf16.mxu1 %v721_v19  ;;  %v710_v9 = vld [vmem:[%s801_s20 + $0x22] ss:$8 sps:$4 sm:$0xff]   ;;  %v393_v10 = vpack.c.bf16 %v358_v6, %v357_v5  ;;  %v613_v61 = vld [vmem:[%s924_s2] ss:$0 sm:$0xff] }
  0x1e   : > { %v353_v12 = vmax.f32 %v710_v9, 0.0  ;;  %v711_v19 = vld [vmem:[%s801_s20 + $0x9] ss:$8 sps:$4 sm:$0xff]   ;;  %v712_v20 = vld [vmem:[%s801_s20 + $0x19] ss:$8 sps:$4 sm:$0xff]  }
  0x1f   : > { %627 = vmatpush3.bf16.msra.mxu0 %v396_v45  ;;  %646 = vmatpush3.bf16.msra.mxu1 %v409_v3  ;;  %v707_v21 = vld [vmem:[%s801_s20] ss:$8 sps:$4 sm:$0xff]  }
  0x20   : > { %628 = vmatprep.subr.bf16.mxu0 %v403_v53  ;;  %v356_v13 = vpack.c.bf16 %v353_v12, %v350_v11  ;;  %v614_v0 = vld [vmem:[%s925_s3] ss:$0 sm:$0xff] }
  0x22   : > { %648 = vmatmul.mubr.msk.bf16.vlgmr.msra.gmra.mxu1 %vm333_vm1, %v356_v13 }
  0x23   : > { %629 = vmatpush3.bf16.msra.mxu0 %v395_v54 }
  0x24   : > { %630 = vmatprep.subr.bf16.mxu0 %v402_v62 }
  0x27   : > { %631 = vmatpush3.bf16.msra.mxu0 %v394_v63 }
  0x28   : > { %632 = vmatprep.subr.bf16.mxu0 %v401_v7 }
  0x2b   : > { %633 = vmatpush3.bf16.msra.mxu0 %v393_v10 }
  0x86   : > { %v677_v14 = vpop.permute.xlu1 %676 }
  0x87   : > { %v667_v15 = vpop.permute.xlu0 %666  ;;  %v679_v28 = vunpack.i.h.bf16 %v677_v14  ;;  %v678_v29 = vunpack.i.l.bf16 %v677_v14 }
  0x88   : > { %v669_v16 = vunpack.i.h.bf16 %v667_v15  ;;  %v668_v17 = vunpack.i.l.bf16 %v667_v15 }
  0x8a   : > { %v682_v18 = vpop.permute.xlu1 %681  ;;  %v342_v31 = vsel %vm333_vm1, %v711_v19, %v668_v17  ;;  %v343_v32 = vsel %vm333_vm1, %v712_v20, %v669_v16 }
  0x8b   : > { %v684_v23 = vunpack.i.h.bf16 %v682_v18  ;;  %v683_v24 = vunpack.i.l.bf16 %v682_v18  ;;  %v672_v25 = vpop.permute.xlu0 %671  ;;  %v344_v46 = vsel %vm336_vm2, %v342_v31, %v678_v29  ;;  %v345_v47 = vsel %vm336_vm2, %v343_v32, %v679_v28 }
  0x8c   : > { %v674_v26 = vunpack.i.h.bf16 %v672_v25  ;;  %v673_v27 = vunpack.i.l.bf16 %v672_v25 }
  0x8e   : > { %v692_v30 = vpop.permute.xlu1 %691  ;;  %v334_v35 = vsel %vm333_vm1, %v707_v21, %v673_v27  ;;  %v335_v36 = vsel %vm333_vm1, %v708_v22, %v674_v26 }
  0x8f   : > { %v694_v33 = vunpack.i.h.bf16 %v692_v30  ;;  %v693_v34 = vunpack.i.l.bf16 %v692_v30  ;;  %v337_v37 = vsel %vm336_vm2, %v334_v35, %v683_v24  ;;  %v338_v38 = vsel %vm336_vm2, %v335_v36, %v684_v23  ;;  %v687_v39 = vpop.permute.xlu0 %686 }
  0x90   : > { %v689_v42 = vunpack.i.h.bf16 %v687_v39  ;;  %v688_v43 = vunpack.i.l.bf16 %v687_v39 }
  0x91   : > { %v340_v40 = vsel %vm339_vm3, %v337_v37, %v693_v34  ;;  %v341_v41 = vsel %vm339_vm3, %v338_v38, %v694_v33 }
  0x92   : > { %v348_v44 = vmax.f32 %v340_v40, 0.0  ;;  %v351_v45 = vmax.f32 %v341_v41, 0.0  ;;  %v346_v48 = vsel %vm339_vm3, %v344_v46, %v688_v43  ;;  %v347_v49 = vsel %vm339_vm3, %v345_v47, %v689_v42 }
  0x93   : > { %v349_v50 = vmax.f32 %v346_v48, 0.0  ;;  %v352_v51 = vmax.f32 %v347_v49, 0.0 }
  0x94   : > { %v354_v52 = vpack.c.bf16 %v351_v45, %v348_v44 }
  0x95   : > { %v355_v53 = vpack.c.bf16 %v352_v51, %v349_v50 }
  0x97   : > { %446 = vmatprep.mubr.bf16.mxu0 %v355_v53 }
  0x98   : > { %447 = vmatmul.mubr.bf16.vlgmr.msra.gmra.mxu0 %v354_v52 }
  0xe2   : > { %v489_v54 = vpop.f32.mrf.mxu1 }
  0xe4   : > { %v649_v55 = vpop.f32.mrf.mxu1 }
  0xe6   : > { %v492_v56 = vpop.f32.mrf.mxu1 }
  0xe8   : > { %v650_v57 = vpop.f32.mrf.mxu1 }
 0x158   : > { %v634_v58 = vpop.f32.mrf.mxu0 }
 0x15a   : > { %v635_v59 = vpop.f32.mrf.mxu0 }
 0x15b   : > { %v636_v60 = vadd.f32 %v635_v59, %v634_v58 }
 0x15c   : > { %v637_v62 = vpop.f32.mrf.mxu0 }
 0x15d   : > { %v490_v63 = vadd.f32 %v636_v60, %v489_v54 }
 0x15e   : > { %v638_v1 = vpop.f32.mrf.mxu0 }
 0x15f   : > { %v503_v2 = vmul.f32 %v613_v61, %v490_v63  ;;  %v639_v3 = vadd.f32 %v638_v1, %v637_v62 }
 0x161   : > { %v512_v4 = vadd.f32 %v614_v0, %v503_v2  ;;  %v493_v5 = vadd.f32 %v639_v3, %v492_v56 }
 0x163   : > { %v516_v6 = vcombine.high %v512_v4, %v512_v4  ;;  %521 = vst.msk [vmem:[%s197_s6] sm:$0xf] %vm520_vm4, %v512_v4  ;;  %v504_v7 = vmul.f32 %v613_v61, %v493_v5 }
 0x165   : > { %522 = vst.msk [vmem:[%s197_s6 + $0x4] sm:$0xf] %vm520_vm4, %v516_v6  ;;  %v513_v8 = vadd.f32 %v614_v0, %v504_v7 }
 0x167   : > { %v517_v9 = vcombine.high %v513_v8, %v513_v8  ;;  %523 = vst.msk [vmem:[%s197_s6 + $0x8] sm:$0xf] %vm520_vm4, %v513_v8 }
 0x169   : > { %524 = vst.msk [vmem:[%s197_s6 + $0xc] sm:$0xf] %vm520_vm4, %v517_v9 }
 0x16a PF: > { %s14_s15 = sadd.s32 1, %s719_s15  }
 0x16b   : > { %p11_p4 = scmp.ge.s32.totalorder %s14_s15, 4  }
 0x16d   :  { %13 = sbr.rel (!%p11_p4) target bundleno = 1 (0x1), region = 68 }

// kernel: generator_forward.64
= control target key start
LH: loop header
LB: loop body
LE: loop exit
PB: predicated region body
PF: predicated region fallthrough
CT: control target
= control target key end

     0   :  { %s1063_s15 = smov 0   ;;  %s1385_s0 = inlined_call_operand.vmem [shape: f32[2,10,10,16], index: 0, kind: input, shape index: {}]   ;;  %s1386_s1 = inlined_call_operand.vmem [shape: f32[144,3], index: 1, kind: input, shape index: {}]   ;;  %s1387_s2 = inlined_call_operand.vmem [shape: f32[1,3], index: 2, kind: input, shape index: {}]   ;;  %s1388_s3 = inlined_call_operand.vmem [shape: f32[1,3], index: 3, kind: input, shape index: {}]   ;;  %s1389_s4 = inlined_call_operand.vmem [shape: f32[2,8,8,3], index: 4, kind: output, shape index: {}]  }
   0x1 LB: > { %s782_s16 = sadd.s32 4294967295, %s1028_s15   ;;  %p786_p0 = scmp.ge.s32.totalorder %s1028_s15, 1  ;;  %s1028_s15 = sphi %s1063_s15, %s14_s15  }
   0x2   : > { %p162_p1 = scmp.lt.s32.totalorder %s1028_s15, 3 }
   0x4   : > { %p163_p2 = pnand %p786_p0, %p162_p1 }
   0x5   : > { %p188_p3 = scmp.lt.s32.totalorder (!%p163_p2), %s782_s16, 1  ;;  %s1031_s11 = smov (!%p163_p2), 32  }
   0x6   : > { %166 = sbr.rel (%p163_p2) target bundleno = 396 (0x18c), region = 36  ;;  %s1032_s12 = smov (!%p163_p2), 16  }
   0x7   : > { %s1033_s23 = smov (!%p163_p2), 48   ;;  %s1034_s28 = smov (!%p163_p2), 64  }
   0x8   : > { %s1035_s8 = smov (!%p163_p2), 80   ;;  %s1036_s17 = smov (!%p163_p2), 96  }
   0x9   : > { %s1037_s18 = smov (!%p163_p2), 112  }
   0xb   : > { %v598_v0 = vld [vmem:[%s1386_s1 + $0x70] sm:$0xff]  ;;  %v599_v1 = vld [vmem:[%s1386_s1 + $0x78] sm:$0xff]  ;;  %v1030_v2 = vmov 0   ;;  %v596_v4 = vld [vmem:[%s1386_s1 + $0x60] sm:$0xff]  ;;  %s1391_s16 = smov (!%p188_p3, %s782_s16), 1  ;;  %vm497_vm0 = vcmask 130048  }
   0xc   : > { %623 = vmatprep.subr.bf16.mxu0 %v1030_v2  ;;  %847 = vmatprep.subr.bf16.mxu1 %v1030_v2  ;;  %v609_v3 = vpack.c.bf16 %v599_v1, %v598_v0  ;;  %v597_v5 = vld [vmem:[%s1386_s1 + $0x68] sm:$0xff]  ;;  %s865_s25 = smul.u32 160, %s1391_s16  ;;  %v594_v7 = vld [vmem:[%s1386_s1 + $0x50] sm:$0xff]  ;;  %v595_v8 = vld [vmem:[%s1386_s1 + $0x58] sm:$0xff]  ;;  %vm506_vm1 = vcmask 261120   ;;  %vm515_vm2 = vcmask 392192  }
   0xd   : > { %v608_v6 = vpack.c.bf16 %v597_v5, %v596_v4  ;;  %v607_v12 = vpack.c.bf16 %v595_v8, %v594_v7  ;;  %v592_v13 = vld [vmem:[%s1386_s1 + $0x40] sm:$0xff]  ;;  %v593_v21 = vld [vmem:[%s1386_s1 + $0x48] sm:$0xff]  ;;  %v590_v33 = vld [vmem:[%s1386_s1 + $0x30] sm:$0xff]  ;;  %vm524_vm3 = vcmask 523264   ;;  %vm533_vm4 = vcmask 654336  }
   0xe   : > { %624 = vmatpush1.bf16.msra.mxu0 %v609_v3  ;;  %856 = vmatpush1.bf16.msra.mxu1 %v609_v3  ;;  %s1099_s6 = scalar_lea.vmem %s1385_s0, %s865_s25  ;;  %v606_v28 = vpack.c.bf16 %v593_v21, %v592_v13  ;;  %v591_v34 = vld [vmem:[%s1386_s1 + $0x38] sm:$0xff]  ;;  %v588_v35 = vld [vmem:[%s1386_s1 + $0x20] sm:$0xff]  ;;  %v589_v36 = vld [vmem:[%s1386_s1 + $0x28] sm:$0xff]  ;;  %vm542_vm5 = vcmask 785408   ;;  %vm551_vm6 = vcmask 916480   ;;  %vm718_vm7 = vcmask 23552  }
   0xf   : > { %625 = vmatprep.subr.bf16.mxu0 %v1030_v2  ;;  %848 = vmatprep.subr.bf16.mxu1 %v1030_v2  ;;  %v215_v9 = vld [vmem:[%s1099_s6 + $0x2] sm:$0xff]  ;;  %v1103_v10 = vld [vmem:[%s1099_s6 + $0x12] sm:$0xff]  ;;  %v605_v38 = vpack.c.bf16 %v591_v34, %v590_v33  ;;  %v604_v42 = vpack.c.bf16 %v589_v36, %v588_v35 }
  0x10   : > { %v207_v11 = vld [vmem:[%s1099_s6 + $0x1] sm:$0xff]  ;;  %v892_v14 = vpack.i.bf16 %v1103_v10, %v215_v9  ;;  %v208_v15 = vld [vmem:[%s1099_s6 + $0x11] sm:$0xff] }
  0x11   : > { %v1112_v16 = vld [vmem:[%s1099_s6 + $0x42] sm:$0xff]  ;;  %v1115_v17 = vld [vmem:[%s1099_s6 + $0x52] sm:$0xff]  ;;  %v882_v18 = vpack.i.bf16 %v208_v15, %v207_v11 }
  0x12   : > { %626 = vmatpush1.bf16.msra.mxu0 %v608_v6  ;;  %857 = vmatpush1.bf16.msra.mxu1 %v608_v6  ;;  %v1120_v19 = vld [vmem:[%s1099_s6 + $0x41] sm:$0xff]  ;;  %v212_v20 = vld [vmem:[%s1099_s6 + $0x51] sm:$0xff]  ;;  %v897_v22 = vpack.i.bf16 %v1115_v17, %v1112_v16 }
  0x13   : > { %627 = vmatprep.subr.bf16.mxu0 %v1030_v2  ;;  %849 = vmatprep.subr.bf16.mxu1 %v1030_v2  ;;  %v1131_v23 = vpack.i.bf16 %v212_v20, %v1120_v19  ;;  %v1134_v24 = vld [vmem:[%s1099_s6 + $0x50] sm:$0xff]  ;;  %v1137_v25 = vld [vmem:[%s1099_s6 + $0x60] sm:$0xff]  ;;  %v587_v44 = vld [vmem:[%s1386_s1 + $0x18] sm:$0xff] }
  0x14   : > { %893 = vrot.lane.b32.xlu1 %v892_v14, %s1031_s11  ;;  %883 = vrot.lane.b32.xlu0 %v882_v18, %s1032_s12  ;;  %v1140_v26 = vld [vmem:[%s1099_s6 + $0x10] sm:$0xff]  ;;  %v1143_v27 = vld [vmem:[%s1099_s6 + $0x20] sm:$0xff]  ;;  %v907_v29 = vpack.i.bf16 %v1137_v25, %v1134_v24 }
  0x15   : > { %v902_v30 = vpack.i.bf16 %v1143_v27, %v1140_v26  ;;  %v1155_v31 = vld [vmem:[%s1099_s6 + $0x61] sm:$0xff]  ;;  %v586_v43 = vld [vmem:[%s1386_s1 + $0x10] sm:$0xff] }
  0x16   : > { %628 = vmatpush1.bf16.msra.mxu0 %v607_v12  ;;  %858 = vmatpush1.bf16.msra.mxu1 %v607_v12  ;;  %v1158_v32 = vld [vmem:[%s1099_s6 + $0x21] sm:$0xff]  ;;  %v917_v37 = vpack.i.bf16 %v1155_v31, %v212_v20  ;;  %v1199_v47 = vld [vmem:[%s1099_s6 + $0x70] sm:$0xff]  ;;  %v603_v51 = vpack.c.bf16 %v587_v44, %v586_v43 }
  0x17   : > { %629 = vmatprep.subr.bf16.mxu0 %v1030_v2  ;;  %850 = vmatprep.subr.bf16.mxu1 %v1030_v2  ;;  %v912_v39 = vpack.i.bf16 %v1158_v32, %v208_v15  ;;  %v1179_v40 = vld [vmem:[%s1099_s6 + $0x62] sm:$0xff]  ;;  %v1202_v48 = vld [vmem:[%s1099_s6 + $0x32] sm:$0xff]  ;;  %v937_v58 = vpack.i.bf16 %v1199_v47, %v1137_v25 }
  0x18   : > { %898 = vrot.lane.b32.xlu1 %v897_v22, %s1031_s11  ;;  %888 = vrot.lane.b32.xlu0 %v1131_v23, %s1032_s12  ;;  %v1182_v41 = vld [vmem:[%s1099_s6 + $0x22] sm:$0xff]  ;;  %v927_v45 = vpack.i.bf16 %v1179_v40, %v1115_v17  ;;  %v1205_v49 = vld [vmem:[%s1099_s6 + $0x30] sm:$0xff]  ;;  %v563_v53 = vmax.f32 %v1202_v48, 0.0  ;;  %v569_v54 = vmax.f32 %v1179_v40, 0.0  ;;  %v992_v20 = vpack.i.bf16 %v1112_v16, %v1202_v48 }
  0x19   : > { %v922_v46 = vpack.i.bf16 %v1182_v41, %v1103_v10  ;;  %v1208_v50 = vld [vmem:[%s1099_s6 + $0x72] sm:$0xff]  ;;  %v561_v52 = vmax.f32 %v1182_v41, 0.0  ;;  %v584_v55 = vld [vmem:[%s1386_s1] sm:$0xff]  ;;  %v585_v56 = vld [vmem:[%s1386_s1 + $0x8] sm:$0xff]  ;;  %v932_v60 = vpack.i.bf16 %v1205_v49, %v1143_v27  ;;  %v962_v8 = vpack.i.bf16 %v1202_v48, %v1182_v41 }
  0x1a   : > { %630 = vmatpush1.bf16.msra.mxu0 %v606_v28  ;;  %859 = vmatpush1.bf16.msra.mxu1 %v606_v28  ;;  %v571_v57 = vmax.f32 %v1208_v50, 0.0  ;;  %v827_v61 = vld [vmem:[%s1099_s6 + $0x71] sm:$0xff]  ;;  %v602_v0 = vpack.c.bf16 %v585_v56, %v584_v55  ;;  %v600_v1 = vld [vmem:[%s1386_s1 + $0x80] sm:$0xff]  ;;  %v601_v3 = vld [vmem:[%s1386_s1 + $0x88] sm:$0xff]  ;;  %v967_v7 = vpack.i.bf16 %v1208_v50, %v1179_v40  ;;  %v565_v28 = vmax.f32 %v1112_v16, 0.0 }
  0x1b   : > { %631 = vmatprep.subr.bf16.mxu0 %v1030_v2  ;;  %851 = vmatprep.subr.bf16.mxu1 %v1030_v2  ;;  %v577_v59 = vpack.c.bf16 %v563_v53, %v561_v52  ;;  %v823_v63 = vld [vmem:[%s1099_s6 + $0x31] sm:$0xff]  ;;  %v947_v4 = vpack.i.bf16 %v827_v61, %v1155_v31  ;;  %v610_v6 = vpack.c.bf16 %v601_v3, %v600_v1  ;;  %v797_v9 = vld [vmem:[%s1099_s6 + $0x80] sm:$0xff] }
  0x1c   : > { %908 = vrot.lane.b32.xlu1 %v907_v29, %s1033_s23  ;;  %903 = vrot.lane.b32.xlu0 %v902_v30, %s1033_s23  ;;  %v581_v62 = vpack.c.bf16 %v571_v57, %v569_v54  ;;  %v942_v5 = vpack.i.bf16 %v823_v63, %v1158_v32  ;;  %v793_v10 = vld [vmem:[%s1099_s6 + $0x40] sm:$0xff]  ;;  %v982_v14 = vpack.i.bf16 %v1120_v19, %v823_v63  ;;  %v821_v21 = vld [vmem:[%s1099_s6 + $0x90] sm:$0xff]  ;;  %v567_v29 = vmax.f32 %v1115_v17, 0.0 }
  0x1d   : > { %838 = vmatprep.mubr.msk.bf16.mxu0 %vm497_vm0, %v577_v59  ;;  %v972_v11 = vpack.i.bf16 %v793_v10, %v1205_v49  ;;  %v805_v12 = vld [vmem:[%s1099_s6 + $0x81] sm:$0xff]  ;;  %v837_v22 = vld [vmem:[%s1099_s6 + $0x92] sm:$0xff]  ;;  %v1007_v19 = vpack.i.bf16 %v821_v21, %v797_v9  ;;  %v1002_v34 = vpack.i.bf16 %v1134_v24, %v793_v10 }
  0x1e   : > { %632 = vmatpush1.bf16.msra.mxu0 %v605_v38  ;;  %860 = vmatpush1.bf16.msra.mxu1 %v605_v38  ;;  %v987_v13 = vpack.i.bf16 %v805_v12, %v827_v61  ;;  %v813_v15 = vld [vmem:[%s1099_s6 + $0x82] sm:$0xff]  ;;  %v575_v31 = vmax.f32 %v837_v22, 0.0  ;;  %v1275_v32 = vpack.c.bf16 %v567_v29, %v565_v28  ;;  %v829_v35 = vld [vmem:[%s1099_s6 + $0x91] sm:$0xff] }
  0x1f   : > { %633 = vmatprep.subr.bf16.mxu0 %v1030_v2  ;;  %852 = vmatprep.subr.bf16.mxu1 %v1030_v2  ;;  %v997_v18 = vpack.i.bf16 %v813_v15, %v1208_v50  ;;  %v573_v30 = vmax.f32 %v813_v15, 0.0  ;;  %v1017_v16 = vpack.i.bf16 %v829_v35, %v805_v12  ;;  %v199_v43 = vld [vmem:[%s1099_s6] sm:$0xff] }
  0x20   : > { %918 = vrot.lane.b32.xlu1 %v917_v37, %s1034_s28  ;;  %913 = vrot.lane.b32.xlu0 %v912_v39, %s1034_s28 }
  0x21   : > { %840 = vmatprep.mubr.msk.bf16.mxu1 %vm497_vm0, %v581_v62  ;;  %v1277_v33 = vpack.c.bf16 %v575_v31, %v573_v30 }
  0x22   : > { %634 = vmatpush1.bf16.msra.mxu0 %v604_v42  ;;  %861 = vmatpush1.bf16.msra.mxu1 %v604_v42 }
  0x23   : > { %635 = vmatprep.subr.bf16.mxu0 %v1030_v2  ;;  %853 = vmatprep.subr.bf16.mxu1 %v1030_v2 }
  0x24   : > { %928 = vrot.lane.b32.xlu1 %v927_v45, %s1035_s8  ;;  %923 = vrot.lane.b32.xlu0 %v922_v46, %s1035_s8 }
  0x26   : > { %636 = vmatpush1.bf16.msra.mxu0 %v603_v51  ;;  %862 = vmatpush1.bf16.msra.mxu1 %v603_v51 }
  0x27   : > { %637 = vmatprep.subr.bf16.mxu0 %v1030_v2  ;;  %854 = vmatprep.subr.bf16.mxu1 %v1030_v2 }
  0x28   : > { %938 = vrot.lane.b32.xlu1 %v937_v58, %s1036_s17  ;;  %933 = vrot.lane.b32.xlu0 %v932_v60, %s1036_s17 }
  0x2a   : > { %638 = vmatpush1.bf16.msra.mxu0 %v602_v0  ;;  %863 = vmatpush1.bf16.msra.mxu1 %v602_v0 }
  0x2b   : > { %653 = vmatprep.subr.bf16.mxu0 %v1030_v2  ;;  %855 = vmatprep.subr.bf16.mxu1 %v1030_v2  ;;  %v977_v2 = vpack.i.bf16 %v797_v9, %v1199_v47 }
  0x2c   : > { %948 = vrot.lane.b32.xlu1 %v947_v4, %s1037_s18  ;;  %943 = vrot.lane.b32.xlu0 %v942_v5, %s1037_s18 }
  0x2e   : > { %654 = vmatpush2.bf16.msra.mxu0 %v610_v6  ;;  %864 = vmatpush2.bf16.msra.mxu1 %v610_v6 }
  0x30   : > { %958 = vrot.lane.b32.xlu1 %v947_v4, %s1032_s12  ;;  %953 = vrot.lane.b32.xlu0 %v942_v5, %s1032_s12  ;;  %s846_s12 = sshll.u32 %s1391_s16, 6 }
  0x34   : > { %968 = vrot.lane.b32.xlu1 %v967_v7, %s1031_s11  ;;  %963 = vrot.lane.b32.xlu0 %v962_v8, %s1031_s11 }
  0x38   : > { %978 = vrot.lane.b32.xlu1 %v977_v2, %s1033_s23  ;;  %973 = vrot.lane.b32.xlu0 %v972_v11, %s1033_s23  ;;  %s1364_s23 = scalar_lea.vmem %s1389_s4, %s846_s12 }
  0x3c   : > { %988 = vrot.lane.b32.xlu1 %v987_v13, %s1034_s28  ;;  %983 = vrot.lane.b32.xlu0 %v982_v14, %s1034_s28 }
  0x40   : > { %998 = vrot.lane.b32.xlu1 %v997_v18, %s1035_s8  ;;  %993 = vrot.lane.b32.xlu0 %v992_v20, %s1035_s8 }
  0x44   : > { %1008 = vrot.lane.b32.xlu1 %v1007_v19, %s1036_s17  ;;  %1003 = vrot.lane.b32.xlu0 %v1002_v34, %s1036_s17 }
  0x48   : > { %1018 = vrot.lane.b32.xlu1 %v1017_v16, %s1037_s18  ;;  %1013 = vrot.lane.b32.xlu0 %v1131_v23, %s1037_s18 }
  0x86   : > { %v894_v17 = vpop.permute.xlu1 %893  ;;  %v884_v36 = vpop.permute.xlu0 %883 }
  0x87   : > { %v886_v41 = vunpack.i.h.bf16 %v884_v36  ;;  %v885_v42 = vunpack.i.l.bf16 %v884_v36  ;;  %v896_v50 = vunpack.i.h.bf16 %v894_v17  ;;  %v895_v51 = vunpack.i.l.bf16 %v894_v17 }
  0x89   : > { %v498_v52 = vsel %vm497_vm0, %v199_v43, %v885_v42  ;;  %v499_v23 = vsel %vm497_vm0, %v1140_v26, %v886_v41 }
  0x8a   : > { %v899_v37 = vpop.permute.xlu1 %898  ;;  %v889_v38 = vpop.permute.xlu0 %888  ;;  %v507_v63 = vsel %vm506_vm1, %v498_v52, %v895_v51  ;;  %v508_v26 = vsel %vm506_vm1, %v499_v23, %v896_v50 }
  0x8b   : > { %v891_v44 = vunpack.i.h.bf16 %v889_v38  ;;  %v890_v45 = vunpack.i.l.bf16 %v889_v38  ;;  %v901_v53 = vunpack.i.h.bf16 %v899_v37  ;;  %v900_v54 = vunpack.i.l.bf16 %v899_v37 }
  0x8d   : > { %v502_v55 = vsel %vm497_vm0, %v793_v10, %v890_v45  ;;  %v503_v56 = vsel %vm497_vm0, %v1134_v24, %v891_v44 }
  0x8e   : > { %v909_v39 = vpop.permute.xlu1 %908  ;;  %v904_v40 = vpop.permute.xlu0 %903  ;;  %v511_v0 = vsel %vm506_vm1, %v502_v55, %v900_v54  ;;  %v512_v1 = vsel %vm506_vm1, %v503_v56, %v901_v53 }
  0x8f   : > { %v911_v58 = vunpack.i.h.bf16 %v909_v39  ;;  %v910_v59 = vunpack.i.l.bf16 %v909_v39  ;;  %v906_v61 = vunpack.i.h.bf16 %v904_v40  ;;  %v905_v62 = vunpack.i.l.bf16 %v904_v40 }
  0x91   : > { %v520_v9 = vsel %vm515_vm2, %v511_v0, %v910_v59  ;;  %v521_v10 = vsel %vm515_vm2, %v512_v1, %v911_v58  ;;  %v516_v13 = vsel %vm515_vm2, %v507_v63, %v905_v62  ;;  %v517_v14 = vsel %vm515_vm2, %v508_v26, %v906_v61 }
  0x92   : > { %v919_v46 = vpop.permute.xlu1 %918  ;;  %v914_v48 = vpop.permute.xlu0 %913 }
  0x93   : > { %v921_v3 = vunpack.i.h.bf16 %v919_v46  ;;  %v920_v24 = vunpack.i.l.bf16 %v919_v46  ;;  %v916_v4 = vunpack.i.h.bf16 %v914_v48  ;;  %v915_v5 = vunpack.i.l.bf16 %v914_v48 }
  0x95   : > { %v529_v20 = vsel %vm524_vm3, %v520_v9, %v920_v24  ;;  %v530_v21 = vsel %vm524_vm3, %v521_v10, %v921_v3  ;;  %v525_v29 = vsel %vm524_vm3, %v516_v13, %v915_v5  ;;  %v526_v30 = vsel %vm524_vm3, %v517_v14, %v916_v4 }
  0x96   : > { %v929_v57 = vpop.permute.xlu1 %928  ;;  %v924_v60 = vpop.permute.xlu0 %923 }
  0x97   : > { %v931_v6 = vunpack.i.h.bf16 %v929_v57  ;;  %v930_v7 = vunpack.i.l.bf16 %v929_v57  ;;  %v926_v2 = vunpack.i.h.bf16 %v924_v60  ;;  %v925_v11 = vunpack.i.l.bf16 %v924_v60 }
  0x99   : > { %v538_v31 = vsel %vm533_vm4, %v529_v20, %v930_v7  ;;  %v539_v19 = vsel %vm533_vm4, %v530_v21, %v931_v6  ;;  %v534_v35 = vsel %vm533_vm4, %v525_v29, %v925_v11  ;;  %v535_v16 = vsel %vm533_vm4, %v526_v30, %v926_v2 }
  0x9a   : > { %v939_v8 = vpop.permute.xlu1 %938  ;;  %v934_v12 = vpop.permute.xlu0 %933 }
  0x9b   : > { %v941_v15 = vunpack.i.h.bf16 %v939_v8  ;;  %v940_v18 = vunpack.i.l.bf16 %v939_v8  ;;  %v936_v22 = vunpack.i.h.bf16 %v934_v12  ;;  %v935_v28 = vunpack.i.l.bf16 %v934_v12 }
  0x9d   : > { %v547_v38 = vsel %vm542_vm5, %v538_v31, %v940_v18  ;;  %v548_v39 = vsel %vm542_vm5, %v539_v19, %v941_v15  ;;  %v543_v42 = vsel %vm542_vm5, %v534_v35, %v935_v28  ;;  %v544_v43 = vsel %vm542_vm5, %v535_v16, %v936_v22 }
  0x9e   : > { %v949_v34 = vpop.permute.xlu1 %948  ;;  %v944_v37 = vpop.permute.xlu0 %943 }
  0x9f   : > { %v951_v17 = vunpack.i.h.bf16 %v949_v34  ;;  %v950_v36 = vunpack.i.l.bf16 %v949_v34  ;;  %v946_v40 = vunpack.i.h.bf16 %v944_v37  ;;  %v945_v41 = vunpack.i.l.bf16 %v944_v37 }
  0xa1   : > { %v556_v44 = vsel %vm551_vm6, %v547_v38, %v950_v36  ;;  %v557_v45 = vsel %vm551_vm6, %v548_v39, %v951_v17  ;;  %v552_v48 = vsel %vm551_vm6, %v543_v42, %v945_v41  ;;  %v553_v50 = vsel %vm551_vm6, %v544_v43, %v946_v40 }
  0xa2   : > { %v959_v46 = vpop.permute.xlu1 %958  ;;  %v568_v51 = vmax.f32 %v556_v44, 0.0  ;;  %v570_v52 = vmax.f32 %v557_v45, 0.0  ;;  %v954_v23 = vpop.permute.xlu0 %953  ;;  %v560_v53 = vmax.f32 %v552_v48, 0.0  ;;  %v562_v54 = vmax.f32 %v553_v50, 0.0 }
  0xa3   : > { %v961_v61 = vunpack.i.h.bf16 %v959_v46  ;;  %v960_v62 = vunpack.i.l.bf16 %v959_v46  ;;  %v956_v26 = vunpack.i.h.bf16 %v954_v23  ;;  %v955_v0 = vunpack.i.l.bf16 %v954_v23 }
  0xa4   : > { %v580_v55 = vpack.c.bf16 %v570_v52, %v568_v51  ;;  %v576_v56 = vpack.c.bf16 %v562_v54, %v560_v53 }
  0xa5   : > { %v504_v6 = vsel %vm497_vm0, %v1137_v25, %v960_v62  ;;  %v501_v8 = vsel %vm497_vm0, %v1205_v49, %v956_v26 }
  0xa6   : > { %v969_v57 = vpop.permute.xlu1 %968  ;;  %672 = vmatmul.mubr.bf16.vlgmr.msra.gmra.mxu1 %v580_v55  ;;  %v964_v58 = vpop.permute.xlu0 %963  ;;  %656 = vmatmul.mubr.bf16.vlgmr.msra.gmra.mxu0 %v576_v56 }
  0xa7   : > { %841 = vmatprep.mubr.msk.bf16.mxu1 %vm497_vm0, %v1277_v33  ;;  %839 = vmatprep.mubr.msk.bf16.mxu0 %vm497_vm0, %v1275_v32  ;;  %v971_v3 = vunpack.i.h.bf16 %v969_v57  ;;  %v970_v24 = vunpack.i.l.bf16 %v969_v57  ;;  %v966_v4 = vunpack.i.h.bf16 %v964_v58  ;;  %v965_v5 = vunpack.i.l.bf16 %v964_v58 }
  0xa8   : > { %v505_v33 = vsel %vm497_vm0, %v1199_v47, %v961_v61  ;;  %v500_v32 = vsel %vm497_vm0, %v1143_v27, %v955_v0 }
  0xa9   : > { %v513_v11 = vsel %vm506_vm1, %v504_v6, %v970_v24  ;;  %v514_v12 = vsel %vm506_vm1, %v505_v33, %v971_v3  ;;  %v509_v25 = vsel %vm506_vm1, %v500_v32, %v965_v5  ;;  %v510_v47 = vsel %vm506_vm1, %v501_v8, %v966_v4  ;;  %v842_v3 = vld [vmem:[%s1387_s2] ss:$0 sm:$0xff] }
  0xaa   : > { %v979_v59 = vpop.permute.xlu1 %978  ;;  %v974_v60 = vpop.permute.xlu0 %973  ;;  %v843_v24 = vld [vmem:[%s1388_s3] ss:$0 sm:$0xff] }
  0xab   : > { %v981_v9 = vunpack.i.h.bf16 %v979_v59  ;;  %v980_v10 = vunpack.i.l.bf16 %v979_v59  ;;  %v976_v13 = vunpack.i.h.bf16 %v974_v60  ;;  %v975_v14 = vunpack.i.l.bf16 %v974_v60 }
  0xad   : > { %v522_v28 = vsel %vm515_vm2, %v513_v11, %v980_v10  ;;  %v523_v29 = vsel %vm515_vm2, %v514_v12, %v981_v9  ;;  %v518_v34 = vsel %vm515_vm2, %v509_v25, %v975_v14  ;;  %v519_v35 = vsel %vm515_vm2, %v510_v47, %v976_v13 }
  0xae   : > { %v989_v63 = vpop.permute.xlu1 %988  ;;  %v984_v1 = vpop.permute.xlu0 %983 }
  0xaf   : > { %v991_v15 = vunpack.i.h.bf16 %v989_v63  ;;  %v990_v18 = vunpack.i.l.bf16 %v989_v63  ;;  %v986_v20 = vunpack.i.h.bf16 %v984_v1  ;;  %v985_v27 = vunpack.i.l.bf16 %v984_v1 }
  0xb1   : > { %v531_v36 = vsel %vm524_vm3, %v522_v28, %v990_v18  ;;  %v532_v37 = vsel %vm524_vm3, %v523_v29, %v991_v15  ;;  %v527_v40 = vsel %vm524_vm3, %v518_v34, %v985_v27  ;;  %v528_v41 = vsel %vm524_vm3, %v519_v35, %v986_v20 }
  0xb2   : > { %v999_v7 = vpop.permute.xlu1 %998  ;;  %v994_v2 = vpop.permute.xlu0 %993 }
  0xb3   : > { %v1001_v21 = vunpack.i.h.bf16 %v999_v7  ;;  %v1000_v22 = vunpack.i.l.bf16 %v999_v7  ;;  %v996_v30 = vunpack.i.h.bf16 %v994_v2  ;;  %v995_v31 = vunpack.i.l.bf16 %v994_v2 }
  0xb5   : > { %v540_v42 = vsel %vm533_vm4, %v531_v36, %v1000_v22  ;;  %v541_v43 = vsel %vm533_vm4, %v532_v37, %v1001_v21  ;;  %v536_v45 = vsel %vm533_vm4, %v527_v40, %v995_v31  ;;  %v537_v46 = vsel %vm533_vm4, %v528_v41, %v996_v30 }
  0xb6   : > { %v1009_v49 = vpop.permute.xlu1 %1008  ;;  %v1004_v19 = vpop.permute.xlu0 %1003 }
  0xb7   : > { %v1011_v16 = vunpack.i.h.bf16 %v1009_v49  ;;  %v1010_v17 = vunpack.i.l.bf16 %v1009_v49  ;;  %v1006_v38 = vunpack.i.h.bf16 %v1004_v19  ;;  %v1005_v39 = vunpack.i.l.bf16 %v1004_v19 }
  0xb9   : > { %v549_v52 = vsel %vm542_vm5, %v540_v42, %v1010_v17  ;;  %v550_v23 = vsel %vm542_vm5, %v541_v43, %v1011_v16  ;;  %v545_v55 = vsel %vm542_vm5, %v536_v45, %v1005_v39  ;;  %v546_v56 = vsel %vm542_vm5, %v537_v46, %v1006_v38 }
  0xba   : > { %v1019_v44 = vpop.permute.xlu1 %1018  ;;  %v1014_v51 = vpop.permute.xlu0 %1013 }
  0xbb   : > { %v1021_v48 = vunpack.i.h.bf16 %v1019_v44  ;;  %v1020_v50 = vunpack.i.l.bf16 %v1019_v44  ;;  %v1016_v53 = vunpack.i.h.bf16 %v1014_v51  ;;  %v1015_v54 = vunpack.i.l.bf16 %v1014_v51 }
  0xbd   : > { %v558_v57 = vsel %vm551_vm6, %v549_v52, %v1020_v50  ;;  %v559_v58 = vsel %vm551_vm6, %v550_v23, %v1021_v48  ;;  %v554_v61 = vsel %vm551_vm6, %v545_v55, %v1015_v54  ;;  %v555_v62 = vsel %vm551_vm6, %v546_v56, %v1016_v53 }
  0xbe   : > { %v572_v59 = vmax.f32 %v558_v57, 0.0  ;;  %v574_v60 = vmax.f32 %v559_v58, 0.0  ;;  %v564_v63 = vmax.f32 %v554_v61, 0.0  ;;  %v566_v26 = vmax.f32 %v555_v62, 0.0 }
  0xc0   : > { %v582_v0 = vpack.c.bf16 %v574_v60, %v572_v59  ;;  %v578_v1 = vpack.c.bf16 %v566_v26, %v564_v63 }
  0xc2   : > { %680 = vmatmul.mubr.bf16.gmra.mxu1 %v582_v0  ;;  %664 = vmatmul.mubr.bf16.gmra.mxu0 %v578_v1 }
 0x166   : > { %v673_v4 = vpop.f32.mrf.mxu1  ;;  %v657_v5 = vpop.f32.mrf.mxu0 }
 0x167   : > { %v699_v6 = vmul.f32 %v842_v3, %v673_v4  ;;  %v695_v33 = vmul.f32 %v842_v3, %v657_v5 }
 0x168   : > { %v675_v7 = vpop.f32.mrf.mxu1  ;;  %v659_v8 = vpop.f32.mrf.mxu0 }
 0x169   : > { %v714_v32 = vadd.f32 %v843_v24, %v699_v6  ;;  %v710_v9 = vadd.f32 %v843_v24, %v695_v33 }
 0x16a   : > { %v676_v10 = vpop.f32.mrf.mxu1  ;;  %v660_v2 = vpop.f32.mrf.mxu0 }
 0x16b   : > { %723 = vst.msk [vmem:[%s1364_s23 + $0x20] sm:$0xff] %vm718_vm7, %v714_v32  ;;  %v700_v11 = vmul.f32 %v842_v3, %v676_v10  ;;  %719 = vst.msk [vmem:[%s1364_s23] sm:$0xff] %vm718_vm7, %v710_v9  ;;  %v696_v12 = vmul.f32 %v842_v3, %v660_v2 }
 0x16c   : > { %v678_v13 = vpop.f32.mrf.mxu1  ;;  %v662_v25 = vpop.f32.mrf.mxu0 }
 0x16d   : > { %v715_v14 = vadd.f32 %v843_v24, %v700_v11  ;;  %v711_v47 = vadd.f32 %v843_v24, %v696_v12 }
 0x16f   : > { %724 = vst.msk [vmem:[%s1364_s23 + $0x28] sm:$0xff] %vm718_vm7, %v715_v14  ;;  %720 = vst.msk [vmem:[%s1364_s23 + $0x8] sm:$0xff] %vm718_vm7, %v711_v47 }
 0x182   : > { %v681_v15 = vpop.f32.mrf.mxu1  ;;  %v665_v18 = vpop.f32.mrf.mxu0 }
 0x183   : > { %v701_v20 = vmul.f32 %v842_v3, %v681_v15  ;;  %v697_v27 = vmul.f32 %v842_v3, %v665_v18 }
 0x184   : > { %v683_v21 = vpop.f32.mrf.mxu1  ;;  %v667_v49 = vpop.f32.mrf.mxu0 }
 0x185   : > { %v716_v22 = vadd.f32 %v843_v24, %v701_v20  ;;  %v712_v28 = vadd.f32 %v843_v24, %v697_v27 }
 0x186   : > { %v684_v29 = vpop.f32.mrf.mxu1  ;;  %v668_v30 = vpop.f32.mrf.mxu0 }
 0x187   : > { %725 = vst.msk [vmem:[%s1364_s23 + $0x30] sm:$0xff] %vm718_vm7, %v716_v22  ;;  %v702_v31 = vmul.f32 %v842_v3, %v684_v29  ;;  %721 = vst.msk [vmem:[%s1364_s23 + $0x10] sm:$0xff] %vm718_vm7, %v712_v28  ;;  %v698_v19 = vmul.f32 %v842_v3, %v668_v30 }
 0x188   : > { %v686_v34 = vpop.f32.mrf.mxu1  ;;  %v670_v16 = vpop.f32.mrf.mxu0 }
 0x189   : > { %v717_v35 = vadd.f32 %v843_v24, %v702_v31  ;;  %v713_v17 = vadd.f32 %v843_v24, %v698_v19 }
 0x18b   : > { %726 = vst.msk [vmem:[%s1364_s23 + $0x38] sm:$0xff] %vm718_vm7, %v717_v35  ;;  %722 = vst.msk [vmem:[%s1364_s23 + $0x18] sm:$0xff] %vm718_vm7, %v713_v17 }
 0x18c PF: > { %s14_s15 = sadd.s32 1, %s1028_s15  }
 0x18d   : > { %p11_p4 = scmp.ge.s32.totalorder %s14_s15, 4  }
 0x18f   :  { %13 = sbr.rel (!%p11_p4) target bundleno = 1 (0x1), region = 68 }

// kernel: generator_forward.100
= control target key start
LH: loop header
LB: loop body
LE: loop exit
PB: predicated region body
PF: predicated region fallthrough
CT: control target
= control target key end

     0   :  { %12 = vsyncpa [#allocation3], 0  ;;  %s2027_s0 = inlined_call_operand.vmem [shape: f32[2,1,4,4,65], index: 0, kind: input, shape index: {}]   ;;  %s2028_s1 = inlined_call_operand.vmem [shape: f32[585,16], index: 1, kind: input, shape index: {}]   ;;  %s2029_s2 = inlined_call_operand.vmem [shape: f32[585,1], index: 2, kind: input, shape index: {}]   ;;  %s2030_s3 = inlined_call_operand.vmem [shape: f32[1,16], index: 3, kind: input, shape index: {}]   ;;  %s2031_s4 = inlined_call_operand.vmem [shape: f32[1,16], index: 4, kind: input, shape index: {}]   ;;  %s2032_s5 = inlined_call_operand.vmem [shape: f32[2,2,2,16], index: 5, kind: output, shape index: {0}]   ;;  %s2033_s6 = inlined_call_operand.hbm [shape: f32[2,2,2,1], index: 6, kind: output, shape index: {1}]  }
   0x1   :  { %14 = vsyncpa [#allocation3 + $0x1], 0  ;;  %s1411_s21 = smov 0   ;;  %s1413_s22 = smov 0  }
   0x2   :  { %s1415_s23 = smov 0   ;;  %s1417_s24 = smov 0  }
   0x3 LB: > { %s1432_s25 = sadd.s32 4294967295, %s1359_s24   ;;  %s1063_s26 = sadd.s32 4294967294, %s1359_s24   ;;  %s1359_s24 = sphi %s1417_s24, %s2039_s24   ;;  %s1355_s23 = sphi %s1415_s23, %s2038_s23   ;;  %s1351_s22 = sphi %s1413_s22, %s2037_s22   ;;  %s1347_s21 = sphi %s1411_s21, %s2036_s21  }
   0x4   : > { %s1436_s27 = sadd.s32 1, %s1359_s24   ;;  %s163_s28 = sadd.s32 1, %s1355_s23 }
   0x5   : > { %s160_s29 = ssub.s32 %s1359_s24, %s1436_s27  ;;  %p173_p0 = scmp.ne.s32.totalorder %s1355_s23, %s1351_s22 }
   0x6   : > { %p161_p1 = scmp.eq.s32.totalorder %s160_s29, 0  ;;  %p174_p2 = scmp.eq.s32.totalorder %s1432_s25, 1 }
   0x7   : > { %p179_p3 = scmp.ne.s32.totalorder %s1351_s22, %s1347_s21  ;;  %p180_p4 = scmp.eq.s32.totalorder %s1063_s26, 1 }
   0x8   : > { %s1447_s30 = scalar_select %p161_p1, %s1355_s23, %s163_s28  }
   0x9   : > { %p1449_p5 = por %p174_p2, %p173_p0  ;;  %p1453_p6 = por %p180_p4, %p179_p3 }
   0xa   : > { %p1066_p7 = scmp.ge.s32.totalorder %s1359_s24, 1  ;;  %p218_p8 = scmp.lt.s32.totalorder %s1359_s24, 3 }
   0xc   : > { %p219_p9 = pnand %p1066_p7, %p218_p8 }
   0xd   : > { %p253_p10 = scmp.lt.s32.totalorder (!%p219_p9), %s1432_s25, 1  ;;  %s1363_s26 = smov (!%p219_p9), 65  }
   0xe   : > { %222 = sbr.rel (%p219_p9) target bundleno = 561 (0x231), region = 40  ;;  %s1364_s28 = smov (!%p219_p9), 69  }
   0xf   : > { %s1365_s15 = smov (!%p219_p9), 2   ;;  %s1366_s29 = smov (!%p219_p9), 4  }
  0x10   : > { %s1368_s10 = smov (!%p219_p9), 8   ;;  %s1369_s14 = smov (!%p219_p9), 71  }
  0x11   : > { %s250_s9 = sand.u32 (!%p219_p9), 1, %s1351_s22   ;;  %s1096_s13 = sshll.u32 (!%p219_p9), %s1432_s25, 6 }
  0x12   : > { %s1970_s18 = scalar_lea.hbm (!%p219_p9), %s2033_s6, %s1096_s13  ;;  %s1974_s20 = scalar_lea.sflag (!%p219_p9), [#allocation3], %s250_s9 }
  0x13   : > { %v290_v0 = vlaneseq  ;;  %v450_v1 = vld [vmem:[%s2028_s1 + $0xf0] sm:$0xff]  ;;  %v451_v2 = vld [vmem:[%s2028_s1 + $0xf8] sm:$0xff]  ;;  %v1361_v3 = vmov 1983009808   ;;  %v448_v8 = vld [vmem:[%s2028_s1 + $0xe0] sm:$0xff]  ;;  %s1476_s19 = scalar_select %p253_p10, %s1432_s25, 1 }
  0x14   : > { %v288_v4 = vunpack.c.l.s4 %v1361_v3  ;;  %v509_v5 = vpack.c.bf16 %v451_v2, %v450_v1  ;;  %v434_v6 = vld [vmem:[%s2028_s1 + $0x70] sm:$0xff]  ;;  %v435_v7 = vld [vmem:[%s2028_s1 + $0x78] sm:$0xff]  ;;  %v449_v11 = vld [vmem:[%s2028_s1 + $0xe8] sm:$0xff]  ;;  %vm535_vm0 = vcmask 1043456   ;;  %vm536_vm1 = vcmask 1044480  }
  0x15   : > { %v291_v9 = vshrl.u32 %v290_v0, 7  ;;  %v501_v10 = vpack.c.bf16 %v435_v7, %v434_v6  ;;  %v432_v12 = vld [vmem:[%s2028_s1 + $0x60] sm:$0xff]  ;;  %v433_v13 = vld [vmem:[%s2028_s1 + $0x68] sm:$0xff]  ;;  %v508_v15 = vpack.c.bf16 %v449_v11, %v448_v8  ;;  %v482_v16 = vld [vmem:[%s2028_s1 + $0x1f0] sm:$0xff]  ;;  %s1094_s17 = sshll.u32 %s1476_s19, 4  ;;  %vm399_vm2 = vcmask 531456  }
  0x16   : > { %v289_v14 = vunpack.c.0.s8 %v288_v4  ;;  %1097 = vmatprep.subr.bf16.mxu0 %v509_v5  ;;  %v483_v17 = vld [vmem:[%s2028_s1 + $0x1f8] sm:$0xff]  ;;  %v446_v18 = vld [vmem:[%s2028_s1 + $0xd0] sm:$0xff]  ;;  %v500_v19 = vpack.c.bf16 %v433_v13, %v432_v12  ;;  %s1509_s12 = scalar_lea.vmem %s2027_s0, %s1094_s17  ;;  %s1362_s17 = smov 67   ;;  %v480_v35 = vld [vmem:[%s2028_s1 + $0x1e0] sm:$0xff]  ;;  %vm401_vm3 = vcmask 15360   ;;  %vm403_vm4 = vcmask 547840  }
  0x17   : > { %1098 = vmatpush3.bf16.msra.mxu0 %v501_v10  ;;  %v525_v20 = vpack.c.bf16 %v483_v17, %v482_v16  ;;  %v447_v21 = vld [vmem:[%s2028_s1 + $0xd8] sm:$0xff]  ;;  %v466_v22 = vld [vmem:[%s2028_s1 + $0x170] sm:$0xff]  ;;  %v1290_v29 = vld.sshfl [vmem:[%s1509_s12 + $0x4] sm:$0xf pattern:$0x76325410] }
  0x18   : > { %v467_v23 = vld [vmem:[%s2028_s1 + $0x178] sm:$0xff]  ;;  %v1511_v24 = vsub.s32 %v289_v14, %v291_v9  ;;  %1099 = vmatprep.subr.bf16.mxu0 %v508_v15  ;;  %v507_v25 = vpack.c.bf16 %v447_v21, %v446_v18  ;;  %v430_v27 = vld [vmem:[%s2028_s1 + $0x50] sm:$0xff]  ;;  %v1291_v30 = vld.sshfl [vmem:[%s1509_s12 + $0x1] sm:$0xf pattern:$0x76325410]  ;;  %331 = vrot.lane.b32.xlu1 %v1290_v29, %s1362_s17 }
  0x19   : > { %v517_v26 = vpack.c.bf16 %v467_v23, %v466_v22  ;;  %v431_v28 = vld [vmem:[%s2028_s1 + $0x58] sm:$0xff]  ;;  %1119 = vmatprep.subr.bf16.mxu1 %v525_v20  ;;  %v1292_v31 = vld.sshfl [vmem:[%s1509_s12 + $0x6] sm:$0xf pattern:$0x76325410]  ;;  %305 = vrot.lane.b32.xlu0 %v1291_v30, %s1363_s26  ;;  %v478_v49 = vld [vmem:[%s2028_s1 + $0x1d0] sm:$0xff] }
  0x1a   : > { %v499_v32 = vpack.c.bf16 %v431_v28, %v430_v27  ;;  %v1293_v33 = vld.sshfl [vmem:[%s1509_s12 + $0x2] sm:$0xf pattern:$0x76325410]  ;;  %v481_v39 = vld [vmem:[%s2028_s1 + $0x1e8] sm:$0xff]  ;;  %v479_v50 = vld [vmem:[%s2028_s1 + $0x1d8] sm:$0xff] }
  0x1b   : > { %1120 = vmatpush3.bf16.msra.mxu1 %v517_v26  ;;  %1100 = vmatpush3.bf16.msra.mxu0 %v500_v19  ;;  %v1294_v34 = vld.sshfl [vmem:[%s1509_s12 + $0x5] sm:$0xf pattern:$0x76325410]  ;;  %v524_v42 = vpack.c.bf16 %v481_v39, %v480_v35  ;;  %v523_v52 = vpack.c.bf16 %v479_v50, %v478_v49  ;;  %v442_v53 = vld [vmem:[%s2028_s1 + $0xb0] sm:$0xff]  ;;  %v443_v54 = vld [vmem:[%s2028_s1 + $0xb8] sm:$0xff] }
  0x1c   : > { %1101 = vmatprep.subr.bf16.mxu0 %v507_v25  ;;  %v1295_v36 = vld.sshfl [vmem:[%s1509_s12 + $0x8] sm:$0xf pattern:$0x76325410]  ;;  %357 = vrot.lane.b32.xlu1 %v1292_v31, %s1364_s28  ;;  %v444_v40 = vld [vmem:[%s2028_s1 + $0xc0] sm:$0xff]  ;;  %v462_v55 = vld [vmem:[%s2028_s1 + $0x150] sm:$0xff]  ;;  %v505_v56 = vpack.c.bf16 %v443_v54, %v442_v53 }
  0x1d   : > { %v1296_v37 = vld.sshfl [vmem:[%s1509_s12 + $0xa] sm:$0xf pattern:$0x76325410]  ;;  %318 = vrot.lane.b32.xlu0 %v1293_v33, %s1365_s15  ;;  %v464_v44 = vld [vmem:[%s2028_s1 + $0x160] sm:$0xff]  ;;  %1121 = vmatprep.subr.bf16.mxu1 %v524_v42  ;;  %v463_v57 = vld [vmem:[%s2028_s1 + $0x158] sm:$0xff] }
  0x1e   : > { %v1297_v38 = vld.sshfl [vmem:[%s1509_s12 + $0x9] sm:$0xf pattern:$0x76325410]  ;;  %v428_v46 = vld [vmem:[%s2028_s1 + $0x40] sm:$0xff]  ;;  %v426_v58 = vld [vmem:[%s2028_s1 + $0x30] sm:$0xff]  ;;  %v515_v60 = vpack.c.bf16 %v463_v57, %v462_v55 }
  0x1f   : > { %1102 = vmatpush3.bf16.msra.mxu0 %v499_v32  ;;  %v445_v41 = vld [vmem:[%s2028_s1 + $0xc8] sm:$0xff]  ;;  %v427_v59 = vld [vmem:[%s2028_s1 + $0x38] sm:$0xff]  ;;  %s1367_s17 = smov 6   ;;  %v476_v62 = vld [vmem:[%s2028_s1 + $0x1c0] sm:$0xff]  ;;  %vm405_vm5 = vcmask 31744   ;;  %vm407_vm6 = vcmask 564224  }
  0x20   : > { %v506_v43 = vpack.c.bf16 %v445_v41, %v444_v40  ;;  %v465_v45 = vld [vmem:[%s2028_s1 + $0x168] sm:$0xff]  ;;  %344 = vrot.lane.b32.xlu1 %v1294_v34, %s1366_s29  ;;  %v497_v61 = vpack.c.bf16 %v427_v59, %v426_v58  ;;  %v440_v0 = vld [vmem:[%s2028_s1 + $0xa0] sm:$0xff]  ;;  %v474_v8 = vld [vmem:[%s2028_s1 + $0x1b0] sm:$0xff]  ;;  %vm409_vm7 = vcmask 48128   ;;  %vm411_vm8 = vcmask 580608   ;;  %s1374_s26 = smov [#allocation2]  }
  0x21   : > { %v516_v47 = vpack.c.bf16 %v465_v45, %v464_v44  ;;  %v429_v48 = vld [vmem:[%s2028_s1 + $0x48] sm:$0xff]  ;;  %370 = vrot.lane.b32.xlu0 %v1295_v36, %s1367_s17  ;;  %v460_v3 = vld [vmem:[%s2028_s1 + $0x140] sm:$0xff]  ;;  %v475_v10 = vld [vmem:[%s2028_s1 + $0x1b8] sm:$0xff]  ;;  %vm1372_vm9 = vmmov 0   ;;  %vm413_vm10 = vcmask 64512   ;;  %vm531_vm11 = vcmask 596992  }
  0x22   : > { %1103 = vmatprep.subr.bf16.mxu0 %v506_v43  ;;  %v498_v51 = vpack.c.bf16 %v429_v48, %v428_v46  ;;  %v477_v63 = vld [vmem:[%s2028_s1 + $0x1c8] sm:$0xff]  ;;  %v424_v6 = vld [vmem:[%s2028_s1 + $0x20] sm:$0xff]  ;;  %v521_v12 = vpack.c.bf16 %v475_v10, %v474_v8  ;;  %v438_v13 = vld [vmem:[%s2028_s1 + $0x90] sm:$0xff]  ;;  %v1370_v46 = vmov 0.0   ;;  %vm951_vm13 = vcmask 1024   ;;  %s1303_s25 = sshll.u32 %s1374_s26, 4  ;;  %s1304_s25 = int_to_ptr.vmem [resolvable:$false] %s1303_s25 }
  0x23   : > { %1122 = vmatpush3.bf16.msra.mxu1 %v516_v47  ;;  %v522_v1 = vpack.c.bf16 %v477_v63, %v476_v62  ;;  %v441_v2 = vld [vmem:[%s2028_s1 + $0xa8] sm:$0xff]  ;;  %v439_v14 = vld [vmem:[%s2028_s1 + $0x98] sm:$0xff]  ;;  %v458_v16 = vld [vmem:[%s2028_s1 + $0x130] sm:$0xff]  ;;  %s1305_s28 = scalar_lea.vmem %s1304_s25, 128 }
  0x24   : > { %1104 = vmatpush3.bf16.msra.mxu0 %v498_v51  ;;  %1123 = vmatprep.subr.bf16.mxu1 %v523_v52  ;;  %v461_v4 = vld [vmem:[%s2028_s1 + $0x148] sm:$0xff]  ;;  %v504_v5 = vpack.c.bf16 %v441_v2, %v440_v0  ;;  %v503_v15 = vpack.c.bf16 %v439_v14, %v438_v13  ;;  %v459_v17 = vld [vmem:[%s2028_s1 + $0x138] sm:$0xff]  ;;  %v422_v18 = vld [vmem:[%s2028_s1 + $0x10] sm:$0xff] }
  0x25   : > { %1105 = vmatprep.subr.bf16.mxu0 %v505_v56  ;;  %v425_v7 = vld [vmem:[%s2028_s1 + $0x28] sm:$0xff]  ;;  %396 = vrot.lane.b32.xlu1 %v1296_v37, %s1368_s10  ;;  %v514_v9 = vpack.c.bf16 %v461_v4, %v460_v3  ;;  %v423_v19 = vld [vmem:[%s2028_s1 + $0x18] sm:$0xff]  ;;  %v472_v20 = vld [vmem:[%s2028_s1 + $0x1a0] sm:$0xff]  ;;  %v513_v22 = vpack.c.bf16 %v459_v17, %v458_v16  ;;  %v1371_v56 = vmov 65535   ;;  %s1067_s10 = sshll.u32 %s250_s9, 2 }
  0x26   : > { %383 = vrot.lane.b32.xlu0 %v1297_v38, %s1369_s14  ;;  %v496_v11 = vpack.c.bf16 %v425_v7, %v424_v6  ;;  %v473_v21 = vld [vmem:[%s2028_s1 + $0x1a8] sm:$0xff]  ;;  %v436_v23 = vld [vmem:[%s2028_s1 + $0x80] sm:$0xff]  ;;  %v495_v26 = vpack.c.bf16 %v423_v19, %v422_v18  ;;  %v470_v33 = vld [vmem:[%s2028_s1 + $0x190] sm:$0xff]  ;;  %v537_v57 = vsel %vm535_vm0, 4294967295, %v1371_v56  ;;  %s252_s11 = scalar_lea.vmem [#allocation2], %s1067_s10 }
  0x27   : > { %1124 = vmatpush3.bf16.msra.mxu1 %v515_v60  ;;  %v437_v25 = vld [vmem:[%s2028_s1 + $0x88] sm:$0xff]  ;;  %v520_v27 = vpack.c.bf16 %v473_v21, %v472_v20  ;;  %v456_v28 = vld [vmem:[%s2028_s1 + $0x120] sm:$0xff]  ;;  %v471_v34 = vld [vmem:[%s2028_s1 + $0x198] sm:$0xff]  ;;  %s976_s14 = sshll.u32 %s252_s11, 4  ;;  %s1972_s14 = int_to_ptr.vmem [resolvable:$true] %s976_s14 }
  0x28   : > { %1106 = vmatpush3.bf16.msra.mxu0 %v497_v61  ;;  %1125 = vmatprep.subr.bf16.mxu1 %v522_v1  ;;  %v457_v29 = vld [vmem:[%s2028_s1 + $0x128] sm:$0xff]  ;;  %v420_v30 = vld [vmem:[%s2028_s1] sm:$0xff]  ;;  %v502_v31 = vpack.c.bf16 %v437_v25, %v436_v23  ;;  %v519_v37 = vpack.c.bf16 %v471_v34, %v470_v33  ;;  %v454_v38 = vld [vmem:[%s2028_s1 + $0x110] sm:$0xff]  ;;  %v1686_v61 = vsel %vm536_vm1, %v537_v57, 0  ;;  %p1306_p0 = scmp.lt.s32.totalorder %s1972_s14, %s1304_s25 }
  0x29   : > { %1107 = vmatprep.subr.bf16.mxu0 %v504_v5  ;;  %v421_v32 = vld [vmem:[%s2028_s1 + $0x8] sm:$0xff]  ;;  %v512_v35 = vpack.c.bf16 %v457_v29, %v456_v28  ;;  %v455_v39 = vld [vmem:[%s2028_s1 + $0x118] sm:$0xff]  ;;  %v468_v40 = vld [vmem:[%s2028_s1 + $0x180] sm:$0xff] }
  0x2a   : > { %v494_v36 = vpack.c.bf16 %v421_v32, %v420_v30  ;;  %v469_v41 = vld [vmem:[%s2028_s1 + $0x188] sm:$0xff]  ;;  %v511_v42 = vpack.c.bf16 %v455_v39, %v454_v38  ;;  %v452_v44 = vld [vmem:[%s2028_s1 + $0x100] sm:$0xff]  ;;  %v692_v47 = vld [vmem:[%s2029_s2 + $0xf0] sm:$0xff] }
  0x2b   : > { %1126 = vmatpush3.bf16.msra.mxu1 %v514_v9  ;;  %v518_v43 = vpack.c.bf16 %v469_v41, %v468_v40  ;;  %v453_v45 = vld [vmem:[%s2028_s1 + $0x108] sm:$0xff]  ;;  %v693_v48 = vld [vmem:[%s2029_s2 + $0xf8] sm:$0xff]  ;;  %v1298_v51 = vld.sshfl [vmem:[%s1509_s12] sm:$0xf pattern:$0x76325410] }
  0x2c   : > { %1108 = vmatpush3.bf16.msra.mxu0 %v496_v11  ;;  %1127 = vmatprep.subr.bf16.mxu1 %v521_v12  ;;  %v510_v49 = vpack.c.bf16 %v453_v45, %v452_v44  ;;  %v751_v50 = vpack.c.bf16 %v693_v48, %v692_v47  ;;  %v492_v54 = vld [vmem:[%s2028_s1 + $0x240] sm:$0xff]  ;;  %v493_v55 = vld [vmem:[%s2028_s1 + $0x248] sm:$0x1]  ;;  %v490_v6 = vld [vmem:[%s2028_s1 + $0x230] sm:$0xff]  ;;  %s1299_s12 = scalar_lea.vmem %s1972_s14, 64 }
  0x2d   : > { %1109 = vmatprep.subr.bf16.mxu0 %v503_v15  ;;  %v530_v59 = vpack.c.bf16 %v493_v55, %v492_v54  ;;  %v491_v7 = vld [vmem:[%s2028_s1 + $0x238] sm:$0xff]  ;;  %v676_v10 = vld [vmem:[%s2029_s2 + $0x70] sm:$0xff]  ;;  %v488_v12 = vld [vmem:[%s2028_s1 + $0x220] sm:$0xff]  ;;  %p1300_p11 = scmp.ne.s32.totalorder %s1972_s14, %s1299_s12  ;;  %p1307_p1 = scmp.lt.s32.totalorder %s1305_s28, %s1299_s12 }
  0x2e   : > { %v529_v9 = vpack.c.bf16 %v491_v7, %v490_v6  ;;  %v677_v11 = vld [vmem:[%s2029_s2 + $0x78] sm:$0xff]  ;;  %v489_v16 = vld [vmem:[%s2028_s1 + $0x228] sm:$0xff]  ;;  %v690_v17 = vld [vmem:[%s2029_s2 + $0xe0] sm:$0xff] }
  0x2f   : > { %1128 = vmatpush3.bf16.msra.mxu1 %v513_v22  ;;  %v540_v3 = vand.u32 %v1686_v61, %v530_v59  ;;  %v691_v18 = vld [vmem:[%s2029_s2 + $0xe8] sm:$0xff]  ;;  %v743_v21 = vpack.c.bf16 %v677_v11, %v676_v10  ;;  %v528_v23 = vpack.c.bf16 %v489_v16, %v488_v12  ;;  %v486_v28 = vld [vmem:[%s2028_s1 + $0x210] sm:$0xff]  ;;  %v487_v29 = vld [vmem:[%s2028_s1 + $0x218] sm:$0xff]  ;;  %p1301_p12 = pnand %p1300_p11, %p1449_p5  ;;  %p1308_p2 = por %p1307_p1, %p1306_p0 }
  0x30   : > { %1110 = vmatpush3.bf16.msra.mxu0 %v495_v26  ;;  %1129 = vmatprep.subr.bf16.mxu1 %v520_v27  ;;  %v750_v25 = vpack.c.bf16 %v691_v18, %v690_v17  ;;  %v674_v26 = vld [vmem:[%s2029_s2 + $0x60] sm:$0xff]  ;;  %v675_v27 = vld [vmem:[%s2029_s2 + $0x68] sm:$0xff]  ;;  %v688_v30 = vld [vmem:[%s2029_s2 + $0xd0] sm:$0xff]  ;;  %v527_v33 = vpack.c.bf16 %v487_v29, %v486_v28 }
  0x31   : > { %1111 = vmatprep.subr.bf16.mxu0 %v502_v31  ;;  %v689_v31 = vld [vmem:[%s2029_s2 + $0xd8] sm:$0xff]  ;;  %v742_v32 = vpack.c.bf16 %v675_v27, %v674_v26  ;;  %v485_v38 = vld [vmem:[%s2028_s1 + $0x208] sm:$0xff]  ;;  %v686_v39 = vld [vmem:[%s2029_s2 + $0xc0] sm:$0xff]  ;;  %p1302_p13 = pneg %p1301_p12 }
  0x32   : > { %v749_v34 = vpack.c.bf16 %v689_v31, %v688_v30  ;;  %v687_v40 = vld [vmem:[%s2029_s2 + $0xc8] sm:$0xff]  ;;  %v724_v41 = vld [vmem:[%s2029_s2 + $0x1f0] sm:$0xff]  ;;  %v670_v48 = vld [vmem:[%s2029_s2 + $0x40] sm:$0xff] }
  0x33   : > { %1130 = vmatpush3.bf16.msra.mxu1 %v512_v35  ;;  %v672_v35 = vld [vmem:[%s2029_s2 + $0x50] sm:$0xff]  ;;  %v748_v47 = vpack.c.bf16 %v687_v40, %v686_v39  ;;  %v685_v55 = vld [vmem:[%s2029_s2 + $0xb8] sm:$0xff]  ;;  %v722_v56 = vld [vmem:[%s2029_s2 + $0x1e0] sm:$0xff]  ;;  %p1309_p3 = pnand %p1308_p2, %p1302_p13 }
  0x34   : > { %1112 = vmatpush3.bf16.msra.mxu0 %v494_v36  ;;  %1131 = vmatprep.subr.bf16.mxu1 %v519_v37  ;;  %v673_v36 = vld [vmem:[%s2029_s2 + $0x58] sm:$0xff]  ;;  %v484_v37 = vld [vmem:[%s2028_s1 + $0x200] sm:$0xff]  ;;  %v723_v57 = vld [vmem:[%s2029_s2 + $0x1e8] sm:$0xff] }
  0x35   : > { %1197 = vmatprep.subr.bf16.mxu0 %v1370_v46  ;;  %v741_v44 = vpack.c.bf16 %v673_v36, %v672_v35  ;;  %v526_v45 = vpack.c.bf16 %v485_v38, %v484_v37  ;;  %v683_v6 = vld [vmem:[%s2029_s2 + $0xa8] sm:$0xff]  ;;  %v720_v7 = vld [vmem:[%s2029_s2 + $0x1d0] sm:$0xff]  ;;  %v666_v12 = vld [vmem:[%s2029_s2 + $0x20] sm:$0xff] }
  0x36   : > { %v705_v16 = vld [vmem:[%s2029_s2 + $0x158] sm:$0xff]  ;;  %v680_v17 = vld [vmem:[%s2029_s2 + $0x90] sm:$0xff]  ;;  %v702_v28 = vld [vmem:[%s2029_s2 + $0x140] sm:$0xff] }
  0x37   : > { %1132 = vmatpush3.bf16.msra.mxu1 %v511_v42  ;;  %v725_v42 = vld [vmem:[%s2029_s2 + $0x1f8] sm:$0xff]  ;;  %v664_v26 = vld [vmem:[%s2029_s2 + $0x10] sm:$0xff]  ;;  %v703_v30 = vld [vmem:[%s2029_s2 + $0x148] sm:$0xff] }
  0x38   : > { %1133 = vmatprep.subr.bf16.mxu1 %v518_v43  ;;  %v681_v18 = vld [vmem:[%s2029_s2 + $0x98] sm:$0xff]  ;;  %v678_v31 = vld [vmem:[%s2029_s2 + $0x80] sm:$0xff]  ;;  %v756_v37 = vpack.c.bf16 %v703_v30, %v702_v28  ;;  %v663_v39 = vld [vmem:[%s2029_s2 + $0x8] sm:$0xff] }
  0x39   : > { %v665_v27 = vld [vmem:[%s2029_s2 + $0x18] sm:$0xff]  ;;  %v662_v36 = vld [vmem:[%s2029_s2] sm:$0xff] }
  0x3a   : > { %v737_v35 = vpack.c.bf16 %v665_v27, %v664_v26  ;;  %v734_v40 = vld [vmem:[%s2029_s2 + $0x240] sm:$0xff] }
  0x3b   : > { %1134 = vmatpush3.bf16.msra.mxu1 %v510_v49  ;;  %v671_v49 = vld [vmem:[%s2029_s2 + $0x48] sm:$0xff] }
  0x3c   : > { %1147 = vmatprep.subr.bf16.mxu1 %v751_v50  ;;  %v767_v50 = vpack.c.bf16 %v725_v42, %v724_v41  ;;  %v735_v41 = vld [vmem:[%s2029_s2 + $0x248] sm:$0x1] }
  0x8a   : > { %v332_v52 = vpop.permute.xlu1 %331 }
  0x8b   : > { %v306_v53 = vpop.permute.xlu0 %305 }
  0x8c   : > { %v400_v62 = vsel %vm399_vm2, %v1298_v51, %v306_v53  ;;  %v708_v51 = vld [vmem:[%s2029_s2 + $0x170] sm:$0xff] }
  0x8d   : > { %v1689_v4 = vpack.c.bf16 %v400_v62, %v400_v62  ;;  %v669_v62 = vld [vmem:[%s2029_s2 + $0x38] sm:$0xff] }
  0x8e   : > { %v358_v58 = vpop.permute.xlu1 %357 }
  0x8f   : > { %v319_v60 = vpop.permute.xlu0 %318 }
  0x90   : > { %v402_v63 = vsel %vm401_vm3, %v306_v53, %v319_v60  ;;  %v684_v53 = vld [vmem:[%s2029_s2 + $0xb0] sm:$0xff] }
  0x91   : > { %v404_v0 = vsel %vm403_vm4, %v402_v63, %v332_v52  ;;  %v668_v60 = vld [vmem:[%s2029_s2 + $0x30] sm:$0xff]  ;;  %v706_v63 = vld [vmem:[%s2029_s2 + $0x160] sm:$0xff] }
  0x92   : > { %v345_v1 = vpop.permute.xlu1 %344  ;;  %v416_v2 = vpack.c.bf16 %v404_v0, %v404_v0 }
  0x93   : > { %v371_v5 = vpop.permute.xlu0 %370  ;;  %v406_v8 = vsel %vm405_vm5, %v332_v52, %v345_v1  ;;  %v709_v52 = vld [vmem:[%s2029_s2 + $0x178] sm:$0xff]  ;;  %v747_v1 = vpack.c.bf16 %v685_v55, %v684_v53  ;;  %v699_v53 = vld [vmem:[%s2029_s2 + $0x128] sm:$0xff] }
  0x94   : > { %574 = vmatprep.mubr.bf16.mxu0 %v416_v2  ;;  %v408_v13 = vsel %vm407_vm6, %v406_v8, %v358_v58  ;;  %v410_v14 = vsel %vm409_vm7, %v358_v58, %v371_v5  ;;  %v740_v58 = vpack.c.bf16 %v671_v49, %v670_v48  ;;  %v759_v59 = vpack.c.bf16 %v709_v52, %v708_v51  ;;  %v682_v5 = vld [vmem:[%s2029_s2 + $0xa0] sm:$0xff]  ;;  %v721_v8 = vld [vmem:[%s2029_s2 + $0x1d8] sm:$0xff] }
  0x95   : > { %575 = vmatmul.mubr.bf16.vlgmr.msra.gmra.mxu0 %v1689_v4  ;;  %v1721_v22 = vpack.c.bf16 %v408_v13, %v408_v13  ;;  %v746_v11 = vpack.c.bf16 %v683_v6, %v682_v5  ;;  %v667_v13 = vld [vmem:[%s2029_s2 + $0x28] sm:$0xff]  ;;  %v736_v48 = vpack.c.bf16 %v663_v39, %v662_v36  ;;  %v772_v49 = vpack.c.bf16 %v735_v41, %v734_v40  ;;  %v698_v52 = vld [vmem:[%s2029_s2 + $0x120] sm:$0xff]  ;;  %v713_v55 = vld [vmem:[%s2029_s2 + $0x198] sm:$0xff] }
  0x96   : > { %1198 = vmatpush3.bf16.msra.mxu0 %v540_v3  ;;  %1207 = vmatprep.mubr.msk.bf16.mxu0 %vm1372_vm9, %v1370_v46  ;;  %v707_v3 = vld [vmem:[%s2029_s2 + $0x168] sm:$0xff] }
  0x97   : > { %1199 = vmatprep.subr.bf16.mxu0 %v1370_v46  ;;  %v397_v43 = vpop.permute.xlu1 %396  ;;  %v758_v10 = vpack.c.bf16 %v707_v3, %v706_v63  ;;  %v710_v63 = vld [vmem:[%s2029_s2 + $0x180] sm:$0xff]  ;;  %v731_v5 = vld [vmem:[%s2029_s2 + $0x228] sm:$0xff] }
  0x98   : > { %v384_v15 = vpop.permute.xlu0 %383 }
  0x99   : > { %v412_v19 = vsel %vm411_vm8, %v410_v14, %v384_v15  ;;  %v414_v54 = vsel %vm413_vm10, %v384_v15, %v397_v43  ;;  %v704_v14 = vld [vmem:[%s2029_s2 + $0x150] sm:$0xff]  ;;  %v765_v15 = vpack.c.bf16 %v721_v8, %v720_v7  ;;  %v694_v7 = vld [vmem:[%s2029_s2 + $0x100] sm:$0xff]  ;;  %v695_v8 = vld [vmem:[%s2029_s2 + $0x108] sm:$0xff] }
  0x9a   : > { %v1719_v20 = vpack.c.bf16 %v412_v19, %v412_v19  ;;  %1200 = vmatpush3.bf16.msra.mxu0 %v529_v9  ;;  %v1803_v0 = vpack.c.bf16 %v414_v54, %v414_v54  ;;  %v739_v9 = vpack.c.bf16 %v669_v62, %v668_v60  ;;  %v718_v19 = vld [vmem:[%s2029_s2 + $0x1c0] sm:$0xff]  ;;  %v700_v43 = vld [vmem:[%s2029_s2 + $0x130] sm:$0xff] }
  0x9b   : > { %1201 = vmatprep.subr.bf16.mxu0 %v1370_v46  ;;  %v712_v54 = vld [vmem:[%s2029_s2 + $0x190] sm:$0xff] }
  0x9c   : > { %614 = vmatprep.mubr.bf16.mxu1 %v1719_v20  ;;  %v761_v60 = vpack.c.bf16 %v713_v55, %v712_v54  ;;  %v696_v62 = vld [vmem:[%s2029_s2 + $0x110] sm:$0xff] }
  0x9d   : > { %615 = vmatmul.mubr.bf16.vlgmr.msra.gmra.mxu1 %v1721_v22 }
  0x9e   : > { %1148 = vmatpush3.bf16.msra.mxu1 %v743_v21  ;;  %808 = vmatprep.mubr.bf16.mxu1 %v416_v2  ;;  %v766_v2 = vpack.c.bf16 %v723_v57, %v722_v56  ;;  %v738_v21 = vpack.c.bf16 %v667_v13, %v666_v12  ;;  %v774_v56 = vand.u32 %v772_v49, %v1686_v61  ;;  %v697_v61 = vld [vmem:[%s2029_s2 + $0x118] sm:$0xff] }
  0x9f   : > { %1202 = vmatpush3.bf16.msra.mxu0 %v528_v23  ;;  %1149 = vmatprep.subr.bf16.mxu1 %v750_v25  ;;  %v757_v23 = vpack.c.bf16 %v705_v16, %v704_v14  ;;  %v745_v25 = vpack.c.bf16 %v681_v18, %v680_v17  ;;  %v754_v57 = vpack.c.bf16 %v699_v53, %v698_v52  ;;  %v729_v12 = vld [vmem:[%s2029_s2 + $0x218] sm:$0xff]  ;;  %v726_v14 = vld [vmem:[%s2029_s2 + $0x200] sm:$0xff]  ;;  %v1373_v17 = vmov 0  }
  0xa0   : > { %1203 = vmatprep.subr.bf16.mxu0 %v1370_v46  ;;  %v753_v3 = vpack.c.bf16 %v697_v61, %v696_v62  ;;  %1278 = vset.pattern.permute.xlu0 %v1373_v17 }
  0xa2   : > { %1150 = vmatpush3.bf16.msra.mxu1 %v742_v32  ;;  %v679_v32 = vld [vmem:[%s2029_s2 + $0x88] sm:$0xff] }
  0xa3   : > { %1204 = vmatpush3.bf16.msra.mxu0 %v527_v33  ;;  %1151 = vmatprep.subr.bf16.mxu1 %v749_v34  ;;  %v716_v33 = vld [vmem:[%s2029_s2 + $0x1b0] sm:$0xff]  ;;  %v717_v34 = vld [vmem:[%s2029_s2 + $0x1b8] sm:$0xff]  ;;  %v744_v38 = vpack.c.bf16 %v679_v32, %v678_v31 }
  0xa4   : > { %1205 = vmatprep.subr.bf16.mxu0 %v1370_v46  ;;  %v763_v42 = vpack.c.bf16 %v717_v34, %v716_v33 }
  0xa6   : > { %1152 = vmatpush3.bf16.msra.mxu1 %v741_v44  ;;  %v701_v44 = vld [vmem:[%s2029_s2 + $0x138] sm:$0xff] }
  0xa7   : > { %1206 = vmatpush3.bf16.msra.mxu0 %v526_v45  ;;  %1153 = vmatprep.subr.bf16.mxu1 %v748_v47  ;;  %v714_v45 = vld [vmem:[%s2029_s2 + $0x1a0] sm:$0xff]  ;;  %v715_v47 = vld [vmem:[%s2029_s2 + $0x1a8] sm:$0xff] }
  0xa8   : > { %1169 = vmatprep.subr.bf16.mxu0 %v767_v50  ;;  %v755_v50 = vpack.c.bf16 %v701_v44, %v700_v43  ;;  %v762_v51 = vpack.c.bf16 %v715_v47, %v714_v45 }
  0xaa   : > { %1208 = vmatmul.mubr.msk.bf16.vlgmr.msra.gmra.mxu0 %vm531_vm11, %v1803_v0  ;;  %1154 = vmatpush3.bf16.msra.mxu1 %v740_v58  ;;  %v732_v58 = vld [vmem:[%s2029_s2 + $0x230] sm:$0xff] }
  0xab   : > { %1170 = vmatpush3.bf16.msra.mxu0 %v759_v59  ;;  %848 = vmatprep.mubr.bf16.mxu0 %v1719_v20  ;;  %v719_v20 = vld [vmem:[%s2029_s2 + $0x1c8] sm:$0xff]  ;;  %v733_v59 = vld [vmem:[%s2029_s2 + $0x238] sm:$0xff] }
  0xac   : > { %1155 = vmatprep.subr.bf16.mxu1 %v747_v1  ;;  %1171 = vmatprep.subr.bf16.mxu0 %v766_v2  ;;  %v764_v29 = vpack.c.bf16 %v719_v20, %v718_v19  ;;  %v711_v1 = vld [vmem:[%s2029_s2 + $0x188] sm:$0xff]  ;;  %v771_v2 = vpack.c.bf16 %v733_v59, %v732_v58 }
  0xad   : > { %v760_v6 = vpack.c.bf16 %v711_v1, %v710_v63 }
  0xae   : > { %1156 = vmatpush3.bf16.msra.mxu1 %v739_v9 }
  0xaf   : > { %1172 = vmatpush3.bf16.msra.mxu0 %v758_v10  ;;  %1157 = vmatprep.subr.bf16.mxu1 %v746_v11  ;;  %v752_v10 = vpack.c.bf16 %v695_v8, %v694_v7  ;;  %v728_v11 = vld [vmem:[%s2029_s2 + $0x210] sm:$0xff] }
  0xb0   : > { %1173 = vmatprep.subr.bf16.mxu0 %v765_v15  ;;  %v769_v13 = vpack.c.bf16 %v729_v12, %v728_v11  ;;  %v727_v15 = vld [vmem:[%s2029_s2 + $0x208] sm:$0xff] }
  0xb1   : > { %v768_v16 = vpack.c.bf16 %v727_v15, %v726_v14 }
  0xb2   : > { %1158 = vmatpush3.bf16.msra.mxu1 %v738_v21 }
  0xb3   : > { %1174 = vmatpush3.bf16.msra.mxu0 %v757_v23  ;;  %1159 = vmatprep.subr.bf16.mxu1 %v745_v25 }
  0xb4   : > { %1175 = vmatprep.subr.bf16.mxu0 %v764_v29 }
  0xb6   : > { %1160 = vmatpush3.bf16.msra.mxu1 %v737_v35 }
  0xb7   : > { %1176 = vmatpush3.bf16.msra.mxu0 %v756_v37  ;;  %1161 = vmatprep.subr.bf16.mxu1 %v744_v38 }
  0xb8   : > { %1177 = vmatprep.subr.bf16.mxu0 %v763_v42 }
  0xba   : > { %1162 = vmatpush3.bf16.msra.mxu1 %v736_v48 }
  0xbb   : > { %1178 = vmatpush3.bf16.msra.mxu0 %v755_v50  ;;  %1211 = vmatprep.subr.bf16.mxu1 %v1370_v46 }
  0xbc   : > { %1179 = vmatprep.subr.bf16.mxu0 %v762_v51 }
  0xbd   : > { %809 = vmatmul.mubr.bf16.vlgmr.msra.gmra.mxu1 %v1689_v4  ;;  %v730_v4 = vld [vmem:[%s2029_s2 + $0x220] sm:$0xff] }
  0xbe   : > { %1212 = vmatpush3.bf16.msra.mxu1 %v774_v56  ;;  %1221 = vmatprep.mubr.msk.bf16.mxu1 %vm1372_vm9, %v1370_v46  ;;  %v770_v9 = vpack.c.bf16 %v731_v5, %v730_v4 }
  0xbf   : > { %1180 = vmatpush3.bf16.msra.mxu0 %v754_v57  ;;  %1213 = vmatprep.subr.bf16.mxu1 %v1370_v46 }
  0xc0   : > { %1181 = vmatprep.subr.bf16.mxu0 %v761_v60 }
  0xc2   : > { %1214 = vmatpush3.bf16.msra.mxu1 %v771_v2 }
  0xc3   : > { %1182 = vmatpush3.bf16.msra.mxu0 %v753_v3  ;;  %1215 = vmatprep.subr.bf16.mxu1 %v1370_v46 }
  0xc4   : > { %1183 = vmatprep.subr.bf16.mxu0 %v760_v6 }
  0xc6   : > { %1216 = vmatpush3.bf16.msra.mxu1 %v770_v9 }
  0xc7   : > { %1184 = vmatpush3.bf16.msra.mxu0 %v752_v10  ;;  %1217 = vmatprep.subr.bf16.mxu1 %v1370_v46 }
  0xca   : > { %849 = vmatmul.mubr.bf16.vlgmr.msra.gmra.mxu0 %v1721_v22  ;;  %1218 = vmatpush3.bf16.msra.mxu1 %v769_v13 }
  0xcb   : > { %1219 = vmatprep.subr.bf16.mxu1 %v1370_v46 }
  0xce   : > { %1220 = vmatpush3.bf16.msra.mxu1 %v768_v16 }
  0xd1   : > { %1222 = vmatmul.mubr.msk.bf16.vlgmr.msra.gmra.mxu1 %vm531_vm11, %v1803_v0 }
 0x155   : > { %v1113_v18 = vpop.f32.mrf.mxu0 }
 0x157   : > { %v1114_v19 = vpop.f32.mrf.mxu0 }
 0x158   : > { %v1115_v20 = vadd.f32 %v1114_v19, %v1113_v18 }
 0x159   : > { %v1116_v21 = vpop.f32.mrf.mxu0 }
 0x15b   : > { %v1117_v23 = vpop.f32.mrf.mxu0 }
 0x15d   : > { %v1135_v25 = vpop.f32.mrf.mxu1 }
 0x15f   : > { %v1136_v26 = vpop.f32.mrf.mxu1 }
 0x160   : > { %v1137_v27 = vadd.f32 %v1136_v26, %v1135_v25 }
 0x161   : > { %v1138_v28 = vpop.f32.mrf.mxu1 }
 0x162   : > { %v617_v22 = vadd.f32 %v1137_v27, %v1115_v20 }
 0x163   : > { %v1139_v29 = vpop.f32.mrf.mxu1 }
 0x16a   : > { %v656_v30 = vpop.f32.mrf.mxu0 }
 0x16b   : > { %v1961_v31 = vadd.f32 %v656_v30, %v617_v22 }
 0x16c   : > { %v1209_v32 = vpop.f32.mrf.mxu0 }
 0x16e   : > { %v659_v33 = vpop.f32.mrf.mxu0 }
 0x170   : > { %v1210_v0 = vpop.f32.mrf.mxu0 }
 0x17d   : > { %v1163_v34 = vpop.f32.mrf.mxu1 }
 0x17f   : > { %v1164_v35 = vpop.f32.mrf.mxu1 }
 0x180   : > { %v1165_v40 = vadd.f32 %v1164_v35, %v1163_v34 }
 0x181   : > { %v1166_v36 = vpop.f32.mrf.mxu1 }
 0x183   : > { %v1167_v37 = vpop.f32.mrf.mxu1 }
 0x18a   : > { %v1185_v38 = vpop.f32.mrf.mxu0 }
 0x18c   : > { %v1186_v39 = vpop.f32.mrf.mxu0 }
 0x18d   : > { %v1187_v41 = vadd.f32 %v1186_v39, %v1185_v38 }
 0x18e   : > { %v1188_v42 = vpop.f32.mrf.mxu0 }
 0x18f   : > { %v851_v43 = vadd.f32 %v1187_v41, %v1165_v40 }
 0x190   : > { %v1189_v44 = vpop.f32.mrf.mxu0 }
 0x191   : > { %v890_v45 = vpop.f32.mrf.mxu1 }
 0x192   : > { %v891_v47 = vadd.f32 %v890_v45, %v851_v43 }
 0x193   : > { %v1223_v48 = vpop.f32.mrf.mxu1 }
 0x194   : > { %vm896_vm12 = vcmp.gt.f32.partialorder %v891_v47, 0.0  ;;  %v899_v49 = vadd.f32 1e-08, %v891_v47 }
 0x195   : > { %v1086_v50 = vsel %vm896_vm12, 1.0, %v1370_v46  ;;  %v893_v51 = vpop.f32.mrf.mxu1 }
 0x196   : > { %1288 = vrcp.f32 %v899_v49  ;;  %v947_v52 = vrot.slane %v1086_v50, %v1511_v24 }
 0x197   : > { %v1224_v53 = vpop.f32.mrf.mxu1 }
 0x198   : > { %v948_v54 = vcombine.high %v947_v52, %v947_v52  ;;  %952 = vst.msk [vmem:[%s252_s11] sm:$0x3] %vm951_vm13, %v947_v52 }
 0x19a   : > { %953 = vst.msk [vmem:[%s252_s11 + $0x2] sm:$0x3] %vm951_vm13, %v948_v54 }
 0x1a3   : > { %v1289_v55 = vpop.eup %1288 }
 0x1a4   : > { %v901_v56 = vmul.f32 9.0, %v1289_v55 }
 0x1a6   : > { %v902_v57 = vmul.f32 %v1086_v50, %v901_v56 }
 0x1a8   : > { %905 = vperm.xlu0 %1278, %v902_v57  }
 0x1a9   : > { %1312 = shalt.err (!%p1309_p3)
}
 0x1aa   : > { %s1313_s29 = scalar_lea.hbm %s1970_s18, 64  ;;  %s1317_s11 = scalar_lea.hbm %s2033_s6, 128 }
 0x1ab   : > { %p1314_p4 = scmp.ne.s32.totalorder %s1970_s18, %s1313_s29  ;;  %p1318_p9 = scmp.lt.s32.totalorder %s1970_s18, %s2033_s6 }
 0x1ac   : > { %p1319_p10 = scmp.lt.s32.totalorder %s1317_s11, %s1313_s29 }
 0x1ad   : > { %p1315_p7 = pnand %p1314_p4, %p1449_p5 }
 0x1ae   : > { %p1320_p11 = por %p1319_p10, %p1318_p9 }
 0x1af   : > { %p1316_p8 = pneg %p1315_p7 }
 0x1b1   : > { %p1321_p12 = pnand %p1320_p11, %p1316_p8 }
 0x1b3   : > { %1324 = shalt.err (!%p1321_p12)
}
 0x1b4   : > { %s1375_s17 = smov 32   ;;  %v1087_v46 = vld [vmem:[%s2030_s3] ss:$0 sm:$0xff]  ;;  %s1095_s29 = sshll.u32 %s1476_s19, 2  ;;  %vm937_vm14 = vcmask 123904  }
 0x1b5   : > { %1225 = dma.vmem_to_hbm [thread:$0]  (%p1449_p5), %s1972_s14, 64, %s1970_s18, %s1974_s20, %s1375_s17, %s1375_s17, %s1365_s15  }
 0x1b6   : > { %v1088_v60 = vld [vmem:[%s2031_s4] ss:$0 sm:$0xff]  ;;  %s262_s10 = scalar_lea.vmem %s2032_s5, %s1095_s29 }
 0x223   : > { %v906_v58 = vpop.permute.xlu0 %905 }
 0x224   : > { %v908_v59 = vmul.f32 %v906_v58, %v1961_v31 }
 0x226   : > { %v916_v62 = vmul.f32 %v1087_v46, %v908_v59 }
 0x228   : > { %v924_v61 = vadd.f32 %v1088_v60, %v916_v62 }
 0x22a   : > { %v925_v63 = vmax.f32 %v924_v61, 0.0 }
 0x22c   : > { %v933_v1 = vrot.slane %v925_v63, %v1511_v24 }
 0x22e   : > { %v934_v2 = vcombine.high %v933_v1, %v933_v1  ;;  %938 = vst.msk [vmem:[%s262_s10] sm:$0x3] %vm937_vm14, %v933_v1 }
 0x230   : > { %939 = vst.msk [vmem:[%s262_s10 + $0x2] sm:$0x3] %vm937_vm14, %v934_v2 }
 0x231 PF: > { %p1231_p5 = scmp.ge.s32.totalorder %s1359_s24, 2  ;;  %s999_s15 = sand.u32 1, %s1347_s21  }
 0x232   : > { %s1000_s19 = scalar_lea.sflag [#allocation3], %s999_s15 }
 0x233   : > { %p1228_p13 = pnand %p1231_p5, %p1453_p6 }
 0x235   : > { %p1229_p0 = pneg %p1228_p13 }
 0x237   : > { %1342 = dma.done.wait (%p1229_p0), %s1000_s19, 64  }
 0x238   : > { %1344 = vsyncadd (%p1229_p0), %s1000_s19, 4294967232  ;;  %p17_p1 = scmp.ge.s32.totalorder %s1436_s27, 4   ;;  %s2036_s21 = smov %s1351_s22 }
 0x239   : > { %s2037_s22 = smov %s1355_s23  ;;  %s2038_s23 = smov %s1447_s30 }
 0x23a   : > { %s2039_s24 = smov %s1436_s27  ;;  %19 = sbr.rel (!%p17_p1) target bundleno = 3 (0x3), region = 89 }
 0x23f   :  { %1005 = vsyncpa [#allocation3], 1 }
 0x240   :  { %1007 = vsyncpa [#allocation3 + $0x1], 1 }

// kernel: generator_forward.65
= control target key start
LH: loop header
LB: loop body
LE: loop exit
PB: predicated region body
PF: predicated region fallthrough
CT: control target
= control target key end

     0   :  { %s1504_s21 = smov 0   ;;  %s1875_s0 = inlined_call_operand.vmem [shape: f32[2,4,9,9,7], index: 0, kind: input, shape index: {}]   ;;  %s1876_s1 = inlined_call_operand.vmem [shape: f32[63,8], index: 1, kind: input, shape index: {}]   ;;  %s1877_s2 = inlined_call_operand.vmem [shape: f32[63,1], index: 2, kind: input, shape index: {}]   ;;  %s1878_s3 = inlined_call_operand.vmem [shape: f32[1,8], index: 3, kind: input, shape index: {}]   ;;  %s1879_s4 = inlined_call_operand.vmem [shape: f32[1,8], index: 4, kind: input, shape index: {}]   ;;  %s1880_s5 = inlined_call_operand.vmem [shape: f32[2,8,8,8], index: 5, kind: output, shape index: {0}]   ;;  %s1881_s6 = inlined_call_operand.vmem [shape: f32[2,8,8,1], index: 6, kind: output, shape index: {1}]  }
   0x1 LB: > { %s1116_s22 = sadd.s32 4294967295, %s1456_s21   ;;  %p1120_p0 = scmp.ge.s32.totalorder %s1456_s21, 1  ;;  %s1456_s21 = sphi %s1504_s21, %s17_s21  }
   0x2   : > { %p215_p1 = scmp.lt.s32.totalorder %s1456_s21, 3 }
   0x4   : > { %p216_p2 = pnand %p1120_p0, %p215_p1 }
   0x5   : > { %p250_p3 = scmp.lt.s32.totalorder (!%p216_p2), %s1116_s22, 1  ;;  %s1458_s27 = smov (!%p216_p2), 14  }
   0x6   : > { %219 = sbr.rel (%p216_p2) target bundleno = 558 (0x22e), region = 40  ;;  %s1459_s28 = smov (!%p216_p2), 7  }
   0x7   : > { %s1460_s29 = smov (!%p216_p2), 21   ;;  %s1462_s30 = smov (!%p216_p2), 28  }
   0x8   : > { %s1463_s19 = smov (!%p216_p2), 35   ;;  %s1464_s11 = smov (!%p216_p2), 42  }
   0x9   : > { %s1466_s9 = smov (!%p216_p2), 56  }
   0xb   : > { %s1883_s22 = smov (!%p250_p3, %s1116_s22), 1  ;;  %vm700_vm0 = vcmask 1046528   ;;  %vm701_vm1 = vcmask 1047552   ;;  %v1461_v28 = vmov 65535   ;;  %v681_v36 = vld [vmem:[%s1876_s1 + $0x30] sm:$0xff]  ;;  %v679_v42 = vld [vmem:[%s1876_s1 + $0x20] sm:$0xff] }
   0xc   : > { %s1252_s23 = smul.u32 576, %s1883_s22  ;;  %v702_v29 = vsel %vm700_vm0, 4294967295, %v1461_v28  ;;  %v682_v37 = vld [vmem:[%s1876_s1 + $0x38] sm:$0x7f]  ;;  %v778_v39 = vld [vmem:[%s1877_s2 + $0x30] sm:$0xff]  ;;  %v680_v43 = vld [vmem:[%s1876_s1 + $0x28] sm:$0xff] }
   0xd   : > { %v703_v38 = vsel %vm701_vm1, %v702_v29, 0  ;;  %v686_v40 = vpack.c.bf16 %v682_v37, %v681_v36  ;;  %v779_v41 = vld [vmem:[%s1877_s2 + $0x38] sm:$0x7f]  ;;  %v776_v46 = vld [vmem:[%s1877_s2 + $0x20] sm:$0xff]  ;;  %v777_v47 = vld [vmem:[%s1877_s2 + $0x28] sm:$0xff]  ;;  %v685_v52 = vpack.c.bf16 %v680_v43, %v679_v42  ;;  %vm599_vm2 = vcmask 56320  }
   0xe   : > { %s1518_s26 = scalar_lea.vmem %s1875_s0, %s1252_s23  ;;  %v783_v45 = vpack.c.bf16 %v779_v41, %v778_v39  ;;  %v782_v53 = vpack.c.bf16 %v777_v47, %v776_v46  ;;  %v677_v54 = vld [vmem:[%s1876_s1 + $0x10] sm:$0xff]  ;;  %v678_v55 = vld [vmem:[%s1876_s1 + $0x18] sm:$0xff]  ;;  %v675_v63 = vld [vmem:[%s1876_s1] sm:$0xff]  ;;  %s1465_s23 = smov 49   ;;  %vm608_vm3 = vcmask 113664   ;;  %vm617_vm4 = vcmask 171008  }
   0xf   : > { %v283_v0 = vld [vmem:[%s1518_s26 + $0x1] sm:$0xff]  ;;  %v1522_v1 = vld [vmem:[%s1518_s26 + $0x11] sm:$0xff]  ;;  %v705_v50 = vand.u32 %v703_v38, %v686_v40  ;;  %v684_v61 = vpack.c.bf16 %v678_v55, %v677_v54  ;;  %vm626_vm5 = vcmask 228352   ;;  %vm635_vm6 = vcmask 285696  }
  0x10   : > { %v1126_v2 = vld [vmem:[%s1518_s26 + $0x90] sm:$0xff]  ;;  %v1282_v3 = vpack.i.bf16 %v1522_v1, %v283_v0  ;;  %v1527_v4 = vld [vmem:[%s1518_s26 + $0xa0] sm:$0xff]  ;;  %v785_v51 = vand.u32 %v783_v45, %v703_v38  ;;  %v775_v58 = vld [vmem:[%s1877_s2 + $0x18] sm:$0xff]  ;;  %vm644_vm7 = vcmask 343040   ;;  %vm653_vm8 = vcmask 400384  }
  0x11   : > { %v1530_v5 = vld [vmem:[%s1518_s26 + $0x21] sm:$0xff]  ;;  %v1533_v6 = vld [vmem:[%s1518_s26 + $0x31] sm:$0xff]  ;;  %v1272_v7 = vpack.i.bf16 %v1527_v4, %v1126_v2  ;;  %1220 = vmatprep.subr.bf16.mxu0 %v705_v50  ;;  %vm662_vm9 = vcmask 457728   ;;  %vm687_vm10 = vcmask 515072   ;;  %vm1019_vm11 = vcmask 7168  }
  0x12   : > { %v1537_v8 = vld [vmem:[%s1518_s26 + $0xb0] sm:$0xff]  ;;  %v1540_v9 = vld [vmem:[%s1518_s26 + $0xc0] sm:$0xff]  ;;  %1283 = vrot.lane.b32.xlu1 %v1282_v3, %s1458_s27  ;;  %v1287_v10 = vpack.i.bf16 %v1533_v6, %v1530_v5  ;;  %1236 = vmatprep.subr.bf16.mxu1 %v785_v51  ;;  %v676_v0 = vld [vmem:[%s1876_s1 + $0x8] sm:$0xff] }
  0x13   : > { %1273 = vrot.lane.b32.xlu0 %v1272_v7, %s1459_s28  ;;  %v1277_v11 = vpack.i.bf16 %v1540_v9, %v1537_v8  ;;  %v1136_v12 = vld [vmem:[%s1518_s26 + $0x140] sm:$0xff]  ;;  %v1137_v13 = vld [vmem:[%s1518_s26 + $0x150] sm:$0xff]  ;;  %v1332_v59 = vpack.i.bf16 %v1537_v8, %v1527_v4  ;;  %1221 = vmatpush3.bf16.msra.mxu0 %v705_v50  ;;  %v773_v4 = vld [vmem:[%s1877_s2 + $0x8] sm:$0xff]  ;;  %v1342_v7 = vpack.i.bf16 %v1530_v5, %v1522_v1 }
  0x14   : > { %v1134_v14 = vld [vmem:[%s1518_s26 + $0x120] sm:$0xff]  ;;  %v1135_v15 = vld [vmem:[%s1518_s26 + $0x130] sm:$0xff]  ;;  %v1297_v16 = vpack.i.bf16 %v1137_v13, %v1136_v12  ;;  %1237 = vmatpush3.bf16.msra.mxu1 %v785_v51  ;;  %1222 = vmatprep.subr.bf16.mxu0 %v685_v52 }
  0x15   : > { %v1292_v17 = vpack.i.bf16 %v1135_v15, %v1134_v14  ;;  %v1144_v18 = vld [vmem:[%s1518_s26 + $0x1d0] sm:$0xff]  ;;  %v1145_v19 = vld [vmem:[%s1518_s26 + $0x1e0] sm:$0xff]  ;;  %1238 = vmatprep.subr.bf16.mxu1 %v782_v53 }
  0x16   : > { %1288 = vrot.lane.b32.xlu1 %v1287_v10, %s1458_s27  ;;  %v1142_v20 = vld [vmem:[%s1518_s26 + $0x1b0] sm:$0xff]  ;;  %v1143_v21 = vld [vmem:[%s1518_s26 + $0x1c0] sm:$0xff]  ;;  %v1307_v22 = vpack.i.bf16 %v1145_v19, %v1144_v18 }
  0x17   : > { %1278 = vrot.lane.b32.xlu0 %v1277_v11, %s1459_s28  ;;  %v1302_v23 = vpack.i.bf16 %v1143_v21, %v1142_v20  ;;  %v1152_v24 = vld [vmem:[%s1518_s26 + $0x141] sm:$0xff]  ;;  %v1153_v25 = vld [vmem:[%s1518_s26 + $0x151] sm:$0xff]  ;;  %1223 = vmatpush3.bf16.msra.mxu0 %v685_v52  ;;  %v683_v11 = vpack.c.bf16 %v676_v0, %v675_v63 }
  0x18   : > { %v1150_v26 = vld [vmem:[%s1518_s26 + $0x121] sm:$0xff]  ;;  %v1151_v27 = vld [vmem:[%s1518_s26 + $0x131] sm:$0xff]  ;;  %v1317_v30 = vpack.i.bf16 %v1153_v25, %v1152_v24  ;;  %1239 = vmatpush3.bf16.msra.mxu1 %v782_v53  ;;  %1224 = vmatprep.subr.bf16.mxu0 %v684_v61 }
  0x19   : > { %v1566_v31 = vld [vmem:[%s1518_s26 + $0x30] sm:$0xff]  ;;  %v1312_v32 = vpack.i.bf16 %v1151_v27, %v1150_v26  ;;  %v1570_v33 = vld [vmem:[%s1518_s26 + $0x40] sm:$0xff] }
  0x1a   : > { %1298 = vrot.lane.b32.xlu1 %v1297_v16, %s1460_s29  ;;  %v1573_v34 = vld [vmem:[%s1518_s26 + $0x10] sm:$0xff]  ;;  %v1576_v35 = vld [vmem:[%s1518_s26 + $0x20] sm:$0xff]  ;;  %v1327_v44 = vpack.i.bf16 %v1570_v33, %v1566_v31 }
  0x1b   : > { %1293 = vrot.lane.b32.xlu0 %v1292_v17, %s1460_s29  ;;  %v1322_v48 = vpack.i.bf16 %v1576_v35, %v1573_v34  ;;  %v1169_v49 = vld [vmem:[%s1518_s26 + $0xd0] sm:$0xff]  ;;  %v1627_v60 = vld [vmem:[%s1518_s26 + $0xe0] sm:$0xff]  ;;  %1225 = vmatpush3.bf16.msra.mxu0 %v684_v61 }
  0x1c   : > { %v1337_v56 = vpack.i.bf16 %v1169_v49, %v1540_v9  ;;  %v774_v57 = vld [vmem:[%s1877_s2 + $0x10] sm:$0xff]  ;;  %v1347_v2 = vpack.i.bf16 %v1627_v60, %v1169_v49  ;;  %v772_v3 = vld [vmem:[%s1877_s2] sm:$0xff]  ;;  %1226 = vmatprep.subr.bf16.mxu0 %v683_v11 }
  0x1d   : > { %v781_v62 = vpack.c.bf16 %v775_v58, %v774_v57  ;;  %v1647_v8 = vld [vmem:[%s1518_s26 + $0xf0] sm:$0xff]  ;;  %v1650_v9 = vld [vmem:[%s1518_s26 + $0x100] sm:$0xff]  ;;  %v780_v12 = vpack.c.bf16 %v773_v4, %v772_v3 }
  0x1e   : > { %1308 = vrot.lane.b32.xlu1 %v1307_v22, %s1462_s30  ;;  %v1177_v10 = vld [vmem:[%s1518_s26 + $0x41] sm:$0xff]  ;;  %v1357_v13 = vpack.i.bf16 %v1650_v9, %v1647_v8  ;;  %v290_v14 = vld [vmem:[%s1518_s26 + $0x71] sm:$0xff]  ;;  %v1412_v47 = vpack.i.bf16 %v1647_v8, %v1627_v60 }
  0x1f   : > { %1303 = vrot.lane.b32.xlu0 %v1302_v23, %s1462_s30  ;;  %1240 = vmatprep.subr.bf16.mxu1 %v781_v62  ;;  %v1352_v1 = vpack.i.bf16 %v1177_v10, %v1533_v6  ;;  %v289_v5 = vld [vmem:[%s1518_s26 + $0x61] sm:$0xff]  ;;  %v288_v15 = vld [vmem:[%s1518_s26 + $0x51] sm:$0xff] }
  0x20   : > { %1241 = vmatpush3.bf16.msra.mxu1 %v781_v62  ;;  %v1367_v16 = vpack.i.bf16 %v290_v14, %v289_v5  ;;  %v1362_v17 = vpack.i.bf16 %v288_v15, %v1177_v10  ;;  %v1140_v18 = vld [vmem:[%s1518_s26 + $0x180] sm:$0xff]  ;;  %v1141_v6 = vld [vmem:[%s1518_s26 + $0x190] sm:$0xff]  ;;  %1227 = vmatpush3.bf16.msra.mxu0 %v683_v11  ;;  %v1422_v50 = vpack.i.bf16 %v289_v5, %v288_v15 }
  0x21   : > { %1242 = vmatprep.subr.bf16.mxu1 %v780_v12  ;;  %v1138_v19 = vld [vmem:[%s1518_s26 + $0x160] sm:$0xff]  ;;  %v1139_v20 = vld [vmem:[%s1518_s26 + $0x170] sm:$0xff]  ;;  %v1377_v21 = vpack.i.bf16 %v1141_v6, %v1140_v18 }
  0x22   : > { %1318 = vrot.lane.b32.xlu1 %v1317_v30, %s1463_s19  ;;  %v1372_v22 = vpack.i.bf16 %v1139_v20, %v1138_v19  ;;  %v1148_v23 = vld [vmem:[%s1518_s26 + $0x210] sm:$0xff]  ;;  %v1149_v24 = vld [vmem:[%s1518_s26 + $0x220] sm:$0xff] }
  0x23   : > { %1313 = vrot.lane.b32.xlu0 %v1312_v32, %s1463_s19  ;;  %v1146_v25 = vld [vmem:[%s1518_s26 + $0x1f0] sm:$0xff]  ;;  %v1147_v26 = vld [vmem:[%s1518_s26 + $0x200] sm:$0xff]  ;;  %v1387_v27 = vpack.i.bf16 %v1149_v24, %v1148_v23 }
  0x24   : > { %1243 = vmatpush3.bf16.msra.mxu1 %v780_v12  ;;  %v1382_v28 = vpack.i.bf16 %v1147_v26, %v1146_v25  ;;  %v1156_v29 = vld [vmem:[%s1518_s26 + $0x181] sm:$0xff]  ;;  %v1157_v30 = vld [vmem:[%s1518_s26 + $0x191] sm:$0xff] }
  0x25   : > { %v1154_v32 = vld [vmem:[%s1518_s26 + $0x161] sm:$0xff]  ;;  %v1155_v36 = vld [vmem:[%s1518_s26 + $0x171] sm:$0xff]  ;;  %v1397_v37 = vpack.i.bf16 %v1157_v30, %v1156_v29 }
  0x26   : > { %1328 = vrot.lane.b32.xlu1 %v1327_v44, %s1464_s11  ;;  %v1392_v38 = vpack.i.bf16 %v1155_v36, %v1154_v32  ;;  %v1682_v39 = vld [vmem:[%s1518_s26 + $0x70] sm:$0xff]  ;;  %v1165_v40 = vld [vmem:[%s1518_s26 + $0x80] sm:$0xff] }
  0x27   : > { %1323 = vrot.lane.b32.xlu0 %v1322_v48, %s1464_s11  ;;  %v1686_v41 = vld [vmem:[%s1518_s26 + $0x50] sm:$0xff]  ;;  %v1689_v42 = vld [vmem:[%s1518_s26 + $0x60] sm:$0xff]  ;;  %v1407_v43 = vpack.i.bf16 %v1165_v40, %v1682_v39 }
  0x28   : > { %v1402_v44 = vpack.i.bf16 %v1689_v42, %v1686_v41  ;;  %v1173_v45 = vld [vmem:[%s1518_s26 + $0x110] sm:$0xff]  ;;  %v1181_v48 = vld [vmem:[%s1518_s26 + $0x81] sm:$0xff] }
  0x29   : > { %v1417_v46 = vpack.i.bf16 %v1173_v45, %v1650_v9  ;;  %v1427_v49 = vpack.i.bf16 %v1181_v48, %v290_v14  ;;  %v266_v62 = vld [vmem:[%s1518_s26] sm:$0xff]  ;;  %s1202_s26 = sshll.u32 %s1883_s22, 6 }
  0x2a   : > { %1338 = vrot.lane.b32.xlu1 %v1337_v56, %s1465_s23  ;;  %s1841_s14 = scalar_lea.vmem %s1880_s5, %s1202_s26 }
  0x2b   : > { %1333 = vrot.lane.b32.xlu0 %v1332_v59, %s1465_s23 }
  0x2e   : > { %1348 = vrot.lane.b32.xlu1 %v1347_v2, %s1459_s28 }
  0x2f   : > { %1343 = vrot.lane.b32.xlu0 %v1342_v7, %s1466_s9 }
  0x32   : > { %1358 = vrot.lane.b32.xlu1 %v1357_v13, %s1459_s28 }
  0x33   : > { %1353 = vrot.lane.b32.xlu0 %v1352_v1, %s1466_s9 }
  0x36   : > { %1368 = vrot.lane.b32.xlu1 %v1367_v16, %s1458_s27 }
  0x37   : > { %1363 = vrot.lane.b32.xlu0 %v1362_v17, %s1458_s27 }
  0x3a   : > { %1378 = vrot.lane.b32.xlu1 %v1377_v21, %s1460_s29 }
  0x3b   : > { %1373 = vrot.lane.b32.xlu0 %v1372_v22, %s1460_s29  ;;  %s1805_s29 = scalar_lea.vmem %s1881_s6, %s1202_s26 }
  0x3e   : > { %1388 = vrot.lane.b32.xlu1 %v1387_v27, %s1462_s30 }
  0x3f   : > { %1383 = vrot.lane.b32.xlu0 %v1382_v28, %s1462_s30 }
  0x42   : > { %1398 = vrot.lane.b32.xlu1 %v1397_v37, %s1463_s19 }
  0x43   : > { %1393 = vrot.lane.b32.xlu0 %v1392_v38, %s1463_s19 }
  0x46   : > { %1408 = vrot.lane.b32.xlu1 %v1407_v43, %s1464_s11 }
  0x47   : > { %1403 = vrot.lane.b32.xlu0 %v1402_v44, %s1464_s11 }
  0x4a   : > { %1418 = vrot.lane.b32.xlu1 %v1417_v46, %s1465_s23 }
  0x4b   : > { %1413 = vrot.lane.b32.xlu0 %v1412_v47, %s1465_s23 }
  0x4e   : > { %1428 = vrot.lane.b32.xlu1 %v1427_v49, %s1466_s9 }
  0x4f   : > { %1423 = vrot.lane.b32.xlu0 %v1422_v50, %s1466_s9 }
  0x84   : > { %v1284_v51 = vpop.permute.xlu1 %1283 }
  0x85   : > { %v1274_v52 = vpop.permute.xlu0 %1273  ;;  %v1286_v3 = vunpack.i.h.bf16 %v1284_v51  ;;  %v1285_v4 = vunpack.i.l.bf16 %v1284_v51 }
  0x86   : > { %v1276_v59 = vunpack.i.h.bf16 %v1274_v52  ;;  %v1275_v60 = vunpack.i.l.bf16 %v1274_v52 }
  0x88   : > { %v1289_v53 = vpop.permute.xlu1 %1288  ;;  %v600_v7 = vsel %vm599_vm2, %v266_v62, %v1275_v60  ;;  %v601_v8 = vsel %vm599_vm2, %v1573_v34, %v1276_v59 }
  0x89   : > { %v1279_v54 = vpop.permute.xlu0 %1278  ;;  %v1291_v9 = vunpack.i.h.bf16 %v1289_v53  ;;  %v1290_v10 = vunpack.i.l.bf16 %v1289_v53  ;;  %v609_v17 = vsel %vm608_vm3, %v600_v7, %v1285_v4  ;;  %v610_v34 = vsel %vm608_vm3, %v601_v8, %v1286_v3 }
  0x8a   : > { %v1281_v63 = vunpack.i.h.bf16 %v1279_v54  ;;  %v1280_v0 = vunpack.i.l.bf16 %v1279_v54 }
  0x8c   : > { %v1299_v55 = vpop.permute.xlu1 %1298  ;;  %v602_v12 = vsel %vm599_vm2, %v1576_v35, %v1280_v0  ;;  %v603_v13 = vsel %vm599_vm2, %v1566_v31, %v1281_v63 }
  0x8d   : > { %v1294_v56 = vpop.permute.xlu0 %1293  ;;  %v1301_v1 = vunpack.i.h.bf16 %v1299_v55  ;;  %v1300_v5 = vunpack.i.l.bf16 %v1299_v55  ;;  %v611_v18 = vsel %vm608_vm3, %v602_v12, %v1290_v10  ;;  %v612_v35 = vsel %vm608_vm3, %v603_v13, %v1291_v9 }
  0x8e   : > { %v1296_v15 = vunpack.i.h.bf16 %v1294_v56  ;;  %v1295_v16 = vunpack.i.l.bf16 %v1294_v56 }
  0x8f   : > { %v620_v20 = vsel %vm617_vm4, %v611_v18, %v1300_v5  ;;  %v621_v21 = vsel %vm617_vm4, %v612_v35, %v1301_v1 }
  0x90   : > { %v1707_v57 = vpop.permute.xlu1 %1308  ;;  %v618_v25 = vsel %vm617_vm4, %v609_v17, %v1295_v16  ;;  %v619_v26 = vsel %vm617_vm4, %v610_v34, %v1296_v15 }
  0x91   : > { %v1304_v58 = vpop.permute.xlu0 %1303  ;;  %v1311_v29 = vunpack.i.h.bf16 %v1707_v57  ;;  %v1310_v30 = vunpack.i.l.bf16 %v1707_v57 }
  0x92   : > { %v1306_v6 = vunpack.i.h.bf16 %v1304_v58  ;;  %v1305_v19 = vunpack.i.l.bf16 %v1304_v58 }
  0x93   : > { %v629_v58 = vsel %vm626_vm5, %v620_v20, %v1310_v30  ;;  %v630_v59 = vsel %vm626_vm5, %v621_v21, %v1311_v29 }
  0x94   : > { %v1709_v61 = vpop.permute.xlu1 %1318  ;;  %v627_v37 = vsel %vm626_vm5, %v618_v25, %v1305_v19  ;;  %v628_v38 = vsel %vm626_vm5, %v619_v26, %v1306_v6 }
  0x95   : > { %v1314_v2 = vpop.permute.xlu0 %1313  ;;  %v1321_v40 = vunpack.i.h.bf16 %v1709_v61  ;;  %v1320_v43 = vunpack.i.l.bf16 %v1709_v61 }
  0x96   : > { %v1316_v22 = vunpack.i.h.bf16 %v1314_v2  ;;  %v1315_v23 = vunpack.i.l.bf16 %v1314_v2 }
  0x97   : > { %v638_v63 = vsel %vm635_vm6, %v629_v58, %v1320_v43  ;;  %v639_v0 = vsel %vm635_vm6, %v630_v59, %v1321_v40 }
  0x98   : > { %v1715_v11 = vpop.permute.xlu1 %1328  ;;  %v636_v45 = vsel %vm635_vm6, %v627_v37, %v1315_v23  ;;  %v637_v46 = vsel %vm635_vm6, %v628_v38, %v1316_v22 }
  0x99   : > { %v1324_v14 = vpop.permute.xlu0 %1323  ;;  %v1331_v47 = vunpack.i.h.bf16 %v1715_v11  ;;  %v1330_v48 = vunpack.i.l.bf16 %v1715_v11 }
  0x9a   : > { %v1326_v27 = vunpack.i.h.bf16 %v1324_v14  ;;  %v1325_v28 = vunpack.i.l.bf16 %v1324_v14 }
  0x9b   : > { %v647_v4 = vsel %vm644_vm7, %v638_v63, %v1330_v48  ;;  %v648_v7 = vsel %vm644_vm7, %v639_v0, %v1331_v47 }
  0x9c   : > { %v1339_v31 = vpop.permute.xlu1 %1338  ;;  %v645_v50 = vsel %vm644_vm7, %v636_v45, %v1325_v28  ;;  %v646_v51 = vsel %vm644_vm7, %v637_v46, %v1326_v27 }
  0x9d   : > { %v1334_v24 = vpop.permute.xlu0 %1333  ;;  %v1341_v54 = vunpack.i.h.bf16 %v1339_v31  ;;  %v1340_v55 = vunpack.i.l.bf16 %v1339_v31 }
  0x9e   : > { %v1336_v32 = vunpack.i.h.bf16 %v1334_v24  ;;  %v1335_v36 = vunpack.i.l.bf16 %v1334_v24 }
  0x9f   : > { %v656_v10 = vsel %vm653_vm8, %v647_v4, %v1340_v55  ;;  %v657_v11 = vsel %vm653_vm8, %v648_v7, %v1341_v54 }
  0xa0   : > { %v1349_v44 = vpop.permute.xlu1 %1348  ;;  %v654_v56 = vsel %vm653_vm8, %v645_v50, %v1335_v36  ;;  %v655_v57 = vsel %vm653_vm8, %v646_v51, %v1336_v32 }
  0xa1   : > { %v1344_v49 = vpop.permute.xlu0 %1343  ;;  %v1351_v6 = vunpack.i.h.bf16 %v1349_v44  ;;  %v1350_v19 = vunpack.i.l.bf16 %v1349_v44 }
  0xa2   : > { %v1346_v52 = vunpack.i.h.bf16 %v1344_v49  ;;  %v1345_v53 = vunpack.i.l.bf16 %v1344_v49 }
  0xa3   : > { %v604_v32 = vsel %vm599_vm2, %v1570_v33, %v1350_v19  ;;  %v605_v36 = vsel %vm599_vm2, %v1686_v41, %v1351_v6 }
  0xa4   : > { %v1359_v60 = vpop.permute.xlu1 %1358  ;;  %v663_v61 = vsel %vm662_vm9, %v654_v56, %v1345_v53  ;;  %v664_v62 = vsel %vm662_vm9, %v655_v57, %v1346_v52 }
  0xa5   : > { %v1354_v2 = vpop.permute.xlu0 %1353  ;;  %v671_v3 = vpack.c.bf16 %v664_v62, %v663_v61  ;;  %v1361_v18 = vunpack.i.h.bf16 %v1359_v60  ;;  %v1360_v35 = vunpack.i.l.bf16 %v1359_v60 }
  0xa6   : > { %v1356_v8 = vunpack.i.h.bf16 %v1354_v2  ;;  %v1355_v9 = vunpack.i.l.bf16 %v1354_v2 }
  0xa7   : > { %1228 = vmatprep.mubr.msk.bf16.mxu0 %vm687_vm10, %v671_v3  ;;  %1244 = vmatprep.mubr.msk.bf16.mxu1 %vm687_vm10, %v671_v3  ;;  %v606_v27 = vsel %vm599_vm2, %v1689_v42, %v1360_v35  ;;  %v607_v28 = vsel %vm599_vm2, %v1682_v39, %v1361_v18 }
  0xa8   : > { %v665_v12 = vsel %vm662_vm9, %v656_v10, %v1355_v9  ;;  %v666_v13 = vsel %vm662_vm9, %v657_v11, %v1356_v8  ;;  %v1369_v1 = vpop.permute.xlu1 %1368 }
  0xa9   : > { %v672_v5 = vpack.c.bf16 %v666_v13, %v665_v12  ;;  %v1364_v14 = vpop.permute.xlu0 %1363  ;;  %v1371_v31 = vunpack.i.h.bf16 %v1369_v1  ;;  %v1370_v20 = vunpack.i.l.bf16 %v1369_v1 }
  0xaa   : > { %v1366_v22 = vunpack.i.h.bf16 %v1364_v14  ;;  %v1365_v23 = vunpack.i.l.bf16 %v1364_v14 }
  0xab   : > { %1229 = vmatmul.mubr.msk.bf16.vlgmr.msra.gmra.mxu0 %vm687_vm10, %v672_v5  ;;  %1245 = vmatmul.mubr.msk.bf16.vlgmr.msra.gmra.mxu1 %vm687_vm10, %v672_v5  ;;  %v615_v37 = vsel %vm608_vm3, %v606_v27, %v1370_v20  ;;  %v616_v38 = vsel %vm608_vm3, %v607_v28, %v1371_v31  ;;  %v1468_v28 = vmov 0.0  }
  0xac   : > { %v1379_v15 = vpop.permute.xlu1 %1378  ;;  %v613_v43 = vsel %vm608_vm3, %v604_v32, %v1365_v23  ;;  %v614_v42 = vsel %vm608_vm3, %v605_v36, %v1366_v22 }
  0xad   : > { %v1374_v16 = vpop.permute.xlu0 %1373  ;;  %v1381_v25 = vunpack.i.h.bf16 %v1379_v15  ;;  %v1380_v26 = vunpack.i.l.bf16 %v1379_v15 }
  0xae   : > { %v1376_v29 = vunpack.i.h.bf16 %v1374_v16  ;;  %v1375_v30 = vunpack.i.l.bf16 %v1374_v16 }
  0xaf   : > { %v624_v46 = vsel %vm617_vm4, %v615_v37, %v1380_v26  ;;  %v625_v47 = vsel %vm617_vm4, %v616_v38, %v1381_v25  ;;  %v1467_v25 = vmov 0  }
  0xb0   : > { %v1389_v17 = vpop.permute.xlu1 %1388  ;;  %v622_v41 = vsel %vm617_vm4, %v613_v43, %v1375_v30  ;;  %v623_v49 = vsel %vm617_vm4, %v614_v42, %v1376_v29  ;;  %1432 = vset.pattern.permute.xlu1 %v1467_v25  ;;  %1433 = vset.pattern.permute.xlu0 %v1467_v25  ;;  %vm1010_vm4 = vcmask 64512  }
  0xb1   : > { %v1384_v34 = vpop.permute.xlu0 %1383  ;;  %v1391_v44 = vunpack.i.h.bf16 %v1389_v17  ;;  %v1390_v45 = vunpack.i.l.bf16 %v1389_v17 }
  0xb2   : > { %v1386_v33 = vunpack.i.h.bf16 %v1384_v34  ;;  %v1385_v48 = vunpack.i.l.bf16 %v1384_v34 }
  0xb3   : > { %v633_v57 = vsel %vm626_vm5, %v624_v46, %v1390_v45  ;;  %v634_v58 = vsel %vm626_vm5, %v625_v47, %v1391_v44 }
  0xb4   : > { %v1399_v21 = vpop.permute.xlu1 %1398  ;;  %v631_v62 = vsel %vm626_vm5, %v622_v41, %v1385_v48  ;;  %v632_v63 = vsel %vm626_vm5, %v623_v49, %v1386_v33 }
  0xb5   : > { %v1394_v24 = vpop.permute.xlu0 %1393  ;;  %v1401_v50 = vunpack.i.h.bf16 %v1399_v21  ;;  %v1400_v51 = vunpack.i.l.bf16 %v1399_v21 }
  0xb6   : > { %v1396_v52 = vunpack.i.h.bf16 %v1394_v24  ;;  %v1395_v53 = vunpack.i.l.bf16 %v1394_v24 }
  0xb7   : > { %v642_v3 = vsel %vm635_vm6, %v633_v57, %v1400_v51  ;;  %v643_v4 = vsel %vm635_vm6, %v634_v58, %v1401_v50 }
  0xb8   : > { %v1409_v40 = vpop.permute.xlu1 %1408  ;;  %v640_v9 = vsel %vm635_vm6, %v631_v62, %v1395_v53  ;;  %v641_v10 = vsel %vm635_vm6, %v632_v63, %v1396_v52 }
  0xb9   : > { %v1404_v39 = vpop.permute.xlu0 %1403  ;;  %v1411_v54 = vunpack.i.h.bf16 %v1409_v40  ;;  %v1410_v55 = vunpack.i.l.bf16 %v1409_v40 }
  0xba   : > { %v1406_v59 = vunpack.i.h.bf16 %v1404_v39  ;;  %v1405_v60 = vunpack.i.l.bf16 %v1404_v39 }
  0xbb   : > { %v651_v11 = vsel %vm644_vm7, %v642_v3, %v1410_v55  ;;  %v652_v12 = vsel %vm644_vm7, %v643_v4, %v1411_v54 }
  0xbc   : > { %v1419_v56 = vpop.permute.xlu1 %1418  ;;  %v649_v1 = vsel %vm644_vm7, %v640_v9, %v1405_v60  ;;  %v650_v5 = vsel %vm644_vm7, %v641_v10, %v1406_v59 }
  0xbd   : > { %v1414_v61 = vpop.permute.xlu0 %1413  ;;  %v1421_v0 = vunpack.i.h.bf16 %v1419_v56  ;;  %v1420_v2 = vunpack.i.l.bf16 %v1419_v56 }
  0xbe   : > { %v1416_v7 = vunpack.i.h.bf16 %v1414_v61  ;;  %v1415_v8 = vunpack.i.l.bf16 %v1414_v61 }
  0xbf   : > { %v660_v17 = vsel %vm653_vm8, %v651_v11, %v1420_v2  ;;  %v661_v34 = vsel %vm653_vm8, %v652_v12, %v1421_v0 }
  0xc0   : > { %v1429_v13 = vpop.permute.xlu1 %1428  ;;  %v658_v6 = vsel %vm653_vm8, %v649_v1, %v1415_v8  ;;  %v659_v19 = vsel %vm653_vm8, %v650_v5, %v1416_v7 }
  0xc1   : > { %v1431_v14 = vunpack.i.h.bf16 %v1429_v13  ;;  %v1430_v15 = vunpack.i.l.bf16 %v1429_v13  ;;  %v1424_v16 = vpop.permute.xlu0 %1423 }
  0xc2   : > { %v1426_v18 = vunpack.i.h.bf16 %v1424_v16  ;;  %v1425_v35 = vunpack.i.l.bf16 %v1424_v16 }
  0xc3   : > { %v669_v31 = vsel %vm662_vm9, %v660_v17, %v1430_v15  ;;  %v670_v20 = vsel %vm662_vm9, %v661_v34, %v1431_v14  ;;  %v1826_v17 = vld [vmem:[%s1878_s3] ss:$0 sm:$0xff] }
  0xc4   : > { %v674_v21 = vpack.c.bf16 %v670_v20, %v669_v31  ;;  %v667_v22 = vsel %vm662_vm9, %v658_v6, %v1425_v35  ;;  %v668_v23 = vsel %vm662_vm9, %v659_v19, %v1426_v18  ;;  %v1831_v35 = vld [vmem:[%s1879_s4] ss:$0 sm:$0xff] }
  0xc5   : > { %v673_v24 = vpack.c.bf16 %v668_v23, %v667_v22 }
  0xc7   : > { %1232 = vmatprep.mubr.msk.bf16.mxu0 %vm687_vm10, %v673_v24  ;;  %1248 = vmatprep.mubr.msk.bf16.mxu1 %vm687_vm10, %v673_v24 }
  0xc8   : > { %1233 = vmatmul.mubr.msk.bf16.gmra.mxu0 %vm687_vm10, %v674_v21  ;;  %1249 = vmatmul.mubr.msk.bf16.gmra.mxu1 %vm687_vm10, %v674_v21 }
 0x16b   : > { %v1246_v26 = vpop.f32.mrf.mxu1  ;;  %v1230_v15 = vpop.f32.mrf.mxu0 }
 0x16c   : > { %vm854_vm12 = vcmp.gt.f32.partialorder %v1246_v26, 0.0  ;;  %v878_v27 = vadd.f32 1e-08, %v1246_v26 }
 0x16d   : > { %v1192_v29 = vsel %vm854_vm12, 1.0, %v1468_v28  ;;  %v821_v30 = vpop.f32.mrf.mxu1  ;;  %v741_v16 = vpop.f32.mrf.mxu0 }
 0x16e   : > { %1434 = vrcp.f32 %v878_v27  ;;  %1022 = vst.msk [vmem:[%s1805_s29 + $0x10] sm:$0xff] %vm1019_vm11, %v1192_v29  ;;  %vm852_vm13 = vcmp.gt.f32.partialorder %v821_v30, 0.0  ;;  %v876_v32 = vadd.f32 1e-08, %v821_v30 }
 0x16f   : > { %v1190_v36 = vsel %vm852_vm13, 1.0, %v1468_v28  ;;  %v1247_v37 = vpop.f32.mrf.mxu1  ;;  %v1231_v19 = vpop.f32.mrf.mxu0 }
 0x170   : > { %1436 = vrcp.f32 %v876_v32  ;;  %1020 = vst.msk [vmem:[%s1805_s29] sm:$0xff] %vm1019_vm11, %v1190_v36  ;;  %vm855_vm14 = vcmp.gt.f32.partialorder %v1247_v37, 0.0  ;;  %v879_v38 = vadd.f32 1e-08, %v1247_v37 }
 0x171   : > { %v1193_v40 = vsel %vm855_vm14, 1.0, %v1468_v28  ;;  %v824_v43 = vpop.f32.mrf.mxu1  ;;  %v744_v25 = vpop.f32.mrf.mxu0 }
 0x172   : > { %1438 = vrcp.f32 %v879_v38  ;;  %1023 = vst.msk [vmem:[%s1805_s29 + $0x18] sm:$0xff] %vm1019_vm11, %v1193_v40  ;;  %vm853_vm15 = vcmp.gt.f32.partialorder %v824_v43, 0.0  ;;  %v877_v42 = vadd.f32 1e-08, %v824_v43 }
 0x173   : > { %v1191_v44 = vsel %vm853_vm15, 1.0, %v1468_v28 }
 0x174   : > { %1440 = vrcp.f32 %v877_v42  ;;  %1021 = vst.msk [vmem:[%s1805_s29 + $0x8] sm:$0xff] %vm1019_vm11, %v1191_v44 }
 0x17b   : > { %v1435_v45 = vpop.eup %1434 }
 0x17c   : > { %v894_v39 = vmul.f32 9.0, %v1435_v45 }
 0x17d   : > { %v1437_v46 = vpop.eup %1436 }
 0x17e   : > { %v902_v47 = vmul.f32 %v1192_v29, %v894_v39  ;;  %v892_v33 = vmul.f32 9.0, %v1437_v46 }
 0x17f   : > { %v1439_v48 = vpop.eup %1438 }
 0x180   : > { %v900_v41 = vmul.f32 %v1190_v36, %v892_v33  ;;  %v895_v49 = vmul.f32 9.0, %v1439_v48  ;;  %920 = vperm.xlu1 %1432, %v902_v47  }
 0x181   : > { %v1441_v50 = vpop.eup %1440 }
 0x182   : > { %v893_v51 = vmul.f32 9.0, %v1441_v50  ;;  %910 = vperm.xlu0 %1433, %v900_v41   ;;  %v903_v52 = vmul.f32 %v1193_v40, %v895_v49 }
 0x184   : > { %v901_v53 = vmul.f32 %v1191_v44, %v893_v51 }
 0x186   : > { %925 = vperm.xlu0 %1433, %v903_v52   ;;  %915 = vperm.xlu1 %1432, %v901_v53  }
 0x188   : > { %v1250_v54 = vpop.f32.mrf.mxu1  ;;  %v1234_v46 = vpop.f32.mrf.mxu0 }
 0x189   : > { %vm858_vm0 = vcmp.gt.f32.partialorder %v1250_v54, 0.0  ;;  %v882_v55 = vadd.f32 1e-08, %v1250_v54 }
 0x18a   : > { %v1196_v56 = vsel %vm858_vm0, 1.0, %v1468_v28  ;;  %v837_v57 = vpop.f32.mrf.mxu1  ;;  %v757_v47 = vpop.f32.mrf.mxu0 }
 0x18b   : > { %1026 = vst.msk [vmem:[%s1805_s29 + $0x30] sm:$0xff] %vm1019_vm11, %v1196_v56  ;;  %vm856_vm1 = vcmp.gt.f32.partialorder %v837_v57, 0.0  ;;  %v880_v58 = vadd.f32 1e-08, %v837_v57  ;;  %1442 = vrcp.f32 %v882_v55 }
 0x18c   : > { %v1194_v59 = vsel %vm856_vm1, 1.0, %v1468_v28  ;;  %v1251_v60 = vpop.f32.mrf.mxu1  ;;  %v1235_v33 = vpop.f32.mrf.mxu0 }
 0x18d   : > { %1444 = vrcp.f32 %v880_v58  ;;  %1024 = vst.msk [vmem:[%s1805_s29 + $0x20] sm:$0xff] %vm1019_vm11, %v1194_v59  ;;  %vm859_vm2 = vcmp.gt.f32.partialorder %v1251_v60, 0.0  ;;  %v883_v61 = vadd.f32 1e-08, %v1251_v60 }
 0x18e   : > { %v1197_v62 = vsel %vm859_vm2, 1.0, %v1468_v28  ;;  %v840_v63 = vpop.f32.mrf.mxu1  ;;  %v760_v49 = vpop.f32.mrf.mxu0 }
 0x18f   : > { %1027 = vst.msk [vmem:[%s1805_s29 + $0x38] sm:$0xff] %vm1019_vm11, %v1197_v62  ;;  %vm857_vm3 = vcmp.gt.f32.partialorder %v840_v63, 0.0  ;;  %v881_v0 = vadd.f32 1e-08, %v840_v63  ;;  %1446 = vrcp.f32 %v883_v61 }
 0x190   : > { %v1195_v2 = vsel %vm857_vm3, 1.0, %v1468_v28 }
 0x191   : > { %1448 = vrcp.f32 %v881_v0  ;;  %1025 = vst.msk [vmem:[%s1805_s29 + $0x28] sm:$0xff] %vm1019_vm11, %v1195_v2 }
 0x198   : > { %v1443_v3 = vpop.eup %1442 }
 0x199   : > { %v898_v9 = vmul.f32 9.0, %v1443_v3 }
 0x19a   : > { %v1445_v4 = vpop.eup %1444 }
 0x19b   : > { %v896_v7 = vmul.f32 9.0, %v1445_v4  ;;  %v906_v13 = vmul.f32 %v1196_v56, %v898_v9 }
 0x19c   : > { %v1447_v8 = vpop.eup %1446 }
 0x19d   : > { %v904_v10 = vmul.f32 %v1194_v59, %v896_v7  ;;  %v899_v1 = vmul.f32 9.0, %v1447_v8 }
 0x19e   : > { %v1449_v11 = vpop.eup %1448 }
 0x19f   : > { %v897_v12 = vmul.f32 9.0, %v1449_v11  ;;  %930 = vperm.xlu1 %1432, %v904_v10   ;;  %v907_v14 = vmul.f32 %v1197_v62, %v899_v1 }
 0x1a1   : > { %v905_v5 = vmul.f32 %v1195_v2, %v897_v12 }
 0x1a3   : > { %940 = vperm.xlu1 %1432, %v906_v13   ;;  %935 = vperm.xlu0 %1433, %v905_v5  }
 0x1a7   : > { %945 = vperm.xlu0 %1433, %v907_v14  }
 0x1fb   : > { %v921_v34 = vpop.permute.xlu1 %920 }
 0x1fc   : > { %v950_v18 = vmul.f32 %v1230_v15, %v921_v34 }
 0x1fd   : > { %v911_v6 = vpop.permute.xlu0 %910 }
 0x1fe   : > { %v965_v31 = vmul.f32 %v1826_v17, %v950_v18  ;;  %v948_v20 = vmul.f32 %v911_v6, %v741_v16 }
 0x200   : > { %v980_v21 = vadd.f32 %v1831_v35, %v965_v31  ;;  %v963_v22 = vmul.f32 %v1826_v17, %v948_v20 }
 0x201   : > { %v926_v23 = vpop.permute.xlu0 %925  ;;  %v916_v24 = vpop.permute.xlu1 %915 }
 0x202   : > { %vm988_vm5 = vcmp.ge.f32.partialorder %v980_v21, 0.0  ;;  %v996_v26 = vmul.f32 0.2, %v980_v21  ;;  %v978_v27 = vadd.f32 %v1831_v35, %v963_v22  ;;  %v951_v28 = vmul.f32 %v1231_v19, %v926_v23 }
 0x203   : > { %v949_v29 = vmul.f32 %v916_v24, %v744_v25 }
 0x204   : > { %v1004_v30 = vsel %vm988_vm5, %v980_v21, %v996_v26  ;;  %vm986_vm6 = vcmp.ge.f32.partialorder %v978_v27, 0.0  ;;  %v994_v32 = vmul.f32 0.2, %v978_v27  ;;  %v966_v36 = vmul.f32 %v1826_v17, %v951_v28 }
 0x205   : > { %1013 = vst.msk [vmem:[%s1841_s14 + $0x10] sm:$0xff] %vm1010_vm4, %v1004_v30  ;;  %v964_v37 = vmul.f32 %v1826_v17, %v949_v29 }
 0x206   : > { %v1002_v38 = vsel %vm986_vm6, %v978_v27, %v994_v32  ;;  %v981_v40 = vadd.f32 %v1831_v35, %v966_v36 }
 0x207   : > { %1011 = vst.msk [vmem:[%s1841_s14] sm:$0xff] %vm1010_vm4, %v1002_v38  ;;  %v979_v43 = vadd.f32 %v1831_v35, %v964_v37 }
 0x208   : > { %vm989_vm7 = vcmp.ge.f32.partialorder %v981_v40, 0.0  ;;  %v997_v42 = vmul.f32 0.2, %v981_v40 }
 0x209   : > { %vm987_vm8 = vcmp.ge.f32.partialorder %v979_v43, 0.0  ;;  %v995_v44 = vmul.f32 0.2, %v979_v43 }
 0x20a   : > { %v1005_v45 = vsel %vm989_vm7, %v981_v40, %v997_v42 }
 0x20b   : > { %1014 = vst.msk [vmem:[%s1841_s14 + $0x18] sm:$0xff] %vm1010_vm4, %v1005_v45  ;;  %v1003_v39 = vsel %vm987_vm8, %v979_v43, %v995_v44 }
 0x20c   : > { %1012 = vst.msk [vmem:[%s1841_s14 + $0x8] sm:$0xff] %vm1010_vm4, %v1003_v39 }
 0x21a   : > { %v931_v48 = vpop.permute.xlu1 %930 }
 0x21b   : > { %v952_v41 = vmul.f32 %v931_v48, %v757_v47 }
 0x21d   : > { %v967_v50 = vmul.f32 %v1826_v17, %v952_v41 }
 0x21e   : > { %v941_v51 = vpop.permute.xlu1 %940  ;;  %v936_v52 = vpop.permute.xlu0 %935 }
 0x21f   : > { %v982_v53 = vadd.f32 %v1831_v35, %v967_v50  ;;  %v954_v54 = vmul.f32 %v1234_v46, %v941_v51  ;;  %v953_v55 = vmul.f32 %v936_v52, %v760_v49 }
 0x221   : > { %vm990_vm9 = vcmp.ge.f32.partialorder %v982_v53, 0.0  ;;  %v998_v56 = vmul.f32 0.2, %v982_v53  ;;  %v969_v57 = vmul.f32 %v1826_v17, %v954_v54  ;;  %v968_v58 = vmul.f32 %v1826_v17, %v953_v55 }
 0x222   : > { %v946_v59 = vpop.permute.xlu0 %945 }
 0x223   : > { %v1006_v60 = vsel %vm990_vm9, %v982_v53, %v998_v56  ;;  %v984_v61 = vadd.f32 %v1831_v35, %v969_v57  ;;  %v983_v62 = vadd.f32 %v1831_v35, %v968_v58  ;;  %v955_v63 = vmul.f32 %v1235_v33, %v946_v59 }
 0x224   : > { %1015 = vst.msk [vmem:[%s1841_s14 + $0x20] sm:$0xff] %vm1010_vm4, %v1006_v60 }
 0x225   : > { %vm992_vm10 = vcmp.ge.f32.partialorder %v984_v61, 0.0  ;;  %v1000_v0 = vmul.f32 0.2, %v984_v61  ;;  %vm991_vm11 = vcmp.ge.f32.partialorder %v983_v62, 0.0  ;;  %v999_v2 = vmul.f32 0.2, %v983_v62 }
 0x226   : > { %v970_v3 = vmul.f32 %v1826_v17, %v955_v63 }
 0x227   : > { %v1008_v4 = vsel %vm992_vm10, %v984_v61, %v1000_v0  ;;  %v1007_v7 = vsel %vm991_vm11, %v983_v62, %v999_v2 }
 0x228   : > { %1017 = vst.msk [vmem:[%s1841_s14 + $0x30] sm:$0xff] %vm1010_vm4, %v1008_v4  ;;  %1016 = vst.msk [vmem:[%s1841_s14 + $0x28] sm:$0xff] %vm1010_vm4, %v1007_v7  ;;  %v985_v8 = vadd.f32 %v1831_v35, %v970_v3 }
 0x22a   : > { %vm993_vm12 = vcmp.ge.f32.partialorder %v985_v8, 0.0  ;;  %v1001_v9 = vmul.f32 0.2, %v985_v8 }
 0x22c   : > { %v1009_v10 = vsel %vm993_vm12, %v985_v8, %v1001_v9 }
 0x22d   : > { %1018 = vst.msk [vmem:[%s1841_s14 + $0x38] sm:$0xff] %vm1010_vm4, %v1009_v10 }
 0x22e PF: > { %s17_s21 = sadd.s32 1, %s1456_s21  }
 0x22f   : > { %p14_p4 = scmp.ge.s32.totalorder %s17_s21, 4  }
 0x231   :  { %16 = sbr.rel (!%p14_p4) target bundleno = 1 (0x1), region = 87 }

</bundles_post_ra>
